<compile_context>
chip_gen: v7x
topology: tpu7x:2x2x1
jax: 0.10.0
libtpu: 0.0.40
codegen_flags: <defaults>
</compile_context>

<pallas_src>
import functools

import jax
import jax.numpy as jnp
from jax.experimental import pallas as pl
from jax.experimental.pallas import tpu as pltpu


# ----------------------------------------------------------------------------
# Model hyper-parameters (match the PyTorch LRCN construction).
# ----------------------------------------------------------------------------
BASE_FEATURES = 2048      # CNNEncoder(base, in_f=2048, ...)
HEAD_HIDDEN = 512         # Head: Linear(in_f, 512)
LSTM_HIDDEN = 256         # RNNDecoder: hidden_size=256
LSTM_LAYERS = 3           # RNNDecoder: num_layers=3
FC1_OUT = 128             # RNNDecoder: Linear(256, 128)
BN_EPS = 1e-5


# ----------------------------------------------------------------------------
# Kernel A: fused per-frame encoder.
#   global-avg-pool over H*W (natural layout, no transpose)
#   -> base projection (stand-in) -> BN1 -> Linear(2048,512) -> ReLU -> BN2
#   -> Linear(512, cnn_features) -> LSTM layer-1 input gates (feats @ W_ih1 + b1)
# Grid = (row tiles [parallel], H*W tiles [arbitrary]) with a VMEM sum accumulator;
# the matmul chain runs only in the last-reduction-step finalize branch.
# ----------------------------------------------------------------------------
def _frame_encode_kernel(x_ref, pw_ref, pb_ref, s1_ref, t1_ref,
                         wl_ref, bl_ref, s2_ref, t2_ref,
                         wo_ref, bo_ref, wih1_ref, b1_ref,
                         o_ref, acc_ref, *, inv_hw):
    k = pl.program_id(1)

    @pl.when(k == 0)
    def _init():
        acc_ref[...] = jnp.zeros_like(acc_ref)

    # x block: (row_tile, hw_tile, C); sum over the spatial (sublane) axis.
    acc_ref[...] += jnp.sum(x_ref[...], axis=1)

    @pl.when(k == pl.num_programs(1) - 1)
    def _finalize():
        pooled = acc_ref[...] * inv_hw                                   # (rt, C)
        # TODO(synk): `base_model` is an external backbone passed into LRCN and not
        # defined in the source; global-avg-pool + this linear projection to 2048
        # features stands in for it so Head/LSTM/FC are exercised faithfully.
        f = jnp.dot(pooled, pw_ref[...],
                    preferred_element_type=jnp.float32) + pb_ref[...]
        h = f * s1_ref[...] + t1_ref[...]                                # BN1 (eval)
        h = jnp.dot(h.astype(jnp.bfloat16), wl_ref[...],                 # bf16 MXU
                    preferred_element_type=jnp.float32) + bl_ref[...]
        h = jnp.maximum(h, 0.0)                                          # ReLU
        h = h * s2_ref[...] + t2_ref[...]                                # BN2 (eval)
        feats = jnp.dot(h.astype(jnp.bfloat16), wo_ref[...],
                        preferred_element_type=jnp.float32) + bo_ref[...]
        # Hoisted LSTM layer-1 input projection: gates_x = feats @ W_ih1 + (b_ih+b_hh)
        gates_x = jnp.dot(feats.astype(jnp.bfloat16), wih1_ref[...],
                          preferred_element_type=jnp.float32) + b1_ref[...]
        o_ref[...] = gates_x.astype(o_ref.dtype)


def frame_encode(x, p):
    """x: (R, HW, C) f32 (natural layout) -> (R, 4*LSTM_HIDDEN) layer-1 gate inputs."""
    R, HW, C = x.shape
    itemsize = x.dtype.itemsize
    budget = 6 * 1024 * 1024            # per-input-block budget; 2x buffers << 64 MiB (v7x)

    row_tile = R if R <= 256 else 256   # == full R or a multiple of 8
    hw_tile = HW                        # full reduction axis when it fits
    # Halving keeps hw_tile a multiple of 8 (sublane axis) and an exact divisor of
    # HW, so no tail masking is ever needed.
    while row_tile * hw_tile * C * itemsize > budget and hw_tile % 16 == 0:
        hw_tile //= 2
    # Fallback for huge / oddly-shaped spatial sizes: shrink rows instead.
    while row_tile * hw_tile * C * itemsize > budget and row_tile % 16 == 0:
        row_tile //= 2

    grid = (pl.cdiv(R, row_tile), HW // hw_tile)
    kernel = functools.partial(_frame_encode_kernel, inv_hw=1.0 / HW)

    args = (x, p["proj_w"], p["proj_b"], p["bn1_scale"], p["bn1_shift"],
            p["head_w_l"], p["head_b_l"], p["bn2_scale"], p["bn2_shift"],
            p["head_w_o"], p["head_b_o"], p["w_ih1"], p["b1"])

    def const(a):   # whole-array block, constant across the grid (2-D params only)
        return pl.BlockSpec(a.shape, lambda i, k: (0, 0))

    in_specs = [pl.BlockSpec((row_tile, hw_tile, C), lambda i, k: (i, k, 0))]
    in_specs += [const(a) for a in args[1:]]

    feat = p["head_w_o"].shape[1]
    gate_dim = 4 * LSTM_HIDDEN
    w_bytes = sum(a.size * a.dtype.itemsize for a in args[1:])
    flops = 2 * R * (HW * C + C * BASE_FEATURES + BASE_FEATURES * HEAD_HIDDEN
                     + HEAD_HIDDEN * feat + feat * gate_dim)

    return pl.pallas_call(
        kernel,
        out_shape=jax.ShapeDtypeStruct((R, gate_dim), jnp.float32),
        grid=grid,
        in_specs=in_specs,
        out_specs=pl.BlockSpec((row_tile, gate_dim), lambda i, k: (i, 0)),
        scratch_shapes=[pltpu.VMEM((row_tile, C), jnp.float32)],
        compiler_params=pltpu.CompilerParams(
            dimension_semantics=("parallel", "arbitrary"),
            vmem_limit_bytes=32 * 1024 * 1024,
        ),
        cost_estimate=pl.CostEstimate(
            flops=int(flops),
            transcendentals=0,
            bytes_accessed=int(x.size * itemsize + R * gate_dim * 4 + w_bytes),
        ),
    )(*args)


# ----------------------------------------------------------------------------
# Kernel B: fused 3-layer LSTM + decoder FC head.
# Grid iterates over time ("arbitrary"); all 3 layers' weights stay resident in
# VMEM; three (h, c) pairs carried in VMEM scratch. PyTorch gate order (i, f, g, o).
# Only the final-timestep hidden state is consumed: the FC head runs inside the
# t == T-1 finalize branch and the only HBM output is the (B, out_f) logits.
# ----------------------------------------------------------------------------
def _lstm_cell(gates, c_prev):
    Hn = LSTM_HIDDEN
    i_g = jax.nn.sigmoid(gates[:, 0 * Hn:1 * Hn])
    f_g = jax.nn.sigmoid(gates[:, 1 * Hn:2 * Hn])
    g_g = jnp.tanh(gates[:, 2 * Hn:3 * Hn])
    o_g = jax.nn.sigmoid(gates[:, 3 * Hn:4 * Hn])
    c_new = f_g * c_prev + i_g * g_g
    h_new = o_g * jnp.tanh(c_new)
    return h_new, c_new


def _lstm_decode_kernel(gx_ref, whh1_ref, wcat2_ref, b2_ref, wcat3_ref, b3_ref,
                        f1w_ref, f1b_ref, f2w_ref, f2b_ref, o_ref,
                        h1, c1, h2, c2, h3, c3):
    t = pl.program_id(0)

    @pl.when(t == 0)
    def _init():
        for r in (h1, c1, h2, c2, h3, c3):
            r[...] = jnp.zeros_like(r)

    # Layer 1: input projection (and both biases) precomputed in kernel A.
    g1 = gx_ref[0] + jnp.dot(h1[...], whh1_ref[...],
                             preferred_element_type=jnp.float32)
    h1n, c1n = _lstm_cell(g1, c1[...])
    h1[...] = h1n
    c1[...] = c1n

    # Layers 2/3: single merged gate matmul per step: [x, h] @ [W_ih; W_hh] + b.
    g2 = jnp.dot(jnp.concatenate([h1n, h2[...]], axis=-1), wcat2_ref[...],
                 preferred_element_type=jnp.float32) + b2_ref[...]
    h2n, c2n = _lstm_cell(g2, c2[...])
    h2[...] = h2n
    c2[...] = c2n

    g3 = jnp.dot(jnp.concatenate([h2n, h3[...]], axis=-1), wcat3_ref[...],
                 preferred_element_type=jnp.float32) + b3_ref[...]
    h3n, c3n = _lstm_cell(g3, c3[...])
    h3[...] = h3n
    c3[...] = c3n

    @pl.when(t == pl.num_programs(0) - 1)
    def _finalize():
        # RNNDecoder head on the last-step hidden state (Dropout = identity).
        y = jnp.maximum(jnp.dot(h3n, f1w_ref[...],
                                preferred_element_type=jnp.float32) + f1b_ref[...],
                        0.0)
        o_ref[...] = (jnp.dot(y, f2w_ref[...],
                              preferred_element_type=jnp.float32)
                      + f2b_ref[...]).astype(o_ref.dtype)


def lstm_decode(gx_seq, p):
    """gx_seq: (T, B, 4H) layer-1 gate inputs -> (B, out_f) logits."""
    T, B, G = gx_seq.shape
    out_f = p["f2_w"].shape[1]

    args = (gx_seq, p["w_hh1"], p["w_cat2"], p["b2"], p["w_cat3"], p["b3"],
            p["f1_w"], p["f1_b"], p["f2_w"], p["f2_b"])

    def const(a):
        return pl.BlockSpec(a.shape, lambda t: (0, 0))

    in_specs = [pl.BlockSpec((1, B, G), lambda t: (t, 0, 0))]
    in_specs += [const(a) for a in args[1:]]

    return pl.pallas_call(
        _lstm_decode_kernel,
        out_shape=jax.ShapeDtypeStruct((B, out_f), jnp.float32),
        grid=(T,),
        in_specs=in_specs,
        out_specs=pl.BlockSpec((B, out_f), lambda t: (0, 0)),
        scratch_shapes=[pltpu.VMEM((B, LSTM_HIDDEN), jnp.float32)
                        for _ in range(2 * LSTM_LAYERS)],
        compiler_params=pltpu.CompilerParams(
            dimension_semantics=("arbitrary",),
            vmem_limit_bytes=32 * 1024 * 1024,
        ),
    )(*args)


# ----------------------------------------------------------------------------
# Full LRCN forward (inference semantics). Exactly two pallas_calls.
# ----------------------------------------------------------------------------
def lrcn_forward(x_3d, params):
    B, T, H, W, C = x_3d.shape
    # CNNEncoder's permute(0,1,4,2,3) + float cast: the permute is redundant for a
    # global-average-pool backbone (mean over H,W commutes with it), so pooling runs
    # on the natural layout — no extra HBM round-trip of the largest tensor.
    x = x_3d.astype(jnp.float32).reshape(B * T, H * W, C)
    gx1 = frame_encode(x, params)                          # (B*T, 4H)
    gx1 = gx1.reshape(B, T, 4 * LSTM_HIDDEN).transpose(1, 0, 2)   # tiny (T,B,4H)
    return lstm_decode(gx1, params)                        # (B, out_f)


# ----------------------------------------------------------------------------
# Deterministic parameter construction.
# ----------------------------------------------------------------------------
def init_lrcn_params(key, in_channels, cnn_features, out_f):
    ks = jax.random.split(key, 32)
    nrm = lambda k, shape, s: s * jax.random.normal(k, shape, dtype=jnp.float32)
    GD = 4 * LSTM_HIDDEN

    p = {}
    # base_model stand-in: linear projection (pool kernel handles the spatial part)
    p["proj_w"] = nrm(ks[0], (in_channels, BASE_FEATURES), 0.5)
    p["proj_b"] = nrm(ks[1], (1, BASE_FEATURES), 0.1)
    # Head.b1 = BatchNorm1d(2048), folded to inference-mode scale/shift
    g1 = 1.0 + nrm(ks[2], (1, BASE_FEATURES), 0.1)
    be1 = nrm(ks[3], (1, BASE_FEATURES), 0.1)
    mu1 = nrm(ks[4], (1, BASE_FEATURES), 0.1)
    v1 = 1.0 + jnp.abs(nrm(ks[5], (1, BASE_FEATURES), 0.1))
    p["bn1_scale"] = g1 * jax.lax.rsqrt(v1 + BN_EPS)
    p["bn1_shift"] = be1 - mu1 * p["bn1_scale"]
    # Head.l = Linear(2048, 512): weights stored transposed (in, out) and in bf16
    p["head_w_l"] = nrm(ks[6], (BASE_FEATURES, HEAD_HIDDEN), 0.05).astype(jnp.bfloat16)
    p["head_b_l"] = nrm(ks[7], (1, HEAD_HIDDEN), 0.05)
    # Head.b2 = BatchNorm1d(512)
    g2 = 1.0 + nrm(ks[8], (1, HEAD_HIDDEN), 0.1)
    be2 = nrm(ks[9], (1, HEAD_HIDDEN), 0.1)
    mu2 = nrm(ks[10], (1, HEAD_HIDDEN), 0.1)
    v2 = 1.0 + jnp.abs(nrm(ks[11], (1, HEAD_HIDDEN), 0.1))
    p["bn2_scale"] = g2 * jax.lax.rsqrt(v2 + BN_EPS)
    p["bn2_shift"] = be2 - mu2 * p["bn2_scale"]
    # Head.o = Linear(512, cnn_features)
    p["head_w_o"] = nrm(ks[12], (HEAD_HIDDEN, cnn_features), 0.1).astype(jnp.bfloat16)
    p["head_b_o"] = nrm(ks[13], (1, cnn_features), 0.1)
    # LSTM layer 1 (gate order i,f,g,o); b1 = b_ih + b_hh, folded into kernel A
    p["w_ih1"] = nrm(ks[14], (cnn_features, GD), 0.1).astype(jnp.bfloat16)
    p["w_hh1"] = nrm(ks[15], (LSTM_HIDDEN, GD), 0.1)
    p["b1"] = nrm(ks[16], (1, GD), 0.1)
    # LSTM layers 2/3: stacked [W_ih; W_hh] -> one merged gate matmul per step
    p["w_cat2"] = jnp.concatenate([nrm(ks[17], (LSTM_HIDDEN, GD), 0.1),
                                   nrm(ks[18], (LSTM_HIDDEN, GD), 0.1)], axis=0)
    p["b2"] = nrm(ks[19], (1, GD), 0.1)
    p["w_cat3"] = jnp.concatenate([nrm(ks[20], (LSTM_HIDDEN, GD), 0.1),
                                   nrm(ks[21], (LSTM_HIDDEN, GD), 0.1)], axis=0)
    p["b3"] = nrm(ks[22], (1, GD), 0.1)
    # RNNDecoder.f1 / f2
    p["f1_w"] = nrm(ks[23], (LSTM_HIDDEN, FC1_OUT), 0.1)
    p["f1_b"] = nrm(ks[24], (1, FC1_OUT), 0.1)
    p["f2_w"] = nrm(ks[25], (FC1_OUT, out_f), 0.1)
    p["f2_b"] = nrm(ks[26], (1, out_f), 0.1)
    return p


# ----------------------------------------------------------------------------
# Pure-JAX reference (same inference-mode math, f32 HIGHEST precision).
# ----------------------------------------------------------------------------
def _dot_hi(a, b):
    return jnp.dot(a, b, precision=jax.lax.Precision.HIGHEST)


def lrcn_reference(x_3d, p):
    B, T, H, W, C = x_3d.shape
    x = x_3d.astype(jnp.float32)
    pooled = x.mean(axis=(2, 3)).reshape(B * T, C)
    f = _dot_hi(pooled, p["proj_w"]) + p["proj_b"]
    h = f * p["bn1_scale"] + p["bn1_shift"]
    h = jnp.maximum(_dot_hi(h, p["head_w_l"].astype(jnp.float32)) + p["head_b_l"], 0.0)
    h = h * p["bn2_scale"] + p["bn2_shift"]
    feats = _dot_hi(h, p["head_w_o"].astype(jnp.float32)) + p["head_b_o"]
    feats = feats.reshape(B, T, -1)

    Hn = LSTM_HIDDEN
    layers = [
        (p["w_ih1"].astype(jnp.float32), p["w_hh1"], p["b1"]),
        (p["w_cat2"][:Hn], p["w_cat2"][Hn:], p["b2"]),
        (p["w_cat3"][:Hn], p["w_cat3"][Hn:], p["b3"]),
    ]
    seq = jnp.transpose(feats, (1, 0, 2))        # (T, B, F)
    for (w_ih, w_hh, b) in layers:
        hs = jnp.zeros((B, Hn), jnp.float32)
        cs = jnp.zeros((B, Hn), jnp.float32)
        outs = []
        for t in range(seq.shape[0]):
            g = _dot_hi(seq[t], w_ih) + _dot_hi(hs, w_hh) + b
            i_g = jax.nn.sigmoid(g[:, 0 * Hn:1 * Hn])
            f_g = jax.nn.sigmoid(g[:, 1 * Hn:2 * Hn])
            g_g = jnp.tanh(g[:, 2 * Hn:3 * Hn])
            o_g = jax.nn.sigmoid(g[:, 3 * Hn:4 * Hn])
            cs = f_g * cs + i_g * g_g
            hs = o_g * jnp.tanh(cs)
            outs.append(hs)
        seq = jnp.stack(outs, axis=0)
    y = jnp.maximum(_dot_hi(seq[-1], p["f1_w"]) + p["f1_b"], 0.0)
    return _dot_hi(y, p["f2_w"]) + p["f2_b"]


if __name__ == "__main__":
    key = jax.random.PRNGKey(0)
    k_x, k_p = jax.random.split(key)

    # Small shapes implied by LRCN.forward: x_3d is (B, T, H, W, C).
    B, T, H, W, C = 2, 8, 16, 16, 3
    cnn_features, out_f = 128, 10

    x_3d = jax.random.normal(k_x, (B, T, H, W, C), dtype=jnp.float32)
    params = init_lrcn_params(k_p, C, cnn_features, out_f)

    fwd = jax.jit(lrcn_forward)
    out = jax.block_until_ready(fwd(x_3d, params))

    assert out.shape == (B, out_f), out.shape
    assert bool(jnp.all(jnp.isfinite(out))), "non-finite output"

    ref = jax.block_until_ready(lrcn_reference(x_3d, params))
    # Tolerance accounts for bf16 MXU inputs in the frame head (f32 accumulation)
    # vs. the all-f32 HIGHEST-precision reference.
    max_err = float(jnp.max(jnp.abs(out - ref)))
    assert jnp.allclose(out, ref, atol=3e-2, rtol=3e-2), max_err

    print("KERNEL_OK")
</pallas_src>

<mosaic_0001>
module attributes {stable_mosaic.version = 11 : i64} {
  func.func @_frame_encode_kernel(%arg0: i32, %arg1: i32, %arg2: memref<16x256x3xf32, #tpu.memory_space<vmem>>, %arg3: memref<3x2048xf32, #tpu.memory_space<vmem>>, %arg4: memref<1x2048xf32, #tpu.memory_space<vmem>>, %arg5: memref<1x2048xf32, #tpu.memory_space<vmem>>, %arg6: memref<1x2048xf32, #tpu.memory_space<vmem>>, %arg7: memref<2048x512xbf16, #tpu.memory_space<vmem>>, %arg8: memref<1x512xf32, #tpu.memory_space<vmem>>, %arg9: memref<1x512xf32, #tpu.memory_space<vmem>>, %arg10: memref<1x512xf32, #tpu.memory_space<vmem>>, %arg11: memref<512x128xbf16, #tpu.memory_space<vmem>>, %arg12: memref<1x128xf32, #tpu.memory_space<vmem>>, %arg13: memref<128x1024xbf16, #tpu.memory_space<vmem>>, %arg14: memref<1x1024xf32, #tpu.memory_space<vmem>>, %arg15: memref<16x1024xf32, #tpu.memory_space<vmem>>, %arg16: memref<16x3xf32, #tpu.memory_space<vmem>>) attributes {dimension_semantics = [#tpu.dimension_semantics<parallel>, #tpu.dimension_semantics<arbitrary>], iteration_bounds = array<i64: 1, 1>, scalar_prefetch = 0 : i64, scratch_operands = 1 : i64, tpu.core_type = #tpu.core_type<tc>, window_params = [{transform_indices = @transform_0, window_bounds = array<i64: 16, 256, 3>}, {pipeline_mode = #tpu.pipeline_mode<synchronous>, transform_indices = @transform_1, window_bounds = array<i64: 3, 2048>}, {pipeline_mode = #tpu.pipeline_mode<synchronous>, transform_indices = @transform_2, window_bounds = array<i64: 1, 2048>}, {pipeline_mode = #tpu.pipeline_mode<synchronous>, transform_indices = @transform_3, window_bounds = array<i64: 1, 2048>}, {pipeline_mode = #tpu.pipeline_mode<synchronous>, transform_indices = @transform_4, window_bounds = array<i64: 1, 2048>}, {pipeline_mode = #tpu.pipeline_mode<synchronous>, transform_indices = @transform_5, window_bounds = array<i64: 2048, 512>}, {pipeline_mode = #tpu.pipeline_mode<synchronous>, transform_indices = @transform_6, window_bounds = array<i64: 1, 512>}, {pipeline_mode = #tpu.pipeline_mode<synchronous>, transform_indices = @transform_7, window_bounds = array<i64: 1, 512>}, {pipeline_mode = #tpu.pipeline_mode<synchronous>, transform_indices = @transform_8, window_bounds = array<i64: 1, 512>}, {pipeline_mode = #tpu.pipeline_mode<synchronous>, transform_indices = @transform_9, window_bounds = array<i64: 512, 128>}, {pipeline_mode = #tpu.pipeline_mode<synchronous>, transform_indices = @transform_10, window_bounds = array<i64: 1, 128>}, {pipeline_mode = #tpu.pipeline_mode<synchronous>, transform_indices = @transform_11, window_bounds = array<i64: 128, 1024>}, {pipeline_mode = #tpu.pipeline_mode<synchronous>, transform_indices = @transform_12, window_bounds = array<i64: 1, 1024>}, {transform_indices = @transform_13, window_bounds = array<i64: 16, 1024>}]} {
    %c0_i32 = arith.constant 0 : i32
    %0 = arith.cmpi eq, %arg1, %c0_i32 : i32
    %1 = arith.extui %0 : i1 to i32
    %c0_i32_0 = arith.constant 0 : i32
    %2 = arith.cmpi ne, %1, %c0_i32_0 : i32
    scf.if %2 {
      %cst_9 = arith.constant 0.000000e+00 : f32
      %11 = vector.broadcast %cst_9 : f32 to vector<16x3xf32>
      %c0_10 = arith.constant 0 : index
      %c0_11 = arith.constant 0 : index
      %12 = vector.load %arg16[%c0_10, %c0_11] : memref<16x3xf32, #tpu.memory_space<vmem>>, vector<16x3xf32>
      tpu.vector_store %arg16[%c0_10, %c0_11], %11 {strides = array<i32>} : memref<16x3xf32, #tpu.memory_space<vmem>>, vector<16x3xf32>,
    } else {
    }
    %c0 = arith.constant 0 : index
    %c0_1 = arith.constant 0 : index
    %3 = vector.load %arg16[%c0, %c0_1] : memref<16x3xf32, #tpu.memory_space<vmem>>, vector<16x3xf32>
    %c0_2 = arith.constant 0 : index
    %c0_3 = arith.constant 0 : index
    %c0_4 = arith.constant 0 : index
    %4 = vector.load %arg2[%c0_2, %c0_3, %c0_4] : memref<16x256x3xf32, #tpu.memory_space<vmem>>, vector<16x256x3xf32>
    %cst = arith.constant dense<0.000000e+00> : vector<16x3xf32>
    %5 = vector.multi_reduction <add>, %4, %cst [1] : vector<16x256x3xf32> to vector<16x3xf32>
    %6 = arith.addf %3, %5 : vector<16x3xf32>
    %c0_5 = arith.constant 0 : index
    %c0_6 = arith.constant 0 : index
    %7 = vector.load %arg16[%c0_5, %c0_6] : memref<16x3xf32, #tpu.memory_space<vmem>>, vector<16x3xf32>
    tpu.vector_store %arg16[%c0_5, %c0_6], %6 {strides = array<i32>} : memref<16x3xf32, #tpu.memory_space<vmem>>, vector<16x3xf32>,
    %c0_i32_7 = arith.constant 0 : i32
    %8 = arith.cmpi eq, %arg1, %c0_i32_7 : i32
    %9 = arith.extui %8 : i1 to i32
    %c0_i32_8 = arith.constant 0 : i32
    %10 = arith.cmpi ne, %9, %c0_i32_8 : i32
    scf.if %10 {
      %c0_9 = arith.constant 0 : index
      %c0_10 = arith.constant 0 : index
      %11 = vector.load %arg16[%c0_9, %c0_10] : memref<16x3xf32, #tpu.memory_space<vmem>>, vector<16x3xf32>
      %cst_11 = arith.constant 3.906250e-03 : f32
      %12 = vector.broadcast %cst_11 : f32 to vector<16x3xf32>
      %13 = arith.mulf %11, %12 : vector<16x3xf32>
      %c0_12 = arith.constant 0 : index
      %c0_13 = arith.constant 0 : index
      %14 = vector.load %arg3[%c0_12, %c0_13] : memref<3x2048xf32, #tpu.memory_space<vmem>>, vector<3x2048xf32>
      %cst_14 = arith.constant dense<0.000000e+00> : vector<16x2048xf32>
      %15 = tpu.matmul %13, %14, %cst_14 {dimension_numbers = #tpu.dot_dimension_numbers<[1], [0], [0], [1], [0, 0, 1, 1], [], []>} : vector<16x3xf32>, vector<3x2048xf32>, vector<16x2048xf32> -> vector<16x2048xf32>
      %c0_15 = arith.constant 0 : index
      %c0_16 = arith.constant 0 : index
      %16 = vector.load %arg4[%c0_15, %c0_16] : memref<1x2048xf32, #tpu.memory_space<vmem>>, vector<1x2048xf32>
      %17 = vector.broadcast %16 : vector<1x2048xf32> to vector<16x2048xf32>
      %18 = arith.addf %15, %17 : vector<16x2048xf32>
      %c0_17 = arith.constant 0 : index
      %c0_18 = arith.constant 0 : index
      %19 = vector.load %arg5[%c0_17, %c0_18] : memref<1x2048xf32, #tpu.memory_space<vmem>>, vector<1x2048xf32>
      %20 = vector.broadcast %19 : vector<1x2048xf32> to vector<16x2048xf32>
      %21 = arith.mulf %18, %20 : vector<16x2048xf32>
      %c0_19 = arith.constant 0 : index
      %c0_20 = arith.constant 0 : index
      %22 = vector.load %arg6[%c0_19, %c0_20] : memref<1x2048xf32, #tpu.memory_space<vmem>>, vector<1x2048xf32>
      %23 = vector.broadcast %22 : vector<1x2048xf32> to vector<16x2048xf32>
      %24 = arith.addf %21, %23 : vector<16x2048xf32>
      %25 = arith.truncf %24 : vector<16x2048xf32> to vector<16x2048xbf16>
      %c0_21 = arith.constant 0 : index
      %c0_22 = arith.constant 0 : index
      %26 = vector.load %arg7[%c0_21, %c0_22] : memref<2048x512xbf16, #tpu.memory_space<vmem>>, vector<2048x512xbf16>
      %cst_23 = arith.constant dense<0.000000e+00> : vector<16x512xf32>
      %27 = tpu.matmul %25, %26, %cst_23 {dimension_numbers = #tpu.dot_dimension_numbers<[1], [0], [0], [1], [0, 0, 1, 1], [], []>} : vector<16x2048xbf16>, vector<2048x512xbf16>, vector<16x512xf32> -> vector<16x512xf32>
      %c0_24 = arith.constant 0 : index
      %c0_25 = arith.constant 0 : index
      %28 = vector.load %arg8[%c0_24, %c0_25] : memref<1x512xf32, #tpu.memory_space<vmem>>, vector<1x512xf32>
      %29 = vector.broadcast %28 : vector<1x512xf32> to vector<16x512xf32>
      %30 = arith.addf %27, %29 : vector<16x512xf32>
      %cst_26 = arith.constant 0.000000e+00 : f32
      %31 = vector.broadcast %cst_26 : f32 to vector<16x512xf32>
      %32 = arith.maximumf %30, %31 : vector<16x512xf32>
      %c0_27 = arith.constant 0 : index
      %c0_28 = arith.constant 0 : index
      %33 = vector.load %arg9[%c0_27, %c0_28] : memref<1x512xf32, #tpu.memory_space<vmem>>, vector<1x512xf32>
      %34 = vector.broadcast %33 : vector<1x512xf32> to vector<16x512xf32>
      %35 = arith.mulf %32, %34 : vector<16x512xf32>
      %c0_29 = arith.constant 0 : index
      %c0_30 = arith.constant 0 : index
      %36 = vector.load %arg10[%c0_29, %c0_30] : memref<1x512xf32, #tpu.memory_space<vmem>>, vector<1x512xf32>
      %37 = vector.broadcast %36 : vector<1x512xf32> to vector<16x512xf32>
      %38 = arith.addf %35, %37 : vector<16x512xf32>
      %39 = arith.truncf %38 : vector<16x512xf32> to vector<16x512xbf16>
      %c0_31 = arith.constant 0 : index
      %c0_32 = arith.constant 0 : index
      %40 = vector.load %arg11[%c0_31, %c0_32] : memref<512x128xbf16, #tpu.memory_space<vmem>>, vector<512x128xbf16>
      %cst_33 = arith.constant dense<0.000000e+00> : vector<16x128xf32>
      %41 = tpu.matmul %39, %40, %cst_33 {dimension_numbers = #tpu.dot_dimension_numbers<[1], [0], [0], [1], [0, 0, 1, 1], [], []>} : vector<16x512xbf16>, vector<512x128xbf16>, vector<16x128xf32> -> vector<16x128xf32>
      %c0_34 = arith.constant 0 : index
      %c0_35 = arith.constant 0 : index
      %42 = vector.load %arg12[%c0_34, %c0_35] : memref<1x128xf32, #tpu.memory_space<vmem>>, vector<1x128xf32>
      %43 = vector.broadcast %42 : vector<1x128xf32> to vector<16x128xf32>
      %44 = arith.addf %41, %43 : vector<16x128xf32>
      %45 = arith.truncf %44 : vector<16x128xf32> to vector<16x128xbf16>
      %c0_36 = arith.constant 0 : index
      %c0_37 = arith.constant 0 : index
      %46 = vector.load %arg13[%c0_36, %c0_37] : memref<128x1024xbf16, #tpu.memory_space<vmem>>, vector<128x1024xbf16>
      %cst_38 = arith.constant dense<0.000000e+00> : vector<16x1024xf32>
      %47 = tpu.matmul %45, %46, %cst_38 {dimension_numbers = #tpu.dot_dimension_numbers<[1], [0], [0], [1], [0, 0, 1, 1], [], []>} : vector<16x128xbf16>, vector<128x1024xbf16>, vector<16x1024xf32> -> vector<16x1024xf32>
      %c0_39 = arith.constant 0 : index
      %c0_40 = arith.constant 0 : index
      %48 = vector.load %arg14[%c0_39, %c0_40] : memref<1x1024xf32, #tpu.memory_space<vmem>>, vector<1x1024xf32>
      %49 = vector.broadcast %48 : vector<1x1024xf32> to vector<16x1024xf32>
      %50 = arith.addf %47, %49 : vector<16x1024xf32>
      %c0_41 = arith.constant 0 : index
      %c0_42 = arith.constant 0 : index
      %51 = vector.load %arg15[%c0_41, %c0_42] : memref<16x1024xf32, #tpu.memory_space<vmem>>, vector<16x1024xf32>
      tpu.vector_store %arg15[%c0_41, %c0_42], %50 {strides = array<i32>} : memref<16x1024xf32, #tpu.memory_space<vmem>>, vector<16x1024xf32>,
    } else {
    }
    return
  }
  func.func @transform_0(%arg0: i32, %arg1: i32) -> (i32, i32, i32) {
    %c0_i32 = arith.constant 0 : i32
    %c0_i32_0 = arith.constant 0 : i32
    return %arg0, %arg1, %c0_i32 : i32, i32, i32
  }
  func.func @transform_1(%arg0: i32, %arg1: i32) -> (i32, i32) {
    %c0_i32 = arith.constant 0 : i32
    %c0_i32_0 = arith.constant 0 : i32
    %c0_i32_1 = arith.constant 0 : i32
    return %c0_i32, %c0_i32_0 : i32, i32
  }
  func.func @transform_2(%arg0: i32, %arg1: i32) -> (i32, i32) {
    %c0_i32 = arith.constant 0 : i32
    %c0_i32_0 = arith.constant 0 : i32
    %c0_i32_1 = arith.constant 0 : i32
    return %c0_i32, %c0_i32_0 : i32, i32
  }
  func.func @transform_3(%arg0: i32, %arg1: i32) -> (i32, i32) {
    %c0_i32 = arith.constant 0 : i32
    %c0_i32_0 = arith.constant 0 : i32
    %c0_i32_1 = arith.constant 0 : i32
    return %c0_i32, %c0_i32_0 : i32, i32
  }
  func.func @transform_4(%arg0: i32, %arg1: i32) -> (i32, i32) {
    %c0_i32 = arith.constant 0 : i32
    %c0_i32_0 = arith.constant 0 : i32
    %c0_i32_1 = arith.constant 0 : i32
    return %c0_i32, %c0_i32_0 : i32, i32
  }
  func.func @transform_5(%arg0: i32, %arg1: i32) -> (i32, i32) {
    %c0_i32 = arith.constant 0 : i32
    %c0_i32_0 = arith.constant 0 : i32
    %c0_i32_1 = arith.constant 0 : i32
    return %c0_i32, %c0_i32_0 : i32, i32
  }
  func.func @transform_6(%arg0: i32, %arg1: i32) -> (i32, i32) {
    %c0_i32 = arith.constant 0 : i32
    %c0_i32_0 = arith.constant 0 : i32
    %c0_i32_1 = arith.constant 0 : i32
    return %c0_i32, %c0_i32_0 : i32, i32
  }
  func.func @transform_7(%arg0: i32, %arg1: i32) -> (i32, i32) {
    %c0_i32 = arith.constant 0 : i32
    %c0_i32_0 = arith.constant 0 : i32
    %c0_i32_1 = arith.constant 0 : i32
    return %c0_i32, %c0_i32_0 : i32, i32
  }
  func.func @transform_8(%arg0: i32, %arg1: i32) -> (i32, i32) {
    %c0_i32 = arith.constant 0 : i32
    %c0_i32_0 = arith.constant 0 : i32
    %c0_i32_1 = arith.constant 0 : i32
    return %c0_i32, %c0_i32_0 : i32, i32
  }
  func.func @transform_9(%arg0: i32, %arg1: i32) -> (i32, i32) {
    %c0_i32 = arith.constant 0 : i32
    %c0_i32_0 = arith.constant 0 : i32
    %c0_i32_1 = arith.constant 0 : i32
    return %c0_i32, %c0_i32_0 : i32, i32
  }
  func.func @transform_10(%arg0: i32, %arg1: i32) -> (i32, i32) {
    %c0_i32 = arith.constant 0 : i32
    %c0_i32_0 = arith.constant 0 : i32
    %c0_i32_1 = arith.constant 0 : i32
    return %c0_i32, %c0_i32_0 : i32, i32
  }
  func.func @transform_11(%arg0: i32, %arg1: i32) -> (i32, i32) {
    %c0_i32 = arith.constant 0 : i32
    %c0_i32_0 = arith.constant 0 : i32
    %c0_i32_1 = arith.constant 0 : i32
    return %c0_i32, %c0_i32_0 : i32, i32
  }
  func.func @transform_12(%arg0: i32, %arg1: i32) -> (i32, i32) {
    %c0_i32 = arith.constant 0 : i32
    %c0_i32_0 = arith.constant 0 : i32
    %c0_i32_1 = arith.constant 0 : i32
    return %c0_i32, %c0_i32_0 : i32, i32
  }
  func.func @transform_13(%arg0: i32, %arg1: i32) -> (i32, i32) {
    %c0_i32 = arith.constant 0 : i32
    %c0_i32_0 = arith.constant 0 : i32
    return %arg0, %c0_i32 : i32, i32
  }
}

module attributes {stable_mosaic.version = 11 : i64} {
  func.func @_lstm_decode_kernel(%arg0: i32, %arg1: memref<1x2x1024xf32, #tpu.memory_space<vmem>>, %arg2: memref<256x1024xf32, #tpu.memory_space<vmem>>, %arg3: memref<512x1024xf32, #tpu.memory_space<vmem>>, %arg4: memref<1x1024xf32, #tpu.memory_space<vmem>>, %arg5: memref<512x1024xf32, #tpu.memory_space<vmem>>, %arg6: memref<1x1024xf32, #tpu.memory_space<vmem>>, %arg7: memref<256x128xf32, #tpu.memory_space<vmem>>, %arg8: memref<1x128xf32, #tpu.memory_space<vmem>>, %arg9: memref<128x10xf32, #tpu.memory_space<vmem>>, %arg10: memref<1x10xf32, #tpu.memory_space<vmem>>, %arg11: memref<2x10xf32, #tpu.memory_space<vmem>>, %arg12: memref<2x256xf32, #tpu.memory_space<vmem>>, %arg13: memref<2x256xf32, #tpu.memory_space<vmem>>, %arg14: memref<2x256xf32, #tpu.memory_space<vmem>>, %arg15: memref<2x256xf32, #tpu.memory_space<vmem>>, %arg16: memref<2x256xf32, #tpu.memory_space<vmem>>, %arg17: memref<2x256xf32, #tpu.memory_space<vmem>>) attributes {dimension_semantics = [#tpu.dimension_semantics<arbitrary>], iteration_bounds = array<i64: 8>, scalar_prefetch = 0 : i64, scratch_operands = 6 : i64, tpu.core_type = #tpu.core_type<tc>, window_params = [{transform_indices = @transform_0, window_bounds = array<i64: 1, 2, 1024>}, {pipeline_mode = #tpu.pipeline_mode<synchronous>, transform_indices = @transform_1, window_bounds = array<i64: 256, 1024>}, {pipeline_mode = #tpu.pipeline_mode<synchronous>, transform_indices = @transform_2, window_bounds = array<i64: 512, 1024>}, {pipeline_mode = #tpu.pipeline_mode<synchronous>, transform_indices = @transform_3, window_bounds = array<i64: 1, 1024>}, {pipeline_mode = #tpu.pipeline_mode<synchronous>, transform_indices = @transform_4, window_bounds = array<i64: 512, 1024>}, {pipeline_mode = #tpu.pipeline_mode<synchronous>, transform_indices = @transform_5, window_bounds = array<i64: 1, 1024>}, {pipeline_mode = #tpu.pipeline_mode<synchronous>, transform_indices = @transform_6, window_bounds = array<i64: 256, 128>}, {pipeline_mode = #tpu.pipeline_mode<synchronous>, transform_indices = @transform_7, window_bounds = array<i64: 1, 128>}, {pipeline_mode = #tpu.pipeline_mode<synchronous>, transform_indices = @transform_8, window_bounds = array<i64: 128, 10>}, {pipeline_mode = #tpu.pipeline_mode<synchronous>, transform_indices = @transform_9, window_bounds = array<i64: 1, 10>}, {pipeline_mode = #tpu.pipeline_mode<synchronous>, transform_indices = @transform_10, window_bounds = array<i64: 2, 10>}]} {
    %c0_i32 = arith.constant 0 : i32
    %0 = arith.cmpi eq, %arg0, %c0_i32 : i32
    %1 = arith.extui %0 : i1 to i32
    %c0_i32_0 = arith.constant 0 : i32
    %2 = arith.cmpi ne, %1, %c0_i32_0 : i32
    scf.if %2 {
      %cst_49 = arith.constant 0.000000e+00 : f32
      %110 = vector.broadcast %cst_49 : f32 to vector<2x256xf32>
      %c0_50 = arith.constant 0 : index
      %c0_51 = arith.constant 0 : index
      %111 = vector.load %arg12[%c0_50, %c0_51] : memref<2x256xf32, #tpu.memory_space<vmem>>, vector<2x256xf32>
      tpu.vector_store %arg12[%c0_50, %c0_51], %110 {strides = array<i32>} : memref<2x256xf32, #tpu.memory_space<vmem>>, vector<2x256xf32>,
      %cst_52 = arith.constant 0.000000e+00 : f32
      %112 = vector.broadcast %cst_52 : f32 to vector<2x256xf32>
      %c0_53 = arith.constant 0 : index
      %c0_54 = arith.constant 0 : index
      %113 = vector.load %arg13[%c0_53, %c0_54] : memref<2x256xf32, #tpu.memory_space<vmem>>, vector<2x256xf32>
      tpu.vector_store %arg13[%c0_53, %c0_54], %112 {strides = array<i32>} : memref<2x256xf32, #tpu.memory_space<vmem>>, vector<2x256xf32>,
      %cst_55 = arith.constant 0.000000e+00 : f32
      %114 = vector.broadcast %cst_55 : f32 to vector<2x256xf32>
      %c0_56 = arith.constant 0 : index
      %c0_57 = arith.constant 0 : index
      %115 = vector.load %arg14[%c0_56, %c0_57] : memref<2x256xf32, #tpu.memory_space<vmem>>, vector<2x256xf32>
      tpu.vector_store %arg14[%c0_56, %c0_57], %114 {strides = array<i32>} : memref<2x256xf32, #tpu.memory_space<vmem>>, vector<2x256xf32>,
      %cst_58 = arith.constant 0.000000e+00 : f32
      %116 = vector.broadcast %cst_58 : f32 to vector<2x256xf32>
      %c0_59 = arith.constant 0 : index
      %c0_60 = arith.constant 0 : index
      %117 = vector.load %arg15[%c0_59, %c0_60] : memref<2x256xf32, #tpu.memory_space<vmem>>, vector<2x256xf32>
      tpu.vector_store %arg15[%c0_59, %c0_60], %116 {strides = array<i32>} : memref<2x256xf32, #tpu.memory_space<vmem>>, vector<2x256xf32>,
      %cst_61 = arith.constant 0.000000e+00 : f32
      %118 = vector.broadcast %cst_61 : f32 to vector<2x256xf32>
      %c0_62 = arith.constant 0 : index
      %c0_63 = arith.constant 0 : index
      %119 = vector.load %arg16[%c0_62, %c0_63] : memref<2x256xf32, #tpu.memory_space<vmem>>, vector<2x256xf32>
      tpu.vector_store %arg16[%c0_62, %c0_63], %118 {strides = array<i32>} : memref<2x256xf32, #tpu.memory_space<vmem>>, vector<2x256xf32>,
      %cst_64 = arith.constant 0.000000e+00 : f32
      %120 = vector.broadcast %cst_64 : f32 to vector<2x256xf32>
      %c0_65 = arith.constant 0 : index
      %c0_66 = arith.constant 0 : index
      %121 = vector.load %arg17[%c0_65, %c0_66] : memref<2x256xf32, #tpu.memory_space<vmem>>, vector<2x256xf32>
      tpu.vector_store %arg17[%c0_65, %c0_66], %120 {strides = array<i32>} : memref<2x256xf32, #tpu.memory_space<vmem>>, vector<2x256xf32>,
    } else {
    }
    %c0 = arith.constant 0 : index
    %c0_1 = arith.constant 0 : index
    %c0_2 = arith.constant 0 : index
    %3 = vector.load %arg1[%c0, %c0_1, %c0_2] : memref<1x2x1024xf32, #tpu.memory_space<vmem>>, vector<1x2x1024xf32>
    %4 = vector.shape_cast %3 : vector<1x2x1024xf32> to vector<2x1024xf32>
    %c0_3 = arith.constant 0 : index
    %c0_4 = arith.constant 0 : index
    %5 = vector.load %arg12[%c0_3, %c0_4] : memref<2x256xf32, #tpu.memory_space<vmem>>, vector<2x256xf32>
    %c0_5 = arith.constant 0 : index
    %c0_6 = arith.constant 0 : index
    %6 = vector.load %arg2[%c0_5, %c0_6] : memref<256x1024xf32, #tpu.memory_space<vmem>>, vector<256x1024xf32>
    %cst = arith.constant dense<0.000000e+00> : vector<2x1024xf32>
    %7 = tpu.matmul %5, %6, %cst {dimension_numbers = #tpu.dot_dimension_numbers<[1], [0], [0], [1], [0, 0, 1, 1], [], []>} : vector<2x256xf32>, vector<256x1024xf32>, vector<2x1024xf32> -> vector<2x1024xf32>
    %8 = arith.addf %4, %7 : vector<2x1024xf32>
    %c0_7 = arith.constant 0 : index
    %c0_8 = arith.constant 0 : index
    %9 = vector.load %arg13[%c0_7, %c0_8] : memref<2x256xf32, #tpu.memory_space<vmem>>, vector<2x256xf32>
    %10 = vector.extract_strided_slice %8 {offsets = [0, 0], sizes = [2, 256], strides = [1, 1]} : vector<2x1024xf32> to vector<2x256xf32>
    %11 = arith.negf %10 : vector<2x256xf32>
    %12 = math.exp %11 : vector<2x256xf32>
    %cst_9 = arith.constant 1.000000e+00 : f32
    %13 = vector.broadcast %cst_9 : f32 to vector<2x256xf32>
    %14 = arith.addf %13, %12 : vector<2x256xf32>
    %15 = arith.divf %13, %14 : vector<2x256xf32>
    %16 = vector.extract_strided_slice %8 {offsets = [0, 256], sizes = [2, 256], strides = [1, 1]} : vector<2x1024xf32> to vector<2x256xf32>
    %17 = arith.negf %16 : vector<2x256xf32>
    %18 = math.exp %17 : vector<2x256xf32>
    %cst_10 = arith.constant 1.000000e+00 : f32
    %19 = vector.broadcast %cst_10 : f32 to vector<2x256xf32>
    %20 = arith.addf %19, %18 : vector<2x256xf32>
    %21 = arith.divf %19, %20 : vector<2x256xf32>
    %22 = vector.extract_strided_slice %8 {offsets = [0, 512], sizes = [2, 256], strides = [1, 1]} : vector<2x1024xf32> to vector<2x256xf32>
    %23 = math.tanh %22 : vector<2x256xf32>
    %24 = vector.extract_strided_slice %8 {offsets = [0, 768], sizes = [2, 256], strides = [1, 1]} : vector<2x1024xf32> to vector<2x256xf32>
    %25 = arith.negf %24 : vector<2x256xf32>
    %26 = math.exp %25 : vector<2x256xf32>
    %cst_11 = arith.constant 1.000000e+00 : f32
    %27 = vector.broadcast %cst_11 : f32 to vector<2x256xf32>
    %28 = arith.addf %27, %26 : vector<2x256xf32>
    %29 = arith.divf %27, %28 : vector<2x256xf32>
    %30 = arith.mulf %21, %9 : vector<2x256xf32>
    %31 = arith.mulf %15, %23 : vector<2x256xf32>
    %32 = arith.addf %30, %31 : vector<2x256xf32>
    %33 = math.tanh %32 : vector<2x256xf32>
    %34 = arith.mulf %29, %33 : vector<2x256xf32>
    %c0_12 = arith.constant 0 : index
    %c0_13 = arith.constant 0 : index
    %35 = vector.load %arg12[%c0_12, %c0_13] : memref<2x256xf32, #tpu.memory_space<vmem>>, vector<2x256xf32>
    tpu.vector_store %arg12[%c0_12, %c0_13], %34 {strides = array<i32>} : memref<2x256xf32, #tpu.memory_space<vmem>>, vector<2x256xf32>,
    %c0_14 = arith.constant 0 : index
    %c0_15 = arith.constant 0 : index
    %36 = vector.load %arg13[%c0_14, %c0_15] : memref<2x256xf32, #tpu.memory_space<vmem>>, vector<2x256xf32>
    tpu.vector_store %arg13[%c0_14, %c0_15], %32 {strides = array<i32>} : memref<2x256xf32, #tpu.memory_space<vmem>>, vector<2x256xf32>,
    %c0_16 = arith.constant 0 : index
    %c0_17 = arith.constant 0 : index
    %37 = vector.load %arg14[%c0_16, %c0_17] : memref<2x256xf32, #tpu.memory_space<vmem>>, vector<2x256xf32>
    %38 = tpu.concatenate %34, %37 in 1 : vector<2x256xf32>, vector<2x256xf32> -> vector<2x512xf32>
    %c0_18 = arith.constant 0 : index
    %c0_19 = arith.constant 0 : index
    %39 = vector.load %arg3[%c0_18, %c0_19] : memref<512x1024xf32, #tpu.memory_space<vmem>>, vector<512x1024xf32>
    %cst_20 = arith.constant dense<0.000000e+00> : vector<2x1024xf32>
    %40 = tpu.matmul %38, %39, %cst_20 {dimension_numbers = #tpu.dot_dimension_numbers<[1], [0], [0], [1], [0, 0, 1, 1], [], []>} : vector<2x512xf32>, vector<512x1024xf32>, vector<2x1024xf32> -> vector<2x1024xf32>
    %c0_21 = arith.constant 0 : index
    %c0_22 = arith.constant 0 : index
    %41 = vector.load %arg4[%c0_21, %c0_22] : memref<1x1024xf32, #tpu.memory_space<vmem>>, vector<1x1024xf32>
    %42 = vector.broadcast %41 : vector<1x1024xf32> to vector<2x1024xf32>
    %43 = arith.addf %40, %42 : vector<2x1024xf32>
    %c0_23 = arith.constant 0 : index
    %c0_24 = arith.constant 0 : index
    %44 = vector.load %arg15[%c0_23, %c0_24] : memref<2x256xf32, #tpu.memory_space<vmem>>, vector<2x256xf32>
    %45 = vector.extract_strided_slice %43 {offsets = [0, 0], sizes = [2, 256], strides = [1, 1]} : vector<2x1024xf32> to vector<2x256xf32>
    %46 = arith.negf %45 : vector<2x256xf32>
    %47 = math.exp %46 : vector<2x256xf32>
    %cst_25 = arith.constant 1.000000e+00 : f32
    %48 = vector.broadcast %cst_25 : f32 to vector<2x256xf32>
    %49 = arith.addf %48, %47 : vector<2x256xf32>
    %50 = arith.divf %48, %49 : vector<2x256xf32>
    %51 = vector.extract_strided_slice %43 {offsets = [0, 256], sizes = [2, 256], strides = [1, 1]} : vector<2x1024xf32> to vector<2x256xf32>
    %52 = arith.negf %51 : vector<2x256xf32>
    %53 = math.exp %52 : vector<2x256xf32>
    %cst_26 = arith.constant 1.000000e+00 : f32
    %54 = vector.broadcast %cst_26 : f32 to vector<2x256xf32>
    %55 = arith.addf %54, %53 : vector<2x256xf32>
    %56 = arith.divf %54, %55 : vector<2x256xf32>
    %57 = vector.extract_strided_slice %43 {offsets = [0, 512], sizes = [2, 256], strides = [1, 1]} : vector<2x1024xf32> to vector<2x256xf32>
    %58 = math.tanh %57 : vector<2x256xf32>
    %59 = vector.extract_strided_slice %43 {offsets = [0, 768], sizes = [2, 256], strides = [1, 1]} : vector<2x1024xf32> to vector<2x256xf32>
    %60 = arith.negf %59 : vector<2x256xf32>
    %61 = math.exp %60 : vector<2x256xf32>
    %cst_27 = arith.constant 1.000000e+00 : f32
    %62 = vector.broadcast %cst_27 : f32 to vector<2x256xf32>
    %63 = arith.addf %62, %61 : vector<2x256xf32>
    %64 = arith.divf %62, %63 : vector<2x256xf32>
    %65 = arith.mulf %56, %44 : vector<2x256xf32>
    %66 = arith.mulf %50, %58 : vector<2x256xf32>
    %67 = arith.addf %65, %66 : vector<2x256xf32>
    %68 = math.tanh %67 : vector<2x256xf32>
    %69 = arith.mulf %64, %68 : vector<2x256xf32>
    %c0_28 = arith.constant 0 : index
    %c0_29 = arith.constant 0 : index
    %70 = vector.load %arg14[%c0_28, %c0_29] : memref<2x256xf32, #tpu.memory_space<vmem>>, vector<2x256xf32>
    tpu.vector_store %arg14[%c0_28, %c0_29], %69 {strides = array<i32>} : memref<2x256xf32, #tpu.memory_space<vmem>>, vector<2x256xf32>,
    %c0_30 = arith.constant 0 : index
    %c0_31 = arith.constant 0 : index
    %71 = vector.load %arg15[%c0_30, %c0_31] : memref<2x256xf32, #tpu.memory_space<vmem>>, vector<2x256xf32>
    tpu.vector_store %arg15[%c0_30, %c0_31], %67 {strides = array<i32>} : memref<2x256xf32, #tpu.memory_space<vmem>>, vector<2x256xf32>,
    %c0_32 = arith.constant 0 : index
    %c0_33 = arith.constant 0 : index
    %72 = vector.load %arg16[%c0_32, %c0_33] : memref<2x256xf32, #tpu.memory_space<vmem>>, vector<2x256xf32>
    %73 = tpu.concatenate %69, %72 in 1 : vector<2x256xf32>, vector<2x256xf32> -> vector<2x512xf32>
    %c0_34 = arith.constant 0 : index
    %c0_35 = arith.constant 0 : index
    %74 = vector.load %arg5[%c0_34, %c0_35] : memref<512x1024xf32, #tpu.memory_space<vmem>>, vector<512x1024xf32>
    %cst_36 = arith.constant dense<0.000000e+00> : vector<2x1024xf32>
    %75 = tpu.matmul %73, %74, %cst_36 {dimension_numbers = #tpu.dot_dimension_numbers<[1], [0], [0], [1], [0, 0, 1, 1], [], []>} : vector<2x512xf32>, vector<512x1024xf32>, vector<2x1024xf32> -> vector<2x1024xf32>
    %c0_37 = arith.constant 0 : index
    %c0_38 = arith.constant 0 : index
    %76 = vector.load %arg6[%c0_37, %c0_38] : memref<1x1024xf32, #tpu.memory_space<vmem>>, vector<1x1024xf32>
    %77 = vector.broadcast %76 : vector<1x1024xf32> to vector<2x1024xf32>
    %78 = arith.addf %75, %77 : vector<2x1024xf32>
    %c0_39 = arith.constant 0 : index
    %c0_40 = arith.constant 0 : index
    %79 = vector.load %arg17[%c0_39, %c0_40] : memref<2x256xf32, #tpu.memory_space<vmem>>, vector<2x256xf32>
    %80 = vector.extract_strided_slice %78 {offsets = [0, 0], sizes = [2, 256], strides = [1, 1]} : vector<2x1024xf32> to vector<2x256xf32>
    %81 = arith.negf %80 : vector<2x256xf32>
    %82 = math.exp %81 : vector<2x256xf32>
    %cst_41 = arith.constant 1.000000e+00 : f32
    %83 = vector.broadcast %cst_41 : f32 to vector<2x256xf32>
    %84 = arith.addf %83, %82 : vector<2x256xf32>
    %85 = arith.divf %83, %84 : vector<2x256xf32>
    %86 = vector.extract_strided_slice %78 {offsets = [0, 256], sizes = [2, 256], strides = [1, 1]} : vector<2x1024xf32> to vector<2x256xf32>
    %87 = arith.negf %86 : vector<2x256xf32>
    %88 = math.exp %87 : vector<2x256xf32>
    %cst_42 = arith.constant 1.000000e+00 : f32
    %89 = vector.broadcast %cst_42 : f32 to vector<2x256xf32>
    %90 = arith.addf %89, %88 : vector<2x256xf32>
    %91 = arith.divf %89, %90 : vector<2x256xf32>
    %92 = vector.extract_strided_slice %78 {offsets = [0, 512], sizes = [2, 256], strides = [1, 1]} : vector<2x1024xf32> to vector<2x256xf32>
    %93 = math.tanh %92 : vector<2x256xf32>
    %94 = vector.extract_strided_slice %78 {offsets = [0, 768], sizes = [2, 256], strides = [1, 1]} : vector<2x1024xf32> to vector<2x256xf32>
    %95 = arith.negf %94 : vector<2x256xf32>
    %96 = math.exp %95 : vector<2x256xf32>
    %cst_43 = arith.constant 1.000000e+00 : f32
    %97 = vector.broadcast %cst_43 : f32 to vector<2x256xf32>
    %98 = arith.addf %97, %96 : vector<2x256xf32>
    %99 = arith.divf %97, %98 : vector<2x256xf32>
    %100 = arith.mulf %91, %79 : vector<2x256xf32>
    %101 = arith.mulf %85, %93 : vector<2x256xf32>
    %102 = arith.addf %100, %101 : vector<2x256xf32>
    %103 = math.tanh %102 : vector<2x256xf32>
    %104 = arith.mulf %99, %103 : vector<2x256xf32>
    %c0_44 = arith.constant 0 : index
    %c0_45 = arith.constant 0 : index
    %105 = vector.load %arg16[%c0_44, %c0_45] : memref<2x256xf32, #tpu.memory_space<vmem>>, vector<2x256xf32>
    tpu.vector_store %arg16[%c0_44, %c0_45], %104 {strides = array<i32>} : memref<2x256xf32, #tpu.memory_space<vmem>>, vector<2x256xf32>,
    %c0_46 = arith.constant 0 : index
    %c0_47 = arith.constant 0 : index
    %106 = vector.load %arg17[%c0_46, %c0_47] : memref<2x256xf32, #tpu.memory_space<vmem>>, vector<2x256xf32>
    tpu.vector_store %arg17[%c0_46, %c0_47], %102 {strides = array<i32>} : memref<2x256xf32, #tpu.memory_space<vmem>>, vector<2x256xf32>,
    %c7_i32 = arith.constant 7 : i32
    %107 = arith.cmpi eq, %arg0, %c7_i32 : i32
    %108 = arith.extui %107 : i1 to i32
    %c0_i32_48 = arith.constant 0 : i32
    %109 = arith.cmpi ne, %108, %c0_i32_48 : i32
    scf.if %109 {
      %c0_49 = arith.constant 0 : index
      %c0_50 = arith.constant 0 : index
      %110 = vector.load %arg7[%c0_49, %c0_50] : memref<256x128xf32, #tpu.memory_space<vmem>>, vector<256x128xf32>
      %cst_51 = arith.constant dense<0.000000e+00> : vector<2x128xf32>
      %111 = tpu.matmul %104, %110, %cst_51 {dimension_numbers = #tpu.dot_dimension_numbers<[1], [0], [0], [1], [0, 0, 1, 1], [], []>} : vector<2x256xf32>, vector<256x128xf32>, vector<2x128xf32> -> vector<2x128xf32>
      %c0_52 = arith.constant 0 : index
      %c0_53 = arith.constant 0 : index
      %112 = vector.load %arg8[%c0_52, %c0_53] : memref<1x128xf32, #tpu.memory_space<vmem>>, vector<1x128xf32>
      %113 = vector.broadcast %112 : vector<1x128xf32> to vector<2x128xf32>
      %114 = arith.addf %111, %113 : vector<2x128xf32>
      %cst_54 = arith.constant 0.000000e+00 : f32
      %115 = vector.broadcast %cst_54 : f32 to vector<2x128xf32>
      %116 = arith.maximumf %114, %115 : vector<2x128xf32>
      %c0_55 = arith.constant 0 : index
      %c0_56 = arith.constant 0 : index
      %117 = vector.load %arg9[%c0_55, %c0_56] : memref<128x10xf32, #tpu.memory_space<vmem>>, vector<128x10xf32>
      %cst_57 = arith.constant dense<0.000000e+00> : vector<2x10xf32>
      %118 = tpu.matmul %116, %117, %cst_57 {dimension_numbers = #tpu.dot_dimension_numbers<[1], [0], [0], [1], [0, 0, 1, 1], [], []>} : vector<2x128xf32>, vector<128x10xf32>, vector<2x10xf32> -> vector<2x10xf32>
      %c0_58 = arith.constant 0 : index
      %c0_59 = arith.constant 0 : index
      %119 = vector.load %arg10[%c0_58, %c0_59] : memref<1x10xf32, #tpu.memory_space<vmem>>, vector<1x10xf32>
      %120 = vector.broadcast %119 : vector<1x10xf32> to vector<2x10xf32>
      %121 = arith.addf %118, %120 : vector<2x10xf32>
      %c0_60 = arith.constant 0 : index
      %c0_61 = arith.constant 0 : index
      %122 = vector.load %arg11[%c0_60, %c0_61] : memref<2x10xf32, #tpu.memory_space<vmem>>, vector<2x10xf32>
      tpu.vector_store %arg11[%c0_60, %c0_61], %121 {strides = array<i32>} : memref<2x10xf32, #tpu.memory_space<vmem>>, vector<2x10xf32>,
    } else {
    }
    return
  }
  func.func @transform_0(%arg0: i32) -> (i32, i32, i32) {
    %c0_i32 = arith.constant 0 : i32
    %c0_i32_0 = arith.constant 0 : i32
    %c0_i32_1 = arith.constant 0 : i32
    return %arg0, %c0_i32, %c0_i32_0 : i32, i32, i32
  }
  func.func @transform_1(%arg0: i32) -> (i32, i32) {
    %c0_i32 = arith.constant 0 : i32
    %c0_i32_0 = arith.constant 0 : i32
    %c0_i32_1 = arith.constant 0 : i32
    return %c0_i32, %c0_i32_0 : i32, i32
  }
  func.func @transform_2(%arg0: i32) -> (i32, i32) {
    %c0_i32 = arith.constant 0 : i32
    %c0_i32_0 = arith.constant 0 : i32
    %c0_i32_1 = arith.constant 0 : i32
    return %c0_i32, %c0_i32_0 : i32, i32
  }
  func.func @transform_3(%arg0: i32) -> (i32, i32) {
    %c0_i32 = arith.constant 0 : i32
    %c0_i32_0 = arith.constant 0 : i32
    %c0_i32_1 = arith.constant 0 : i32
    return %c0_i32, %c0_i32_0 : i32, i32
  }
  func.func @transform_4(%arg0: i32) -> (i32, i32) {
    %c0_i32 = arith.constant 0 : i32
    %c0_i32_0 = arith.constant 0 : i32
    %c0_i32_1 = arith.constant 0 : i32
    return %c0_i32, %c0_i32_0 : i32, i32
  }
  func.func @transform_5(%arg0: i32) -> (i32, i32) {
    %c0_i32 = arith.constant 0 : i32
    %c0_i32_0 = arith.constant 0 : i32
    %c0_i32_1 = arith.constant 0 : i32
    return %c0_i32, %c0_i32_0 : i32, i32
  }
  func.func @transform_6(%arg0: i32) -> (i32, i32) {
    %c0_i32 = arith.constant 0 : i32
    %c0_i32_0 = arith.constant 0 : i32
    %c0_i32_1 = arith.constant 0 : i32
    return %c0_i32, %c0_i32_0 : i32, i32
  }
  func.func @transform_7(%arg0: i32) -> (i32, i32) {
    %c0_i32 = arith.constant 0 : i32
    %c0_i32_0 = arith.constant 0 : i32
    %c0_i32_1 = arith.constant 0 : i32
    return %c0_i32, %c0_i32_0 : i32, i32
  }
  func.func @transform_8(%arg0: i32) -> (i32, i32) {
    %c0_i32 = arith.constant 0 : i32
    %c0_i32_0 = arith.constant 0 : i32
    %c0_i32_1 = arith.constant 0 : i32
    return %c0_i32, %c0_i32_0 : i32, i32
  }
  func.func @transform_9(%arg0: i32) -> (i32, i32) {
    %c0_i32 = arith.constant 0 : i32
    %c0_i32_0 = arith.constant 0 : i32
    %c0_i32_1 = arith.constant 0 : i32
    return %c0_i32, %c0_i32_0 : i32, i32
  }
  func.func @transform_10(%arg0: i32) -> (i32, i32) {
    %c0_i32 = arith.constant 0 : i32
    %c0_i32_0 = arith.constant 0 : i32
    %c0_i32_1 = arith.constant 0 : i32
    return %c0_i32, %c0_i32_0 : i32, i32
  }
}

</mosaic_0001>

<bundles_post_ra>
// kernel: lrcn_forward.3
= control target key start
LH: loop header
LB: loop body
LE: loop exit
PB: predicated region body
PF: predicated region fallthrough
CT: control target
= control target key end

     0   :  { %15 = vsyncpa [#allocation9], 0  ;;  %s9580_s0 = inlined_call_operand.vmem [shape: f32[8,2,1024], index: 0, kind: input, shape index: {}]   ;;  %s9581_s1 = inlined_call_operand.vmem [shape: f32[256,1024], index: 1, kind: input, shape index: {}]   ;;  %s9582_s2 = inlined_call_operand.vmem [shape: f32[512,1024], index: 2, kind: input, shape index: {}]   ;;  %s9583_s3 = inlined_call_operand.vmem [shape: f32[1,1024], index: 3, kind: input, shape index: {}]   ;;  %s9584_s4 = inlined_call_operand.vmem [shape: f32[512,1024], index: 4, kind: input, shape index: {}]   ;;  %s9585_s5 = inlined_call_operand.vmem [shape: f32[1,1024], index: 5, kind: input, shape index: {}]   ;;  %s9586_s6 = inlined_call_operand.hbm [shape: f32[256,128], index: 6, kind: input, shape index: {}]   ;;  %s9587_s7 = inlined_call_operand.vmem [shape: f32[1,128], index: 7, kind: input, shape index: {}]   ;;  %s9588_s8 = inlined_call_operand.vmem [shape: f32[128,10], index: 8, kind: input, shape index: {}]   ;;  %s9589_s9 = inlined_call_operand.vmem [shape: f32[1,10], index: 9, kind: input, shape index: {}]   ;;  %s9590_s10 = inlined_call_operand.hbm [shape: f32[2,10], index: 10, kind: output, shape index: {}]  }
   0x1   :  { %16 = vsyncpa [#allocation10], 0  ;;  %s5463_s13 = smov 0  }
   0x2 LB: > { %s5469_s14 = sadd.s32 4294967295, %s5397_s13   ;;  %p3719_p0 = scmp.ge.s32.totalorder %s5397_s13, 1  ;;  %s5397_s13 = sphi %s5463_s13, %s22_s13  }
   0x3   : > { %p263_p1 = scmp.lt.s32.totalorder %s5397_s13, 9  ;;  %s5399_s15 = smov [#allocation8]  }
   0x4   : > { %s290_s16 = sshll.u32 %s5399_s15, 4  ;;  %p9591_p4 = scmp.eq.s32.totalorder %s5469_s14, 0  ;;  %s291_s16 = int_to_ptr.vmem [resolvable:$true] %s290_s16 }
   0x5   : > { %p5474_p3 = pnand %p3719_p0, %p263_p1  ;;  %s5329_s21 = scalar_lea.hbm %s9586_s6, 4096 }
   0x6   : > { %p5330_p7 = scmp.ne.s32.totalorder %s9586_s6, %s5329_s21  ;;  %p5336_p11 = scmp.lt.u32.totalorder %s5329_s21, %s9586_s6 }
   0x7   : > { %s9593_s17 = scalar_select %p5474_p3, 1, 0 }
   0x8   : > { %p5222_p5 = pneg %p5474_p3 }
   0xa   : > { %p5483_p6 = pnand %p9591_p4, %p5222_p5 }
   0xc   : > { %p5331_p8 = pneg %p5483_p6 }
   0xe   : > { %p5332_p9 = pnand %p5331_p8, %p5330_p7 }
  0x10   : > { %p5333_p10 = pneg %p5332_p9 }
  0x12   : > { %p5338_p12 = pnand %p5336_p11, %p5333_p10 }
  0x14   : > { %5341 = shalt.err (!%p5338_p12)
}
  0x15   : > { %s5342_s26 = scalar_lea.vmem %s291_s16, 4096  ;;  %p5350_p5 = scmp.lt.s32.totalorder %s291_s16, %s291_s16 }
  0x16   : > { %p5343_p13 = scmp.ne.s32.totalorder %s291_s16, %s5342_s26  ;;  %p5351_p2 = scmp.lt.s32.totalorder %s5342_s26, %s5342_s26 }
  0x18   : > { %p5345_p0 = pnand %p5343_p13, %p5331_p8  ;;  %p5352_p4 = por %p5351_p2, %p5350_p5 }
  0x1a   : > { %p5346_p1 = pneg %p5345_p0 }
  0x1c   : > { %p5353_p3 = pnand %p5352_p4, %p5346_p1 }
  0x1e   : > { %5356 = shalt.err (!%p5353_p3)
}
  0x1f   : > { %s5400_s27 = smov 128   ;;  %s5401_s28 = smov 8  }
  0x20   : > { %5225 = dma.hbm_to_vmem [thread:$0]  (!%p5483_p6), %s9586_s6, 4096, %s291_s16, [#allocation9], %s5400_s27, %s5400_s27, %s5401_s28  }
  0x21   : > { %p9595_p7 = scmp.ne.s32.totalorder %s9593_s17, 0 }
  0x22   : > { %p9596_p9 = scmp.eq.s32.totalorder (!%p9595_p7), %s5469_s14, 0 }
  0x23   : > { %323 = sbr.rel (%p9595_p7) target bundleno = 1782 (0x6f6), region = 60 }
  0x2a   : > { %5388 = dma.done.wait (%p9596_p9), [#allocation9], 4096   ;;  %p9597_p8 = pmov %p9596_p9 }
  0x2b   : > { %p356_p2 = scmp.lt.s32.totalorder %s5469_s14, 7  ;;  %p9598_p3 = scmp.ne.s32.totalorder %s5469_s14, 0 }
  0x2c   : > { %5390 = vsyncadd (%p9597_p8), [#allocation9], 4294963200  ;;  %v5402_v0 = vmov (!%p9598_p3), 0.0  }
  0x2d   : > { %s357_s11 = scalar_select %p356_p2, %s5469_s14, 7 }
  0x2e   : > { %364 = sbr.rel (%p9598_p3) target bundleno = 53 (0x35), region = 68  ;;  %365 = vst [vmem:[#allocation2] sm:$0xf] (!%p9598_p3), %v5402_v0  ;;  %366 = vst [vmem:[#allocation3] sm:$0xf] (!%p9598_p3), %v5402_v0 }
  0x2f   : > { %s3758_s12 = sshll.u32 %s357_s11, 4  ;;  %367 = vst [vmem:[#allocation4] sm:$0xf] (!%p9598_p3), %v5402_v0  ;;  %368 = vst [vmem:[#allocation5] sm:$0xf] (!%p9598_p3), %v5402_v0 }
  0x30   : > { %s5514_s19 = scalar_lea.vmem %s9580_s0, %s3758_s12  ;;  %369 = vst [vmem:[#allocation6] sm:$0xf] (!%p9598_p3), %v5402_v0  ;;  %370 = vst [vmem:[#allocation7] sm:$0xf] (!%p9598_p3), %v5402_v0 }
  0x35 PF: > { %v375_v1 = vld [vmem:[%s9581_s1 + $0x8] sm:$0xff]  ;;  %v377_v3 = vld [vmem:[%s9581_s1 + $0x18] sm:$0xff]  ;;  %v374_v6 = vld [vmem:[%s9581_s1] sm:$0xff]  ;;  %p3751_p4 = scmp.ne.s32.totalorder %s5469_s14, 7 }
  0x36   : > { %v383_v2 = vld [vmem:[%s9581_s1 + $0x48] sm:$0xff]  ;;  %v385_v5 = vld [vmem:[%s9581_s1 + $0x58] sm:$0xff]  ;;  %v382_v7 = vld [vmem:[%s9581_s1 + $0x40] sm:$0xff]  ;;  %vm5405_vm0 = vmmov (!%p3751_p4), 0   ;;  %vm3658_vm1 = vcmask (!%p3751_p4), 74752  }
  0x37   : > { %v3846_v4 = vpack.c.bf16 %v383_v2, %v375_v1  ;;  %v3910_v8 = vpack.c.bf16 %v385_v5, %v377_v3  ;;  %v3848_v9 = vpack.c.bf16 %v382_v7, %v374_v6  ;;  %v376_v10 = vld [vmem:[%s9581_s1 + $0x10] sm:$0xff]  ;;  %v391_v12 = vld [vmem:[%s9581_s1 + $0x88] sm:$0xff]  ;;  %v393_v15 = vld [vmem:[%s9581_s1 + $0x98] sm:$0xff] }
  0x38   : > { %v384_v11 = vld [vmem:[%s9581_s1 + $0x50] sm:$0xff]  ;;  %v399_v14 = vld [vmem:[%s9581_s1 + $0xc8] sm:$0xff]  ;;  %v401_v16 = vld [vmem:[%s9581_s1 + $0xd8] sm:$0xff] }
  0x39   : > { %3847 = vmatprep.subr.bf16.mxu0 %v3846_v4  ;;  %v3912_v13 = vpack.c.bf16 %v384_v11, %v376_v10  ;;  %3911 = vmatprep.subr.bf16.mxu1 %v3910_v8  ;;  %v3850_v17 = vpack.c.bf16 %v399_v14, %v391_v12  ;;  %v3914_v18 = vpack.c.bf16 %v401_v16, %v393_v15  ;;  %v390_v19 = vld [vmem:[%s9581_s1 + $0x80] sm:$0xff]  ;;  %v392_v21 = vld [vmem:[%s9581_s1 + $0x90] sm:$0xff]  ;;  %v407_v24 = vld [vmem:[%s9581_s1 + $0x108] sm:$0xff] }
  0x3a   : > { %3849 = vmatpush1.bf16.msra.mxu0 %v3848_v9  ;;  %v398_v20 = vld [vmem:[%s9581_s1 + $0xc0] sm:$0xff]  ;;  %v400_v23 = vld [vmem:[%s9581_s1 + $0xd0] sm:$0xff]  ;;  %v415_v25 = vld [vmem:[%s9581_s1 + $0x148] sm:$0xff] }
  0x3b   : > { %3913 = vmatpush1.bf16.msra.mxu1 %v3912_v13  ;;  %v3852_v22 = vpack.c.bf16 %v398_v20, %v390_v19  ;;  %3851 = vmatprep.subr.bf16.mxu0 %v3850_v17  ;;  %v3916_v26 = vpack.c.bf16 %v400_v23, %v392_v21  ;;  %v3854_v27 = vpack.c.bf16 %v415_v25, %v407_v24  ;;  %v409_v28 = vld [vmem:[%s9581_s1 + $0x118] sm:$0xff]  ;;  %v406_v30 = vld [vmem:[%s9581_s1 + $0x100] sm:$0xff]  ;;  %v408_v33 = vld [vmem:[%s9581_s1 + $0x110] sm:$0xff] }
  0x3c   : > { %3915 = vmatprep.subr.bf16.mxu1 %v3914_v18  ;;  %v417_v29 = vld [vmem:[%s9581_s1 + $0x158] sm:$0xff]  ;;  %v414_v32 = vld [vmem:[%s9581_s1 + $0x140] sm:$0xff]  ;;  %v416_v34 = vld [vmem:[%s9581_s1 + $0x150] sm:$0xff] }
  0x3d   : > { %v3918_v31 = vpack.c.bf16 %v417_v29, %v409_v28  ;;  %v3856_v35 = vpack.c.bf16 %v414_v32, %v406_v30  ;;  %v423_v36 = vld [vmem:[%s9581_s1 + $0x188] sm:$0xff]  ;;  %v425_v38 = vld [vmem:[%s9581_s1 + $0x198] sm:$0xff]  ;;  %v3920_v39 = vpack.c.bf16 %v416_v34, %v408_v33  ;;  %v422_v42 = vld [vmem:[%s9581_s1 + $0x180] sm:$0xff] }
  0x3e   : > { %3853 = vmatpush1.bf16.msra.mxu0 %v3852_v22  ;;  %v431_v37 = vld [vmem:[%s9581_s1 + $0x1c8] sm:$0xff]  ;;  %v433_v41 = vld [vmem:[%s9581_s1 + $0x1d8] sm:$0xff]  ;;  %v430_v43 = vld [vmem:[%s9581_s1 + $0x1c0] sm:$0xff] }
  0x3f   : > { %3917 = vmatpush1.bf16.msra.mxu1 %v3916_v26  ;;  %3855 = vmatprep.subr.bf16.mxu0 %v3854_v27  ;;  %v3858_v40 = vpack.c.bf16 %v431_v37, %v423_v36  ;;  %v3922_v44 = vpack.c.bf16 %v433_v41, %v425_v38  ;;  %v424_v45 = vld [vmem:[%s9581_s1 + $0x190] sm:$0xff]  ;;  %v439_v47 = vld [vmem:[%s9581_s1 + $0x208] sm:$0xff]  ;;  %v441_v49 = vld [vmem:[%s9581_s1 + $0x218] sm:$0xff]  ;;  %v3860_v51 = vpack.c.bf16 %v430_v43, %v422_v42 }
  0x40   : > { %3919 = vmatprep.subr.bf16.mxu1 %v3918_v31  ;;  %v432_v46 = vld [vmem:[%s9581_s1 + $0x1d0] sm:$0xff]  ;;  %v447_v48 = vld [vmem:[%s9581_s1 + $0x248] sm:$0xff]  ;;  %v449_v50 = vld [vmem:[%s9581_s1 + $0x258] sm:$0xff] }
  0x41   : > { %v3924_v52 = vpack.c.bf16 %v432_v46, %v424_v45  ;;  %v3862_v53 = vpack.c.bf16 %v447_v48, %v439_v47  ;;  %v438_v54 = vld [vmem:[%s9581_s1 + $0x200] sm:$0xff]  ;;  %v440_v56 = vld [vmem:[%s9581_s1 + $0x210] sm:$0xff]  ;;  %v3926_v57 = vpack.c.bf16 %v449_v50, %v441_v49  ;;  %v455_v59 = vld [vmem:[%s9581_s1 + $0x288] sm:$0xff] }
  0x42   : > { %3857 = vmatpush1.bf16.msra.mxu0 %v3856_v35  ;;  %v446_v55 = vld [vmem:[%s9581_s1 + $0x240] sm:$0xff]  ;;  %v448_v58 = vld [vmem:[%s9581_s1 + $0x250] sm:$0xff]  ;;  %v463_v60 = vld [vmem:[%s9581_s1 + $0x2c8] sm:$0xff] }
  0x43   : > { %3921 = vmatpush1.bf16.msra.mxu1 %v3920_v39  ;;  %3859 = vmatprep.subr.bf16.mxu0 %v3858_v40  ;;  %v457_v61 = vld [vmem:[%s9581_s1 + $0x298] sm:$0xff]  ;;  %v3864_v63 = vpack.c.bf16 %v446_v55, %v438_v54  ;;  %v3928_v0 = vpack.c.bf16 %v448_v58, %v440_v56  ;;  %v3866_v1 = vpack.c.bf16 %v463_v60, %v455_v59  ;;  %v454_v2 = vld [vmem:[%s9581_s1 + $0x280] sm:$0xff]  ;;  %v456_v4 = vld [vmem:[%s9581_s1 + $0x290] sm:$0xff] }
  0x44   : > { %3923 = vmatprep.subr.bf16.mxu1 %v3922_v44  ;;  %v465_v62 = vld [vmem:[%s9581_s1 + $0x2d8] sm:$0xff]  ;;  %v462_v3 = vld [vmem:[%s9581_s1 + $0x2c0] sm:$0xff]  ;;  %v464_v6 = vld [vmem:[%s9581_s1 + $0x2d0] sm:$0xff] }
  0x45   : > { %v3930_v5 = vpack.c.bf16 %v465_v62, %v457_v61  ;;  %v471_v7 = vld [vmem:[%s9581_s1 + $0x308] sm:$0xff]  ;;  %v473_v9 = vld [vmem:[%s9581_s1 + $0x318] sm:$0xff]  ;;  %v3868_v11 = vpack.c.bf16 %v462_v3, %v454_v2  ;;  %v3932_v12 = vpack.c.bf16 %v464_v6, %v456_v4  ;;  %v470_v14 = vld [vmem:[%s9581_s1 + $0x300] sm:$0xff] }
  0x46   : > { %3861 = vmatpush1.bf16.msra.mxu0 %v3860_v51  ;;  %v479_v8 = vld [vmem:[%s9581_s1 + $0x348] sm:$0xff]  ;;  %v481_v10 = vld [vmem:[%s9581_s1 + $0x358] sm:$0xff]  ;;  %v478_v15 = vld [vmem:[%s9581_s1 + $0x340] sm:$0xff] }
  0x47   : > { %3925 = vmatpush1.bf16.msra.mxu1 %v3924_v52  ;;  %3863 = vmatprep.subr.bf16.mxu0 %v3862_v53  ;;  %v3870_v13 = vpack.c.bf16 %v479_v8, %v471_v7  ;;  %v472_v16 = vld [vmem:[%s9581_s1 + $0x310] sm:$0xff]  ;;  %v3934_v17 = vpack.c.bf16 %v481_v10, %v473_v9  ;;  %v487_v19 = vld [vmem:[%s9581_s1 + $0x388] sm:$0xff]  ;;  %v489_v21 = vld [vmem:[%s9581_s1 + $0x398] sm:$0xff]  ;;  %v3872_v23 = vpack.c.bf16 %v478_v15, %v470_v14 }
  0x48   : > { %3927 = vmatprep.subr.bf16.mxu1 %v3926_v57  ;;  %v480_v18 = vld [vmem:[%s9581_s1 + $0x350] sm:$0xff]  ;;  %v495_v20 = vld [vmem:[%s9581_s1 + $0x3c8] sm:$0xff]  ;;  %v497_v22 = vld [vmem:[%s9581_s1 + $0x3d8] sm:$0xff] }
  0x49   : > { %v3936_v24 = vpack.c.bf16 %v480_v18, %v472_v16  ;;  %v3874_v25 = vpack.c.bf16 %v495_v20, %v487_v19  ;;  %v486_v26 = vld [vmem:[%s9581_s1 + $0x380] sm:$0xff]  ;;  %v488_v28 = vld [vmem:[%s9581_s1 + $0x390] sm:$0xff]  ;;  %v3938_v29 = vpack.c.bf16 %v497_v22, %v489_v21  ;;  %v503_v31 = vld [vmem:[%s9581_s1 + $0x408] sm:$0xff] }
  0x4a   : > { %3865 = vmatpush1.bf16.msra.mxu0 %v3864_v63  ;;  %v494_v27 = vld [vmem:[%s9581_s1 + $0x3c0] sm:$0xff]  ;;  %v496_v30 = vld [vmem:[%s9581_s1 + $0x3d0] sm:$0xff]  ;;  %v511_v32 = vld [vmem:[%s9581_s1 + $0x448] sm:$0xff] }
  0x4b   : > { %3929 = vmatpush1.bf16.msra.mxu1 %v3928_v0  ;;  %3867 = vmatprep.subr.bf16.mxu0 %v3866_v1  ;;  %v505_v33 = vld [vmem:[%s9581_s1 + $0x418] sm:$0xff]  ;;  %v3876_v35 = vpack.c.bf16 %v494_v27, %v486_v26  ;;  %v3940_v36 = vpack.c.bf16 %v496_v30, %v488_v28  ;;  %v3878_v37 = vpack.c.bf16 %v511_v32, %v503_v31  ;;  %v502_v38 = vld [vmem:[%s9581_s1 + $0x400] sm:$0xff]  ;;  %v504_v40 = vld [vmem:[%s9581_s1 + $0x410] sm:$0xff] }
  0x4c   : > { %3931 = vmatprep.subr.bf16.mxu1 %v3930_v5  ;;  %v513_v34 = vld [vmem:[%s9581_s1 + $0x458] sm:$0xff]  ;;  %v510_v39 = vld [vmem:[%s9581_s1 + $0x440] sm:$0xff]  ;;  %v512_v42 = vld [vmem:[%s9581_s1 + $0x450] sm:$0xff] }
  0x4d   : > { %v3942_v41 = vpack.c.bf16 %v513_v34, %v505_v33  ;;  %v519_v43 = vld [vmem:[%s9581_s1 + $0x488] sm:$0xff]  ;;  %v521_v45 = vld [vmem:[%s9581_s1 + $0x498] sm:$0xff]  ;;  %v3880_v47 = vpack.c.bf16 %v510_v39, %v502_v38  ;;  %v3944_v48 = vpack.c.bf16 %v512_v42, %v504_v40  ;;  %v518_v50 = vld [vmem:[%s9581_s1 + $0x480] sm:$0xff] }
  0x4e   : > { %3869 = vmatpush1.bf16.msra.mxu0 %v3868_v11  ;;  %v527_v44 = vld [vmem:[%s9581_s1 + $0x4c8] sm:$0xff]  ;;  %v529_v46 = vld [vmem:[%s9581_s1 + $0x4d8] sm:$0xff]  ;;  %v526_v51 = vld [vmem:[%s9581_s1 + $0x4c0] sm:$0xff] }
  0x4f   : > { %3933 = vmatpush1.bf16.msra.mxu1 %v3932_v12  ;;  %3871 = vmatprep.subr.bf16.mxu0 %v3870_v13  ;;  %v3882_v49 = vpack.c.bf16 %v527_v44, %v519_v43  ;;  %v520_v52 = vld [vmem:[%s9581_s1 + $0x490] sm:$0xff]  ;;  %v3946_v53 = vpack.c.bf16 %v529_v46, %v521_v45  ;;  %v535_v55 = vld [vmem:[%s9581_s1 + $0x508] sm:$0xff]  ;;  %v537_v57 = vld [vmem:[%s9581_s1 + $0x518] sm:$0xff]  ;;  %v3884_v59 = vpack.c.bf16 %v526_v51, %v518_v50 }
  0x50   : > { %3935 = vmatprep.subr.bf16.mxu1 %v3934_v17  ;;  %v528_v54 = vld [vmem:[%s9581_s1 + $0x4d0] sm:$0xff]  ;;  %v543_v56 = vld [vmem:[%s9581_s1 + $0x548] sm:$0xff]  ;;  %v545_v58 = vld [vmem:[%s9581_s1 + $0x558] sm:$0xff] }
  0x51   : > { %v3948_v60 = vpack.c.bf16 %v528_v54, %v520_v52  ;;  %v3886_v61 = vpack.c.bf16 %v543_v56, %v535_v55  ;;  %v534_v62 = vld [vmem:[%s9581_s1 + $0x500] sm:$0xff]  ;;  %v536_v0 = vld [vmem:[%s9581_s1 + $0x510] sm:$0xff]  ;;  %v3950_v1 = vpack.c.bf16 %v545_v58, %v537_v57  ;;  %v551_v3 = vld [vmem:[%s9581_s1 + $0x588] sm:$0xff] }
  0x52   : > { %3873 = vmatpush1.bf16.msra.mxu0 %v3872_v23  ;;  %v542_v63 = vld [vmem:[%s9581_s1 + $0x540] sm:$0xff]  ;;  %v544_v2 = vld [vmem:[%s9581_s1 + $0x550] sm:$0xff]  ;;  %v559_v4 = vld [vmem:[%s9581_s1 + $0x5c8] sm:$0xff] }
  0x53   : > { %3937 = vmatpush1.bf16.msra.mxu1 %v3936_v24  ;;  %3875 = vmatprep.subr.bf16.mxu0 %v3874_v25  ;;  %v553_v5 = vld [vmem:[%s9581_s1 + $0x598] sm:$0xff]  ;;  %v3888_v7 = vpack.c.bf16 %v542_v63, %v534_v62  ;;  %v550_v8 = vld [vmem:[%s9581_s1 + $0x580] sm:$0xff]  ;;  %v3952_v9 = vpack.c.bf16 %v544_v2, %v536_v0  ;;  %v3890_v10 = vpack.c.bf16 %v559_v4, %v551_v3  ;;  %v552_v12 = vld [vmem:[%s9581_s1 + $0x590] sm:$0xff] }
  0x54   : > { %3939 = vmatprep.subr.bf16.mxu1 %v3938_v29  ;;  %v561_v6 = vld [vmem:[%s9581_s1 + $0x5d8] sm:$0xff]  ;;  %v558_v11 = vld [vmem:[%s9581_s1 + $0x5c0] sm:$0xff]  ;;  %v560_v13 = vld [vmem:[%s9581_s1 + $0x5d0] sm:$0xff] }
  0x55   : > { %v3954_v14 = vpack.c.bf16 %v561_v6, %v553_v5  ;;  %v567_v15 = vld [vmem:[%s9581_s1 + $0x608] sm:$0xff]  ;;  %v5812_v17 = vld.sshfl [vmem:[#allocation2] sm:$0x33 pattern:$0x76325410]  ;;  %v569_v18 = vld [vmem:[%s9581_s1 + $0x618] sm:$0xff]  ;;  %v3892_v21 = vpack.c.bf16 %v558_v11, %v550_v8  ;;  %v3956_v22 = vpack.c.bf16 %v560_v13, %v552_v12 }
  0x56   : > { %3877 = vmatpush1.bf16.msra.mxu0 %v3876_v35  ;;  %v575_v16 = vld [vmem:[%s9581_s1 + $0x648] sm:$0xff]  ;;  %v577_v19 = vld [vmem:[%s9581_s1 + $0x658] sm:$0xff]  ;;  %v5822_v20 = vcombine.high %v5812_v17, %v5812_v17  ;;  %v566_v24 = vld [vmem:[%s9581_s1 + $0x600] sm:$0xff] }
  0x57   : > { %3941 = vmatpush1.bf16.msra.mxu1 %v3940_v36  ;;  %3879 = vmatprep.subr.bf16.mxu0 %v3878_v37  ;;  %v3894_v23 = vpack.c.bf16 %v575_v16, %v567_v15  ;;  %v574_v25 = vld [vmem:[%s9581_s1 + $0x640] sm:$0xff]  ;;  %v568_v26 = vld [vmem:[%s9581_s1 + $0x610] sm:$0xff]  ;;  %v3958_v27 = vpack.c.bf16 %v577_v19, %v569_v18  ;;  %v583_v29 = vld [vmem:[%s9581_s1 + $0x688] sm:$0xff] }
  0x58   : > { %3943 = vmatprep.subr.bf16.mxu1 %v3942_v41  ;;  %v576_v28 = vld [vmem:[%s9581_s1 + $0x650] sm:$0xff]  ;;  %v591_v30 = vld [vmem:[%s9581_s1 + $0x6c8] sm:$0xff]  ;;  %705 = vmatprep.mubr.f32.mxu0 %v5822_v20  ;;  %v585_v31 = vld [vmem:[%s9581_s1 + $0x698] sm:$0xff]  ;;  %v3896_v33 = vpack.c.bf16 %v574_v25, %v566_v24 }
  0x59   : > { %v593_v32 = vld [vmem:[%s9581_s1 + $0x6d8] sm:$0xff]  ;;  %776 = vmatprep.mubr.f32.mxu1 %v5822_v20  ;;  %v3960_v34 = vpack.c.bf16 %v576_v28, %v568_v26  ;;  %v3898_v35 = vpack.c.bf16 %v591_v30, %v583_v29  ;;  %v582_v36 = vld [vmem:[%s9581_s1 + $0x680] sm:$0xff]  ;;  %v584_v38 = vld [vmem:[%s9581_s1 + $0x690] sm:$0xff] }
  0x5a   : > { %3881 = vmatpush1.bf16.msra.mxu0 %v3880_v47  ;;  %v590_v37 = vld [vmem:[%s9581_s1 + $0x6c0] sm:$0xff]  ;;  %v3962_v39 = vpack.c.bf16 %v593_v32, %v585_v31  ;;  %v592_v40 = vld [vmem:[%s9581_s1 + $0x6d0] sm:$0xff]  ;;  %v599_v41 = vld [vmem:[%s9581_s1 + $0x708] sm:$0xff] }
  0x5b   : > { %3945 = vmatpush1.bf16.msra.mxu1 %v3944_v48  ;;  %3883 = vmatprep.subr.bf16.mxu0 %v3882_v49  ;;  %v607_v42 = vld [vmem:[%s9581_s1 + $0x748] sm:$0xff]  ;;  %v601_v43 = vld [vmem:[%s9581_s1 + $0x718] sm:$0xff]  ;;  %v3900_v45 = vpack.c.bf16 %v590_v37, %v582_v36  ;;  %v3964_v46 = vpack.c.bf16 %v592_v40, %v584_v38  ;;  %v598_v48 = vld [vmem:[%s9581_s1 + $0x700] sm:$0xff] }
  0x5c   : > { %3947 = vmatprep.subr.bf16.mxu1 %v3946_v53  ;;  %v609_v44 = vld [vmem:[%s9581_s1 + $0x758] sm:$0xff]  ;;  %v3902_v47 = vpack.c.bf16 %v607_v42, %v599_v41  ;;  %v606_v49 = vld [vmem:[%s9581_s1 + $0x740] sm:$0xff]  ;;  %v600_v50 = vld [vmem:[%s9581_s1 + $0x710] sm:$0xff] }
  0x5d   : > { %v3966_v51 = vpack.c.bf16 %v609_v44, %v601_v43  ;;  %v608_v52 = vld [vmem:[%s9581_s1 + $0x750] sm:$0xff]  ;;  %v615_v53 = vld [vmem:[%s9581_s1 + $0x788] sm:$0xff]  ;;  %v617_v55 = vld [vmem:[%s9581_s1 + $0x798] sm:$0xff]  ;;  %v3904_v57 = vpack.c.bf16 %v606_v49, %v598_v48 }
  0x5e   : > { %3885 = vmatpush1.bf16.msra.mxu0 %v3884_v59  ;;  %v623_v54 = vld [vmem:[%s9581_s1 + $0x7c8] sm:$0xff]  ;;  %v625_v56 = vld [vmem:[%s9581_s1 + $0x7d8] sm:$0xff]  ;;  %v3968_v58 = vpack.c.bf16 %v608_v52, %v600_v50  ;;  %v616_v62 = vld [vmem:[%s9581_s1 + $0x790] sm:$0xff] }
  0x5f   : > { %3949 = vmatpush1.bf16.msra.mxu1 %v3948_v60  ;;  %3887 = vmatprep.subr.bf16.mxu0 %v3886_v61  ;;  %v3906_v59 = vpack.c.bf16 %v623_v54, %v615_v53  ;;  %v614_v60 = vld [vmem:[%s9581_s1 + $0x780] sm:$0xff]  ;;  %v3970_v63 = vpack.c.bf16 %v625_v56, %v617_v55  ;;  %v624_v0 = vld [vmem:[%s9581_s1 + $0x7d0] sm:$0xff]  ;;  %v387_v2 = vld [vmem:[%s9581_s1 + $0x68] sm:$0xff] }
  0x60   : > { %3951 = vmatprep.subr.bf16.mxu1 %v3950_v1  ;;  %v622_v61 = vld [vmem:[%s9581_s1 + $0x7c0] sm:$0xff]  ;;  %v379_v1 = vld [vmem:[%s9581_s1 + $0x28] sm:$0xff]  ;;  %v381_v3 = vld [vmem:[%s9581_s1 + $0x38] sm:$0xff]  ;;  %v3972_v6 = vpack.c.bf16 %v624_v0, %v616_v62 }
  0x61   : > { %v389_v4 = vld [vmem:[%s9581_s1 + $0x78] sm:$0xff]  ;;  %v3908_v5 = vpack.c.bf16 %v622_v61, %v614_v60  ;;  %v378_v8 = vld [vmem:[%s9581_s1 + $0x20] sm:$0xff]  ;;  %v388_v12 = vld [vmem:[%s9581_s1 + $0x70] sm:$0xff] }
  0x62   : > { %3889 = vmatpush1.bf16.msra.mxu0 %v3888_v7  ;;  %v3974_v7 = vpack.c.bf16 %v387_v2, %v379_v1  ;;  %v4038_v11 = vpack.c.bf16 %v389_v4, %v381_v3  ;;  %v395_v13 = vld [vmem:[%s9581_s1 + $0xa8] sm:$0xff]  ;;  %v397_v15 = vld [vmem:[%s9581_s1 + $0xb8] sm:$0xff]  ;;  %v396_v24 = vld [vmem:[%s9581_s1 + $0xb0] sm:$0xff] }
  0x63   : > { %3953 = vmatpush1.bf16.msra.mxu1 %v3952_v9  ;;  %3891 = vmatprep.subr.bf16.mxu0 %v3890_v10  ;;  %v386_v9 = vld [vmem:[%s9581_s1 + $0x60] sm:$0xff]  ;;  %v380_v10 = vld [vmem:[%s9581_s1 + $0x30] sm:$0xff]  ;;  %v405_v16 = vld [vmem:[%s9581_s1 + $0xf8] sm:$0xff] }
  0x64   : > { %3955 = vmatprep.subr.bf16.mxu1 %v3954_v14  ;;  %v403_v14 = vld [vmem:[%s9581_s1 + $0xe8] sm:$0xff]  ;;  %v3976_v18 = vpack.c.bf16 %v386_v9, %v378_v8  ;;  %v4040_v19 = vpack.c.bf16 %v388_v12, %v380_v10  ;;  %v4042_v25 = vpack.c.bf16 %v405_v16, %v397_v15  ;;  %v404_v26 = vld [vmem:[%s9581_s1 + $0xf0] sm:$0xff]  ;;  %v413_v29 = vld [vmem:[%s9581_s1 + $0x138] sm:$0xff] }
  0x65   : > { %v419_v28 = vld [vmem:[%s9581_s1 + $0x168] sm:$0xff]  ;;  %v421_v30 = vld [vmem:[%s9581_s1 + $0x178] sm:$0xff]  ;;  %v4044_v32 = vpack.c.bf16 %v404_v26, %v396_v24  ;;  %v412_v36 = vld [vmem:[%s9581_s1 + $0x130] sm:$0xff] }
  0x66   : > { %3893 = vmatpush1.bf16.msra.mxu0 %v3892_v21  ;;  %v3978_v21 = vpack.c.bf16 %v403_v14, %v395_v13  ;;  %v4046_v37 = vpack.c.bf16 %v421_v30, %v413_v29  ;;  %v420_v38 = vld [vmem:[%s9581_s1 + $0x170] sm:$0xff]  ;;  %v435_v40 = vld [vmem:[%s9581_s1 + $0x1e8] sm:$0xff]  ;;  %v429_v41 = vld [vmem:[%s9581_s1 + $0x1b8] sm:$0xff] }
  0x67   : > { %3957 = vmatpush1.bf16.msra.mxu1 %v3956_v22  ;;  %3895 = vmatprep.subr.bf16.mxu0 %v3894_v23  ;;  %v394_v22 = vld [vmem:[%s9581_s1 + $0xa0] sm:$0xff]  ;;  %v437_v42 = vld [vmem:[%s9581_s1 + $0x1f8] sm:$0xff]  ;;  %v4048_v44 = vpack.c.bf16 %v420_v38, %v412_v36  ;;  %v428_v48 = vld [vmem:[%s9581_s1 + $0x1b0] sm:$0xff] }
  0x68   : > { %3959 = vmatprep.subr.bf16.mxu1 %v3958_v27  ;;  %v402_v23 = vld [vmem:[%s9581_s1 + $0xe0] sm:$0xff]  ;;  %v411_v27 = vld [vmem:[%s9581_s1 + $0x128] sm:$0xff]  ;;  %v436_v49 = vld [vmem:[%s9581_s1 + $0x1f0] sm:$0xff] }
  0x69   : > { %v3980_v31 = vpack.c.bf16 %v402_v23, %v394_v22  ;;  %v443_v50 = vld [vmem:[%s9581_s1 + $0x228] sm:$0xff]  ;;  %v445_v52 = vld [vmem:[%s9581_s1 + $0x238] sm:$0xff]  ;;  %v4052_v55 = vpack.c.bf16 %v436_v49, %v428_v48  ;;  %v452_v61 = vld [vmem:[%s9581_s1 + $0x270] sm:$0xff] }
  0x6a   : > { %3897 = vmatpush1.bf16.msra.mxu0 %v3896_v33  ;;  %v3982_v33 = vpack.c.bf16 %v419_v28, %v411_v27  ;;  %v453_v53 = vld [vmem:[%s9581_s1 + $0x278] sm:$0xff]  ;;  %v459_v62 = vld [vmem:[%s9581_s1 + $0x2a8] sm:$0xff]  ;;  %v468_v9 = vld [vmem:[%s9581_s1 + $0x2f0] sm:$0xff] }
  0x6b   : > { %3961 = vmatpush1.bf16.msra.mxu1 %v3960_v34  ;;  %3899 = vmatprep.subr.bf16.mxu0 %v3898_v35  ;;  %v410_v34 = vld [vmem:[%s9581_s1 + $0x120] sm:$0xff]  ;;  %v4054_v60 = vpack.c.bf16 %v453_v53, %v445_v52  ;;  %v461_v0 = vld [vmem:[%s9581_s1 + $0x2b8] sm:$0xff]  ;;  %v475_v10 = vld [vmem:[%s9581_s1 + $0x328] sm:$0xff] }
  0x6c   : > { %3963 = vmatprep.subr.bf16.mxu1 %v3962_v39  ;;  %v418_v35 = vld [vmem:[%s9581_s1 + $0x160] sm:$0xff]  ;;  %v427_v39 = vld [vmem:[%s9581_s1 + $0x1a8] sm:$0xff]  ;;  %v469_v1 = vld [vmem:[%s9581_s1 + $0x2f8] sm:$0xff] }
  0x6d   : > { %v3984_v43 = vpack.c.bf16 %v418_v35, %v410_v34  ;;  %v4058_v8 = vpack.c.bf16 %v469_v1, %v461_v0  ;;  %v477_v12 = vld [vmem:[%s9581_s1 + $0x338] sm:$0xff]  ;;  %v484_v23 = vld [vmem:[%s9581_s1 + $0x370] sm:$0xff]  ;;  %v491_v24 = vld [vmem:[%s9581_s1 + $0x3a8] sm:$0xff] }
  0x6e   : > { %3901 = vmatpush1.bf16.msra.mxu0 %v3900_v45  ;;  %v3986_v45 = vpack.c.bf16 %v435_v40, %v427_v39  ;;  %v485_v13 = vld [vmem:[%s9581_s1 + $0x378] sm:$0xff]  ;;  %v500_v35 = vld [vmem:[%s9581_s1 + $0x3f0] sm:$0xff]  ;;  %v507_v36 = vld [vmem:[%s9581_s1 + $0x428] sm:$0xff] }
  0x6f   : > { %3965 = vmatpush1.bf16.msra.mxu1 %v3964_v46  ;;  %3903 = vmatprep.subr.bf16.mxu0 %v3902_v47  ;;  %v426_v46 = vld [vmem:[%s9581_s1 + $0x1a0] sm:$0xff]  ;;  %v4062_v22 = vpack.c.bf16 %v485_v13, %v477_v12  ;;  %v493_v26 = vld [vmem:[%s9581_s1 + $0x3b8] sm:$0xff]  ;;  %v523_v48 = vld [vmem:[%s9581_s1 + $0x4a8] sm:$0xff] }
  0x70   : > { %3967 = vmatprep.subr.bf16.mxu1 %v3966_v51  ;;  %v434_v47 = vld [vmem:[%s9581_s1 + $0x1e0] sm:$0xff]  ;;  %v451_v51 = vld [vmem:[%s9581_s1 + $0x268] sm:$0xff]  ;;  %v501_v27 = vld [vmem:[%s9581_s1 + $0x3f8] sm:$0xff] }
  0x71   : > { %v3988_v54 = vpack.c.bf16 %v434_v47, %v426_v46  ;;  %v3990_v56 = vpack.c.bf16 %v451_v51, %v443_v50  ;;  %v4066_v34 = vpack.c.bf16 %v501_v27, %v493_v26  ;;  %v509_v38 = vld [vmem:[%s9581_s1 + $0x438] sm:$0xff]  ;;  %v516_v47 = vld [vmem:[%s9581_s1 + $0x470] sm:$0xff] }
  0x72   : > { %3905 = vmatpush1.bf16.msra.mxu0 %v3904_v57  ;;  %v442_v57 = vld [vmem:[%s9581_s1 + $0x220] sm:$0xff]  ;;  %v517_v39 = vld [vmem:[%s9581_s1 + $0x478] sm:$0xff] }
  0x73   : > { %3969 = vmatpush1.bf16.msra.mxu1 %v3968_v58  ;;  %3907 = vmatprep.subr.bf16.mxu0 %v3906_v59  ;;  %v450_v58 = vld [vmem:[%s9581_s1 + $0x260] sm:$0xff]  ;;  %v444_v59 = vld [vmem:[%s9581_s1 + $0x230] sm:$0xff]  ;;  %v4070_v46 = vpack.c.bf16 %v517_v39, %v509_v38  ;;  %v525_v49 = vld [vmem:[%s9581_s1 + $0x4b8] sm:$0xff] }
  0x74   : > { %3971 = vmatprep.subr.bf16.mxu1 %v3970_v63  ;;  %v467_v63 = vld [vmem:[%s9581_s1 + $0x2e8] sm:$0xff]  ;;  %v3992_v2 = vpack.c.bf16 %v450_v58, %v442_v57  ;;  %v4056_v3 = vpack.c.bf16 %v452_v61, %v444_v59  ;;  %v533_v50 = vld [vmem:[%s9581_s1 + $0x4f8] sm:$0xff]  ;;  %v532_v58 = vld [vmem:[%s9581_s1 + $0x4f0] sm:$0xff] }
  0x75   : > { %v3994_v4 = vpack.c.bf16 %v467_v63, %v459_v62  ;;  %v4074_v57 = vpack.c.bf16 %v533_v50, %v525_v49  ;;  %v539_v59 = vld [vmem:[%s9581_s1 + $0x528] sm:$0xff]  ;;  %v541_v61 = vld [vmem:[%s9581_s1 + $0x538] sm:$0xff] }
  0x76   : > { %3909 = vmatpush1.bf16.msra.mxu0 %v3908_v5  ;;  %v458_v5 = vld [vmem:[%s9581_s1 + $0x2a0] sm:$0xff]  ;;  %v549_v62 = vld [vmem:[%s9581_s1 + $0x578] sm:$0xff] }
  0x77   : > { %3973 = vmatpush1.bf16.msra.mxu1 %v3972_v6  ;;  %3975 = vmatprep.subr.bf16.mxu0 %v3974_v7  ;;  %v466_v6 = vld [vmem:[%s9581_s1 + $0x2e0] sm:$0xff]  ;;  %v460_v7 = vld [vmem:[%s9581_s1 + $0x2b0] sm:$0xff] }
  0x78   : > { %4039 = vmatprep.subr.bf16.mxu1 %v4038_v11  ;;  %v483_v11 = vld [vmem:[%s9581_s1 + $0x368] sm:$0xff]  ;;  %v3996_v14 = vpack.c.bf16 %v466_v6, %v458_v5  ;;  %v4060_v15 = vpack.c.bf16 %v468_v9, %v460_v7  ;;  %v4078_v5 = vpack.c.bf16 %v549_v62, %v541_v61  ;;  %v548_v6 = vld [vmem:[%s9581_s1 + $0x570] sm:$0xff]  ;;  %v557_v9 = vld [vmem:[%s9581_s1 + $0x5b8] sm:$0xff] }
  0x79   : > { %706 = vmatmul.mubr.f32.vlgmr.msra.gmra.mrb[0].mxu0 %v5812_v17  ;;  %v3998_v16 = vpack.c.bf16 %v483_v11, %v475_v10  ;;  %v555_v7 = vld [vmem:[%s9581_s1 + $0x5a8] sm:$0xff]  ;;  %v565_v10 = vld [vmem:[%s9581_s1 + $0x5f8] sm:$0xff] }
  0x7a   : > { %777 = vmatmul.mubr.f32.vlgmr.msra.gmra.mrb[0].mxu1 %v5812_v17  ;;  %3977 = vmatpush1.bf16.msra.mxu0 %v3976_v18  ;;  %v474_v18 = vld [vmem:[%s9581_s1 + $0x320] sm:$0xff] }
  0x7b   : > { %4041 = vmatpush1.bf16.msra.mxu1 %v4040_v19  ;;  %3979 = vmatprep.subr.bf16.mxu0 %v3978_v21  ;;  %v482_v19 = vld [vmem:[%s9581_s1 + $0x360] sm:$0xff]  ;;  %v476_v21 = vld [vmem:[%s9581_s1 + $0x330] sm:$0xff] }
  0x7c   : > { %4043 = vmatprep.subr.bf16.mxu1 %v4042_v25  ;;  %847 = vmatprep.mubr.f32.mxu0 %v5822_v20  ;;  %v499_v25 = vld [vmem:[%s9581_s1 + $0x3e8] sm:$0xff]  ;;  %v4000_v28 = vpack.c.bf16 %v482_v19, %v474_v18  ;;  %v4064_v29 = vpack.c.bf16 %v484_v23, %v476_v21  ;;  %v4082_v18 = vpack.c.bf16 %v565_v10, %v557_v9  ;;  %v564_v19 = vld [vmem:[%s9581_s1 + $0x5f0] sm:$0xff]  ;;  %v573_v23 = vld [vmem:[%s9581_s1 + $0x638] sm:$0xff] }
  0x7d   : > { %918 = vmatprep.mubr.f32.mxu1 %v5822_v20  ;;  %v4050_v20 = vpack.c.bf16 %v437_v42, %v429_v41  ;;  %v4002_v30 = vpack.c.bf16 %v499_v25, %v491_v24  ;;  %v571_v21 = vld [vmem:[%s9581_s1 + $0x628] sm:$0xff]  ;;  %v581_v24 = vld [vmem:[%s9581_s1 + $0x678] sm:$0xff] }
  0x7e   : > { %3981 = vmatpush1.bf16.msra.mxu0 %v3980_v31  ;;  %v490_v31 = vld [vmem:[%s9581_s1 + $0x3a0] sm:$0xff]  ;;  %v1038_v10 = vld [vmem:[%s9582_s2 + $0x58] sm:$0xff] }
  0x7f   : > { %4045 = vmatpush1.bf16.msra.mxu1 %v4044_v32  ;;  %3983 = vmatprep.subr.bf16.mxu0 %v3982_v33  ;;  %v498_v32 = vld [vmem:[%s9581_s1 + $0x3e0] sm:$0xff]  ;;  %v492_v33 = vld [vmem:[%s9581_s1 + $0x3b0] sm:$0xff] }
  0x80   : > { %4047 = vmatprep.subr.bf16.mxu1 %v4046_v37  ;;  %v515_v37 = vld [vmem:[%s9581_s1 + $0x468] sm:$0xff]  ;;  %v4004_v40 = vpack.c.bf16 %v498_v32, %v490_v31  ;;  %v4068_v41 = vpack.c.bf16 %v500_v35, %v492_v33  ;;  %v4086_v31 = vpack.c.bf16 %v581_v24, %v573_v23  ;;  %v580_v32 = vld [vmem:[%s9581_s1 + $0x670] sm:$0xff]  ;;  %v589_v35 = vld [vmem:[%s9581_s1 + $0x6b8] sm:$0xff] }
  0x81   : > { %v4006_v42 = vpack.c.bf16 %v515_v37, %v507_v36  ;;  %v587_v33 = vld [vmem:[%s9581_s1 + $0x6a8] sm:$0xff]  ;;  %v597_v36 = vld [vmem:[%s9581_s1 + $0x6f8] sm:$0xff] }
  0x82   : > { %3985 = vmatpush1.bf16.msra.mxu0 %v3984_v43  ;;  %v506_v43 = vld [vmem:[%s9581_s1 + $0x420] sm:$0xff] }
  0x83   : > { %4049 = vmatpush1.bf16.msra.mxu1 %v4048_v44  ;;  %3987 = vmatprep.subr.bf16.mxu0 %v3986_v45  ;;  %v514_v44 = vld [vmem:[%s9581_s1 + $0x460] sm:$0xff]  ;;  %v508_v45 = vld [vmem:[%s9581_s1 + $0x430] sm:$0xff] }
  0x84   : > { %4051 = vmatprep.subr.bf16.mxu1 %v4050_v20  ;;  %v531_v20 = vld [vmem:[%s9581_s1 + $0x4e8] sm:$0xff]  ;;  %v4008_v51 = vpack.c.bf16 %v514_v44, %v506_v43  ;;  %v4072_v52 = vpack.c.bf16 %v516_v47, %v508_v45  ;;  %v4090_v43 = vpack.c.bf16 %v597_v36, %v589_v35  ;;  %v596_v44 = vld [vmem:[%s9581_s1 + $0x6f0] sm:$0xff]  ;;  %v605_v47 = vld [vmem:[%s9581_s1 + $0x738] sm:$0xff] }
  0x85   : > { %v4010_v53 = vpack.c.bf16 %v531_v20, %v523_v48  ;;  %v603_v45 = vld [vmem:[%s9581_s1 + $0x728] sm:$0xff]  ;;  %v613_v48 = vld [vmem:[%s9581_s1 + $0x778] sm:$0xff]  ;;  %v1059_v36 = vld [vmem:[%s9582_s2 + $0x100] sm:$0xff] }
  0x86   : > { %3989 = vmatpush1.bf16.msra.mxu0 %v3988_v54  ;;  %v522_v54 = vld [vmem:[%s9581_s1 + $0x4a0] sm:$0xff]  ;;  %v1070_v35 = vld [vmem:[%s9582_s2 + $0x158] sm:$0xff] }
  0x87   : > { %4053 = vmatpush1.bf16.msra.mxu1 %v4052_v55  ;;  %3991 = vmatprep.subr.bf16.mxu0 %v3990_v56  ;;  %v530_v55 = vld [vmem:[%s9581_s1 + $0x4e0] sm:$0xff]  ;;  %v524_v56 = vld [vmem:[%s9581_s1 + $0x4b0] sm:$0xff] }
  0x88   : > { %4055 = vmatprep.subr.bf16.mxu1 %v4054_v60  ;;  %v547_v60 = vld [vmem:[%s9581_s1 + $0x568] sm:$0xff]  ;;  %v4012_v63 = vpack.c.bf16 %v530_v55, %v522_v54  ;;  %v4076_v0 = vpack.c.bf16 %v532_v58, %v524_v56  ;;  %v4094_v54 = vpack.c.bf16 %v613_v48, %v605_v47  ;;  %v612_v55 = vld [vmem:[%s9581_s1 + $0x770] sm:$0xff]  ;;  %v621_v58 = vld [vmem:[%s9581_s1 + $0x7b8] sm:$0xff] }
  0x89   : > { %v4014_v1 = vpack.c.bf16 %v547_v60, %v539_v59  ;;  %v619_v56 = vld [vmem:[%s9581_s1 + $0x7a8] sm:$0xff]  ;;  %v629_v59 = vld [vmem:[%s9581_s1 + $0x7f8] sm:$0xff]  ;;  %v1075_v48 = vld [vmem:[%s9582_s2 + $0x180] sm:$0xff] }
  0x8a   : > { %3993 = vmatpush1.bf16.msra.mxu0 %v3992_v2  ;;  %v538_v2 = vld [vmem:[%s9581_s1 + $0x520] sm:$0xff]  ;;  %v1086_v47 = vld [vmem:[%s9582_s2 + $0x1d8] sm:$0xff] }
  0x8b   : > { %4057 = vmatpush1.bf16.msra.mxu1 %v4056_v3  ;;  %3995 = vmatprep.subr.bf16.mxu0 %v3994_v4  ;;  %v546_v3 = vld [vmem:[%s9581_s1 + $0x560] sm:$0xff]  ;;  %v540_v4 = vld [vmem:[%s9581_s1 + $0x530] sm:$0xff] }
  0x8c   : > { %4059 = vmatprep.subr.bf16.mxu1 %v4058_v8  ;;  %v563_v8 = vld [vmem:[%s9581_s1 + $0x5e8] sm:$0xff]  ;;  %v4016_v11 = vpack.c.bf16 %v546_v3, %v538_v2  ;;  %v4080_v12 = vpack.c.bf16 %v548_v6, %v540_v4  ;;  %v620_v2 = vld [vmem:[%s9581_s1 + $0x7b0] sm:$0xff] }
  0x8d   : > { %v4018_v13 = vpack.c.bf16 %v563_v8, %v555_v7  ;;  %v628_v3 = vld [vmem:[%s9581_s1 + $0x7f0] sm:$0xff]  ;;  %v1028_v6 = vld [vmem:[%s9582_s2 + $0x8] sm:$0xff]  ;;  %v1030_v8 = vld [vmem:[%s9582_s2 + $0x18] sm:$0xff] }
  0x8e   : > { %3997 = vmatpush1.bf16.msra.mxu0 %v3996_v14  ;;  %v554_v14 = vld [vmem:[%s9581_s1 + $0x5a0] sm:$0xff]  ;;  %v1036_v7 = vld [vmem:[%s9582_s2 + $0x48] sm:$0xff] }
  0x8f   : > { %4061 = vmatpush1.bf16.msra.mxu1 %v4060_v15  ;;  %3999 = vmatprep.subr.bf16.mxu0 %v3998_v16  ;;  %v562_v15 = vld [vmem:[%s9581_s1 + $0x5e0] sm:$0xff]  ;;  %v556_v16 = vld [vmem:[%s9581_s1 + $0x5b0] sm:$0xff]  ;;  %v4102_v9 = vpack.c.bf16 %v1036_v7, %v1028_v6  ;;  %v1118_v6 = vld [vmem:[%s9582_s2 + $0x2d8] sm:$0xff] }
  0x90   : > { %4063 = vmatprep.subr.bf16.mxu1 %v4062_v22  ;;  %v579_v22 = vld [vmem:[%s9581_s1 + $0x668] sm:$0xff]  ;;  %v4020_v25 = vpack.c.bf16 %v562_v15, %v554_v14  ;;  %v4084_v26 = vpack.c.bf16 %v564_v19, %v556_v16  ;;  %v1029_v14 = vld [vmem:[%s9582_s2 + $0x10] sm:$0xff]  ;;  %v1107_v7 = vld [vmem:[%s9582_s2 + $0x280] sm:$0xff] }
  0x91   : > { %v4022_v27 = vpack.c.bf16 %v579_v22, %v571_v21  ;;  %v1037_v15 = vld [vmem:[%s9582_s2 + $0x50] sm:$0xff]  ;;  %v1044_v16 = vld [vmem:[%s9582_s2 + $0x88] sm:$0xff]  ;;  %v1046_v21 = vld [vmem:[%s9582_s2 + $0x98] sm:$0xff] }
  0x92   : > { %4001 = vmatpush1.bf16.msra.mxu0 %v4000_v28  ;;  %v570_v28 = vld [vmem:[%s9581_s1 + $0x620] sm:$0xff]  ;;  %v1052_v19 = vld [vmem:[%s9582_s2 + $0xc8] sm:$0xff]  ;;  %v1054_v22 = vld [vmem:[%s9582_s2 + $0xd8] sm:$0xff] }
  0x93   : > { %4065 = vmatpush1.bf16.msra.mxu1 %v4064_v29  ;;  %4003 = vmatprep.subr.bf16.mxu0 %v4002_v30  ;;  %v578_v29 = vld [vmem:[%s9581_s1 + $0x660] sm:$0xff]  ;;  %v572_v30 = vld [vmem:[%s9581_s1 + $0x630] sm:$0xff]  ;;  %v4106_v23 = vpack.c.bf16 %v1052_v19, %v1044_v16  ;;  %v4234_v24 = vpack.c.bf16 %v1054_v22, %v1046_v21 }
  0x94   : > { %4067 = vmatprep.subr.bf16.mxu1 %v4066_v34  ;;  %v595_v34 = vld [vmem:[%s9581_s1 + $0x6e8] sm:$0xff]  ;;  %v4024_v37 = vpack.c.bf16 %v578_v29, %v570_v28  ;;  %v4088_v38 = vpack.c.bf16 %v580_v32, %v572_v30  ;;  %v1053_v29 = vld [vmem:[%s9582_s2 + $0xd0] sm:$0xff]  ;;  %v1123_v19 = vld [vmem:[%s9582_s2 + $0x300] sm:$0xff] }
  0x95   : > { %v4026_v39 = vpack.c.bf16 %v595_v34, %v587_v33  ;;  %v1060_v30 = vld [vmem:[%s9582_s2 + $0x108] sm:$0xff]  ;;  %v1062_v34 = vld [vmem:[%s9582_s2 + $0x118] sm:$0xff]  ;;  %v1131_v21 = vld [vmem:[%s9582_s2 + $0x340] sm:$0xff] }
  0x96   : > { %4005 = vmatpush1.bf16.msra.mxu0 %v4004_v40  ;;  %v586_v40 = vld [vmem:[%s9581_s1 + $0x6a0] sm:$0xff] }
  0x97   : > { %4069 = vmatpush1.bf16.msra.mxu1 %v4068_v41  ;;  %4007 = vmatprep.subr.bf16.mxu0 %v4006_v42  ;;  %v594_v41 = vld [vmem:[%s9581_s1 + $0x6e0] sm:$0xff]  ;;  %v588_v42 = vld [vmem:[%s9581_s1 + $0x6b0] sm:$0xff] }
  0x98   : > { %4071 = vmatprep.subr.bf16.mxu1 %v4070_v46  ;;  %v611_v46 = vld [vmem:[%s9581_s1 + $0x768] sm:$0xff]  ;;  %v4028_v20 = vpack.c.bf16 %v594_v41, %v586_v40  ;;  %v4092_v49 = vpack.c.bf16 %v596_v44, %v588_v42  ;;  %v1069_v40 = vld [vmem:[%s9582_s2 + $0x150] sm:$0xff]  ;;  %v1078_v44 = vld [vmem:[%s9582_s2 + $0x198] sm:$0xff] }
  0x99   : > { %v4030_v50 = vpack.c.bf16 %v611_v46, %v603_v45  ;;  %v1076_v42 = vld [vmem:[%s9582_s2 + $0x188] sm:$0xff] }
  0x9a   : > { %4009 = vmatpush1.bf16.msra.mxu0 %v4008_v51  ;;  %v602_v51 = vld [vmem:[%s9581_s1 + $0x720] sm:$0xff] }
  0x9b   : > { %4073 = vmatpush1.bf16.msra.mxu1 %v4072_v52  ;;  %4011 = vmatprep.subr.bf16.mxu0 %v4010_v53  ;;  %v610_v52 = vld [vmem:[%s9581_s1 + $0x760] sm:$0xff]  ;;  %v604_v53 = vld [vmem:[%s9581_s1 + $0x730] sm:$0xff] }
  0x9c   : > { %4075 = vmatprep.subr.bf16.mxu1 %v4074_v57  ;;  %v627_v57 = vld [vmem:[%s9581_s1 + $0x7e8] sm:$0xff]  ;;  %v4032_v60 = vpack.c.bf16 %v610_v52, %v602_v51  ;;  %v4096_v61 = vpack.c.bf16 %v612_v55, %v604_v53  ;;  %v1085_v51 = vld [vmem:[%s9582_s2 + $0x1d0] sm:$0xff]  ;;  %v1102_v55 = vld [vmem:[%s9582_s2 + $0x258] sm:$0xff] }
  0x9d   : > { %v4034_v62 = vpack.c.bf16 %v627_v57, %v619_v56  ;;  %v1092_v52 = vld [vmem:[%s9582_s2 + $0x208] sm:$0xff] }
  0x9e   : > { %4013 = vmatpush1.bf16.msra.mxu0 %v4012_v63  ;;  %v618_v63 = vld [vmem:[%s9581_s1 + $0x7a0] sm:$0xff]  ;;  %v1100_v53 = vld [vmem:[%s9582_s2 + $0x248] sm:$0xff] }
  0x9f   : > { %4077 = vmatpush1.bf16.msra.mxu1 %v4076_v0  ;;  %4015 = vmatprep.subr.bf16.mxu0 %v4014_v1  ;;  %v626_v0 = vld [vmem:[%s9581_s1 + $0x7e0] sm:$0xff]  ;;  %v4098_v1 = vpack.c.bf16 %v629_v59, %v621_v58  ;;  %v4118_v58 = vpack.c.bf16 %v1100_v53, %v1092_v52  ;;  %v1174_v52 = vld [vmem:[%s9582_s2 + $0x498] sm:$0xff] }
  0xa0   : > { %4079 = vmatprep.subr.bf16.mxu1 %v4078_v5  ;;  %v4036_v4 = vpack.c.bf16 %v626_v0, %v618_v63  ;;  %v4100_v5 = vpack.c.bf16 %v628_v3, %v620_v2  ;;  %v1091_v59 = vld [vmem:[%s9582_s2 + $0x200] sm:$0xff]  ;;  %v1101_v63 = vld [vmem:[%s9582_s2 + $0x250] sm:$0xff]  ;;  %v1108_v2 = vld [vmem:[%s9582_s2 + $0x288] sm:$0xff] }
  0xa1   : > { %v1116_v3 = vld [vmem:[%s9582_s2 + $0x2c8] sm:$0xff] }
  0xa2   : > { %4017 = vmatpush1.bf16.msra.mxu0 %v4016_v11  ;;  %v1035_v11 = vld [vmem:[%s9582_s2 + $0x40] sm:$0xff] }
  0xa3   : > { %4081 = vmatpush1.bf16.msra.mxu1 %v4080_v12  ;;  %4019 = vmatprep.subr.bf16.mxu0 %v4018_v13  ;;  %v4230_v12 = vpack.c.bf16 %v1038_v10, %v1030_v8  ;;  %v1115_v8 = vld [vmem:[%s9582_s2 + $0x2c0] sm:$0xff] }
  0xa4   : > { %4083 = vmatprep.subr.bf16.mxu1 %v4082_v18  ;;  %v4232_v18 = vpack.c.bf16 %v1037_v15, %v1029_v14  ;;  %v4124_v10 = vpack.c.bf16 %v1115_v8, %v1107_v7  ;;  %v1132_v14 = vld [vmem:[%s9582_s2 + $0x348] sm:$0xff]  ;;  %v1126_v15 = vld [vmem:[%s9582_s2 + $0x318] sm:$0xff]  ;;  %v1189_v7 = vld [vmem:[%s9582_s2 + $0x510] sm:$0xff] }
  0xa5   : > { %v1197_v8 = vld [vmem:[%s9582_s2 + $0x550] sm:$0xff] }
  0xa6   : > { %4021 = vmatpush1.bf16.msra.mxu0 %v4020_v25  ;;  %v1043_v25 = vld [vmem:[%s9582_s2 + $0x80] sm:$0xff] }
  0xa7   : > { %4085 = vmatpush1.bf16.msra.mxu1 %v4084_v26  ;;  %4023 = vmatprep.subr.bf16.mxu0 %v4022_v27  ;;  %v1051_v26 = vld [vmem:[%s9582_s2 + $0xc0] sm:$0xff]  ;;  %v1045_v27 = vld [vmem:[%s9582_s2 + $0x90] sm:$0xff] }
  0xa8   : > { %4087 = vmatprep.subr.bf16.mxu1 %v4086_v31  ;;  %v4108_v28 = vpack.c.bf16 %v1051_v26, %v1043_v25  ;;  %v1068_v31 = vld [vmem:[%s9582_s2 + $0x148] sm:$0xff]  ;;  %v4236_v32 = vpack.c.bf16 %v1053_v29, %v1045_v27  ;;  %v1133_v25 = vld [vmem:[%s9582_s2 + $0x350] sm:$0xff]  ;;  %v1142_v29 = vld [vmem:[%s9582_s2 + $0x398] sm:$0xff] }
  0xa9   : > { %v4110_v33 = vpack.c.bf16 %v1068_v31, %v1060_v30  ;;  %v1140_v27 = vld [vmem:[%s9582_s2 + $0x388] sm:$0xff]  ;;  %v1150_v31 = vld [vmem:[%s9582_s2 + $0x3d8] sm:$0xff] }
  0xaa   : > { %4025 = vmatpush1.bf16.msra.mxu0 %v4024_v37  ;;  %v4238_v37 = vpack.c.bf16 %v1070_v35, %v1062_v34  ;;  %v4258_v34 = vpack.c.bf16 %v1150_v31, %v1142_v29  ;;  %v1227_v29 = vld [vmem:[%s9582_s2 + $0x640] sm:$0xff] }
  0xab   : > { %4089 = vmatpush1.bf16.msra.mxu1 %v4088_v38  ;;  %4027 = vmatprep.subr.bf16.mxu0 %v4026_v39  ;;  %v1067_v38 = vld [vmem:[%s9582_s2 + $0x140] sm:$0xff]  ;;  %v1061_v39 = vld [vmem:[%s9582_s2 + $0x110] sm:$0xff] }
  0xac   : > { %4091 = vmatprep.subr.bf16.mxu1 %v4090_v43  ;;  %v4112_v41 = vpack.c.bf16 %v1067_v38, %v1059_v36  ;;  %v1084_v43 = vld [vmem:[%s9582_s2 + $0x1c8] sm:$0xff]  ;;  %v4240_v45 = vpack.c.bf16 %v1069_v40, %v1061_v39  ;;  %v1141_v36 = vld [vmem:[%s9582_s2 + $0x390] sm:$0xff] }
  0xad   : > { %v4114_v46 = vpack.c.bf16 %v1084_v43, %v1076_v42  ;;  %v1156_v39 = vld [vmem:[%s9582_s2 + $0x408] sm:$0xff]  ;;  %v1166_v43 = vld [vmem:[%s9582_s2 + $0x458] sm:$0xff] }
  0xae   : > { %4029 = vmatpush1.bf16.msra.mxu0 %v4028_v20  ;;  %v1083_v20 = vld [vmem:[%s9582_s2 + $0x1c0] sm:$0xff]  ;;  %v1164_v40 = vld [vmem:[%s9582_s2 + $0x448] sm:$0xff] }
  0xaf   : > { %4093 = vmatpush1.bf16.msra.mxu1 %v4092_v49  ;;  %4031 = vmatprep.subr.bf16.mxu0 %v4030_v50  ;;  %v4242_v49 = vpack.c.bf16 %v1086_v47, %v1078_v44  ;;  %v1077_v50 = vld [vmem:[%s9582_s2 + $0x190] sm:$0xff]  ;;  %v4116_v56 = vpack.c.bf16 %v1083_v20, %v1075_v48  ;;  %v4134_v42 = vpack.c.bf16 %v1164_v40, %v1156_v39  ;;  %v1155_v44 = vld [vmem:[%s9582_s2 + $0x400] sm:$0xff] }
  0xb0   : > { %4095 = vmatprep.subr.bf16.mxu1 %v4094_v54  ;;  %v1094_v54 = vld [vmem:[%s9582_s2 + $0x218] sm:$0xff]  ;;  %v4244_v57 = vpack.c.bf16 %v1085_v51, %v1077_v50  ;;  %v1157_v48 = vld [vmem:[%s9582_s2 + $0x410] sm:$0xff]  ;;  %v1172_v50 = vld [vmem:[%s9582_s2 + $0x488] sm:$0xff] }
  0xb1   : > { %v1165_v20 = vld [vmem:[%s9582_s2 + $0x450] sm:$0xff]  ;;  %v1180_v51 = vld [vmem:[%s9582_s2 + $0x4c8] sm:$0xff] }
  0xb2   : > { %4033 = vmatpush1.bf16.msra.mxu0 %v4032_v60  ;;  %v1099_v60 = vld [vmem:[%s9582_s2 + $0x240] sm:$0xff]  ;;  %v4138_v53 = vpack.c.bf16 %v1180_v51, %v1172_v50  ;;  %v1262_v50 = vld [vmem:[%s9582_s2 + $0x758] sm:$0xff] }
  0xb3   : > { %4097 = vmatpush1.bf16.msra.mxu1 %v4096_v61  ;;  %4035 = vmatprep.subr.bf16.mxu0 %v4034_v62  ;;  %v4246_v61 = vpack.c.bf16 %v1102_v55, %v1094_v54  ;;  %v1093_v62 = vld [vmem:[%s9582_s2 + $0x210] sm:$0xff]  ;;  %v4120_v0 = vpack.c.bf16 %v1099_v60, %v1091_v59  ;;  %v1182_v54 = vld [vmem:[%s9582_s2 + $0x4d8] sm:$0xff]  ;;  %v1171_v55 = vld [vmem:[%s9582_s2 + $0x480] sm:$0xff] }
  0xb4   : > { %4099 = vmatprep.subr.bf16.mxu1 %v4098_v1  ;;  %v4248_v1 = vpack.c.bf16 %v1101_v63, %v1093_v62  ;;  %v1173_v59 = vld [vmem:[%s9582_s2 + $0x490] sm:$0xff]  ;;  %v1188_v62 = vld [vmem:[%s9582_s2 + $0x508] sm:$0xff]  ;;  %v1251_v51 = vld [vmem:[%s9582_s2 + $0x700] sm:$0xff] }
  0xb5   : > { %v1181_v60 = vld [vmem:[%s9582_s2 + $0x4d0] sm:$0xff]  ;;  %v1196_v63 = vld [vmem:[%s9582_s2 + $0x548] sm:$0xff] }
  0xb6   : > { %4037 = vmatpush1.bf16.msra.mxu0 %v4036_v4  ;;  %v1110_v4 = vld [vmem:[%s9582_s2 + $0x298] sm:$0xff] }
  0xb7   : > { %4101 = vmatpush1.bf16.msra.mxu1 %v4100_v5  ;;  %4103 = vmatprep.subr.bf16.mxu0 %v4102_v9  ;;  %v4122_v5 = vpack.c.bf16 %v1116_v3, %v1108_v2  ;;  %v4250_v9 = vpack.c.bf16 %v1118_v6, %v1110_v4  ;;  %v1198_v2 = vld [vmem:[%s9582_s2 + $0x558] sm:$0xff]  ;;  %v1187_v3 = vld [vmem:[%s9582_s2 + $0x500] sm:$0xff] }
  0xb8   : > { %4231 = vmatprep.subr.bf16.mxu1 %v4230_v12  ;;  %v1195_v4 = vld [vmem:[%s9582_s2 + $0x540] sm:$0xff] }
  0xb9   : > { %848 = vmatmul.mubr.f32.vlgmr.msra.gmra.mrb[2].mxu0 %v5812_v17  ;;  %v4144_v6 = vpack.c.bf16 %v1195_v4, %v1187_v3  ;;  %v1277_v3 = vld [vmem:[%s9582_s2 + $0x7d0] sm:$0xff] }
  0xba   : > { %919 = vmatmul.mubr.f32.vlgmr.msra.gmra.mrb[2].mxu1 %v5812_v17  ;;  %v1027_v17 = vld [vmem:[%s9582_s2] sm:$0xff] }
  0xbb   : > { %v4104_v13 = vpack.c.bf16 %v1035_v11, %v1027_v17  ;;  %4233 = vmatpush1.bf16.msra.mxu1 %v4232_v18  ;;  %v1109_v17 = vld [vmem:[%s9582_s2 + $0x290] sm:$0xff]  ;;  %v1134_v18 = vld [vmem:[%s9582_s2 + $0x358] sm:$0xff] }
  0xbc   : > { %4235 = vmatprep.subr.bf16.mxu1 %v4234_v24  ;;  %v1117_v11 = vld [vmem:[%s9582_s2 + $0x2d0] sm:$0xff]  ;;  %v4254_v22 = vpack.c.bf16 %v1134_v18, %v1126_v15  ;;  %v1211_v15 = vld [vmem:[%s9582_s2 + $0x5c0] sm:$0xff] }
  0xbd   : > { %4105 = vmatpush1.bf16.msra.mxu0 %v4104_v13  ;;  %v4252_v12 = vpack.c.bf16 %v1117_v11, %v1109_v17  ;;  %v1124_v13 = vld [vmem:[%s9582_s2 + $0x308] sm:$0xff]  ;;  %v1125_v24 = vld [vmem:[%s9582_s2 + $0x310] sm:$0xff]  ;;  %v1206_v11 = vld [vmem:[%s9582_s2 + $0x598] sm:$0xff] }
  0xbe   : > { %4107 = vmatprep.subr.bf16.mxu0 %v4106_v23  ;;  %v4126_v16 = vpack.c.bf16 %v1132_v14, %v1124_v13  ;;  %v4128_v23 = vpack.c.bf16 %v1131_v21, %v1123_v19  ;;  %v4256_v26 = vpack.c.bf16 %v1133_v25, %v1125_v24  ;;  %v1212_v17 = vld [vmem:[%s9582_s2 + $0x5c8] sm:$0xff]  ;;  %v1214_v13 = vld [vmem:[%s9582_s2 + $0x5d8] sm:$0xff]  ;;  %v1203_v14 = vld [vmem:[%s9582_s2 + $0x580] sm:$0xff] }
  0xbf   : > { %4237 = vmatpush1.bf16.msra.mxu1 %v4236_v32  ;;  %v1139_v32 = vld [vmem:[%s9582_s2 + $0x380] sm:$0xff]  ;;  %v4148_v18 = vpack.c.bf16 %v1211_v15, %v1203_v14  ;;  %v1205_v19 = vld [vmem:[%s9582_s2 + $0x590] sm:$0xff]  ;;  %v1228_v24 = vld [vmem:[%s9582_s2 + $0x648] sm:$0xff] }
  0xc0   : > { %4239 = vmatprep.subr.bf16.mxu1 %v4238_v37  ;;  %v1149_v37 = vld [vmem:[%s9582_s2 + $0x3d0] sm:$0xff]  ;;  %v1222_v25 = vld [vmem:[%s9582_s2 + $0x618] sm:$0xff] }
  0xc1   : > { %4109 = vmatpush1.bf16.msra.mxu0 %v4108_v28  ;;  %v1148_v28 = vld [vmem:[%s9582_s2 + $0x3c8] sm:$0xff]  ;;  %v4260_v38 = vpack.c.bf16 %v1149_v37, %v1141_v36  ;;  %v1213_v21 = vld [vmem:[%s9582_s2 + $0x5d0] sm:$0xff]  ;;  %v1238_v37 = vld [vmem:[%s9582_s2 + $0x698] sm:$0xff] }
  0xc2   : > { %4111 = vmatprep.subr.bf16.mxu0 %v4110_v33  ;;  %v4130_v30 = vpack.c.bf16 %v1148_v28, %v1140_v27  ;;  %v1147_v33 = vld [vmem:[%s9582_s2 + $0x3c0] sm:$0xff]  ;;  %v1230_v27 = vld [vmem:[%s9582_s2 + $0x658] sm:$0xff]  ;;  %v1244_v36 = vld [vmem:[%s9582_s2 + $0x6c8] sm:$0xff] }
  0xc3   : > { %4241 = vmatpush1.bf16.msra.mxu1 %v4240_v45  ;;  %v4132_v35 = vpack.c.bf16 %v1147_v33, %v1139_v32  ;;  %v1163_v45 = vld [vmem:[%s9582_s2 + $0x440] sm:$0xff]  ;;  %v1221_v32 = vld [vmem:[%s9582_s2 + $0x610] sm:$0xff] }
  0xc4   : > { %4243 = vmatprep.subr.bf16.mxu1 %v4242_v49  ;;  %v4136_v47 = vpack.c.bf16 %v1163_v45, %v1155_v44  ;;  %v4264_v49 = vpack.c.bf16 %v1165_v20, %v1157_v48  ;;  %v1219_v28 = vld [vmem:[%s9582_s2 + $0x600] sm:$0xff]  ;;  %v1229_v33 = vld [vmem:[%s9582_s2 + $0x650] sm:$0xff] }
  0xc5   : > { %4113 = vmatpush1.bf16.msra.mxu0 %v4112_v41  ;;  %v1158_v41 = vld [vmem:[%s9582_s2 + $0x418] sm:$0xff]  ;;  %v4152_v31 = vpack.c.bf16 %v1227_v29, %v1219_v28  ;;  %v1245_v45 = vld [vmem:[%s9582_s2 + $0x6d0] sm:$0xff]  ;;  %v371_v28 = vld [vmem:[%s5514_s19] sm:$0xff] }
  0xc6   : > { %4115 = vmatprep.subr.bf16.mxu0 %v4114_v46  ;;  %v4262_v46 = vpack.c.bf16 %v1166_v43, %v1158_v41  ;;  %v1235_v41 = vld [vmem:[%s9582_s2 + $0x680] sm:$0xff]  ;;  %v1237_v43 = vld [vmem:[%s9582_s2 + $0x690] sm:$0xff] }
  0xc7   : > { %4245 = vmatpush1.bf16.msra.mxu1 %v4244_v57  ;;  %v4266_v57 = vpack.c.bf16 %v1182_v54, %v1174_v52  ;;  %v4284_v48 = vpack.c.bf16 %v1245_v45, %v1237_v43  ;;  %v1253_v54 = vld [vmem:[%s9582_s2 + $0x710] sm:$0xff]  ;;  %v372_v45 = vld [vmem:[%s5514_s19 + $0x8] sm:$0xff] }
  0xc8   : > { %4247 = vmatprep.subr.bf16.mxu1 %v4246_v61  ;;  %v4268_v61 = vpack.c.bf16 %v1181_v60, %v1173_v59  ;;  %v1270_v59 = vld [vmem:[%s9582_s2 + $0x798] sm:$0xff] }
  0xc9   : > { %4117 = vmatpush1.bf16.msra.mxu0 %v4116_v56  ;;  %v1179_v56 = vld [vmem:[%s9582_s2 + $0x4c0] sm:$0xff] }
  0xca   : > { %4119 = vmatprep.subr.bf16.mxu0 %v4118_v58  ;;  %v4140_v58 = vpack.c.bf16 %v1179_v56, %v1171_v55  ;;  %v1261_v55 = vld [vmem:[%s9582_s2 + $0x750] sm:$0xff] }
  0xcb   : > { %4249 = vmatpush1.bf16.msra.mxu1 %v4248_v1  ;;  %v4142_v1 = vpack.c.bf16 %v1196_v63, %v1188_v62  ;;  %v4288_v60 = vpack.c.bf16 %v1261_v55, %v1253_v54  ;;  %v1278_v62 = vld [vmem:[%s9582_s2 + $0x7d8] sm:$0xff]  ;;  %v1267_v63 = vld [vmem:[%s9582_s2 + $0x780] sm:$0xff] }
  0xcc   : > { %4251 = vmatprep.subr.bf16.mxu1 %v4250_v9  ;;  %v4272_v9 = vpack.c.bf16 %v1197_v8, %v1189_v7  ;;  %v1292_v7 = vld [vmem:[%s9582_s2 + $0x848] sm:$0xff]  ;;  %v1286_v8 = vld [vmem:[%s9582_s2 + $0x818] sm:$0xff] }
  0xcd   : > { %4121 = vmatpush1.bf16.msra.mxu0 %v4120_v0  ;;  %v1190_v0 = vld [vmem:[%s9582_s2 + $0x518] sm:$0xff] }
  0xce   : > { %4123 = vmatprep.subr.bf16.mxu0 %v4122_v5  ;;  %v4270_v5 = vpack.c.bf16 %v1198_v2, %v1190_v0  ;;  %v1275_v0 = vld [vmem:[%s9582_s2 + $0x7c0] sm:$0xff]  ;;  %v1269_v2 = vld [vmem:[%s9582_s2 + $0x790] sm:$0xff] }
  0xcf   : > { %4253 = vmatpush1.bf16.msra.mxu1 %v4252_v12  ;;  %v4164_v4 = vpack.c.bf16 %v1275_v0, %v1267_v63  ;;  %v1285_v63 = vld [vmem:[%s9582_s2 + $0x810] sm:$0xff] }
  0xd0   : > { %4255 = vmatprep.subr.bf16.mxu1 %v4254_v22  ;;  %v4276_v22 = vpack.c.bf16 %v1213_v21, %v1205_v19  ;;  %v1293_v0 = vld [vmem:[%s9582_s2 + $0x850] sm:$0xff] }
  0xd1   : > { %4125 = vmatpush1.bf16.msra.mxu0 %v4124_v10  ;;  %v1204_v10 = vld [vmem:[%s9582_s2 + $0x588] sm:$0xff] }
  0xd2   : > { %4127 = vmatprep.subr.bf16.mxu0 %v4126_v16  ;;  %v4146_v12 = vpack.c.bf16 %v1212_v17, %v1204_v10  ;;  %v4274_v16 = vpack.c.bf16 %v1214_v13, %v1206_v11  ;;  %v1294_v10 = vld [vmem:[%s9582_s2 + $0x858] sm:$0xff]  ;;  %v5403_v11 = vmov 1983009808   ;;  %v938_v13 = vlaneseq }
  0xd3   : > { %4257 = vmatpush1.bf16.msra.mxu1 %v4256_v26  ;;  %v4294_v17 = vpack.c.bf16 %v1294_v10, %v1286_v8  ;;  %v1299_v10 = vld [vmem:[%s9582_s2 + $0x880] sm:$0xff] }
  0xd4   : > { %4259 = vmatprep.subr.bf16.mxu1 %v4258_v34  ;;  %v1236_v34 = vld [vmem:[%s9582_s2 + $0x688] sm:$0xff]  ;;  %v6696_v15 = vshrl.u32 %v938_v13, 7  ;;  %v1301_v13 = vld [vmem:[%s9582_s2 + $0x890] sm:$0xff] }
  0xd5   : > { %4129 = vmatpush1.bf16.msra.mxu0 %v4128_v23  ;;  %v1220_v23 = vld [vmem:[%s9582_s2 + $0x608] sm:$0xff]  ;;  %v4154_v39 = vpack.c.bf16 %v1244_v36, %v1236_v34 }
  0xd6   : > { %4131 = vmatprep.subr.bf16.mxu0 %v4130_v30  ;;  %v4150_v26 = vpack.c.bf16 %v1228_v24, %v1220_v23  ;;  %v4278_v30 = vpack.c.bf16 %v1230_v27, %v1222_v25 }
  0xd7   : > { %4261 = vmatpush1.bf16.msra.mxu1 %v4260_v38  ;;  %v1246_v38 = vld [vmem:[%s9582_s2 + $0x6d8] sm:$0xff] }
  0xd8   : > { %4263 = vmatprep.subr.bf16.mxu1 %v4262_v46  ;;  %v4282_v40 = vpack.c.bf16 %v1246_v38, %v1238_v37  ;;  %v1252_v46 = vld [vmem:[%s9582_s2 + $0x708] sm:$0xff] }
  0xd9   : > { %4133 = vmatpush1.bf16.msra.mxu0 %v4132_v35  ;;  %v4280_v35 = vpack.c.bf16 %v1229_v33, %v1221_v32 }
  0xda   : > { %4135 = vmatprep.subr.bf16.mxu0 %v4134_v42  ;;  %v1243_v42 = vld [vmem:[%s9582_s2 + $0x6c0] sm:$0xff] }
  0xdb   : > { %4265 = vmatpush1.bf16.msra.mxu1 %v4264_v49  ;;  %v4156_v44 = vpack.c.bf16 %v1243_v42, %v1235_v41  ;;  %v1254_v49 = vld [vmem:[%s9582_s2 + $0x718] sm:$0xff] }
  0xdc   : > { %4267 = vmatprep.subr.bf16.mxu1 %v4266_v57  ;;  %v4286_v52 = vpack.c.bf16 %v1262_v50, %v1254_v49  ;;  %v1268_v57 = vld [vmem:[%s9582_s2 + $0x788] sm:$0xff]  ;;  %v971_v50 = vld [vmem:[#allocation3] sm:$0xf] }
  0xdd   : > { %4137 = vmatpush1.bf16.msra.mxu0 %v4136_v47  ;;  %v1260_v47 = vld [vmem:[%s9582_s2 + $0x748] sm:$0xff] }
  0xde   : > { %4139 = vmatprep.subr.bf16.mxu0 %v4138_v53  ;;  %v4158_v20 = vpack.c.bf16 %v1260_v47, %v1252_v46  ;;  %v1259_v53 = vld [vmem:[%s9582_s2 + $0x740] sm:$0xff] }
  0xdf   : > { %4269 = vmatpush1.bf16.msra.mxu1 %v4268_v61  ;;  %v4160_v56 = vpack.c.bf16 %v1259_v53, %v1251_v51 }
  0xe0   : > { %4271 = vmatprep.subr.bf16.mxu1 %v4270_v5  ;;  %v4292_v5 = vpack.c.bf16 %v1277_v3, %v1269_v2  ;;  %v1308_v3 = vld [vmem:[%s9582_s2 + $0x8c8] sm:$0xff] }
  0xe1   : > { %4141 = vmatpush1.bf16.msra.mxu0 %v4140_v58  ;;  %v1276_v58 = vld [vmem:[%s9582_s2 + $0x7c8] sm:$0xff] }
  0xe2   : > { %4143 = vmatprep.subr.bf16.mxu0 %v4142_v1  ;;  %v4162_v61 = vpack.c.bf16 %v1276_v58, %v1268_v57  ;;  %v4290_v1 = vpack.c.bf16 %v1278_v62, %v1270_v59  ;;  %v1291_v62 = vld [vmem:[%s9582_s2 + $0x840] sm:$0xff] }
  0xe3   : > { %4273 = vmatpush1.bf16.msra.mxu1 %v4272_v9 }
  0xe4   : > { %4275 = vmatprep.subr.bf16.mxu1 %v4274_v16 }
  0xe5   : > { %4145 = vmatpush1.bf16.msra.mxu0 %v4144_v6  ;;  %v1284_v6 = vld [vmem:[%s9582_s2 + $0x808] sm:$0xff] }
  0xe6   : > { %4147 = vmatprep.subr.bf16.mxu0 %v4146_v12  ;;  %v4166_v9 = vpack.c.bf16 %v1292_v7, %v1284_v6  ;;  %v936_v12 = vunpack.c.l.s4 %v5403_v11  ;;  %v6727_v6 = vld.sshfl [vmem:[#allocation4] sm:$0x33 pattern:$0x76325410] }
  0xe7   : > { %4277 = vmatpush1.bf16.msra.mxu1 %v4276_v22 }
  0xe8   : > { %4279 = vmatprep.subr.bf16.mxu1 %v4278_v30  ;;  %v937_v14 = vunpack.c.0.s8 %v936_v12 }
  0xe9   : > { %4149 = vmatpush1.bf16.msra.mxu0 %v4148_v18 }
  0xea   : > { %4151 = vmatprep.subr.bf16.mxu0 %v4150_v26  ;;  %v940_v18 = vsub.s32 %v937_v14, %v6696_v15  ;;  %v1309_v14 = vld [vmem:[%s9582_s2 + $0x8d0] sm:$0xff] }
  0xeb   : > { %4281 = vmatpush1.bf16.msra.mxu1 %v4280_v35 }
  0xec   : > { %4283 = vmatprep.subr.bf16.mxu1 %v4282_v40 }
  0xed   : > { %4153 = vmatpush1.bf16.msra.mxu0 %v4152_v31 }
  0xee   : > { %4155 = vmatprep.subr.bf16.mxu0 %v4154_v39 }
  0xef   : > { %4285 = vmatpush1.bf16.msra.mxu1 %v4284_v48 }
  0xf0   : > { %4287 = vmatprep.subr.bf16.mxu1 %v4286_v52 }
  0xf1   : > { %4157 = vmatpush1.bf16.msra.mxu0 %v4156_v44 }
  0xf2   : > { %4159 = vmatprep.subr.bf16.mxu0 %v4158_v20 }
  0xf3   : > { %4289 = vmatpush1.bf16.msra.mxu1 %v4288_v60 }
  0xf4   : > { %4291 = vmatprep.subr.bf16.mxu1 %v4290_v1  ;;  %v1300_v1 = vld [vmem:[%s9582_s2 + $0x888] sm:$0xff] }
  0xf5   : > { %4161 = vmatpush1.bf16.msra.mxu0 %v4160_v56  ;;  %v4170_v11 = vpack.c.bf16 %v1308_v3, %v1300_v1  ;;  %v1373_v1 = vld [vmem:[%s9582_s2 + $0xad0] sm:$0xff]  ;;  %v1380_v3 = vld [vmem:[%s9582_s2 + $0xb08] sm:$0xff] }
  0xf6   : > { %4163 = vmatprep.subr.bf16.mxu0 %v4162_v61  ;;  %v1283_v61 = vld [vmem:[%s9582_s2 + $0x800] sm:$0xff] }
  0xf7   : > { %4293 = vmatpush1.bf16.msra.mxu1 %v4292_v5  ;;  %v1310_v5 = vld [vmem:[%s9582_s2 + $0x8d8] sm:$0xff]  ;;  %v4168_v8 = vpack.c.bf16 %v1291_v62, %v1283_v61  ;;  %v1371_v61 = vld [vmem:[%s9582_s2 + $0xac0] sm:$0xff] }
  0xf8   : > { %4295 = vmatprep.subr.bf16.mxu1 %v4294_v17  ;;  %v1307_v17 = vld [vmem:[%s9582_s2 + $0x8c0] sm:$0xff] }
  0xf9   : > { %4165 = vmatpush1.bf16.msra.mxu0 %v4164_v4  ;;  %v1302_v4 = vld [vmem:[%s9582_s2 + $0x898] sm:$0xff] }
  0xfa   : > { %4167 = vmatprep.subr.bf16.mxu0 %v4166_v9  ;;  %v4296_v9 = vpack.c.bf16 %v1293_v0, %v1285_v63  ;;  %v4298_v12 = vpack.c.bf16 %v1310_v5, %v1302_v4  ;;  %v1365_v0 = vld [vmem:[%s9582_s2 + $0xa90] sm:$0xff]  ;;  %v1388_v4 = vld [vmem:[%s9582_s2 + $0xb48] sm:$0xff]  ;;  %v1382_v5 = vld [vmem:[%s9582_s2 + $0xb18] sm:$0xff] }
 0x14c   : > { %v707_v16 = vpop.f32.mrb[0].mxu0 }
 0x14d   : > { %v778_v19 = vpop.f32.mrb[0].mxu1  ;;  %v709_v21 = vpop.f32.mrb[1].mxu0 }
 0x14e   : > { %v933_v22 = vcombine.low %v707_v16, %v709_v21  ;;  %v780_v23 = vpop.f32.mrb[1].mxu1  ;;  %v1316_v16 = vld [vmem:[%s9582_s2 + $0x908] sm:$0xff]  ;;  %v1326_v21 = vld [vmem:[%s9582_s2 + $0x958] sm:$0xff] }
 0x14f   : > { %v934_v24 = vcombine.low %v778_v19, %v780_v23  ;;  %v1318_v19 = vld [vmem:[%s9582_s2 + $0x918] sm:$0xff]  ;;  %v4172_v23 = vpack.c.bf16 %v1307_v17, %v1299_v10  ;;  %v4316_v10 = vpack.c.bf16 %v1373_v1, %v1365_v0  ;;  %v1379_v17 = vld [vmem:[%s9582_s2 + $0xb00] sm:$0xff]  ;;  %v1445_v1 = vld [vmem:[%s9582_s2 + $0xd10] sm:$0xff] }
 0x150   : > { %v941_v25 = vrot.slane %v933_v22, %v940_v18  ;;  %v6761_v22 = vcombine.high %v6727_v6, %v6727_v6 }
 0x151   : > { %v948_v26 = vrot.slane %v934_v24, %v940_v18  ;;  %v4300_v24 = vpack.c.bf16 %v1309_v14, %v1301_v13  ;;  %v1381_v14 = vld [vmem:[%s9582_s2 + $0xb10] sm:$0xff] }
 0x153   : > { %v949_v27 = vcombine.low %v941_v25, %v948_v26  ;;  %v1315_v25 = vld [vmem:[%s9582_s2 + $0x900] sm:$0xff] }
 0x154   : > { %v1323_v26 = vld [vmem:[%s9582_s2 + $0x940] sm:$0xff] }
 0x155   : > { %v969_v29 = vadd.f32 %v949_v27, %v371_v28  ;;  %v4302_v28 = vpack.c.bf16 %v1326_v21, %v1318_v19  ;;  %v1404_v19 = vld [vmem:[%s9582_s2 + $0xbc8] sm:$0xff]  ;;  %v1398_v21 = vld [vmem:[%s9582_s2 + $0xb98] sm:$0xff] }
 0x157   : > { %v979_v30 = vrot.slane %v969_v29, 4  ;;  %v3728_v32 = vmul.f32 -1.442695, %v969_v29  ;;  %v1317_v29 = vld [vmem:[%s9582_s2 + $0x910] sm:$0xff] }
 0x159   : > { %v3729_v31 = vmul.f32 -1.442695, %v979_v30  ;;  %v1325_v30 = vld [vmem:[%s9582_s2 + $0x950] sm:$0xff] }
 0x15b   : > { %5247 = vpow2.f32 %v3729_v31  ;;  %v1332_v31 = vld [vmem:[%s9582_s2 + $0x988] sm:$0xff] }
 0x15c   : > { %5249 = vpow2.f32 %v3728_v32  ;;  %v1340_v32 = vld [vmem:[%s9582_s2 + $0x9c8] sm:$0xff] }
 0x165   : > { %v5248_v36 = vpop.eup %5247 }
 0x166   : > { %v5250_v39 = vpop.eup %5249  ;;  %v984_v42 = vadd.f32 1.0, %v5248_v36  ;;  %v4304_v36 = vpack.c.bf16 %v1325_v30, %v1317_v29  ;;  %v1397_v30 = vld [vmem:[%s9582_s2 + $0xb90] sm:$0xff] }
 0x167   : > { %v975_v44 = vadd.f32 1.0, %v5250_v39  ;;  %v4178_v39 = vpack.c.bf16 %v1340_v32, %v1332_v31  ;;  %v1405_v31 = vld [vmem:[%s9582_s2 + $0xbd0] sm:$0xff]  ;;  %v1412_v32 = vld [vmem:[%s9582_s2 + $0xc08] sm:$0xff] }
 0x168   : > { %5251 = vrcp.f32 %v984_v42  ;;  %v1341_v42 = vld [vmem:[%s9582_s2 + $0x9d0] sm:$0xff] }
 0x169   : > { %5253 = vrcp.f32 %v975_v44  ;;  %v1356_v44 = vld [vmem:[%s9582_s2 + $0xa48] sm:$0xff] }
 0x172   : > { %v5252_v49 = vpop.eup %5251 }
 0x173   : > { %v5254_v51 = vpop.eup %5253  ;;  %v997_v53 = vmul.f32 %v5252_v49, %v971_v50  ;;  %v1355_v49 = vld [vmem:[%s9582_s2 + $0xa40] sm:$0xff] }
 0x18c   : > { %v849_v33 = vpop.f32.mrb[2].mxu0 }
 0x18d   : > { %v920_v34 = vpop.f32.mrb[2].mxu1  ;;  %v851_v35 = vpop.f32.mrb[3].mxu0 }
 0x18e   : > { %v950_v37 = vcombine.low %v849_v33, %v851_v35  ;;  %v922_v38 = vpop.f32.mrb[3].mxu1  ;;  %v1334_v33 = vld [vmem:[%s9582_s2 + $0x998] sm:$0xff]  ;;  %v4176_v35 = vpack.c.bf16 %v1323_v26, %v1315_v25  ;;  %v1395_v26 = vld [vmem:[%s9582_s2 + $0xb80] sm:$0xff] }
 0x18f   : > { %v951_v40 = vcombine.low %v920_v34, %v922_v38  ;;  %v1342_v34 = vld [vmem:[%s9582_s2 + $0x9d8] sm:$0xff]  ;;  %v1339_v38 = vld [vmem:[%s9582_s2 + $0x9c0] sm:$0xff] }
 0x190   : > { %v958_v41 = vrot.slane %v950_v37, %v940_v18  ;;  %v1331_v37 = vld [vmem:[%s9582_s2 + $0x980] sm:$0xff] }
 0x191   : > { %v965_v43 = vrot.slane %v951_v40, %v940_v18  ;;  %v4306_v40 = vpack.c.bf16 %v1342_v34, %v1334_v33  ;;  %v1420_v33 = vld [vmem:[%s9582_s2 + $0xc48] sm:$0xff]  ;;  %v1414_v34 = vld [vmem:[%s9582_s2 + $0xc18] sm:$0xff] }
 0x193   : > { %v966_v46 = vcombine.low %v958_v41, %v965_v43  ;;  %v1333_v41 = vld [vmem:[%s9582_s2 + $0x990] sm:$0xff]  ;;  %v1348_v43 = vld [vmem:[%s9582_s2 + $0xa08] sm:$0xff] }
 0x194   : > { %v4182_v50 = vpack.c.bf16 %v1356_v44, %v1348_v43  ;;  %v1421_v43 = vld [vmem:[%s9582_s2 + $0xc50] sm:$0xff]  ;;  %v1428_v44 = vld [vmem:[%s9582_s2 + $0xc88] sm:$0xff] }
 0x195   : > { %v970_v47 = vadd.f32 %v966_v46, %v372_v45  ;;  %v1350_v45 = vld [vmem:[%s9582_s2 + $0xa18] sm:$0xff] }
 0x196   : > { %v1358_v46 = vld [vmem:[%s9582_s2 + $0xa58] sm:$0xff] }
 0x197   : > { %5255 = vtanh.f32 %v970_v47  ;;  %v989_v48 = vrot.slane %v970_v47, 4  ;;  %v4180_v47 = vpack.c.bf16 %v1339_v38, %v1331_v37  ;;  %v4324_v37 = vpack.c.bf16 %v1405_v31, %v1397_v30  ;;  %v1411_v38 = vld [vmem:[%s9582_s2 + $0xc00] sm:$0xff]  ;;  %v1477_v31 = vld [vmem:[%s9582_s2 + $0xe10] sm:$0xff] }
 0x199   : > { %v3730_v20 = vmul.f32 -1.442695, %v989_v48  ;;  %v4308_v48 = vpack.c.bf16 %v1341_v42, %v1333_v41  ;;  %v1413_v42 = vld [vmem:[%s9582_s2 + $0xc10] sm:$0xff] }
 0x19b   : > { %5257 = vpow2.f32 %v3730_v20  ;;  %v1347_v20 = vld [vmem:[%s9582_s2 + $0xa00] sm:$0xff] }
 0x1a1   : > { %v5256_v52 = vpop.eup %5255 }
 0x1a2   : > { %v998_v54 = vmul.f32 %v5256_v52, %v5254_v51  ;;  %v4310_v51 = vpack.c.bf16 %v1358_v46, %v1350_v45  ;;  %v1349_v52 = vld [vmem:[%s9582_s2 + $0xa10] sm:$0xff]  ;;  %v1436_v45 = vld [vmem:[%s9582_s2 + $0xcc8] sm:$0xff]  ;;  %v1430_v46 = vld [vmem:[%s9582_s2 + $0xc98] sm:$0xff] }
 0x1a4   : > { %v999_v55 = vadd.f32 %v998_v54, %v997_v53  ;;  %v1357_v53 = vld [vmem:[%s9582_s2 + $0xa50] sm:$0xff]  ;;  %v1364_v54 = vld [vmem:[%s9582_s2 + $0xa88] sm:$0xff] }
 0x1a5   : > { %v5258_v56 = vpop.eup %5257 }
 0x1a6   : > { %v994_v57 = vadd.f32 1.0, %v5258_v56  ;;  %1003 = vst [vmem:[#allocation3] sm:$0xf] %v999_v55  ;;  %5259 = vtanh.f32 %v999_v55  ;;  %v1372_v55 = vld [vmem:[%s9582_s2 + $0xac8] sm:$0xff]  ;;  %v1366_v56 = vld [vmem:[%s9582_s2 + $0xa98] sm:$0xff] }
 0x1a7   : > { %v4186_v62 = vpack.c.bf16 %v1372_v55, %v1364_v54  ;;  %v1437_v54 = vld [vmem:[%s9582_s2 + $0xcd0] sm:$0xff]  ;;  %v1444_v55 = vld [vmem:[%s9582_s2 + $0xd08] sm:$0xff] }
 0x1a8   : > { %5261 = vrcp.f32 %v994_v57  ;;  %v1374_v57 = vld [vmem:[%s9582_s2 + $0xad8] sm:$0xff] }
 0x1a9   : > { %v4314_v63 = vpack.c.bf16 %v1374_v57, %v1366_v56  ;;  %v1452_v56 = vld [vmem:[%s9582_s2 + $0xd48] sm:$0xff]  ;;  %v1446_v57 = vld [vmem:[%s9582_s2 + $0xd18] sm:$0xff] }
 0x1b0   : > { %v5260_v58 = vpop.eup %5259 }
 0x1b2   : > { %v5262_v59 = vpop.eup %5261 }
 0x1b3   : > { %v1001_v60 = vmul.f32 %v5262_v59, %v5260_v58  ;;  %v4184_v58 = vpack.c.bf16 %v1355_v49, %v1347_v20  ;;  %v4312_v59 = vpack.c.bf16 %v1357_v53, %v1349_v52  ;;  %v4328_v20 = vpack.c.bf16 %v1421_v43, %v1413_v42  ;;  %v1427_v49 = vld [vmem:[%s9582_s2 + $0xc80] sm:$0xff]  ;;  %v1429_v53 = vld [vmem:[%s9582_s2 + $0xc90] sm:$0xff] }
 0x1b4   : > { %v1493_v43 = vld [vmem:[%s9582_s2 + $0xe90] sm:$0xff] }
 0x1b5   : > { %1002 = vst [vmem:[#allocation2] sm:$0xf] %v1001_v60  ;;  %v6716_v2 = vrot.slane %v1001_v60, %v940_v18  ;;  %v1324_v18 = vld [vmem:[%s9582_s2 + $0x948] sm:$0xff]  ;;  %v1363_v60 = vld [vmem:[%s9582_s2 + $0xa80] sm:$0xff] }
 0x1b6   : > { %v4174_v27 = vpack.c.bf16 %v1324_v18, %v1316_v16  ;;  %v1389_v16 = vld [vmem:[%s9582_s2 + $0xb50] sm:$0xff]  ;;  %v1396_v18 = vld [vmem:[%s9582_s2 + $0xb88] sm:$0xff] }
 0x1b7   : > { %v6731_v7 = vcombine.high %v6716_v2, %v6716_v2  ;;  %v4320_v25 = vpack.c.bf16 %v1389_v16, %v1381_v14  ;;  %v1461_v16 = vld [vmem:[%s9582_s2 + $0xd90] sm:$0xff] }
 0x1b9   : > { %1645 = vmatprep.mubr.f32.mxu0 %v6731_v7  ;;  %1787 = vmatprep.mubr.f32.mxu1 %v6731_v7 }
 0x1ba   : > { %1646 = vmatmul.mubr.f32.vlgmr.msra.gmra.mrb[4].mxu0 %v6716_v2  ;;  %1788 = vmatmul.mubr.f32.vlgmr.msra.gmra.mrb[4].mxu1 %v6716_v2 }
 0x1bb   : > { %4169 = vmatpush1.bf16.msra.mxu0 %v4168_v8  ;;  %4297 = vmatpush1.bf16.msra.mxu1 %v4296_v9  ;;  %v1390_v8 = vld [vmem:[%s9582_s2 + $0xb58] sm:$0xff]  ;;  %v4188_v9 = vpack.c.bf16 %v1371_v61, %v1363_v60  ;;  %v4332_v60 = vpack.c.bf16 %v1437_v54, %v1429_v53  ;;  %v1443_v61 = vld [vmem:[%s9582_s2 + $0xd00] sm:$0xff]  ;;  %v1509_v54 = vld [vmem:[%s9582_s2 + $0xf10] sm:$0xff] }
 0x1bc   : > { %4171 = vmatprep.subr.bf16.mxu0 %v4170_v11  ;;  %4299 = vmatprep.subr.bf16.mxu1 %v4298_v12  ;;  %v1387_v11 = vld [vmem:[%s9582_s2 + $0xb40] sm:$0xff]  ;;  %v4190_v12 = vpack.c.bf16 %v1388_v4, %v1380_v3  ;;  %v4318_v13 = vpack.c.bf16 %v1390_v8, %v1382_v5  ;;  %v1453_v3 = vld [vmem:[%s9582_s2 + $0xd50] sm:$0xff]  ;;  %v1460_v4 = vld [vmem:[%s9582_s2 + $0xd88] sm:$0xff] }
 0x1bd   : > { %1716 = vmatprep.mubr.f32.mxu0 %v6761_v22  ;;  %1858 = vmatprep.mubr.f32.mxu1 %v6761_v22  ;;  %v1468_v5 = vld [vmem:[%s9582_s2 + $0xdc8] sm:$0xff]  ;;  %v1462_v8 = vld [vmem:[%s9582_s2 + $0xd98] sm:$0xff] }
 0x1bf   : > { %4173 = vmatpush1.bf16.msra.mxu0 %v4172_v23  ;;  %4301 = vmatpush1.bf16.msra.mxu1 %v4300_v24  ;;  %v1406_v23 = vld [vmem:[%s9582_s2 + $0xbd8] sm:$0xff]  ;;  %v4192_v24 = vpack.c.bf16 %v1387_v11, %v1379_v17  ;;  %v4336_v17 = vpack.c.bf16 %v1453_v3, %v1445_v1  ;;  %v1459_v11 = vld [vmem:[%s9582_s2 + $0xd80] sm:$0xff]  ;;  %v1525_v3 = vld [vmem:[%s9582_s2 + $0xf90] sm:$0xff] }
 0x1c0   : > { %4175 = vmatprep.subr.bf16.mxu0 %v4174_v27  ;;  %4303 = vmatprep.subr.bf16.mxu1 %v4302_v28  ;;  %v1403_v27 = vld [vmem:[%s9582_s2 + $0xbc0] sm:$0xff]  ;;  %v4194_v28 = vpack.c.bf16 %v1404_v19, %v1396_v18  ;;  %v4322_v29 = vpack.c.bf16 %v1406_v23, %v1398_v21  ;;  %v1469_v18 = vld [vmem:[%s9582_s2 + $0xdd0] sm:$0xff]  ;;  %v1476_v19 = vld [vmem:[%s9582_s2 + $0xe08] sm:$0xff] }
 0x1c1   : > { %v1484_v21 = vld [vmem:[%s9582_s2 + $0xe48] sm:$0xff]  ;;  %v1478_v23 = vld [vmem:[%s9582_s2 + $0xe18] sm:$0xff] }
 0x1c3   : > { %4177 = vmatpush1.bf16.msra.mxu0 %v4176_v35  ;;  %4305 = vmatpush1.bf16.msra.mxu1 %v4304_v36  ;;  %v1422_v35 = vld [vmem:[%s9582_s2 + $0xc58] sm:$0xff]  ;;  %v4196_v36 = vpack.c.bf16 %v1403_v27, %v1395_v26  ;;  %v4340_v26 = vpack.c.bf16 %v1469_v18, %v1461_v16  ;;  %v1475_v27 = vld [vmem:[%s9582_s2 + $0xe00] sm:$0xff]  ;;  %v1033_v18 = vld [vmem:[%s9582_s2 + $0x30] sm:$0xff] }
 0x1c4   : > { %4179 = vmatprep.subr.bf16.mxu0 %v4178_v39  ;;  %4307 = vmatprep.subr.bf16.mxu1 %v4306_v40  ;;  %v1419_v39 = vld [vmem:[%s9582_s2 + $0xc40] sm:$0xff]  ;;  %v4198_v40 = vpack.c.bf16 %v1420_v33, %v1412_v32  ;;  %v4326_v41 = vpack.c.bf16 %v1422_v35, %v1414_v34  ;;  %v1485_v32 = vld [vmem:[%s9582_s2 + $0xe50] sm:$0xff]  ;;  %v1492_v33 = vld [vmem:[%s9582_s2 + $0xe88] sm:$0xff] }
 0x1c5   : > { %v1500_v34 = vld [vmem:[%s9582_s2 + $0xec8] sm:$0xff]  ;;  %v1494_v35 = vld [vmem:[%s9582_s2 + $0xe98] sm:$0xff]  ;;  %v1039_v16 = vld [vmem:[%s9582_s2 + $0x60] sm:$0xff] }
 0x1c7   : > { %4181 = vmatpush1.bf16.msra.mxu0 %v4180_v47  ;;  %4309 = vmatpush1.bf16.msra.mxu1 %v4308_v48  ;;  %v1438_v47 = vld [vmem:[%s9582_s2 + $0xcd8] sm:$0xff]  ;;  %v4200_v48 = vpack.c.bf16 %v1419_v39, %v1411_v38  ;;  %v4344_v38 = vpack.c.bf16 %v1485_v32, %v1477_v31  ;;  %v1491_v39 = vld [vmem:[%s9582_s2 + $0xe80] sm:$0xff] }
 0x1c8   : > { %4183 = vmatprep.subr.bf16.mxu0 %v4182_v50  ;;  %4311 = vmatprep.subr.bf16.mxu1 %v4310_v51  ;;  %v1435_v50 = vld [vmem:[%s9582_s2 + $0xcc0] sm:$0xff]  ;;  %v4202_v51 = vpack.c.bf16 %v1436_v45, %v1428_v44  ;;  %v4330_v52 = vpack.c.bf16 %v1438_v47, %v1430_v46  ;;  %v1501_v44 = vld [vmem:[%s9582_s2 + $0xed0] sm:$0xff]  ;;  %v1508_v45 = vld [vmem:[%s9582_s2 + $0xf08] sm:$0xff] }
 0x1c9   : > { %v1516_v46 = vld [vmem:[%s9582_s2 + $0xf48] sm:$0xff]  ;;  %v1510_v47 = vld [vmem:[%s9582_s2 + $0xf18] sm:$0xff] }
 0x1cb   : > { %4185 = vmatpush1.bf16.msra.mxu0 %v4184_v58  ;;  %4313 = vmatpush1.bf16.msra.mxu1 %v4312_v59  ;;  %v1454_v58 = vld [vmem:[%s9582_s2 + $0xd58] sm:$0xff]  ;;  %v4204_v59 = vpack.c.bf16 %v1435_v50, %v1427_v49  ;;  %v4348_v49 = vpack.c.bf16 %v1501_v44, %v1493_v43  ;;  %v1507_v50 = vld [vmem:[%s9582_s2 + $0xf00] sm:$0xff]  ;;  %v1080_v44 = vld [vmem:[%s9582_s2 + $0x1a8] sm:$0xff] }
 0x1cc   : > { %4187 = vmatprep.subr.bf16.mxu0 %v4186_v62  ;;  %4315 = vmatprep.subr.bf16.mxu1 %v4314_v63  ;;  %v1451_v62 = vld [vmem:[%s9582_s2 + $0xd40] sm:$0xff]  ;;  %v4206_v63 = vpack.c.bf16 %v1452_v56, %v1444_v55  ;;  %v4334_v0 = vpack.c.bf16 %v1454_v58, %v1446_v57  ;;  %v1517_v55 = vld [vmem:[%s9582_s2 + $0xf50] sm:$0xff]  ;;  %v1524_v56 = vld [vmem:[%s9582_s2 + $0xf88] sm:$0xff] }
 0x1cd   : > { %v1532_v57 = vld [vmem:[%s9582_s2 + $0xfc8] sm:$0xff]  ;;  %v1526_v58 = vld [vmem:[%s9582_s2 + $0xf98] sm:$0xff] }
 0x1cf   : > { %4189 = vmatpush1.bf16.msra.mxu0 %v4188_v9  ;;  %4317 = vmatpush1.bf16.msra.mxu1 %v4316_v10  ;;  %v1470_v9 = vld [vmem:[%s9582_s2 + $0xdd8] sm:$0xff]  ;;  %v4208_v10 = vpack.c.bf16 %v1451_v62, %v1443_v61  ;;  %v4352_v61 = vpack.c.bf16 %v1517_v55, %v1509_v54  ;;  %v1523_v62 = vld [vmem:[%s9582_s2 + $0xf80] sm:$0xff]  ;;  %v1089_v54 = vld [vmem:[%s9582_s2 + $0x1f0] sm:$0xff] }
 0x1d0   : > { %4191 = vmatprep.subr.bf16.mxu0 %v4190_v12  ;;  %4319 = vmatprep.subr.bf16.mxu1 %v4318_v13  ;;  %v1467_v12 = vld [vmem:[%s9582_s2 + $0xdc0] sm:$0xff]  ;;  %v4210_v13 = vpack.c.bf16 %v1468_v5, %v1460_v4  ;;  %v4338_v14 = vpack.c.bf16 %v1470_v9, %v1462_v8  ;;  %v1533_v4 = vld [vmem:[%s9582_s2 + $0xfd0] sm:$0xff]  ;;  %v1032_v5 = vld [vmem:[%s9582_s2 + $0x28] sm:$0xff] }
 0x1d1   : > { %v1040_v8 = vld [vmem:[%s9582_s2 + $0x68] sm:$0xff]  ;;  %v1034_v9 = vld [vmem:[%s9582_s2 + $0x38] sm:$0xff] }
 0x1d2   : > { %v1096_v55 = vld [vmem:[%s9582_s2 + $0x228] sm:$0xff] }
 0x1d3   : > { %4193 = vmatpush1.bf16.msra.mxu0 %v4192_v24  ;;  %4321 = vmatpush1.bf16.msra.mxu1 %v4320_v25  ;;  %v1486_v24 = vld [vmem:[%s9582_s2 + $0xe58] sm:$0xff]  ;;  %v4212_v25 = vpack.c.bf16 %v1467_v12, %v1459_v11  ;;  %v4356_v11 = vpack.c.bf16 %v1533_v4, %v1525_v3  ;;  %v4358_v12 = vpack.c.bf16 %v1040_v8, %v1032_v5  ;;  %v1105_v3 = vld [vmem:[%s9582_s2 + $0x270] sm:$0xff]  ;;  %v1112_v4 = vld [vmem:[%s9582_s2 + $0x2a8] sm:$0xff] }
 0x1d4   : > { %4195 = vmatprep.subr.bf16.mxu0 %v4194_v28  ;;  %4323 = vmatprep.subr.bf16.mxu1 %v4322_v29  ;;  %v1483_v28 = vld [vmem:[%s9582_s2 + $0xe40] sm:$0xff]  ;;  %v4214_v29 = vpack.c.bf16 %v1484_v21, %v1476_v19  ;;  %v4342_v30 = vpack.c.bf16 %v1486_v24, %v1478_v23  ;;  %v1041_v19 = vld [vmem:[%s9582_s2 + $0x70] sm:$0xff]  ;;  %v1048_v21 = vld [vmem:[%s9582_s2 + $0xa8] sm:$0xff] }
 0x1d5   : > { %v1056_v23 = vld [vmem:[%s9582_s2 + $0xe8] sm:$0xff]  ;;  %v1050_v24 = vld [vmem:[%s9582_s2 + $0xb8] sm:$0xff] }
 0x1d6   : > { %v4362_v31 = vpack.c.bf16 %v1056_v23, %v1048_v21  ;;  %v1120_v5 = vld [vmem:[%s9582_s2 + $0x2e8] sm:$0xff]  ;;  %v1114_v8 = vld [vmem:[%s9582_s2 + $0x2b8] sm:$0xff] }
 0x1d7   : > { %4197 = vmatpush1.bf16.msra.mxu0 %v4196_v36  ;;  %4325 = vmatpush1.bf16.msra.mxu1 %v4324_v37  ;;  %v1502_v36 = vld [vmem:[%s9582_s2 + $0xed8] sm:$0xff]  ;;  %v4216_v37 = vpack.c.bf16 %v1483_v28, %v1475_v27  ;;  %v4488_v27 = vpack.c.bf16 %v1041_v19, %v1033_v18  ;;  %v1047_v28 = vld [vmem:[%s9582_s2 + $0xa0] sm:$0xff]  ;;  %v1121_v18 = vld [vmem:[%s9582_s2 + $0x2f0] sm:$0xff] }
 0x1d8   : > { %4199 = vmatprep.subr.bf16.mxu0 %v4198_v40  ;;  %4327 = vmatprep.subr.bf16.mxu1 %v4326_v41  ;;  %v1499_v40 = vld [vmem:[%s9582_s2 + $0xec0] sm:$0xff]  ;;  %v4218_v41 = vpack.c.bf16 %v1500_v34, %v1492_v33  ;;  %v4346_v42 = vpack.c.bf16 %v1502_v36, %v1494_v35  ;;  %v1057_v33 = vld [vmem:[%s9582_s2 + $0xf0] sm:$0xff]  ;;  %v1064_v34 = vld [vmem:[%s9582_s2 + $0x128] sm:$0xff] }
 0x1d9   : > { %v1072_v35 = vld [vmem:[%s9582_s2 + $0x168] sm:$0xff]  ;;  %v1066_v36 = vld [vmem:[%s9582_s2 + $0x138] sm:$0xff] }
 0x1da   : > { %v1128_v19 = vld [vmem:[%s9582_s2 + $0x328] sm:$0xff]  ;;  %v1130_v23 = vld [vmem:[%s9582_s2 + $0x338] sm:$0xff] }
 0x1db   : > { %4201 = vmatpush1.bf16.msra.mxu0 %v4200_v48  ;;  %4329 = vmatpush1.bf16.msra.mxu1 %v4328_v20  ;;  %v1518_v48 = vld [vmem:[%s9582_s2 + $0xf58] sm:$0xff]  ;;  %v4220_v20 = vpack.c.bf16 %v1499_v40, %v1491_v39  ;;  %v4366_v40 = vpack.c.bf16 %v1072_v35, %v1064_v34  ;;  %v1136_v21 = vld [vmem:[%s9582_s2 + $0x368] sm:$0xff] }
 0x1dc   : > { %4203 = vmatprep.subr.bf16.mxu0 %v4202_v51  ;;  %4331 = vmatprep.subr.bf16.mxu1 %v4330_v52  ;;  %v1515_v51 = vld [vmem:[%s9582_s2 + $0xf40] sm:$0xff]  ;;  %v4222_v52 = vpack.c.bf16 %v1516_v46, %v1508_v45  ;;  %v4350_v53 = vpack.c.bf16 %v1518_v48, %v1510_v47  ;;  %v1088_v45 = vld [vmem:[%s9582_s2 + $0x1e8] sm:$0xff]  ;;  %v1082_v46 = vld [vmem:[%s9582_s2 + $0x1b8] sm:$0xff] }
 0x1dd   : > { %v1090_v47 = vld [vmem:[%s9582_s2 + $0x1f8] sm:$0xff]  ;;  %v1152_v34 = vld [vmem:[%s9582_s2 + $0x3e8] sm:$0xff] }
 0x1de   : > { %v1146_v35 = vld [vmem:[%s9582_s2 + $0x3b8] sm:$0xff] }
 0x1df   : > { %4205 = vmatpush1.bf16.msra.mxu0 %v4204_v59  ;;  %4333 = vmatpush1.bf16.msra.mxu1 %v4332_v60  ;;  %v1534_v59 = vld [vmem:[%s9582_s2 + $0xfd8] sm:$0xff]  ;;  %v4224_v60 = vpack.c.bf16 %v1515_v51, %v1507_v50  ;;  %v1079_v50 = vld [vmem:[%s9582_s2 + $0x1a0] sm:$0xff] }
 0x1e0   : > { %4207 = vmatprep.subr.bf16.mxu0 %v4206_v63  ;;  %4335 = vmatprep.subr.bf16.mxu1 %v4334_v0  ;;  %v1531_v63 = vld [vmem:[%s9582_s2 + $0xfc0] sm:$0xff]  ;;  %v4226_v0 = vpack.c.bf16 %v1532_v57, %v1524_v56  ;;  %v4354_v1 = vpack.c.bf16 %v1534_v59, %v1526_v58  ;;  %v1104_v56 = vld [vmem:[%s9582_s2 + $0x268] sm:$0xff]  ;;  %v1098_v57 = vld [vmem:[%s9582_s2 + $0x238] sm:$0xff] }
 0x1e1   : > { %v1087_v51 = vld [vmem:[%s9582_s2 + $0x1e0] sm:$0xff]  ;;  %v1106_v58 = vld [vmem:[%s9582_s2 + $0x278] sm:$0xff] }
 0x1e2   : > { %v4372_v59 = vpack.c.bf16 %v1087_v51, %v1079_v50  ;;  %v1167_v50 = vld [vmem:[%s9582_s2 + $0x460] sm:$0xff]  ;;  %v1161_v51 = vld [vmem:[%s9582_s2 + $0x430] sm:$0xff] }
 0x1e3   : > { %4209 = vmatpush1.bf16.msra.mxu0 %v4208_v10  ;;  %4337 = vmatpush1.bf16.msra.mxu1 %v4336_v17  ;;  %v1042_v10 = vld [vmem:[%s9582_s2 + $0x78] sm:$0xff]  ;;  %v4228_v17 = vpack.c.bf16 %v1531_v63, %v1523_v62  ;;  %v1095_v62 = vld [vmem:[%s9582_s2 + $0x220] sm:$0xff] }
 0x1e4   : > { %4211 = vmatprep.subr.bf16.mxu0 %v4210_v13  ;;  %4339 = vmatprep.subr.bf16.mxu1 %v4338_v14  ;;  %v4486_v13 = vpack.c.bf16 %v1042_v10, %v1034_v9  ;;  %v1031_v14 = vld [vmem:[%s9582_s2 + $0x20] sm:$0xff]  ;;  %v1122_v9 = vld [vmem:[%s9582_s2 + $0x2f8] sm:$0xff] }
 0x1e5   : > { %v1103_v63 = vld [vmem:[%s9582_s2 + $0x260] sm:$0xff] }
 0x1e6   : > { %v4376_v10 = vpack.c.bf16 %v1103_v63, %v1095_v62  ;;  %v1183_v62 = vld [vmem:[%s9582_s2 + $0x4e0] sm:$0xff]  ;;  %v1177_v63 = vld [vmem:[%s9582_s2 + $0x4b0] sm:$0xff] }
 0x1e7   : > { %4213 = vmatpush1.bf16.msra.mxu0 %v4212_v25  ;;  %4341 = vmatpush1.bf16.msra.mxu1 %v4340_v26  ;;  %v1058_v25 = vld [vmem:[%s9582_s2 + $0xf8] sm:$0xff]  ;;  %v4360_v26 = vpack.c.bf16 %v1039_v16, %v1031_v14  ;;  %v1113_v14 = vld [vmem:[%s9582_s2 + $0x2b0] sm:$0xff]  ;;  %v4506_v16 = vpack.c.bf16 %v1122_v9, %v1114_v8 }
 0x1e8   : > { %4215 = vmatprep.subr.bf16.mxu0 %v4214_v29  ;;  %4343 = vmatprep.subr.bf16.mxu1 %v4342_v30  ;;  %v1055_v29 = vld [vmem:[%s9582_s2 + $0xe0] sm:$0xff]  ;;  %v1049_v30 = vld [vmem:[%s9582_s2 + $0xb0] sm:$0xff]  ;;  %v4490_v32 = vpack.c.bf16 %v1058_v25, %v1050_v24  ;;  %v1138_v24 = vld [vmem:[%s9582_s2 + $0x378] sm:$0xff] }
 0x1e9   : > { %v4492_v39 = vpack.c.bf16 %v1057_v33, %v1049_v30  ;;  %v1129_v30 = vld [vmem:[%s9582_s2 + $0x330] sm:$0xff]  ;;  %v1144_v33 = vld [vmem:[%s9582_s2 + $0x3a8] sm:$0xff]  ;;  %v1202_v8 = vld [vmem:[%s9582_s2 + $0x578] sm:$0xff] }
 0x1eb   : > { %4217 = vmatpush1.bf16.msra.mxu0 %v4216_v37  ;;  %4345 = vmatpush1.bf16.msra.mxu1 %v4344_v38  ;;  %v1074_v37 = vld [vmem:[%s9582_s2 + $0x178] sm:$0xff]  ;;  %v4364_v38 = vpack.c.bf16 %v1055_v29, %v1047_v28  ;;  %v1127_v28 = vld [vmem:[%s9582_s2 + $0x320] sm:$0xff] }
 0x1ec   : > { %4219 = vmatprep.subr.bf16.mxu0 %v4218_v41  ;;  %4347 = vmatprep.subr.bf16.mxu1 %v4346_v42  ;;  %v1071_v41 = vld [vmem:[%s9582_s2 + $0x160] sm:$0xff]  ;;  %v1065_v42 = vld [vmem:[%s9582_s2 + $0x130] sm:$0xff]  ;;  %v4494_v43 = vpack.c.bf16 %v1074_v37, %v1066_v36  ;;  %v1154_v36 = vld [vmem:[%s9582_s2 + $0x3f8] sm:$0xff] }
 0x1ed   : > { %v1135_v29 = vld [vmem:[%s9582_s2 + $0x360] sm:$0xff] }
 0x1ee   : > { %v4384_v37 = vpack.c.bf16 %v1135_v29, %v1127_v28  ;;  %v1215_v28 = vld [vmem:[%s9582_s2 + $0x5e0] sm:$0xff]  ;;  %v1209_v29 = vld [vmem:[%s9582_s2 + $0x5b0] sm:$0xff] }
 0x1ef   : > { %4221 = vmatpush1.bf16.msra.mxu0 %v4220_v20  ;;  %4349 = vmatpush1.bf16.msra.mxu1 %v4348_v49  ;;  %v4370_v49 = vpack.c.bf16 %v1088_v45, %v1080_v44  ;;  %v1168_v44 = vld [vmem:[%s9582_s2 + $0x468] sm:$0xff]  ;;  %v1162_v45 = vld [vmem:[%s9582_s2 + $0x438] sm:$0xff] }
 0x1f0   : > { %4223 = vmatprep.subr.bf16.mxu0 %v4222_v52  ;;  %4351 = vmatprep.subr.bf16.mxu1 %v4350_v53  ;;  %v1081_v52 = vld [vmem:[%s9582_s2 + $0x1b0] sm:$0xff]  ;;  %v4498_v53 = vpack.c.bf16 %v1090_v47, %v1082_v46  ;;  %v1170_v46 = vld [vmem:[%s9582_s2 + $0x478] sm:$0xff] }
 0x1f3   : > { %4225 = vmatpush1.bf16.msra.mxu0 %v4224_v60  ;;  %4353 = vmatpush1.bf16.msra.mxu1 %v4352_v61  ;;  %v4500_v60 = vpack.c.bf16 %v1089_v54, %v1081_v52  ;;  %v4374_v61 = vpack.c.bf16 %v1104_v56, %v1096_v55  ;;  %v4518_v52 = vpack.c.bf16 %v1170_v46, %v1162_v45  ;;  %v1176_v54 = vld [vmem:[%s9582_s2 + $0x4a8] sm:$0xff]  ;;  %v1178_v56 = vld [vmem:[%s9582_s2 + $0x4b8] sm:$0xff] }
 0x1f4   : > { %4227 = vmatprep.subr.bf16.mxu0 %v4226_v0  ;;  %4355 = vmatprep.subr.bf16.mxu1 %v4354_v1  ;;  %v1097_v0 = vld [vmem:[%s9582_s2 + $0x230] sm:$0xff]  ;;  %v4502_v1 = vpack.c.bf16 %v1106_v58, %v1098_v57  ;;  %v1184_v55 = vld [vmem:[%s9582_s2 + $0x4e8] sm:$0xff]  ;;  %v1186_v57 = vld [vmem:[%s9582_s2 + $0x4f8] sm:$0xff] }
 0x1f5   : > { %v1250_v45 = vld [vmem:[%s9582_s2 + $0x6f8] sm:$0xff] }
 0x1f7   : > { %4229 = vmatpush1.bf16.msra.mxu0 %v4228_v17  ;;  %4357 = vmatpush1.bf16.msra.mxu1 %v4356_v11  ;;  %v4504_v17 = vpack.c.bf16 %v1105_v3, %v1097_v0  ;;  %v4378_v11 = vpack.c.bf16 %v1120_v5, %v1112_v4  ;;  %v4522_v0 = vpack.c.bf16 %v1186_v57, %v1178_v56  ;;  %v1192_v3 = vld [vmem:[%s9582_s2 + $0x528] sm:$0xff]  ;;  %v1194_v5 = vld [vmem:[%s9582_s2 + $0x538] sm:$0xff] }
 0x1f8   : > { %4359 = vmatprep.subr.bf16.mxu0 %v4358_v12  ;;  %4487 = vmatprep.subr.bf16.mxu1 %v4486_v13  ;;  %v1111_v12 = vld [vmem:[%s9582_s2 + $0x2a0] sm:$0xff]  ;;  %v1200_v4 = vld [vmem:[%s9582_s2 + $0x568] sm:$0xff]  ;;  %v1266_v56 = vld [vmem:[%s9582_s2 + $0x778] sm:$0xff] }
 0x1f9   : > { %v1119_v13 = vld [vmem:[%s9582_s2 + $0x2e0] sm:$0xff] }
 0x1fa   : > { %1717 = vmatmul.mubr.f32.vlgmr.msra.gmra.mrb[4].mxu0 %v6727_v6  ;;  %1859 = vmatmul.mubr.f32.vlgmr.msra.gmra.mrb[4].mxu1 %v6727_v6  ;;  %v1063_v6 = vld [vmem:[%s9582_s2 + $0x120] sm:$0xff]  ;;  %v4380_v25 = vpack.c.bf16 %v1119_v13, %v1111_v12  ;;  %v1193_v13 = vld [vmem:[%s9582_s2 + $0x530] sm:$0xff] }
 0x1fb   : > { %4361 = vmatpush1.bf16.msra.mxu0 %v4360_v26  ;;  %1929 = vmatprep.mubr.f32.mxu0 %v6731_v7  ;;  %v4368_v48 = vpack.c.bf16 %v1071_v41, %v1063_v6  ;;  %v4508_v26 = vpack.c.bf16 %v1121_v18, %v1113_v14  ;;  %v1151_v6 = vld [vmem:[%s9582_s2 + $0x3e0] sm:$0xff]  ;;  %v1145_v41 = vld [vmem:[%s9582_s2 + $0x3b0] sm:$0xff]  ;;  %v4526_v14 = vpack.c.bf16 %v1202_v8, %v1194_v5  ;;  %v1208_v18 = vld [vmem:[%s9582_s2 + $0x5a8] sm:$0xff] }
 0x1fc   : > { %4489 = vmatpush1.bf16.msra.mxu1 %v4488_v27  ;;  %2071 = vmatprep.mubr.f32.mxu1 %v6731_v7  ;;  %v1073_v7 = vld [vmem:[%s9582_s2 + $0x170] sm:$0xff]  ;;  %v4382_v27 = vpack.c.bf16 %v1136_v21, %v1128_v19  ;;  %v1199_v12 = vld [vmem:[%s9582_s2 + $0x560] sm:$0xff]  ;;  %v1216_v19 = vld [vmem:[%s9582_s2 + $0x5e8] sm:$0xff] }
 0x1fd   : > { %4363 = vmatprep.subr.bf16.mxu0 %v4362_v31  ;;  %4491 = vmatprep.subr.bf16.mxu1 %v4490_v32  ;;  %v4496_v20 = vpack.c.bf16 %v1073_v7, %v1065_v42  ;;  %v4510_v31 = vpack.c.bf16 %v1138_v24, %v1130_v23  ;;  %v1137_v32 = vld [vmem:[%s9582_s2 + $0x370] sm:$0xff]  ;;  %v4514_v42 = vpack.c.bf16 %v1154_v36, %v1146_v35  ;;  %v1160_v7 = vld [vmem:[%s9582_s2 + $0x428] sm:$0xff]  ;;  %v1210_v21 = vld [vmem:[%s9582_s2 + $0x5b8] sm:$0xff] }
 0x1fe   : > { %v1218_v23 = vld [vmem:[%s9582_s2 + $0x5f8] sm:$0xff] }
 0x1ff   : > { %4365 = vmatpush1.bf16.msra.mxu0 %v4364_v38  ;;  %v4512_v38 = vpack.c.bf16 %v1137_v32, %v1129_v30  ;;  %v4530_v30 = vpack.c.bf16 %v1218_v23, %v1210_v21  ;;  %v1224_v32 = vld [vmem:[%s9582_s2 + $0x628] sm:$0xff]  ;;  %v1234_v35 = vld [vmem:[%s9582_s2 + $0x678] sm:$0xff] }
 0x200   : > { %4493 = vmatpush1.bf16.msra.mxu1 %v4492_v39  ;;  %4367 = vmatprep.subr.bf16.mxu0 %v4366_v40  ;;  %v4386_v39 = vpack.c.bf16 %v1152_v34, %v1144_v33  ;;  %v1143_v40 = vld [vmem:[%s9582_s2 + $0x3a0] sm:$0xff]  ;;  %v1232_v33 = vld [vmem:[%s9582_s2 + $0x668] sm:$0xff]  ;;  %v1226_v34 = vld [vmem:[%s9582_s2 + $0x638] sm:$0xff] }
 0x201   : > { %4495 = vmatprep.subr.bf16.mxu1 %v4494_v43  ;;  %v1153_v43 = vld [vmem:[%s9582_s2 + $0x3f0] sm:$0xff]  ;;  %v4388_v47 = vpack.c.bf16 %v1151_v6, %v1143_v40  ;;  %v1231_v40 = vld [vmem:[%s9582_s2 + $0x660] sm:$0xff]  ;;  %v1282_v5 = vld [vmem:[%s9582_s2 + $0x7f8] sm:$0xff] }
 0x202   : > { %v1225_v6 = vld [vmem:[%s9582_s2 + $0x630] sm:$0xff]  ;;  %v1298_v21 = vld [vmem:[%s9582_s2 + $0x878] sm:$0xff] }
 0x203   : > { %4369 = vmatpush1.bf16.msra.mxu0 %v4368_v48  ;;  %v4516_v48 = vpack.c.bf16 %v1153_v43, %v1145_v41  ;;  %v4534_v41 = vpack.c.bf16 %v1234_v35, %v1226_v34  ;;  %v1240_v43 = vld [vmem:[%s9582_s2 + $0x6a8] sm:$0xff]  ;;  %v1314_v34 = vld [vmem:[%s9582_s2 + $0x8f8] sm:$0xff] }
 0x204   : > { %4497 = vmatpush1.bf16.msra.mxu1 %v4496_v20  ;;  %4371 = vmatprep.subr.bf16.mxu0 %v4370_v49  ;;  %v4390_v20 = vpack.c.bf16 %v1168_v44, %v1160_v7  ;;  %v1159_v49 = vld [vmem:[%s9582_s2 + $0x420] sm:$0xff]  ;;  %v1248_v7 = vld [vmem:[%s9582_s2 + $0x6e8] sm:$0xff]  ;;  %v1242_v44 = vld [vmem:[%s9582_s2 + $0x6b8] sm:$0xff] }
 0x205   : > { %4499 = vmatprep.subr.bf16.mxu1 %v4498_v53  ;;  %v1169_v53 = vld [vmem:[%s9582_s2 + $0x470] sm:$0xff]  ;;  %v4392_v58 = vpack.c.bf16 %v1167_v50, %v1159_v49  ;;  %v1247_v49 = vld [vmem:[%s9582_s2 + $0x6e0] sm:$0xff] }
 0x206   : > { %v1241_v50 = vld [vmem:[%s9582_s2 + $0x6b0] sm:$0xff] }
 0x207   : > { %4373 = vmatpush1.bf16.msra.mxu0 %v4372_v59  ;;  %v4520_v59 = vpack.c.bf16 %v1169_v53, %v1161_v51  ;;  %v4538_v51 = vpack.c.bf16 %v1250_v45, %v1242_v44  ;;  %v1256_v53 = vld [vmem:[%s9582_s2 + $0x728] sm:$0xff]  ;;  %v1330_v44 = vld [vmem:[%s9582_s2 + $0x978] sm:$0xff] }
 0x208   : > { %4501 = vmatpush1.bf16.msra.mxu1 %v4500_v60  ;;  %4375 = vmatprep.subr.bf16.mxu0 %v4374_v61  ;;  %v4394_v60 = vpack.c.bf16 %v1184_v55, %v1176_v54  ;;  %v1175_v61 = vld [vmem:[%s9582_s2 + $0x4a0] sm:$0xff]  ;;  %v1264_v54 = vld [vmem:[%s9582_s2 + $0x768] sm:$0xff]  ;;  %v1258_v55 = vld [vmem:[%s9582_s2 + $0x738] sm:$0xff] }
 0x209   : > { %4503 = vmatprep.subr.bf16.mxu1 %v4502_v1  ;;  %v1185_v1 = vld [vmem:[%s9582_s2 + $0x4f0] sm:$0xff]  ;;  %v4396_v9 = vpack.c.bf16 %v1183_v62, %v1175_v61  ;;  %v1263_v61 = vld [vmem:[%s9582_s2 + $0x760] sm:$0xff] }
 0x20a   : > { %v1257_v62 = vld [vmem:[%s9582_s2 + $0x730] sm:$0xff] }
 0x20b   : > { %4377 = vmatpush1.bf16.msra.mxu0 %v4376_v10  ;;  %v4524_v10 = vpack.c.bf16 %v1185_v1, %v1177_v63  ;;  %v4542_v63 = vpack.c.bf16 %v1266_v56, %v1258_v55  ;;  %v1272_v1 = vld [vmem:[%s9582_s2 + $0x7a8] sm:$0xff] }
 0x20c   : > { %4505 = vmatpush1.bf16.msra.mxu1 %v4504_v17  ;;  %4379 = vmatprep.subr.bf16.mxu0 %v4378_v11  ;;  %v4398_v17 = vpack.c.bf16 %v1200_v4, %v1192_v3  ;;  %v1191_v11 = vld [vmem:[%s9582_s2 + $0x520] sm:$0xff]  ;;  %v1280_v3 = vld [vmem:[%s9582_s2 + $0x7e8] sm:$0xff]  ;;  %v1274_v4 = vld [vmem:[%s9582_s2 + $0x7b8] sm:$0xff] }
 0x20d   : > { %4507 = vmatprep.subr.bf16.mxu1 %v4506_v16  ;;  %v1201_v16 = vld [vmem:[%s9582_s2 + $0x570] sm:$0xff]  ;;  %v4400_v24 = vpack.c.bf16 %v1199_v12, %v1191_v11  ;;  %v1279_v11 = vld [vmem:[%s9582_s2 + $0x7e0] sm:$0xff] }
 0x20e   : > { %v1273_v12 = vld [vmem:[%s9582_s2 + $0x7b0] sm:$0xff] }
 0x20f   : > { %4381 = vmatpush1.bf16.msra.mxu0 %v4380_v25  ;;  %v4528_v25 = vpack.c.bf16 %v1201_v16, %v1193_v13  ;;  %v4546_v13 = vpack.c.bf16 %v1282_v5, %v1274_v4  ;;  %v1288_v16 = vld [vmem:[%s9582_s2 + $0x828] sm:$0xff] }
 0x210   : > { %4509 = vmatpush1.bf16.msra.mxu1 %v4508_v26  ;;  %4383 = vmatprep.subr.bf16.mxu0 %v4382_v27  ;;  %v4402_v26 = vpack.c.bf16 %v1216_v19, %v1208_v18  ;;  %v1207_v27 = vld [vmem:[%s9582_s2 + $0x5a0] sm:$0xff]  ;;  %v1296_v18 = vld [vmem:[%s9582_s2 + $0x868] sm:$0xff]  ;;  %v1290_v19 = vld [vmem:[%s9582_s2 + $0x838] sm:$0xff] }
 0x211   : > { %4511 = vmatprep.subr.bf16.mxu1 %v4510_v31  ;;  %v1217_v31 = vld [vmem:[%s9582_s2 + $0x5f0] sm:$0xff]  ;;  %v4404_v36 = vpack.c.bf16 %v1215_v28, %v1207_v27  ;;  %v1295_v27 = vld [vmem:[%s9582_s2 + $0x860] sm:$0xff] }
 0x212   : > { %v1289_v28 = vld [vmem:[%s9582_s2 + $0x830] sm:$0xff] }
 0x213   : > { %4385 = vmatpush1.bf16.msra.mxu0 %v4384_v37  ;;  %v4532_v37 = vpack.c.bf16 %v1217_v31, %v1209_v29  ;;  %v4550_v29 = vpack.c.bf16 %v1298_v21, %v1290_v19  ;;  %v1304_v31 = vld [vmem:[%s9582_s2 + $0x8a8] sm:$0xff] }
 0x214   : > { %4513 = vmatpush1.bf16.msra.mxu1 %v4512_v38  ;;  %4387 = vmatprep.subr.bf16.mxu0 %v4386_v39  ;;  %v4406_v38 = vpack.c.bf16 %v1232_v33, %v1224_v32  ;;  %v1223_v39 = vld [vmem:[%s9582_s2 + $0x620] sm:$0xff]  ;;  %v1312_v32 = vld [vmem:[%s9582_s2 + $0x8e8] sm:$0xff]  ;;  %v1306_v33 = vld [vmem:[%s9582_s2 + $0x8b8] sm:$0xff] }
 0x215   : > { %4515 = vmatprep.subr.bf16.mxu1 %v4514_v42  ;;  %v1233_v42 = vld [vmem:[%s9582_s2 + $0x670] sm:$0xff]  ;;  %v4408_v46 = vpack.c.bf16 %v1231_v40, %v1223_v39  ;;  %v1311_v39 = vld [vmem:[%s9582_s2 + $0x8e0] sm:$0xff] }
 0x216   : > { %v1305_v40 = vld [vmem:[%s9582_s2 + $0x8b0] sm:$0xff] }
 0x217   : > { %4389 = vmatpush1.bf16.msra.mxu0 %v4388_v47  ;;  %v4536_v47 = vpack.c.bf16 %v1233_v42, %v1225_v6  ;;  %v4554_v6 = vpack.c.bf16 %v1314_v34, %v1306_v33  ;;  %v1320_v42 = vld [vmem:[%s9582_s2 + $0x928] sm:$0xff] }
 0x218   : > { %4517 = vmatpush1.bf16.msra.mxu1 %v4516_v48  ;;  %4391 = vmatprep.subr.bf16.mxu0 %v4390_v20  ;;  %v4410_v48 = vpack.c.bf16 %v1248_v7, %v1240_v43  ;;  %v1239_v20 = vld [vmem:[%s9582_s2 + $0x6a0] sm:$0xff]  ;;  %v1328_v43 = vld [vmem:[%s9582_s2 + $0x968] sm:$0xff]  ;;  %v1322_v7 = vld [vmem:[%s9582_s2 + $0x938] sm:$0xff] }
 0x219   : > { %4519 = vmatprep.subr.bf16.mxu1 %v4518_v52  ;;  %v1249_v52 = vld [vmem:[%s9582_s2 + $0x6f0] sm:$0xff]  ;;  %v4412_v57 = vpack.c.bf16 %v1247_v49, %v1239_v20  ;;  %v1327_v20 = vld [vmem:[%s9582_s2 + $0x960] sm:$0xff] }
 0x21a   : > { %v1321_v49 = vld [vmem:[%s9582_s2 + $0x930] sm:$0xff] }
 0x21b   : > { %4393 = vmatpush1.bf16.msra.mxu0 %v4392_v58  ;;  %v4540_v58 = vpack.c.bf16 %v1249_v52, %v1241_v50  ;;  %v1329_v50 = vld [vmem:[%s9582_s2 + $0x970] sm:$0xff]  ;;  %v1344_v52 = vld [vmem:[%s9582_s2 + $0x9e8] sm:$0xff] }
 0x21c   : > { %4521 = vmatpush1.bf16.msra.mxu1 %v4520_v59  ;;  %4395 = vmatprep.subr.bf16.mxu0 %v4394_v60  ;;  %v4414_v59 = vpack.c.bf16 %v1264_v54, %v1256_v53  ;;  %v1255_v60 = vld [vmem:[%s9582_s2 + $0x720] sm:$0xff]  ;;  %v1338_v53 = vld [vmem:[%s9582_s2 + $0x9b8] sm:$0xff]  ;;  %v4560_v56 = vpack.c.bf16 %v1329_v50, %v1321_v49  ;;  %v1416_v49 = vld [vmem:[%s9582_s2 + $0xc28] sm:$0xff] }
 0x21d   : > { %4523 = vmatprep.subr.bf16.mxu1 %v4522_v0  ;;  %v1265_v0 = vld [vmem:[%s9582_s2 + $0x770] sm:$0xff]  ;;  %v4416_v8 = vpack.c.bf16 %v1263_v61, %v1255_v60  ;;  %v1346_v54 = vld [vmem:[%s9582_s2 + $0x9f8] sm:$0xff] }
 0x21e   : > { %v1337_v60 = vld [vmem:[%s9582_s2 + $0x9b0] sm:$0xff]  ;;  %v1418_v50 = vld [vmem:[%s9582_s2 + $0xc38] sm:$0xff] }
 0x21f   : > { %4397 = vmatpush1.bf16.msra.mxu0 %v4396_v9  ;;  %v4544_v9 = vpack.c.bf16 %v1265_v0, %v1257_v62  ;;  %v1345_v61 = vld [vmem:[%s9582_s2 + $0x9f0] sm:$0xff]  ;;  %v1352_v62 = vld [vmem:[%s9582_s2 + $0xa28] sm:$0xff]  ;;  %v1354_v0 = vld [vmem:[%s9582_s2 + $0xa38] sm:$0xff] }
 0x220   : > { %4525 = vmatpush1.bf16.msra.mxu1 %v4524_v10  ;;  %4399 = vmatprep.subr.bf16.mxu0 %v4398_v17  ;;  %v4418_v10 = vpack.c.bf16 %v1280_v3, %v1272_v1  ;;  %v1271_v17 = vld [vmem:[%s9582_s2 + $0x7a0] sm:$0xff]  ;;  %v1362_v1 = vld [vmem:[%s9582_s2 + $0xa78] sm:$0xff]  ;;  %v4564_v4 = vpack.c.bf16 %v1345_v61, %v1337_v60  ;;  %v1432_v60 = vld [vmem:[%s9582_s2 + $0xca8] sm:$0xff] }
 0x221   : > { %4527 = vmatprep.subr.bf16.mxu1 %v4526_v14  ;;  %v1281_v14 = vld [vmem:[%s9582_s2 + $0x7f0] sm:$0xff]  ;;  %v4420_v23 = vpack.c.bf16 %v1279_v11, %v1271_v17  ;;  %v4566_v17 = vpack.c.bf16 %v1362_v1, %v1354_v0  ;;  %v1434_v61 = vld [vmem:[%s9582_s2 + $0xcb8] sm:$0xff] }
 0x222   : > { %v1361_v11 = vld [vmem:[%s9582_s2 + $0xa70] sm:$0xff] }
 0x223   : > { %4401 = vmatpush1.bf16.msra.mxu0 %v4400_v24  ;;  %v4548_v24 = vpack.c.bf16 %v1281_v14, %v1273_v12  ;;  %v1368_v12 = vld [vmem:[%s9582_s2 + $0xaa8] sm:$0xff]  ;;  %v1370_v14 = vld [vmem:[%s9582_s2 + $0xab8] sm:$0xff] }
 0x224   : > { %4529 = vmatpush1.bf16.msra.mxu1 %v4528_v25  ;;  %4403 = vmatprep.subr.bf16.mxu0 %v4402_v26  ;;  %v4422_v25 = vpack.c.bf16 %v1296_v18, %v1288_v16  ;;  %v1287_v26 = vld [vmem:[%s9582_s2 + $0x820] sm:$0xff]  ;;  %v1378_v16 = vld [vmem:[%s9582_s2 + $0xaf8] sm:$0xff] }
 0x225   : > { %4531 = vmatprep.subr.bf16.mxu1 %v4530_v30  ;;  %v1297_v30 = vld [vmem:[%s9582_s2 + $0x870] sm:$0xff]  ;;  %v4424_v35 = vpack.c.bf16 %v1295_v27, %v1287_v26  ;;  %v4570_v26 = vpack.c.bf16 %v1378_v16, %v1370_v14 }
 0x226   : > { %v1377_v27 = vld [vmem:[%s9582_s2 + $0xaf0] sm:$0xff] }
 0x227   : > { %4405 = vmatpush1.bf16.msra.mxu0 %v4404_v36  ;;  %v4552_v36 = vpack.c.bf16 %v1297_v30, %v1289_v28  ;;  %v1384_v28 = vld [vmem:[%s9582_s2 + $0xb28] sm:$0xff]  ;;  %v1386_v30 = vld [vmem:[%s9582_s2 + $0xb38] sm:$0xff] }
 0x228   : > { %4533 = vmatpush1.bf16.msra.mxu1 %v4532_v37  ;;  %4407 = vmatprep.subr.bf16.mxu0 %v4406_v38  ;;  %v4426_v37 = vpack.c.bf16 %v1312_v32, %v1304_v31  ;;  %v1303_v38 = vld [vmem:[%s9582_s2 + $0x8a0] sm:$0xff]  ;;  %v1394_v31 = vld [vmem:[%s9582_s2 + $0xb78] sm:$0xff] }
 0x229   : > { %4535 = vmatprep.subr.bf16.mxu1 %v4534_v41  ;;  %v1313_v41 = vld [vmem:[%s9582_s2 + $0x8f0] sm:$0xff]  ;;  %v4428_v45 = vpack.c.bf16 %v1311_v39, %v1303_v38  ;;  %v4574_v38 = vpack.c.bf16 %v1394_v31, %v1386_v30 }
 0x22a   : > { %v1393_v39 = vld [vmem:[%s9582_s2 + $0xb70] sm:$0xff] }
 0x22b   : > { %4409 = vmatpush1.bf16.msra.mxu0 %v4408_v46  ;;  %v4556_v46 = vpack.c.bf16 %v1313_v41, %v1305_v40  ;;  %v1400_v40 = vld [vmem:[%s9582_s2 + $0xba8] sm:$0xff]  ;;  %v1402_v41 = vld [vmem:[%s9582_s2 + $0xbb8] sm:$0xff] }
 0x22c   : > { %4537 = vmatpush1.bf16.msra.mxu1 %v4536_v47  ;;  %4411 = vmatprep.subr.bf16.mxu0 %v4410_v48  ;;  %v4430_v47 = vpack.c.bf16 %v1328_v43, %v1320_v42  ;;  %v1319_v48 = vld [vmem:[%s9582_s2 + $0x920] sm:$0xff]  ;;  %v1410_v42 = vld [vmem:[%s9582_s2 + $0xbf8] sm:$0xff] }
 0x22d   : > { %4539 = vmatprep.subr.bf16.mxu1 %v4538_v51  ;;  %v1336_v51 = vld [vmem:[%s9582_s2 + $0x9a8] sm:$0xff]  ;;  %v4432_v55 = vpack.c.bf16 %v1327_v20, %v1319_v48  ;;  %v4578_v48 = vpack.c.bf16 %v1410_v42, %v1402_v41  ;;  %v1409_v20 = vld [vmem:[%s9582_s2 + $0xbf0] sm:$0xff] }
 0x22f   : > { %4413 = vmatpush1.bf16.msra.mxu0 %v4412_v57  ;;  %v4434_v57 = vpack.c.bf16 %v1344_v52, %v1336_v51  ;;  %v1426_v51 = vld [vmem:[%s9582_s2 + $0xc78] sm:$0xff] }
 0x230   : > { %4541 = vmatpush1.bf16.msra.mxu1 %v4540_v58  ;;  %4415 = vmatprep.subr.bf16.mxu0 %v4414_v59  ;;  %v1335_v58 = vld [vmem:[%s9582_s2 + $0x9a0] sm:$0xff] }
 0x231   : > { %4543 = vmatprep.subr.bf16.mxu1 %v4542_v63  ;;  %v1343_v59 = vld [vmem:[%s9582_s2 + $0x9e0] sm:$0xff]  ;;  %v1360_v63 = vld [vmem:[%s9582_s2 + $0xa68] sm:$0xff] }
 0x232   : > { %v4436_v3 = vpack.c.bf16 %v1343_v59, %v1335_v58  ;;  %v4438_v5 = vpack.c.bf16 %v1360_v63, %v1352_v62  ;;  %v4582_v58 = vpack.c.bf16 %v1426_v51, %v1418_v50  ;;  %v1425_v59 = vld [vmem:[%s9582_s2 + $0xc70] sm:$0xff]  ;;  %v1442_v62 = vld [vmem:[%s9582_s2 + $0xcf8] sm:$0xff] }
 0x233   : > { %4417 = vmatpush1.bf16.msra.mxu0 %v4416_v8  ;;  %v1351_v8 = vld [vmem:[%s9582_s2 + $0xa20] sm:$0xff] }
 0x234   : > { %4545 = vmatpush1.bf16.msra.mxu1 %v4544_v9  ;;  %4419 = vmatprep.subr.bf16.mxu0 %v4418_v10  ;;  %v1359_v9 = vld [vmem:[%s9582_s2 + $0xa60] sm:$0xff]  ;;  %v1353_v10 = vld [vmem:[%s9582_s2 + $0xa30] sm:$0xff] }
 0x235   : > { %4547 = vmatprep.subr.bf16.mxu1 %v4546_v13  ;;  %v1376_v13 = vld [vmem:[%s9582_s2 + $0xae8] sm:$0xff]  ;;  %v4440_v18 = vpack.c.bf16 %v1359_v9, %v1351_v8  ;;  %v4568_v19 = vpack.c.bf16 %v1361_v11, %v1353_v10  ;;  %v4586_v8 = vpack.c.bf16 %v1442_v62, %v1434_v61  ;;  %v1441_v9 = vld [vmem:[%s9582_s2 + $0xcf0] sm:$0xff]  ;;  %v1450_v11 = vld [vmem:[%s9582_s2 + $0xd38] sm:$0xff] }
 0x236   : > { %v4442_v21 = vpack.c.bf16 %v1376_v13, %v1368_v12  ;;  %v1448_v10 = vld [vmem:[%s9582_s2 + $0xd28] sm:$0xff]  ;;  %v1458_v12 = vld [vmem:[%s9582_s2 + $0xd78] sm:$0xff] }
 0x237   : > { %4421 = vmatpush1.bf16.msra.mxu0 %v4420_v23  ;;  %v1367_v23 = vld [vmem:[%s9582_s2 + $0xaa0] sm:$0xff] }
 0x238   : > { %4549 = vmatpush1.bf16.msra.mxu1 %v4548_v24  ;;  %4423 = vmatprep.subr.bf16.mxu0 %v4422_v25  ;;  %v1375_v24 = vld [vmem:[%s9582_s2 + $0xae0] sm:$0xff]  ;;  %v1369_v25 = vld [vmem:[%s9582_s2 + $0xab0] sm:$0xff] }
 0x239   : > { %4551 = vmatprep.subr.bf16.mxu1 %v4550_v29  ;;  %v1392_v29 = vld [vmem:[%s9582_s2 + $0xb68] sm:$0xff]  ;;  %v4444_v32 = vpack.c.bf16 %v1375_v24, %v1367_v23  ;;  %v4572_v33 = vpack.c.bf16 %v1377_v27, %v1369_v25  ;;  %v4590_v23 = vpack.c.bf16 %v1458_v12, %v1450_v11  ;;  %v1457_v24 = vld [vmem:[%s9582_s2 + $0xd70] sm:$0xff]  ;;  %v1466_v27 = vld [vmem:[%s9582_s2 + $0xdb8] sm:$0xff] }
 0x23a   : > { %1930 = vmatmul.mubr.f32.vlgmr.msra.gmra.mrb[6].mxu0 %v6716_v2  ;;  %v4446_v34 = vpack.c.bf16 %v1392_v29, %v1384_v28  ;;  %v1464_v25 = vld [vmem:[%s9582_s2 + $0xda8] sm:$0xff]  ;;  %v1474_v28 = vld [vmem:[%s9582_s2 + $0xdf8] sm:$0xff] }
 0x23b   : > { %2072 = vmatmul.mubr.f32.vlgmr.msra.gmra.mrb[6].mxu1 %v6716_v2  ;;  %4425 = vmatpush1.bf16.msra.mxu0 %v4424_v35  ;;  %v4558_v2 = vpack.c.bf16 %v1330_v44, %v1322_v7  ;;  %v1383_v35 = vld [vmem:[%s9582_s2 + $0xb20] sm:$0xff] }
 0x23c   : > { %4553 = vmatpush1.bf16.msra.mxu1 %v4552_v36  ;;  %4427 = vmatprep.subr.bf16.mxu0 %v4426_v37  ;;  %v1391_v36 = vld [vmem:[%s9582_s2 + $0xb60] sm:$0xff]  ;;  %v1385_v37 = vld [vmem:[%s9582_s2 + $0xb30] sm:$0xff] }
 0x23d   : > { %4555 = vmatprep.subr.bf16.mxu1 %v4554_v6  ;;  %2000 = vmatprep.mubr.f32.mxu0 %v6761_v22  ;;  %v1408_v6 = vld [vmem:[%s9582_s2 + $0xbe8] sm:$0xff]  ;;  %v4448_v43 = vpack.c.bf16 %v1391_v36, %v1383_v35  ;;  %v4576_v7 = vpack.c.bf16 %v1393_v39, %v1385_v37  ;;  %v4594_v35 = vpack.c.bf16 %v1474_v28, %v1466_v27  ;;  %v1473_v36 = vld [vmem:[%s9582_s2 + $0xdf0] sm:$0xff]  ;;  %v1482_v39 = vld [vmem:[%s9582_s2 + $0xe38] sm:$0xff] }
 0x23e   : > { %2142 = vmatprep.mubr.f32.mxu1 %v6761_v22  ;;  %v4562_v22 = vpack.c.bf16 %v1346_v54, %v1338_v53  ;;  %v4450_v44 = vpack.c.bf16 %v1408_v6, %v1400_v40  ;;  %v1480_v37 = vld [vmem:[%s9582_s2 + $0xe28] sm:$0xff]  ;;  %v1490_v40 = vld [vmem:[%s9582_s2 + $0xe78] sm:$0xff] }
 0x23f   : > { %4429 = vmatpush1.bf16.msra.mxu0 %v4428_v45  ;;  %v1399_v45 = vld [vmem:[%s9582_s2 + $0xba0] sm:$0xff] }
 0x240   : > { %4557 = vmatpush1.bf16.msra.mxu1 %v4556_v46  ;;  %4431 = vmatprep.subr.bf16.mxu0 %v4430_v47  ;;  %v1407_v46 = vld [vmem:[%s9582_s2 + $0xbe0] sm:$0xff]  ;;  %v1401_v47 = vld [vmem:[%s9582_s2 + $0xbb0] sm:$0xff] }
 0x241   : > { %4559 = vmatprep.subr.bf16.mxu1 %v4558_v2  ;;  %v1424_v2 = vld [vmem:[%s9582_s2 + $0xc68] sm:$0xff]  ;;  %v4452_v52 = vpack.c.bf16 %v1407_v46, %v1399_v45  ;;  %v4580_v53 = vpack.c.bf16 %v1409_v20, %v1401_v47  ;;  %v4598_v45 = vpack.c.bf16 %v1490_v40, %v1482_v39  ;;  %v1489_v46 = vld [vmem:[%s9582_s2 + $0xe70] sm:$0xff]  ;;  %v1498_v20 = vld [vmem:[%s9582_s2 + $0xeb8] sm:$0xff] }
 0x242   : > { %v4454_v54 = vpack.c.bf16 %v1424_v2, %v1416_v49  ;;  %v1496_v47 = vld [vmem:[%s9582_s2 + $0xea8] sm:$0xff]  ;;  %v1506_v49 = vld [vmem:[%s9582_s2 + $0xef8] sm:$0xff] }
 0x243   : > { %4433 = vmatpush1.bf16.msra.mxu0 %v4432_v55  ;;  %v1415_v55 = vld [vmem:[%s9582_s2 + $0xc20] sm:$0xff] }
 0x244   : > { %4561 = vmatpush1.bf16.msra.mxu1 %v4560_v56  ;;  %4435 = vmatprep.subr.bf16.mxu0 %v4434_v57  ;;  %v1423_v56 = vld [vmem:[%s9582_s2 + $0xc60] sm:$0xff]  ;;  %v1417_v57 = vld [vmem:[%s9582_s2 + $0xc30] sm:$0xff] }
 0x245   : > { %4563 = vmatprep.subr.bf16.mxu1 %v4562_v22  ;;  %v1440_v22 = vld [vmem:[%s9582_s2 + $0xce8] sm:$0xff]  ;;  %v4456_v63 = vpack.c.bf16 %v1423_v56, %v1415_v55  ;;  %v4584_v0 = vpack.c.bf16 %v1425_v59, %v1417_v57  ;;  %v4602_v55 = vpack.c.bf16 %v1506_v49, %v1498_v20  ;;  %v1505_v56 = vld [vmem:[%s9582_s2 + $0xef0] sm:$0xff]  ;;  %v1514_v59 = vld [vmem:[%s9582_s2 + $0xf38] sm:$0xff] }
 0x246   : > { %v4458_v1 = vpack.c.bf16 %v1440_v22, %v1432_v60  ;;  %v1512_v57 = vld [vmem:[%s9582_s2 + $0xf28] sm:$0xff]  ;;  %v1522_v60 = vld [vmem:[%s9582_s2 + $0xf78] sm:$0xff] }
 0x247   : > { %4437 = vmatpush1.bf16.msra.mxu0 %v4436_v3  ;;  %v1431_v3 = vld [vmem:[%s9582_s2 + $0xca0] sm:$0xff] }
 0x248   : > { %4565 = vmatpush1.bf16.msra.mxu1 %v4564_v4  ;;  %4439 = vmatprep.subr.bf16.mxu0 %v4438_v5  ;;  %v1439_v4 = vld [vmem:[%s9582_s2 + $0xce0] sm:$0xff]  ;;  %v1433_v5 = vld [vmem:[%s9582_s2 + $0xcb0] sm:$0xff] }
 0x249   : > { %4567 = vmatprep.subr.bf16.mxu1 %v4566_v17  ;;  %v1456_v17 = vld [vmem:[%s9582_s2 + $0xd68] sm:$0xff]  ;;  %v4460_v13 = vpack.c.bf16 %v1439_v4, %v1431_v3  ;;  %v4588_v14 = vpack.c.bf16 %v1441_v9, %v1433_v5  ;;  %v4606_v3 = vpack.c.bf16 %v1522_v60, %v1514_v59  ;;  %v1521_v4 = vld [vmem:[%s9582_s2 + $0xf70] sm:$0xff]  ;;  %v1530_v9 = vld [vmem:[%s9582_s2 + $0xfb8] sm:$0xff] }
 0x24a   : > { %v4462_v16 = vpack.c.bf16 %v1456_v17, %v1448_v10  ;;  %v1528_v5 = vld [vmem:[%s9582_s2 + $0xfa8] sm:$0xff]  ;;  %v1538_v10 = vld [vmem:[%s9582_s2 + $0xff8] sm:$0xff] }
 0x24b   : > { %4441 = vmatpush1.bf16.msra.mxu0 %v4440_v18  ;;  %v1447_v18 = vld [vmem:[%s9582_s2 + $0xd20] sm:$0xff] }
 0x24c   : > { %4569 = vmatpush1.bf16.msra.mxu1 %v4568_v19  ;;  %4443 = vmatprep.subr.bf16.mxu0 %v4442_v21  ;;  %v1455_v19 = vld [vmem:[%s9582_s2 + $0xd60] sm:$0xff]  ;;  %v1449_v21 = vld [vmem:[%s9582_s2 + $0xd30] sm:$0xff] }
 0x24d   : > { %4571 = vmatprep.subr.bf16.mxu1 %v4570_v26  ;;  %v1472_v26 = vld [vmem:[%s9582_s2 + $0xde8] sm:$0xff]  ;;  %v4464_v29 = vpack.c.bf16 %v1455_v19, %v1447_v18  ;;  %v4592_v30 = vpack.c.bf16 %v1457_v24, %v1449_v21  ;;  %v4610_v18 = vpack.c.bf16 %v1538_v10, %v1530_v9  ;;  %v1537_v19 = vld [vmem:[%s9582_s2 + $0xff0] sm:$0xff]  ;;  %v2248_v24 = vld [vmem:[%s9584_s4 + $0x18] sm:$0xff] }
 0x24e   : > { %v4466_v31 = vpack.c.bf16 %v1472_v26, %v1464_v25  ;;  %v2246_v21 = vld [vmem:[%s9584_s4 + $0x8] sm:$0xff]  ;;  %v2256_v25 = vld [vmem:[%s9584_s4 + $0x58] sm:$0xff] }
 0x24f   : > { %4445 = vmatpush1.bf16.msra.mxu0 %v4444_v32  ;;  %v1463_v32 = vld [vmem:[%s9582_s2 + $0xda0] sm:$0xff] }
 0x250   : > { %4573 = vmatpush1.bf16.msra.mxu1 %v4572_v33  ;;  %4447 = vmatprep.subr.bf16.mxu0 %v4446_v34  ;;  %v1471_v33 = vld [vmem:[%s9582_s2 + $0xde0] sm:$0xff]  ;;  %v1465_v34 = vld [vmem:[%s9582_s2 + $0xdb0] sm:$0xff] }
 0x251   : > { %4575 = vmatprep.subr.bf16.mxu1 %v4574_v38  ;;  %v1488_v38 = vld [vmem:[%s9582_s2 + $0xe68] sm:$0xff]  ;;  %v4468_v6 = vpack.c.bf16 %v1471_v33, %v1463_v32  ;;  %v4596_v41 = vpack.c.bf16 %v1473_v36, %v1465_v34  ;;  %v4742_v32 = vpack.c.bf16 %v2256_v25, %v2248_v24  ;;  %v2255_v33 = vld [vmem:[%s9584_s4 + $0x50] sm:$0xff]  ;;  %v2264_v36 = vld [vmem:[%s9584_s4 + $0x98] sm:$0xff] }
 0x252   : > { %v4470_v42 = vpack.c.bf16 %v1488_v38, %v1480_v37  ;;  %v2262_v34 = vld [vmem:[%s9584_s4 + $0x88] sm:$0xff]  ;;  %v2272_v37 = vld [vmem:[%s9584_s4 + $0xd8] sm:$0xff] }
 0x253   : > { %4449 = vmatpush1.bf16.msra.mxu0 %v4448_v43  ;;  %v1479_v43 = vld [vmem:[%s9582_s2 + $0xe20] sm:$0xff] }
 0x254   : > { %4577 = vmatpush1.bf16.msra.mxu1 %v4576_v7  ;;  %4451 = vmatprep.subr.bf16.mxu0 %v4450_v44  ;;  %v1487_v7 = vld [vmem:[%s9582_s2 + $0xe60] sm:$0xff]  ;;  %v1481_v44 = vld [vmem:[%s9582_s2 + $0xe30] sm:$0xff] }
 0x255   : > { %4579 = vmatprep.subr.bf16.mxu1 %v4578_v48  ;;  %v1504_v48 = vld [vmem:[%s9582_s2 + $0xee8] sm:$0xff]  ;;  %v4472_v2 = vpack.c.bf16 %v1487_v7, %v1479_v43  ;;  %v4600_v50 = vpack.c.bf16 %v1489_v46, %v1481_v44  ;;  %v4746_v43 = vpack.c.bf16 %v2272_v37, %v2264_v36  ;;  %v2271_v7 = vld [vmem:[%s9584_s4 + $0xd0] sm:$0xff] }
 0x256   : > { %v4474_v51 = vpack.c.bf16 %v1504_v48, %v1496_v47  ;;  %v2278_v44 = vld [vmem:[%s9584_s4 + $0x108] sm:$0xff]  ;;  %v2280_v47 = vld [vmem:[%s9584_s4 + $0x118] sm:$0xff] }
 0x257   : > { %4453 = vmatpush1.bf16.msra.mxu0 %v4452_v52  ;;  %v1495_v52 = vld [vmem:[%s9582_s2 + $0xea0] sm:$0xff]  ;;  %v5327_v46 = vld.sshfl [vmem:[#allocation4] sm:$0x33 pattern:$0x76325410]  ;;  %v2288_v48 = vld [vmem:[%s9584_s4 + $0x158] sm:$0xff] }
 0x258   : > { %4581 = vmatpush1.bf16.msra.mxu1 %v4580_v53  ;;  %4455 = vmatprep.subr.bf16.mxu0 %v4454_v54  ;;  %v1503_v53 = vld [vmem:[%s9582_s2 + $0xee0] sm:$0xff]  ;;  %v1497_v54 = vld [vmem:[%s9582_s2 + $0xeb0] sm:$0xff] }
 0x259   : > { %4583 = vmatprep.subr.bf16.mxu1 %v4582_v58  ;;  %v1520_v58 = vld [vmem:[%s9582_s2 + $0xf68] sm:$0xff]  ;;  %v4476_v22 = vpack.c.bf16 %v1503_v53, %v1495_v52  ;;  %v4604_v61 = vpack.c.bf16 %v1505_v56, %v1497_v54  ;;  %v2279_v52 = vld [vmem:[%s9584_s4 + $0x110] sm:$0xff]  ;;  %v4750_v53 = vpack.c.bf16 %v2288_v48, %v2280_v47 }
 0x25a   : > { %v4478_v62 = vpack.c.bf16 %v1520_v58, %v1512_v57  ;;  %v2287_v54 = vld [vmem:[%s9584_s4 + $0x150] sm:$0xff]  ;;  %v2302_v56 = vld [vmem:[%s9584_s4 + $0x1c8] sm:$0xff]  ;;  %v2296_v57 = vld [vmem:[%s9584_s4 + $0x198] sm:$0xff] }
 0x25b   : > { %4457 = vmatpush1.bf16.msra.mxu0 %v4456_v63  ;;  %v1511_v63 = vld [vmem:[%s9582_s2 + $0xf20] sm:$0xff]  ;;  %v2304_v58 = vld [vmem:[%s9584_s4 + $0x1d8] sm:$0xff]  ;;  %v4752_v60 = vpack.c.bf16 %v2287_v54, %v2279_v52  ;;  %v2374_v54 = vld [vmem:[%s9584_s4 + $0x408] sm:$0xff] }
 0x25c   : > { %4585 = vmatpush1.bf16.msra.mxu1 %v4584_v0  ;;  %4459 = vmatprep.subr.bf16.mxu0 %v4458_v1  ;;  %v1519_v0 = vld [vmem:[%s9582_s2 + $0xf60] sm:$0xff]  ;;  %v1513_v1 = vld [vmem:[%s9582_s2 + $0xf30] sm:$0xff] }
 0x25d   : > { %4587 = vmatprep.subr.bf16.mxu1 %v4586_v8  ;;  %v1536_v8 = vld [vmem:[%s9582_s2 + $0xfe8] sm:$0xff]  ;;  %v4480_v17 = vpack.c.bf16 %v1519_v0, %v1511_v63  ;;  %v4608_v11 = vpack.c.bf16 %v1521_v4, %v1513_v1  ;;  %v2295_v63 = vld [vmem:[%s9584_s4 + $0x190] sm:$0xff]  ;;  %v4754_v0 = vpack.c.bf16 %v2304_v58, %v2296_v57 }
 0x25e   : > { %v4482_v12 = vpack.c.bf16 %v1536_v8, %v1528_v5  ;;  %v2303_v1 = vld [vmem:[%s9584_s4 + $0x1d0] sm:$0xff]  ;;  %v2318_v4 = vld [vmem:[%s9584_s4 + $0x248] sm:$0xff]  ;;  %v2312_v5 = vld [vmem:[%s9584_s4 + $0x218] sm:$0xff] }
 0x25f   : > { %4461 = vmatpush1.bf16.msra.mxu0 %v4460_v13  ;;  %v1527_v13 = vld [vmem:[%s9582_s2 + $0xfa0] sm:$0xff]  ;;  %v2320_v8 = vld [vmem:[%s9584_s4 + $0x258] sm:$0xff]  ;;  %v4756_v10 = vpack.c.bf16 %v2303_v1, %v2295_v63  ;;  %v2375_v1 = vld [vmem:[%s9584_s4 + $0x410] sm:$0xff] }
 0x260   : > { %4589 = vmatpush1.bf16.msra.mxu1 %v4588_v14  ;;  %4463 = vmatprep.subr.bf16.mxu0 %v4462_v16  ;;  %v1535_v14 = vld [vmem:[%s9582_s2 + $0xfe0] sm:$0xff]  ;;  %v1529_v16 = vld [vmem:[%s9582_s2 + $0xfb0] sm:$0xff] }
 0x261   : > { %4591 = vmatprep.subr.bf16.mxu1 %v4590_v23  ;;  %v2254_v23 = vld [vmem:[%s9584_s4 + $0x48] sm:$0xff]  ;;  %v4484_v26 = vpack.c.bf16 %v1535_v14, %v1527_v13  ;;  %v4612_v27 = vpack.c.bf16 %v1537_v19, %v1529_v16  ;;  %v2311_v13 = vld [vmem:[%s9584_s4 + $0x210] sm:$0xff]  ;;  %v4758_v14 = vpack.c.bf16 %v2320_v8, %v2312_v5 }
 0x262   : > { %v4614_v28 = vpack.c.bf16 %v2254_v23, %v2246_v21  ;;  %v2319_v16 = vld [vmem:[%s9584_s4 + $0x250] sm:$0xff]  ;;  %v2334_v19 = vld [vmem:[%s9584_s4 + $0x2c8] sm:$0xff]  ;;  %v2328_v21 = vld [vmem:[%s9584_s4 + $0x298] sm:$0xff] }
 0x263   : > { %4465 = vmatpush1.bf16.msra.mxu0 %v4464_v29  ;;  %v2245_v29 = vld [vmem:[%s9584_s4] sm:$0xff]  ;;  %v2336_v23 = vld [vmem:[%s9584_s4 + $0x2d8] sm:$0xff]  ;;  %v4760_v25 = vpack.c.bf16 %v2319_v16, %v2311_v13  ;;  %v2390_v8 = vld [vmem:[%s9584_s4 + $0x488] sm:$0xff] }
 0x264   : > { %4593 = vmatpush1.bf16.msra.mxu1 %v4592_v30  ;;  %4467 = vmatprep.subr.bf16.mxu0 %v4466_v31  ;;  %v2253_v30 = vld [vmem:[%s9584_s4 + $0x40] sm:$0xff]  ;;  %v2247_v31 = vld [vmem:[%s9584_s4 + $0x10] sm:$0xff] }
 0x265   : > { %4595 = vmatprep.subr.bf16.mxu1 %v4594_v35  ;;  %v2270_v35 = vld [vmem:[%s9584_s4 + $0xc8] sm:$0xff]  ;;  %v4616_v38 = vpack.c.bf16 %v2253_v30, %v2245_v29  ;;  %v4744_v39 = vpack.c.bf16 %v2255_v33, %v2247_v31  ;;  %v2327_v29 = vld [vmem:[%s9584_s4 + $0x290] sm:$0xff]  ;;  %v4762_v30 = vpack.c.bf16 %v2336_v23, %v2328_v21  ;;  %v2389_v13 = vld [vmem:[%s9584_s4 + $0x480] sm:$0xff] }
 0x266   : > { %v4618_v40 = vpack.c.bf16 %v2270_v35, %v2262_v34  ;;  %v2335_v31 = vld [vmem:[%s9584_s4 + $0x2d0] sm:$0xff]  ;;  %v2350_v33 = vld [vmem:[%s9584_s4 + $0x348] sm:$0xff]  ;;  %v2344_v34 = vld [vmem:[%s9584_s4 + $0x318] sm:$0xff] }
 0x267   : > { %4469 = vmatpush1.bf16.msra.mxu0 %v4468_v6  ;;  %v2261_v6 = vld [vmem:[%s9584_s4 + $0x80] sm:$0xff]  ;;  %v2352_v35 = vld [vmem:[%s9584_s4 + $0x358] sm:$0xff]  ;;  %v4764_v37 = vpack.c.bf16 %v2335_v31, %v2327_v29  ;;  %v2391_v16 = vld [vmem:[%s9584_s4 + $0x490] sm:$0xff] }
 0x268   : > { %4597 = vmatpush1.bf16.msra.mxu1 %v4596_v41  ;;  %4471 = vmatprep.subr.bf16.mxu0 %v4470_v42  ;;  %v2269_v41 = vld [vmem:[%s9584_s4 + $0xc0] sm:$0xff]  ;;  %v2263_v42 = vld [vmem:[%s9584_s4 + $0x90] sm:$0xff]  ;;  %v2406_v23 = vld [vmem:[%s9584_s4 + $0x508] sm:$0xff] }
 0x269   : > { %4599 = vmatprep.subr.bf16.mxu1 %v4598_v45  ;;  %v2286_v45 = vld [vmem:[%s9584_s4 + $0x148] sm:$0xff]  ;;  %v4620_v20 = vpack.c.bf16 %v2269_v41, %v2261_v6  ;;  %v4748_v49 = vpack.c.bf16 %v2271_v7, %v2263_v42  ;;  %v2343_v6 = vld [vmem:[%s9584_s4 + $0x310] sm:$0xff]  ;;  %v4766_v41 = vpack.c.bf16 %v2352_v35, %v2344_v34  ;;  %v2413_v29 = vld [vmem:[%s9584_s4 + $0x540] sm:$0xff] }
 0x26a   : > { %v2351_v42 = vld [vmem:[%s9584_s4 + $0x350] sm:$0xff]  ;;  %v2366_v7 = vld [vmem:[%s9584_s4 + $0x3c8] sm:$0xff] }
 0x26b   : > { %4473 = vmatpush1.bf16.msra.mxu0 %v4472_v2  ;;  %v4622_v2 = vpack.c.bf16 %v2286_v45, %v2278_v44  ;;  %v2360_v44 = vld [vmem:[%s9584_s4 + $0x398] sm:$0xff]  ;;  %v4768_v47 = vpack.c.bf16 %v2351_v42, %v2343_v6  ;;  %v2422_v35 = vld [vmem:[%s9584_s4 + $0x588] sm:$0xff]  ;;  %v2429_v6 = vld [vmem:[%s9584_s4 + $0x5c0] sm:$0xff] }
 0x26c   : > { %4601 = vmatpush1.bf16.msra.mxu1 %v4600_v50  ;;  %4475 = vmatprep.subr.bf16.mxu0 %v4474_v51  ;;  %v2277_v50 = vld [vmem:[%s9584_s4 + $0x100] sm:$0xff]  ;;  %v2368_v45 = vld [vmem:[%s9584_s4 + $0x3d8] sm:$0xff] }
 0x26d   : > { %4603 = vmatprep.subr.bf16.mxu1 %v4602_v55  ;;  %v2285_v51 = vld [vmem:[%s9584_s4 + $0x140] sm:$0xff]  ;;  %v2294_v55 = vld [vmem:[%s9584_s4 + $0x188] sm:$0xff] }
 0x26e   : > { %v4624_v59 = vpack.c.bf16 %v2285_v51, %v2277_v50  ;;  %v2359_v50 = vld [vmem:[%s9584_s4 + $0x390] sm:$0xff] }
 0x26f   : > { %4477 = vmatpush1.bf16.msra.mxu0 %v4476_v22  ;;  %v4626_v22 = vpack.c.bf16 %v2302_v56, %v2294_v55  ;;  %v2367_v51 = vld [vmem:[%s9584_s4 + $0x3d0] sm:$0xff]  ;;  %v2382_v55 = vld [vmem:[%s9584_s4 + $0x448] sm:$0xff]  ;;  %v2376_v56 = vld [vmem:[%s9584_s4 + $0x418] sm:$0xff] }
 0x270   : > { %4605 = vmatpush1.bf16.msra.mxu1 %v4604_v61  ;;  %4479 = vmatprep.subr.bf16.mxu0 %v4478_v62  ;;  %v2293_v61 = vld [vmem:[%s9584_s4 + $0x180] sm:$0xff] }
 0x271   : > { %4607 = vmatprep.subr.bf16.mxu1 %v4606_v3  ;;  %v2301_v62 = vld [vmem:[%s9584_s4 + $0x1c0] sm:$0xff]  ;;  %v2310_v3 = vld [vmem:[%s9584_s4 + $0x208] sm:$0xff] }
 0x272   : > { %v4628_v9 = vpack.c.bf16 %v2301_v62, %v2293_v61 }
 0x273   : > { %4481 = vmatpush1.bf16.msra.mxu0 %v4480_v17  ;;  %v4630_v17 = vpack.c.bf16 %v2318_v4, %v2310_v3  ;;  %v2383_v3 = vld [vmem:[%s9584_s4 + $0x450] sm:$0xff] }
 0x274   : > { %4609 = vmatpush1.bf16.msra.mxu1 %v4608_v11  ;;  %4483 = vmatprep.subr.bf16.mxu0 %v4482_v12  ;;  %v2309_v11 = vld [vmem:[%s9584_s4 + $0x200] sm:$0xff]  ;;  %v4776_v5 = vpack.c.bf16 %v2383_v3, %v2375_v1 }
 0x275   : > { %4611 = vmatprep.subr.bf16.mxu1 %v4610_v18  ;;  %v2317_v12 = vld [vmem:[%s9584_s4 + $0x240] sm:$0xff]  ;;  %v2326_v18 = vld [vmem:[%s9584_s4 + $0x288] sm:$0xff] }
 0x276   : > { %v4632_v24 = vpack.c.bf16 %v2317_v12, %v2309_v11  ;;  %v2400_v11 = vld [vmem:[%s9584_s4 + $0x4d8] sm:$0xff] }
 0x277   : > { %4485 = vmatpush1.bf16.msra.mxu0 %v4484_v26  ;;  %v4634_v26 = vpack.c.bf16 %v2334_v19, %v2326_v18  ;;  %v2399_v19 = vld [vmem:[%s9584_s4 + $0x4d0] sm:$0xff] }
 0x278   : > { %4613 = vmatpush1.bf16.msra.mxu1 %v4612_v27  ;;  %4615 = vmatprep.subr.bf16.mxu0 %v4614_v28  ;;  %v2325_v27 = vld [vmem:[%s9584_s4 + $0x280] sm:$0xff]  ;;  %v4780_v21 = vpack.c.bf16 %v2399_v19, %v2391_v16  ;;  %v2479_v19 = vld [vmem:[%s9584_s4 + $0x750] sm:$0xff] }
 0x279   : > { %4743 = vmatprep.subr.bf16.mxu1 %v4742_v32  ;;  %v2333_v28 = vld [vmem:[%s9584_s4 + $0x2c0] sm:$0xff]  ;;  %v2342_v32 = vld [vmem:[%s9584_s4 + $0x308] sm:$0xff] }
 0x27a   : > { %2001 = vmatmul.mubr.f32.vlgmr.msra.gmra.mrb[6].mxu0 %v5327_v46  ;;  %v4636_v36 = vpack.c.bf16 %v2333_v28, %v2325_v27  ;;  %v2416_v27 = vld [vmem:[%s9584_s4 + $0x558] sm:$0xff]  ;;  %v2405_v28 = vld [vmem:[%s9584_s4 + $0x500] sm:$0xff] }
 0x27b   : > { %2143 = vmatmul.mubr.f32.vlgmr.msra.gmra.mrb[6].mxu1 %v5327_v46  ;;  %4617 = vmatpush1.bf16.msra.mxu0 %v4616_v38  ;;  %v4638_v38 = vpack.c.bf16 %v2350_v33, %v2342_v32  ;;  %v4656_v31 = vpack.c.bf16 %v2413_v29, %v2405_v28  ;;  %v2407_v32 = vld [vmem:[%s9584_s4 + $0x510] sm:$0xff]  ;;  %v2477_v16 = vld [vmem:[%s9584_s4 + $0x740] sm:$0xff] }
 0x27c   : > { %4745 = vmatpush1.bf16.msra.mxu1 %v4744_v39  ;;  %4619 = vmatprep.subr.bf16.mxu0 %v4618_v40  ;;  %v2341_v39 = vld [vmem:[%s9584_s4 + $0x300] sm:$0xff]  ;;  %v2415_v33 = vld [vmem:[%s9584_s4 + $0x550] sm:$0xff] }
 0x27d   : > { %4747 = vmatprep.subr.bf16.mxu1 %v4746_v43  ;;  %v2349_v40 = vld [vmem:[%s9584_s4 + $0x340] sm:$0xff]  ;;  %v2358_v43 = vld [vmem:[%s9584_s4 + $0x388] sm:$0xff]  ;;  %v4784_v34 = vpack.c.bf16 %v2415_v33, %v2407_v32  ;;  %v2487_v32 = vld [vmem:[%s9584_s4 + $0x790] sm:$0xff] }
 0x27e   : > { %v4640_v46 = vpack.c.bf16 %v2349_v40, %v2341_v39  ;;  %v4642_v48 = vpack.c.bf16 %v2366_v7, %v2358_v43  ;;  %v2432_v39 = vld [vmem:[%s9584_s4 + $0x5d8] sm:$0xff]  ;;  %v2421_v40 = vld [vmem:[%s9584_s4 + $0x580] sm:$0xff]  ;;  %v2423_v43 = vld [vmem:[%s9584_s4 + $0x590] sm:$0xff] }
 0x27f   : > { %4621 = vmatpush1.bf16.msra.mxu0 %v4620_v20  ;;  %v2357_v20 = vld [vmem:[%s9584_s4 + $0x380] sm:$0xff]  ;;  %v4660_v42 = vpack.c.bf16 %v2429_v6, %v2421_v40  ;;  %v2431_v7 = vld [vmem:[%s9584_s4 + $0x5d0] sm:$0xff]  ;;  %v2512_v40 = vld [vmem:[%s9584_s4 + $0x858] sm:$0xff] }
 0x280   : > { %4749 = vmatpush1.bf16.msra.mxu1 %v4748_v49  ;;  %4623 = vmatprep.subr.bf16.mxu0 %v4622_v2  ;;  %v2365_v49 = vld [vmem:[%s9584_s4 + $0x3c0] sm:$0xff]  ;;  %v4770_v2 = vpack.c.bf16 %v2368_v45, %v2360_v44  ;;  %v4788_v44 = vpack.c.bf16 %v2431_v7, %v2423_v43  ;;  %v2438_v45 = vld [vmem:[%s9584_s4 + $0x608] sm:$0xff]  ;;  %v2495_v33 = vld [vmem:[%s9584_s4 + $0x7d0] sm:$0xff]  ;;  %v1551_v43 = vsub.s32 2, %v6696_v15  ;;  %v1547_v7 = vsub.s32 1, %v6696_v15 }
 0x281   : > { %4751 = vmatprep.subr.bf16.mxu1 %v4750_v53  ;;  %v4644_v52 = vpack.c.bf16 %v2365_v49, %v2357_v20  ;;  %v4772_v53 = vpack.c.bf16 %v2367_v51, %v2359_v50  ;;  %v2448_v20 = vld [vmem:[%s9584_s4 + $0x658] sm:$0xff]  ;;  %v2437_v49 = vld [vmem:[%s9584_s4 + $0x600] sm:$0xff] }
 0x282   : > { %v2485_v28 = vld [vmem:[%s9584_s4 + $0x780] sm:$0xff] }
 0x283   : > { %4625 = vmatpush1.bf16.msra.mxu0 %v4624_v59  ;;  %v4646_v59 = vpack.c.bf16 %v2382_v55, %v2374_v54  ;;  %v2454_v55 = vld [vmem:[%s9584_s4 + $0x688] sm:$0xff] }
 0x284   : > { %4753 = vmatpush1.bf16.msra.mxu1 %v4752_v60  ;;  %4627 = vmatprep.subr.bf16.mxu0 %v4626_v22  ;;  %v2384_v60 = vld [vmem:[%s9584_s4 + $0x458] sm:$0xff]  ;;  %v2373_v22 = vld [vmem:[%s9584_s4 + $0x400] sm:$0xff] }
 0x285   : > { %4755 = vmatprep.subr.bf16.mxu1 %v4754_v0  ;;  %v4774_v63 = vpack.c.bf16 %v2384_v60, %v2376_v56  ;;  %v2381_v0 = vld [vmem:[%s9584_s4 + $0x440] sm:$0xff]  ;;  %v2462_v56 = vld [vmem:[%s9584_s4 + $0x6c8] sm:$0xff] }
 0x286   : > { %v4648_v4 = vpack.c.bf16 %v2381_v0, %v2373_v22  ;;  %v4666_v60 = vpack.c.bf16 %v2462_v56, %v2454_v55  ;;  %v2464_v22 = vld [vmem:[%s9584_s4 + $0x6d8] sm:$0xff]  ;;  %v2461_v0 = vld [vmem:[%s9584_s4 + $0x6c0] sm:$0xff] }
 0x287   : > { %4629 = vmatpush1.bf16.msra.mxu0 %v4628_v9  ;;  %v2398_v9 = vld [vmem:[%s9584_s4 + $0x4c8] sm:$0xff] }
 0x288   : > { %4757 = vmatpush1.bf16.msra.mxu1 %v4756_v10  ;;  %4631 = vmatprep.subr.bf16.mxu0 %v4630_v17  ;;  %v4650_v10 = vpack.c.bf16 %v2398_v9, %v2390_v8  ;;  %v2392_v17 = vld [vmem:[%s9584_s4 + $0x498] sm:$0xff]  ;;  %v2470_v8 = vld [vmem:[%s9584_s4 + $0x708] sm:$0xff] }
 0x289   : > { %4759 = vmatprep.subr.bf16.mxu1 %v4758_v14  ;;  %v4778_v12 = vpack.c.bf16 %v2400_v11, %v2392_v17  ;;  %v2397_v14 = vld [vmem:[%s9584_s4 + $0x4c0] sm:$0xff]  ;;  %v2472_v17 = vld [vmem:[%s9584_s4 + $0x718] sm:$0xff] }
 0x28a   : > { %v4652_v18 = vpack.c.bf16 %v2397_v14, %v2389_v13  ;;  %v2480_v11 = vld [vmem:[%s9584_s4 + $0x758] sm:$0xff]  ;;  %v2469_v14 = vld [vmem:[%s9584_s4 + $0x700] sm:$0xff] }
 0x28b   : > { %4633 = vmatpush1.bf16.msra.mxu0 %v4632_v24  ;;  %v2414_v24 = vld [vmem:[%s9584_s4 + $0x548] sm:$0xff]  ;;  %v4798_v13 = vpack.c.bf16 %v2480_v11, %v2472_v17 }
 0x28c   : > { %4761 = vmatpush1.bf16.msra.mxu1 %v4760_v25  ;;  %4635 = vmatprep.subr.bf16.mxu0 %v4634_v26  ;;  %v2408_v25 = vld [vmem:[%s9584_s4 + $0x518] sm:$0xff]  ;;  %v4654_v26 = vpack.c.bf16 %v2414_v24, %v2406_v23  ;;  %v2494_v23 = vld [vmem:[%s9584_s4 + $0x7c8] sm:$0xff]  ;;  %v4672_v24 = vpack.c.bf16 %v2477_v16, %v2469_v14 }
 0x28d   : > { %4763 = vmatprep.subr.bf16.mxu1 %v4762_v30  ;;  %v4782_v30 = vpack.c.bf16 %v2416_v27, %v2408_v25  ;;  %v2496_v27 = vld [vmem:[%s9584_s4 + $0x7d8] sm:$0xff] }
 0x28f   : > { %4637 = vmatpush1.bf16.msra.mxu0 %v4636_v36  ;;  %v2430_v36 = vld [vmem:[%s9584_s4 + $0x5c8] sm:$0xff] }
 0x290   : > { %4765 = vmatpush1.bf16.msra.mxu1 %v4764_v37  ;;  %4639 = vmatprep.subr.bf16.mxu0 %v4638_v38  ;;  %v2424_v37 = vld [vmem:[%s9584_s4 + $0x598] sm:$0xff]  ;;  %v4658_v38 = vpack.c.bf16 %v2430_v36, %v2422_v35  ;;  %v4804_v35 = vpack.c.bf16 %v2495_v33, %v2487_v32  ;;  %v2502_v36 = vld [vmem:[%s9584_s4 + $0x808] sm:$0xff] }
 0x291   : > { %4767 = vmatprep.subr.bf16.mxu1 %v4766_v41  ;;  %v4786_v41 = vpack.c.bf16 %v2432_v39, %v2424_v37  ;;  %v2510_v37 = vld [vmem:[%s9584_s4 + $0x848] sm:$0xff] }
 0x292   : > { %v4678_v39 = vpack.c.bf16 %v2510_v37, %v2502_v36 }
 0x293   : > { %4641 = vmatpush1.bf16.msra.mxu0 %v4640_v46  ;;  %v2446_v46 = vld [vmem:[%s9584_s4 + $0x648] sm:$0xff] }
 0x294   : > { %4769 = vmatpush1.bf16.msra.mxu1 %v4768_v47  ;;  %4643 = vmatprep.subr.bf16.mxu0 %v4642_v48  ;;  %v2440_v47 = vld [vmem:[%s9584_s4 + $0x618] sm:$0xff]  ;;  %v4662_v48 = vpack.c.bf16 %v2446_v46, %v2438_v45 }
 0x295   : > { %4771 = vmatprep.subr.bf16.mxu1 %v4770_v2  ;;  %v2445_v2 = vld [vmem:[%s9584_s4 + $0x640] sm:$0xff]  ;;  %v4790_v50 = vpack.c.bf16 %v2448_v20, %v2440_v47 }
 0x296   : > { %v4664_v51 = vpack.c.bf16 %v2445_v2, %v2437_v49 }
 0x297   : > { %4645 = vmatpush1.bf16.msra.mxu0 %v4644_v52  ;;  %v2439_v52 = vld [vmem:[%s9584_s4 + $0x610] sm:$0xff] }
 0x298   : > { %4773 = vmatpush1.bf16.msra.mxu1 %v4772_v53  ;;  %4647 = vmatprep.subr.bf16.mxu0 %v4646_v59  ;;  %v2447_v53 = vld [vmem:[%s9584_s4 + $0x650] sm:$0xff]  ;;  %v2456_v59 = vld [vmem:[%s9584_s4 + $0x698] sm:$0xff] }
 0x299   : > { %4775 = vmatprep.subr.bf16.mxu1 %v4774_v63  ;;  %v4792_v54 = vpack.c.bf16 %v2447_v53, %v2439_v52  ;;  %v2453_v63 = vld [vmem:[%s9584_s4 + $0x680] sm:$0xff]  ;;  %v4794_v1 = vpack.c.bf16 %v2464_v22, %v2456_v59  ;;  %v1559_v59 = vsub.s32 4, %v6696_v15 }
 0x29a   : > { %v4668_v3 = vpack.c.bf16 %v2461_v0, %v2453_v63 }
 0x29b   : > { %4649 = vmatpush1.bf16.msra.mxu0 %v4648_v4  ;;  %v2455_v4 = vld [vmem:[%s9584_s4 + $0x690] sm:$0xff] }
 0x29c   : > { %4777 = vmatpush1.bf16.msra.mxu1 %v4776_v5  ;;  %4651 = vmatprep.subr.bf16.mxu0 %v4650_v10  ;;  %v2463_v5 = vld [vmem:[%s9584_s4 + $0x6d0] sm:$0xff]  ;;  %v2478_v10 = vld [vmem:[%s9584_s4 + $0x748] sm:$0xff] }
 0x29d   : > { %4779 = vmatprep.subr.bf16.mxu1 %v4778_v12  ;;  %v4796_v9 = vpack.c.bf16 %v2463_v5, %v2455_v4  ;;  %v4670_v12 = vpack.c.bf16 %v2478_v10, %v2470_v8 }
 0x29f   : > { %4653 = vmatpush1.bf16.msra.mxu0 %v4652_v18  ;;  %v2471_v18 = vld [vmem:[%s9584_s4 + $0x710] sm:$0xff] }
 0x2a0   : > { %4781 = vmatpush1.bf16.msra.mxu1 %v4780_v21  ;;  %4655 = vmatprep.subr.bf16.mxu0 %v4654_v26  ;;  %v2486_v21 = vld [vmem:[%s9584_s4 + $0x788] sm:$0xff]  ;;  %v4800_v25 = vpack.c.bf16 %v2479_v19, %v2471_v18  ;;  %v2488_v26 = vld [vmem:[%s9584_s4 + $0x798] sm:$0xff] }
 0x2a1   : > { %4783 = vmatprep.subr.bf16.mxu1 %v4782_v30  ;;  %v4674_v29 = vpack.c.bf16 %v2494_v23, %v2486_v21  ;;  %v4802_v30 = vpack.c.bf16 %v2496_v27, %v2488_v26  ;;  %v3738_v21 = vld.sshfl [vmem:[#allocation5] sm:$0x33 pattern:$0x76325410] }
 0x2a2   : > { %v2196_v26 = vcombine.high %v3738_v21, %v3738_v21 }
 0x2a3   : > { %4657 = vmatpush1.bf16.msra.mxu0 %v4656_v31  ;;  %v2493_v31 = vld [vmem:[%s9584_s4 + $0x7c0] sm:$0xff] }
 0x2a4   : > { %4785 = vmatpush1.bf16.msra.mxu1 %v4784_v34  ;;  %4659 = vmatprep.subr.bf16.mxu0 %v4658_v38  ;;  %v4676_v34 = vpack.c.bf16 %v2493_v31, %v2485_v28  ;;  %v2504_v38 = vld [vmem:[%s9584_s4 + $0x818] sm:$0xff] }
 0x2a5   : > { %4787 = vmatprep.subr.bf16.mxu1 %v4786_v41  ;;  %v4806_v6 = vpack.c.bf16 %v2512_v40, %v2504_v38  ;;  %v1543_v41 = vsub.s32 0, %v6696_v15 }
 0x2a7   : > { %4661 = vmatpush1.bf16.msra.mxu0 %v4660_v42  ;;  %v1539_v42 = vld [vmem:[%s9583_s3] sm:$0xff] }
 0x2a8   : > { %4789 = vmatpush1.bf16.msra.mxu1 %v4788_v44  ;;  %4663 = vmatprep.subr.bf16.mxu0 %v4662_v48  ;;  %v1555_v44 = vsub.s32 3, %v6696_v15  ;;  %v1544_v45 = vrot.slane %v1539_v42, %v1543_v41  ;;  %v1552_v46 = vrot.slane %v1539_v42, %v1551_v43  ;;  %v1548_v47 = vrot.slane %v1539_v42, %v1547_v7 }
 0x2a9   : > { %4791 = vmatprep.subr.bf16.mxu1 %v4790_v50 }
 0x2aa   : > { %v1556_v48 = vrot.slane %v1539_v42, %v1555_v44 }
 0x2ab   : > { %4665 = vmatpush1.bf16.msra.mxu0 %v4664_v51 }
 0x2ac   : > { %4793 = vmatpush1.bf16.msra.mxu1 %v4792_v54  ;;  %4667 = vmatprep.subr.bf16.mxu0 %v4666_v60 }
 0x2ad   : > { %4795 = vmatprep.subr.bf16.mxu1 %v4794_v1  ;;  %v1560_v1 = vrot.slane %v1539_v42, %v1559_v59 }
 0x2af   : > { %4669 = vmatpush1.bf16.msra.mxu0 %v4668_v3 }
 0x2b0   : > { %4797 = vmatpush1.bf16.msra.mxu1 %v4796_v9  ;;  %4671 = vmatprep.subr.bf16.mxu0 %v4670_v12 }
 0x2b1   : > { %4799 = vmatprep.subr.bf16.mxu1 %v4798_v13 }
 0x2b3   : > { %4673 = vmatpush1.bf16.msra.mxu0 %v4672_v24 }
 0x2b4   : > { %4801 = vmatpush1.bf16.msra.mxu1 %v4800_v25  ;;  %4675 = vmatprep.subr.bf16.mxu0 %v4674_v29 }
 0x2b5   : > { %4803 = vmatprep.subr.bf16.mxu1 %v4802_v30 }
 0x2b7   : > { %4677 = vmatpush1.bf16.msra.mxu0 %v4676_v34 }
 0x2b8   : > { %4805 = vmatpush1.bf16.msra.mxu1 %v4804_v35  ;;  %4679 = vmatprep.subr.bf16.mxu0 %v4678_v39 }
 0x2b9   : > { %4807 = vmatprep.subr.bf16.mxu1 %v4806_v6 }
 0x2cd   : > { %v8068_v57 = vpop.f32.mrb[4].mxu0  ;;  %v8070_v58 = vpop.f32.mrb[4].mxu1 }
 0x2ce   : > { %v8078_v61 = vpop.f32.mrb[5].mxu0  ;;  %v8080_v62 = vpop.f32.mrb[5].mxu1  ;;  %v5182_v20 = vadd.f32 %v8068_v57, %v1544_v45  ;;  %v5184_v49 = vadd.f32 %v8070_v58, %v1552_v46  ;;  %v1567_v57 = vsub.s32 6, %v6696_v15  ;;  %v1563_v58 = vsub.s32 5, %v6696_v15  ;;  %v2509_v45 = vld [vmem:[%s9584_s4 + $0x840] sm:$0xff] }
 0x2cf   : > { %v5183_v2 = vadd.f32 %v8078_v61, %v1548_v47  ;;  %v5185_v50 = vadd.f32 %v8080_v62, %v1556_v48  ;;  %v1571_v62 = vsub.s32 7, %v6696_v15  ;;  %v2503_v47 = vld [vmem:[%s9584_s4 + $0x810] sm:$0xff] }
 0x2d0   : > { %v3732_v51 = vmul.f32 -1.442695, %v5182_v20  ;;  %v3734_v52 = vmul.f32 -1.442695, %v5184_v49  ;;  %v1568_v4 = vrot.slane %v1539_v42, %v1567_v57  ;;  %v1564_v5 = vrot.slane %v1539_v42, %v1563_v58  ;;  %v2511_v48 = vld [vmem:[%s9584_s4 + $0x850] sm:$0xff]  ;;  %v2518_v20 = vld [vmem:[%s9584_s4 + $0x888] sm:$0xff] }
 0x2d1   : > { %v3733_v53 = vmul.f32 -1.442695, %v5183_v2  ;;  %v3735_v54 = vmul.f32 -1.442695, %v5185_v50  ;;  %v1572_v8 = vrot.slane %v1539_v42, %v1571_v62  ;;  %v2501_v42 = vld [vmem:[%s9584_s4 + $0x800] sm:$0xff]  ;;  %v2526_v50 = vld [vmem:[%s9584_s4 + $0x8c8] sm:$0xff] }
 0x2d2   : > { %5263 = vpow2.f32 %v3732_v51  ;;  %v2520_v51 = vld [vmem:[%s9584_s4 + $0x898] sm:$0xff] }
 0x2d3   : > { %5265 = vpow2.f32 %v3734_v52  ;;  %v2528_v52 = vld [vmem:[%s9584_s4 + $0x8d8] sm:$0xff] }
 0x2d4   : > { %5267 = vpow2.f32 %v3733_v53 }
 0x2d5   : > { %5269 = vpow2.f32 %v3735_v54  ;;  %v8328_v54 = vld.sshfl [vmem:[#allocation6] sm:$0x33 pattern:$0x76325410] }
 0x2dc   : > { %v5264_v55 = vpop.eup %5263 }
 0x2dd   : > { %v5266_v56 = vpop.eup %5265  ;;  %v2156_v22 = vadd.f32 1.0, %v5264_v55 }
 0x2de   : > { %v5268_v60 = vpop.eup %5267  ;;  %v2168_v63 = vadd.f32 1.0, %v5266_v56  ;;  %v4680_v56 = vpack.c.bf16 %v2509_v45, %v2501_v42  ;;  %v2573_v42 = vld [vmem:[%s9584_s4 + $0xa40] sm:$0xff] }
 0x2df   : > { %v5270_v61 = vpop.eup %5269  ;;  %v2157_v0 = vadd.f32 1.0, %v5268_v60  ;;  %5271 = vrcp.f32 %v2156_v22  ;;  %v4808_v60 = vpack.c.bf16 %v2511_v48, %v2503_v47  ;;  %v2525_v22 = vld [vmem:[%s9584_s4 + $0x8c0] sm:$0xff]  ;;  %v2567_v47 = vld [vmem:[%s9584_s4 + $0xa10] sm:$0xff] }
 0x2e0   : > { %v2169_v3 = vadd.f32 1.0, %v5270_v61  ;;  %5273 = vrcp.f32 %v2168_v63  ;;  %v2517_v61 = vld [vmem:[%s9584_s4 + $0x880] sm:$0xff]  ;;  %v4682_v63 = vpack.c.bf16 %v2526_v50, %v2518_v20  ;;  %v2575_v48 = vld [vmem:[%s9584_s4 + $0xa50] sm:$0xff]  ;;  %v2582_v20 = vld [vmem:[%s9584_s4 + $0xa88] sm:$0xff] }
 0x2e1   : > { %5275 = vrcp.f32 %v2157_v0  ;;  %v4810_v0 = vpack.c.bf16 %v2528_v52, %v2520_v51  ;;  %v2584_v50 = vld [vmem:[%s9584_s4 + $0xa98] sm:$0xff] }
 0x2e2   : > { %5277 = vrcp.f32 %v2169_v3  ;;  %v2527_v3 = vld [vmem:[%s9584_s4 + $0x8d0] sm:$0xff]  ;;  %v2592_v51 = vld [vmem:[%s9584_s4 + $0xad8] sm:$0xff] }
 0x2e9   : > { %v5272_v23 = vpop.eup %5271 }
 0x2ea   : > { %v5274_v24 = vpop.eup %5273 }
 0x2eb   : > { %v5276_v25 = vpop.eup %5275  ;;  %v2199_v30 = vmul.f32 %v5274_v24, %v3738_v21  ;;  %v2543_v21 = vld [vmem:[%s9584_s4 + $0x950] sm:$0xff]  ;;  %v2558_v24 = vld [vmem:[%s9584_s4 + $0x9c8] sm:$0xff] }
 0x2ec   : > { %v5278_v27 = vpop.eup %5277 }
 0x2ed   : > { %v2200_v32 = vmul.f32 %v5278_v27, %v2196_v26  ;;  %v2560_v26 = vld [vmem:[%s9584_s4 + $0x9d8] sm:$0xff] }
 0x34d   : > { %v2002_v9 = vpop.f32.mrb[6].mxu0 }
 0x34e   : > { %v5186_v10 = vadd.f32 %v2002_v9, %v1560_v1  ;;  %v2144_v17 = vpop.f32.mrb[6].mxu1  ;;  %v2004_v11 = vpop.f32.mrb[7].mxu0  ;;  %v2519_v1 = vld [vmem:[%s9584_s4 + $0x890] sm:$0xff]  ;;  %v2536_v9 = vld [vmem:[%s9584_s4 + $0x918] sm:$0xff] }
 0x34f   : > { %v5188_v12 = vadd.f32 %v2144_v17, %v1568_v4  ;;  %v5187_v13 = vadd.f32 %v2004_v11, %v1564_v5  ;;  %v2146_v14 = vpop.f32.mrb[7].mxu1  ;;  %v2534_v4 = vld [vmem:[%s9584_s4 + $0x908] sm:$0xff]  ;;  %v8362_v17 = vcombine.high %v8328_v54, %v8328_v54  ;;  %v4684_v11 = vpack.c.bf16 %v2525_v22, %v2517_v61 }
 0x350   : > { %5279 = vtanh.f32 %v5186_v10  ;;  %v5189_v16 = vadd.f32 %v2146_v14, %v1572_v8  ;;  %v2542_v8 = vld [vmem:[%s9584_s4 + $0x948] sm:$0xff]  ;;  %v2544_v10 = vld [vmem:[%s9584_s4 + $0x958] sm:$0xff]  ;;  %v2541_v14 = vld [vmem:[%s9584_s4 + $0x940] sm:$0xff]  ;;  %v4826_v22 = vpack.c.bf16 %v2592_v51, %v2584_v50 }
 0x351   : > { %v3736_v18 = vmul.f32 -1.442695, %v5188_v12  ;;  %5281 = vtanh.f32 %v5187_v13  ;;  %v4812_v12 = vpack.c.bf16 %v2527_v3, %v2519_v1  ;;  %v2533_v13 = vld [vmem:[%s9584_s4 + $0x900] sm:$0xff]  ;;  %v2598_v1 = vld [vmem:[%s9584_s4 + $0xb08] sm:$0xff] }
 0x352   : > { %v3737_v19 = vmul.f32 -1.442695, %v5189_v16  ;;  %v4686_v16 = vpack.c.bf16 %v2542_v8, %v2534_v4  ;;  %v4688_v27 = vpack.c.bf16 %v2541_v14, %v2533_v13  ;;  %v2606_v3 = vld [vmem:[%s9584_s4 + $0xb48] sm:$0xff]  ;;  %v2600_v4 = vld [vmem:[%s9584_s4 + $0xb18] sm:$0xff]  ;;  %v2599_v14 = vld [vmem:[%s9584_s4 + $0xb10] sm:$0xff] }
 0x353   : > { %5283 = vpow2.f32 %v3736_v18  ;;  %v4814_v18 = vpack.c.bf16 %v2544_v10, %v2536_v9  ;;  %v2597_v10 = vld [vmem:[%s9584_s4 + $0xb00] sm:$0xff] }
 0x354   : > { %5285 = vpow2.f32 %v3737_v19  ;;  %v2535_v19 = vld [vmem:[%s9584_s4 + $0x910] sm:$0xff]  ;;  %v2645_v51 = vld [vmem:[%s9584_s4 + $0xc80] sm:$0xff] }
 0x35a   : > { %v5280_v28 = vpop.eup %5279 }
 0x35b   : > { %v5282_v29 = vpop.eup %5281  ;;  %v2201_v31 = vmul.f32 %v5280_v28, %v5272_v23  ;;  %v2550_v23 = vld [vmem:[%s9584_s4 + $0x988] sm:$0xff]  ;;  %v4816_v28 = vpack.c.bf16 %v2543_v21, %v2535_v19  ;;  %v2616_v21 = vld [vmem:[%s9584_s4 + $0xb98] sm:$0xff] }
 0x35c   : > { %v2202_v33 = vmul.f32 %v5282_v29, %v5276_v25  ;;  %v2552_v25 = vld [vmem:[%s9584_s4 + $0x998] sm:$0xff]  ;;  %v2549_v29 = vld [vmem:[%s9584_s4 + $0x980] sm:$0xff]  ;;  %v2622_v19 = vld [vmem:[%s9584_s4 + $0xbc8] sm:$0xff] }
 0x35d   : > { %v5284_v34 = vpop.eup %5283  ;;  %v2203_v35 = vadd.f32 %v2201_v31, %v2199_v30  ;;  %v2557_v30 = vld [vmem:[%s9584_s4 + $0x9c0] sm:$0xff]  ;;  %v4690_v31 = vpack.c.bf16 %v2558_v24, %v2550_v23  ;;  %v2624_v23 = vld [vmem:[%s9584_s4 + $0xbd8] sm:$0xff] }
 0x35e   : > { %v5286_v36 = vpop.eup %5285  ;;  %v2182_v37 = vadd.f32 1.0, %v5284_v34  ;;  %v2204_v38 = vadd.f32 %v2202_v33, %v2200_v32  ;;  %v4818_v32 = vpack.c.bf16 %v2560_v26, %v2552_v25  ;;  %v2551_v33 = vld [vmem:[%s9584_s4 + $0x990] sm:$0xff]  ;;  %v2613_v26 = vld [vmem:[%s9584_s4 + $0xb80] sm:$0xff] }
 0x35f   : > { %5287 = vtanh.f32 %v2203_v35  ;;  %v2183_v39 = vadd.f32 1.0, %v5286_v36  ;;  %v2559_v34 = vld [vmem:[%s9584_s4 + $0x9d0] sm:$0xff]  ;;  %v2574_v36 = vld [vmem:[%s9584_s4 + $0xa48] sm:$0xff] }
 0x360   : > { %5289 = vrcp.f32 %v2182_v37  ;;  %v2223_v40 = vcombine.low %v2203_v35, %v2204_v38  ;;  %v2566_v35 = vld [vmem:[%s9584_s4 + $0xa08] sm:$0xff]  ;;  %v2568_v37 = vld [vmem:[%s9584_s4 + $0xa18] sm:$0xff] }
 0x361   : > { %5291 = vtanh.f32 %v2204_v38  ;;  %v2576_v38 = vld [vmem:[%s9584_s4 + $0xa58] sm:$0xff]  ;;  %v4694_v45 = vpack.c.bf16 %v2574_v36, %v2566_v35 }
 0x362   : > { %3740 = vst.sshfl [vmem:[#allocation5] sm:$0x33 pattern:$0x76325410] %v2223_v40  ;;  %5293 = vrcp.f32 %v2183_v39  ;;  %v4692_v39 = vpack.c.bf16 %v2557_v30, %v2549_v29  ;;  %v4820_v40 = vpack.c.bf16 %v2559_v34, %v2551_v33  ;;  %v4834_v29 = vpack.c.bf16 %v2624_v23, %v2616_v21  ;;  %v2615_v30 = vld [vmem:[%s9584_s4 + $0xb90] sm:$0xff]  ;;  %v2638_v33 = vld [vmem:[%s9584_s4 + $0xc48] sm:$0xff] }
 0x363   : > { %v2632_v34 = vld [vmem:[%s9584_s4 + $0xc18] sm:$0xff]  ;;  %v2677_v23 = vld [vmem:[%s9584_s4 + $0xd80] sm:$0xff] }
 0x364   : > { %v2640_v35 = vld [vmem:[%s9584_s4 + $0xc58] sm:$0xff] }
 0x369   : > { %v5288_v6 = vpop.eup %5287 }
 0x36a   : > { %v5290_v46 = vpop.eup %5289 }
 0x36b   : > { %v5292_v49 = vpop.eup %5291  ;;  %v8317_v2 = vmul.f32 %v5290_v46, %v5288_v6  ;;  %v2565_v6 = vld [vmem:[%s9584_s4 + $0xa00] sm:$0xff]  ;;  %v4822_v46 = vpack.c.bf16 %v2576_v38, %v2568_v37 }
 0x36c   : > { %v5294_v53 = vpop.eup %5293  ;;  %v4696_v52 = vpack.c.bf16 %v2573_v42, %v2565_v6  ;;  %v2629_v38 = vld [vmem:[%s9584_s4 + $0xc00] sm:$0xff]  ;;  %v4838_v6 = vpack.c.bf16 %v2640_v35, %v2632_v34  ;;  %v2631_v42 = vld [vmem:[%s9584_s4 + $0xc10] sm:$0xff] }
 0x36d   : > { %v8330_v55 = vmul.f32 %v5294_v53, %v5292_v49  ;;  %v2590_v49 = vld [vmem:[%s9584_s4 + $0xac8] sm:$0xff]  ;;  %v4824_v53 = vpack.c.bf16 %v2575_v48, %v2567_v47  ;;  %v2648_v48 = vld [vmem:[%s9584_s4 + $0xc98] sm:$0xff]  ;;  %v2693_v35 = vld [vmem:[%s9584_s4 + $0xe00] sm:$0xff] }
 0x36e   : > { %v4698_v61 = vpack.c.bf16 %v2590_v49, %v2582_v20  ;;  %v2654_v47 = vld [vmem:[%s9584_s4 + $0xcc8] sm:$0xff]  ;;  %v2656_v20 = vld [vmem:[%s9584_s4 + $0xcd8] sm:$0xff] }
 0x36f   : > { %2863 = vmatprep.mubr.f32.mxu0 %v8330_v55  ;;  %3005 = vmatprep.mubr.f32.mxu1 %v8330_v55  ;;  %v2211_v5 = vcombine.low %v8317_v2, %v8330_v55 }
 0x370   : > { %2864 = vmatmul.mubr.f32.vlgmr.msra.gmra.mrb[8].mxu0 %v8317_v2  ;;  %3006 = vmatmul.mubr.f32.vlgmr.msra.gmra.mrb[8].mxu1 %v8317_v2 }
 0x371   : > { %3739 = vst.sshfl [vmem:[#allocation4] sm:$0x33 pattern:$0x76325410] %v2211_v5  ;;  %4681 = vmatpush1.bf16.msra.mxu0 %v4680_v56  ;;  %4809 = vmatpush1.bf16.msra.mxu1 %v4808_v60  ;;  %v2581_v56 = vld [vmem:[%s9584_s4 + $0xa80] sm:$0xff]  ;;  %v2608_v5 = vld [vmem:[%s9584_s4 + $0xb58] sm:$0xff] }
 0x372   : > { %4683 = vmatprep.subr.bf16.mxu0 %v4682_v63  ;;  %4811 = vmatprep.subr.bf16.mxu1 %v4810_v0  ;;  %v2589_v60 = vld [vmem:[%s9584_s4 + $0xac0] sm:$0xff]  ;;  %v2583_v63 = vld [vmem:[%s9584_s4 + $0xa90] sm:$0xff]  ;;  %v4830_v13 = vpack.c.bf16 %v2608_v5, %v2600_v4 }
 0x373   : > { %2934 = vmatprep.mubr.f32.mxu0 %v8362_v17  ;;  %3076 = vmatprep.mubr.f32.mxu1 %v8362_v17  ;;  %v2591_v0 = vld [vmem:[%s9584_s4 + $0xad0] sm:$0xff]  ;;  %v4700_v8 = vpack.c.bf16 %v2589_v60, %v2581_v56  ;;  %v4842_v56 = vpack.c.bf16 %v2656_v20, %v2648_v48  ;;  %v2661_v5 = vld [vmem:[%s9584_s4 + $0xd00] sm:$0xff] }
 0x374   : > { %v4828_v9 = vpack.c.bf16 %v2591_v0, %v2583_v63  ;;  %v2647_v60 = vld [vmem:[%s9584_s4 + $0xc90] sm:$0xff]  ;;  %v2670_v63 = vld [vmem:[%s9584_s4 + $0xd48] sm:$0xff]  ;;  %v2664_v0 = vld [vmem:[%s9584_s4 + $0xd18] sm:$0xff] }
 0x375   : > { %4685 = vmatpush1.bf16.msra.mxu0 %v4684_v11  ;;  %4813 = vmatpush1.bf16.msra.mxu1 %v4812_v12  ;;  %v2605_v11 = vld [vmem:[%s9584_s4 + $0xb40] sm:$0xff]  ;;  %v4702_v12 = vpack.c.bf16 %v2606_v3, %v2598_v1  ;;  %v2672_v1 = vld [vmem:[%s9584_s4 + $0xd58] sm:$0xff] }
 0x376   : > { %4687 = vmatprep.subr.bf16.mxu0 %v4686_v16  ;;  %4815 = vmatprep.subr.bf16.mxu1 %v4814_v18  ;;  %v2607_v16 = vld [vmem:[%s9584_s4 + $0xb50] sm:$0xff]  ;;  %v2614_v18 = vld [vmem:[%s9584_s4 + $0xb88] sm:$0xff]  ;;  %v4704_v24 = vpack.c.bf16 %v2605_v11, %v2597_v10  ;;  %v4846_v10 = vpack.c.bf16 %v2672_v1, %v2664_v0  ;;  %v2709_v20 = vld [vmem:[%s9584_s4 + $0xe80] sm:$0xff] }
 0x377   : > { %v4832_v25 = vpack.c.bf16 %v2607_v16, %v2599_v14  ;;  %v2663_v11 = vld [vmem:[%s9584_s4 + $0xd10] sm:$0xff]  ;;  %v2686_v14 = vld [vmem:[%s9584_s4 + $0xdc8] sm:$0xff]  ;;  %v2680_v16 = vld [vmem:[%s9584_s4 + $0xd98] sm:$0xff] }
 0x378   : > { %v2725_v1 = vld [vmem:[%s9584_s4 + $0xf00] sm:$0xff] }
 0x379   : > { %4689 = vmatpush1.bf16.msra.mxu0 %v4688_v27  ;;  %4817 = vmatpush1.bf16.msra.mxu1 %v4816_v28  ;;  %v2621_v27 = vld [vmem:[%s9584_s4 + $0xbc0] sm:$0xff]  ;;  %v4706_v28 = vpack.c.bf16 %v2622_v19, %v2614_v18  ;;  %v2688_v18 = vld [vmem:[%s9584_s4 + $0xdd8] sm:$0xff] }
 0x37a   : > { %4691 = vmatprep.subr.bf16.mxu0 %v4690_v31  ;;  %4819 = vmatprep.subr.bf16.mxu1 %v4818_v32  ;;  %v2623_v31 = vld [vmem:[%s9584_s4 + $0xbd0] sm:$0xff]  ;;  %v2630_v32 = vld [vmem:[%s9584_s4 + $0xc08] sm:$0xff]  ;;  %v4708_v36 = vpack.c.bf16 %v2621_v27, %v2613_v26  ;;  %v4850_v26 = vpack.c.bf16 %v2688_v18, %v2680_v16  ;;  %v2741_v18 = vld [vmem:[%s9584_s4 + $0xf80] sm:$0xff] }
 0x37b   : > { %v4836_v37 = vpack.c.bf16 %v2623_v31, %v2615_v30  ;;  %v2679_v27 = vld [vmem:[%s9584_s4 + $0xd90] sm:$0xff]  ;;  %v2702_v30 = vld [vmem:[%s9584_s4 + $0xe48] sm:$0xff]  ;;  %v2696_v31 = vld [vmem:[%s9584_s4 + $0xe18] sm:$0xff] }
 0x37d   : > { %4693 = vmatpush1.bf16.msra.mxu0 %v4692_v39  ;;  %4821 = vmatpush1.bf16.msra.mxu1 %v4820_v40  ;;  %v2637_v39 = vld [vmem:[%s9584_s4 + $0xc40] sm:$0xff]  ;;  %v4710_v40 = vpack.c.bf16 %v2638_v33, %v2630_v32  ;;  %v2704_v32 = vld [vmem:[%s9584_s4 + $0xe58] sm:$0xff] }
 0x37e   : > { %4695 = vmatprep.subr.bf16.mxu0 %v4694_v45  ;;  %4823 = vmatprep.subr.bf16.mxu1 %v4822_v46  ;;  %v2639_v45 = vld [vmem:[%s9584_s4 + $0xc50] sm:$0xff]  ;;  %v2646_v46 = vld [vmem:[%s9584_s4 + $0xc88] sm:$0xff]  ;;  %v4712_v49 = vpack.c.bf16 %v2637_v39, %v2629_v38  ;;  %v4854_v38 = vpack.c.bf16 %v2704_v32, %v2696_v31 }
 0x37f   : > { %v4840_v50 = vpack.c.bf16 %v2639_v45, %v2631_v42  ;;  %v2695_v39 = vld [vmem:[%s9584_s4 + $0xe10] sm:$0xff]  ;;  %v2718_v42 = vld [vmem:[%s9584_s4 + $0xec8] sm:$0xff]  ;;  %v2712_v45 = vld [vmem:[%s9584_s4 + $0xe98] sm:$0xff] }
 0x381   : > { %4697 = vmatpush1.bf16.msra.mxu0 %v4696_v52  ;;  %4825 = vmatpush1.bf16.msra.mxu1 %v4824_v53  ;;  %v2653_v52 = vld [vmem:[%s9584_s4 + $0xcc0] sm:$0xff]  ;;  %v4714_v53 = vpack.c.bf16 %v2654_v47, %v2646_v46  ;;  %v2720_v46 = vld [vmem:[%s9584_s4 + $0xed8] sm:$0xff] }
 0x382   : > { %4699 = vmatprep.subr.bf16.mxu0 %v4698_v61  ;;  %4827 = vmatprep.subr.bf16.mxu1 %v4826_v22  ;;  %v2655_v61 = vld [vmem:[%s9584_s4 + $0xcd0] sm:$0xff]  ;;  %v2662_v22 = vld [vmem:[%s9584_s4 + $0xd08] sm:$0xff]  ;;  %v4716_v3 = vpack.c.bf16 %v2653_v52, %v2645_v51  ;;  %v4858_v51 = vpack.c.bf16 %v2720_v46, %v2712_v45  ;;  %v2265_v46 = vld [vmem:[%s9584_s4 + $0xa0] sm:$0xff] }
 0x383   : > { %v4844_v4 = vpack.c.bf16 %v2655_v61, %v2647_v60  ;;  %v2711_v52 = vld [vmem:[%s9584_s4 + $0xe90] sm:$0xff]  ;;  %v2734_v60 = vld [vmem:[%s9584_s4 + $0xf48] sm:$0xff]  ;;  %v2728_v61 = vld [vmem:[%s9584_s4 + $0xf18] sm:$0xff] }
 0x385   : > { %4701 = vmatpush1.bf16.msra.mxu0 %v4700_v8  ;;  %4829 = vmatpush1.bf16.msra.mxu1 %v4828_v9  ;;  %v2669_v8 = vld [vmem:[%s9584_s4 + $0xd40] sm:$0xff]  ;;  %v4718_v9 = vpack.c.bf16 %v2670_v63, %v2662_v22  ;;  %v2736_v22 = vld [vmem:[%s9584_s4 + $0xf58] sm:$0xff] }
 0x386   : > { %4703 = vmatprep.subr.bf16.mxu0 %v4702_v12  ;;  %4831 = vmatprep.subr.bf16.mxu1 %v4830_v13  ;;  %v2671_v12 = vld [vmem:[%s9584_s4 + $0xd50] sm:$0xff]  ;;  %v2678_v13 = vld [vmem:[%s9584_s4 + $0xd88] sm:$0xff]  ;;  %v4720_v19 = vpack.c.bf16 %v2669_v8, %v2661_v5  ;;  %v4862_v5 = vpack.c.bf16 %v2736_v22, %v2728_v61 }
 0x387   : > { %v4848_v21 = vpack.c.bf16 %v2671_v12, %v2663_v11  ;;  %v2727_v8 = vld [vmem:[%s9584_s4 + $0xf10] sm:$0xff]  ;;  %v2750_v11 = vld [vmem:[%s9584_s4 + $0xfc8] sm:$0xff]  ;;  %v2744_v12 = vld [vmem:[%s9584_s4 + $0xf98] sm:$0xff] }
 0x389   : > { %4705 = vmatpush1.bf16.msra.mxu0 %v4704_v24  ;;  %4833 = vmatpush1.bf16.msra.mxu1 %v4832_v25  ;;  %v2685_v24 = vld [vmem:[%s9584_s4 + $0xdc0] sm:$0xff]  ;;  %v4722_v25 = vpack.c.bf16 %v2686_v14, %v2678_v13  ;;  %v2752_v13 = vld [vmem:[%s9584_s4 + $0xfd8] sm:$0xff] }
 0x38a   : > { %4707 = vmatprep.subr.bf16.mxu0 %v4706_v28  ;;  %4835 = vmatprep.subr.bf16.mxu1 %v4834_v29  ;;  %v2687_v28 = vld [vmem:[%s9584_s4 + $0xdd0] sm:$0xff]  ;;  %v2694_v29 = vld [vmem:[%s9584_s4 + $0xe08] sm:$0xff]  ;;  %v4724_v33 = vpack.c.bf16 %v2685_v24, %v2677_v23  ;;  %v4866_v23 = vpack.c.bf16 %v2752_v13, %v2744_v12  ;;  %v2297_v12 = vld [vmem:[%s9584_s4 + $0x1a0] sm:$0xff] }
 0x38b   : > { %v4852_v34 = vpack.c.bf16 %v2687_v28, %v2679_v27  ;;  %v2743_v24 = vld [vmem:[%s9584_s4 + $0xf90] sm:$0xff]  ;;  %v2258_v27 = vld [vmem:[%s9584_s4 + $0x68] sm:$0xff]  ;;  %v2252_v28 = vld [vmem:[%s9584_s4 + $0x38] sm:$0xff] }
 0x38c   : > { %v2305_v13 = vld [vmem:[%s9584_s4 + $0x1e0] sm:$0xff] }
 0x38d   : > { %4709 = vmatpush1.bf16.msra.mxu0 %v4708_v36  ;;  %4837 = vmatpush1.bf16.msra.mxu1 %v4836_v37  ;;  %v2701_v36 = vld [vmem:[%s9584_s4 + $0xe40] sm:$0xff]  ;;  %v4726_v37 = vpack.c.bf16 %v2702_v30, %v2694_v29  ;;  %v2260_v29 = vld [vmem:[%s9584_s4 + $0x78] sm:$0xff] }
 0x38e   : > { %4711 = vmatprep.subr.bf16.mxu0 %v4710_v40  ;;  %4839 = vmatprep.subr.bf16.mxu1 %v4838_v6  ;;  %v2703_v40 = vld [vmem:[%s9584_s4 + $0xe50] sm:$0xff]  ;;  %v2710_v6 = vld [vmem:[%s9584_s4 + $0xe88] sm:$0xff]  ;;  %v4728_v47 = vpack.c.bf16 %v2701_v36, %v2693_v35  ;;  %v2257_v35 = vld [vmem:[%s9584_s4 + $0x60] sm:$0xff] }
 0x38f   : > { %v4856_v48 = vpack.c.bf16 %v2703_v40, %v2695_v39  ;;  %v2251_v36 = vld [vmem:[%s9584_s4 + $0x30] sm:$0xff]  ;;  %v2274_v39 = vld [vmem:[%s9584_s4 + $0xe8] sm:$0xff]  ;;  %v2268_v40 = vld [vmem:[%s9584_s4 + $0xb8] sm:$0xff] }
 0x391   : > { %4713 = vmatpush1.bf16.msra.mxu0 %v4712_v49  ;;  %4841 = vmatpush1.bf16.msra.mxu1 %v4840_v50  ;;  %v2717_v49 = vld [vmem:[%s9584_s4 + $0xec0] sm:$0xff]  ;;  %v4730_v50 = vpack.c.bf16 %v2718_v42, %v2710_v6  ;;  %v2276_v6 = vld [vmem:[%s9584_s4 + $0xf8] sm:$0xff] }
 0x392   : > { %4715 = vmatprep.subr.bf16.mxu0 %v4714_v53  ;;  %4843 = vmatprep.subr.bf16.mxu1 %v4842_v56  ;;  %v2719_v53 = vld [vmem:[%s9584_s4 + $0xed0] sm:$0xff]  ;;  %v2726_v56 = vld [vmem:[%s9584_s4 + $0xf08] sm:$0xff]  ;;  %v4732_v63 = vpack.c.bf16 %v2717_v49, %v2709_v20  ;;  %v5002_v49 = vpack.c.bf16 %v2276_v6, %v2268_v40  ;;  %v2329_v40 = vld [vmem:[%s9584_s4 + $0x2a0] sm:$0xff] }
 0x393   : > { %v4860_v0 = vpack.c.bf16 %v2719_v53, %v2711_v52  ;;  %v2290_v52 = vld [vmem:[%s9584_s4 + $0x168] sm:$0xff]  ;;  %v2284_v53 = vld [vmem:[%s9584_s4 + $0x138] sm:$0xff]  ;;  %v2337_v6 = vld [vmem:[%s9584_s4 + $0x2e0] sm:$0xff] }
 0x395   : > { %4717 = vmatpush1.bf16.msra.mxu0 %v4716_v3  ;;  %4845 = vmatpush1.bf16.msra.mxu1 %v4844_v4  ;;  %v2733_v3 = vld [vmem:[%s9584_s4 + $0xf40] sm:$0xff]  ;;  %v4734_v4 = vpack.c.bf16 %v2734_v60, %v2726_v56  ;;  %v2292_v56 = vld [vmem:[%s9584_s4 + $0x178] sm:$0xff] }
 0x396   : > { %4719 = vmatprep.subr.bf16.mxu0 %v4718_v9  ;;  %4847 = vmatprep.subr.bf16.mxu1 %v4846_v10  ;;  %v2735_v9 = vld [vmem:[%s9584_s4 + $0xf50] sm:$0xff]  ;;  %v2742_v10 = vld [vmem:[%s9584_s4 + $0xf88] sm:$0xff]  ;;  %v4736_v14 = vpack.c.bf16 %v2733_v3, %v2725_v1  ;;  %v5006_v1 = vpack.c.bf16 %v2292_v56, %v2284_v53  ;;  %v2345_v53 = vld [vmem:[%s9584_s4 + $0x320] sm:$0xff] }
 0x397   : > { %v4864_v16 = vpack.c.bf16 %v2735_v9, %v2727_v8  ;;  %v2298_v3 = vld [vmem:[%s9584_s4 + $0x1a8] sm:$0xff]  ;;  %v2308_v8 = vld [vmem:[%s9584_s4 + $0x1f8] sm:$0xff]  ;;  %v2353_v56 = vld [vmem:[%s9584_s4 + $0x360] sm:$0xff] }
 0x399   : > { %4721 = vmatpush1.bf16.msra.mxu0 %v4720_v19  ;;  %4849 = vmatpush1.bf16.msra.mxu1 %v4848_v21  ;;  %v2749_v19 = vld [vmem:[%s9584_s4 + $0xfc0] sm:$0xff]  ;;  %v4738_v21 = vpack.c.bf16 %v2750_v11, %v2742_v10 }
 0x39a   : > { %4723 = vmatprep.subr.bf16.mxu0 %v4722_v25  ;;  %4851 = vmatprep.subr.bf16.mxu1 %v4850_v26  ;;  %v2751_v25 = vld [vmem:[%s9584_s4 + $0xfd0] sm:$0xff]  ;;  %v2250_v26 = vld [vmem:[%s9584_s4 + $0x28] sm:$0xff]  ;;  %v4740_v30 = vpack.c.bf16 %v2749_v19, %v2741_v18 }
 0x39b   : > { %v4868_v31 = vpack.c.bf16 %v2751_v25, %v2743_v24  ;;  %v4870_v32 = vpack.c.bf16 %v2258_v27, %v2250_v26  ;;  %v2307_v18 = vld [vmem:[%s9584_s4 + $0x1f0] sm:$0xff]  ;;  %v2314_v19 = vld [vmem:[%s9584_s4 + $0x228] sm:$0xff]  ;;  %v2324_v24 = vld [vmem:[%s9584_s4 + $0x278] sm:$0xff]  ;;  %v4884_v25 = vpack.c.bf16 %v2305_v13, %v2297_v12 }
 0x39c   : > { %v2378_v12 = vld [vmem:[%s9584_s4 + $0x428] sm:$0xff] }
 0x39d   : > { %4725 = vmatpush1.bf16.msra.mxu0 %v4724_v33  ;;  %4853 = vmatpush1.bf16.msra.mxu1 %v4852_v34  ;;  %v4998_v33 = vpack.c.bf16 %v2260_v29, %v2252_v28  ;;  %v2249_v34 = vld [vmem:[%s9584_s4 + $0x20] sm:$0xff]  ;;  %v2386_v13 = vld [vmem:[%s9584_s4 + $0x468] sm:$0xff] }
 0x39e   : > { %4727 = vmatprep.subr.bf16.mxu0 %v4726_v37  ;;  %4855 = vmatprep.subr.bf16.mxu1 %v4854_v38  ;;  %v2259_v37 = vld [vmem:[%s9584_s4 + $0x70] sm:$0xff]  ;;  %v2266_v38 = vld [vmem:[%s9584_s4 + $0xa8] sm:$0xff]  ;;  %v4872_v42 = vpack.c.bf16 %v2257_v35, %v2249_v34  ;;  %v2313_v28 = vld [vmem:[%s9584_s4 + $0x220] sm:$0xff] }
 0x39f   : > { %v5000_v45 = vpack.c.bf16 %v2259_v37, %v2251_v36  ;;  %v4874_v20 = vpack.c.bf16 %v2274_v39, %v2266_v38  ;;  %v2321_v29 = vld [vmem:[%s9584_s4 + $0x260] sm:$0xff]  ;;  %v2338_v34 = vld [vmem:[%s9584_s4 + $0x2e8] sm:$0xff]  ;;  %v2332_v35 = vld [vmem:[%s9584_s4 + $0x2b8] sm:$0xff] }
 0x3a0   : > { %v2340_v36 = vld [vmem:[%s9584_s4 + $0x2f8] sm:$0xff]  ;;  %v4888_v37 = vpack.c.bf16 %v2321_v29, %v2313_v28  ;;  %v2394_v28 = vld [vmem:[%s9584_s4 + $0x4a8] sm:$0xff] }
 0x3a1   : > { %4729 = vmatpush1.bf16.msra.mxu0 %v4728_v47  ;;  %4857 = vmatpush1.bf16.msra.mxu1 %v4856_v48  ;;  %v2273_v47 = vld [vmem:[%s9584_s4 + $0xe0] sm:$0xff]  ;;  %v2267_v48 = vld [vmem:[%s9584_s4 + $0xb0] sm:$0xff]  ;;  %v2402_v29 = vld [vmem:[%s9584_s4 + $0x4e8] sm:$0xff] }
 0x3a2   : > { %4731 = vmatprep.subr.bf16.mxu0 %v4730_v50  ;;  %4859 = vmatprep.subr.bf16.mxu1 %v4858_v51  ;;  %v2275_v50 = vld [vmem:[%s9584_s4 + $0xf0] sm:$0xff]  ;;  %v2282_v51 = vld [vmem:[%s9584_s4 + $0x128] sm:$0xff]  ;;  %v4876_v60 = vpack.c.bf16 %v2273_v47, %v2265_v46 }
 0x3a3   : > { %v5004_v61 = vpack.c.bf16 %v2275_v50, %v2267_v48  ;;  %v4878_v22 = vpack.c.bf16 %v2290_v52, %v2282_v51  ;;  %v2339_v46 = vld [vmem:[%s9584_s4 + $0x2f0] sm:$0xff]  ;;  %v2346_v47 = vld [vmem:[%s9584_s4 + $0x328] sm:$0xff]  ;;  %v4892_v50 = vpack.c.bf16 %v2337_v6, %v2329_v40 }
 0x3a4   : > { %v2354_v48 = vld [vmem:[%s9584_s4 + $0x368] sm:$0xff] }
 0x3a5   : > { %4733 = vmatpush1.bf16.msra.mxu0 %v4732_v63  ;;  %4861 = vmatpush1.bf16.msra.mxu1 %v4860_v0  ;;  %v2289_v63 = vld [vmem:[%s9584_s4 + $0x160] sm:$0xff]  ;;  %v2283_v0 = vld [vmem:[%s9584_s4 + $0x130] sm:$0xff]  ;;  %v4894_v52 = vpack.c.bf16 %v2354_v48, %v2346_v47  ;;  %v2410_v40 = vld [vmem:[%s9584_s4 + $0x528] sm:$0xff] }
 0x3a6   : > { %4735 = vmatprep.subr.bf16.mxu0 %v4734_v4  ;;  %4863 = vmatprep.subr.bf16.mxu1 %v4862_v5  ;;  %v2306_v4 = vld [vmem:[%s9584_s4 + $0x1e8] sm:$0xff]  ;;  %v2300_v5 = vld [vmem:[%s9584_s4 + $0x1b8] sm:$0xff] }
 0x3a7   : > { %v4882_v11 = vpack.c.bf16 %v2306_v4, %v2298_v3  ;;  %v2418_v6 = vld [vmem:[%s9584_s4 + $0x568] sm:$0xff] }
 0x3a8   : > { %v4910_v48 = vpack.c.bf16 %v2418_v6, %v2410_v40 }
 0x3a9   : > { %4737 = vmatpush1.bf16.msra.mxu0 %v4736_v14  ;;  %4865 = vmatpush1.bf16.msra.mxu1 %v4864_v16  ;;  %v2299_v14 = vld [vmem:[%s9584_s4 + $0x1b0] sm:$0xff]  ;;  %v5010_v16 = vpack.c.bf16 %v2308_v8, %v2300_v5  ;;  %v2361_v5 = vld [vmem:[%s9584_s4 + $0x3a0] sm:$0xff] }
 0x3aa   : > { %4739 = vmatprep.subr.bf16.mxu0 %v4738_v21  ;;  %4867 = vmatprep.subr.bf16.mxu1 %v4866_v23  ;;  %v2322_v21 = vld [vmem:[%s9584_s4 + $0x268] sm:$0xff]  ;;  %v2316_v23 = vld [vmem:[%s9584_s4 + $0x238] sm:$0xff]  ;;  %v5012_v26 = vpack.c.bf16 %v2307_v18, %v2299_v14  ;;  %v2369_v8 = vld [vmem:[%s9584_s4 + $0x3e0] sm:$0xff] }
 0x3ab   : > { %v4886_v27 = vpack.c.bf16 %v2322_v21, %v2314_v19  ;;  %v2380_v14 = vld [vmem:[%s9584_s4 + $0x438] sm:$0xff]  ;;  %v4900_v18 = vpack.c.bf16 %v2369_v8, %v2361_v5  ;;  %v4902_v21 = vpack.c.bf16 %v2386_v13, %v2378_v12  ;;  %v2442_v5 = vld [vmem:[%s9584_s4 + $0x628] sm:$0xff] }
 0x3ac   : > { %v2450_v8 = vld [vmem:[%s9584_s4 + $0x668] sm:$0xff] }
 0x3ad   : > { %4741 = vmatpush1.bf16.msra.mxu0 %v4740_v30  ;;  %4869 = vmatpush1.bf16.msra.mxu1 %v4868_v31  ;;  %v2315_v30 = vld [vmem:[%s9584_s4 + $0x230] sm:$0xff]  ;;  %v5014_v31 = vpack.c.bf16 %v2324_v24, %v2316_v23  ;;  %v2377_v23 = vld [vmem:[%s9584_s4 + $0x420] sm:$0xff]  ;;  %v4918_v13 = vpack.c.bf16 %v2450_v8, %v2442_v5 }
 0x3ae   : > { %4871 = vmatprep.subr.bf16.mxu0 %v4870_v32  ;;  %4999 = vmatprep.subr.bf16.mxu1 %v4998_v33  ;;  %v2323_v32 = vld [vmem:[%s9584_s4 + $0x270] sm:$0xff]  ;;  %v2330_v33 = vld [vmem:[%s9584_s4 + $0x2a8] sm:$0xff]  ;;  %v2385_v24 = vld [vmem:[%s9584_s4 + $0x460] sm:$0xff] }
 0x3af   : > { %v5016_v38 = vpack.c.bf16 %v2323_v32, %v2315_v30  ;;  %v4890_v39 = vpack.c.bf16 %v2338_v34, %v2330_v33  ;;  %v2396_v30 = vld [vmem:[%s9584_s4 + $0x4b8] sm:$0xff]  ;;  %v4904_v32 = vpack.c.bf16 %v2385_v24, %v2377_v23  ;;  %v4906_v34 = vpack.c.bf16 %v2402_v29, %v2394_v28  ;;  %v2458_v23 = vld [vmem:[%s9584_s4 + $0x6a8] sm:$0xff] }
 0x3b0   : > { %2935 = vmatmul.mubr.f32.vlgmr.msra.gmra.mrb[8].mxu0 %v8328_v54  ;;  %3077 = vmatmul.mubr.f32.vlgmr.msra.gmra.mrb[8].mxu1 %v8328_v54  ;;  %v2281_v54 = vld [vmem:[%s9584_s4 + $0x120] sm:$0xff]  ;;  %v2466_v24 = vld [vmem:[%s9584_s4 + $0x6e8] sm:$0xff] }
 0x3b1   : > { %4873 = vmatpush1.bf16.msra.mxu0 %v4872_v42  ;;  %3147 = vmatprep.mubr.f32.mxu0 %v8330_v55  ;;  %v4880_v9 = vpack.c.bf16 %v2289_v63, %v2281_v54  ;;  %v2331_v42 = vld [vmem:[%s9584_s4 + $0x2b0] sm:$0xff]  ;;  %v2362_v54 = vld [vmem:[%s9584_s4 + $0x3a8] sm:$0xff]  ;;  %v4922_v29 = vpack.c.bf16 %v2466_v24, %v2458_v23 }
 0x3b2   : > { %5001 = vmatpush1.bf16.msra.mxu1 %v5000_v45  ;;  %3289 = vmatprep.mubr.f32.mxu1 %v8330_v55  ;;  %v2291_v55 = vld [vmem:[%s9584_s4 + $0x170] sm:$0xff]  ;;  %v5018_v45 = vpack.c.bf16 %v2340_v36, %v2332_v35  ;;  %v5020_v51 = vpack.c.bf16 %v2339_v46, %v2331_v42  ;;  %v2370_v63 = vld [vmem:[%s9584_s4 + $0x3e8] sm:$0xff]  ;;  %v2393_v35 = vld [vmem:[%s9584_s4 + $0x4a0] sm:$0xff] }
 0x3b3   : > { %4875 = vmatprep.subr.bf16.mxu0 %v4874_v20  ;;  %5003 = vmatprep.subr.bf16.mxu1 %v5002_v49  ;;  %v5008_v10 = vpack.c.bf16 %v2291_v55, %v2283_v0  ;;  %v2348_v20 = vld [vmem:[%s9584_s4 + $0x338] sm:$0xff]  ;;  %v4896_v55 = vpack.c.bf16 %v2353_v56, %v2345_v53  ;;  %v4898_v4 = vpack.c.bf16 %v2370_v63, %v2362_v54  ;;  %v2401_v36 = vld [vmem:[%s9584_s4 + $0x4e0] sm:$0xff]  ;;  %v2426_v53 = vld [vmem:[%s9584_s4 + $0x5a8] sm:$0xff] }
 0x3b4   : > { %v2356_v49 = vld [vmem:[%s9584_s4 + $0x378] sm:$0xff]  ;;  %v4908_v46 = vpack.c.bf16 %v2401_v36, %v2393_v35  ;;  %v2434_v56 = vld [vmem:[%s9584_s4 + $0x5e8] sm:$0xff] }
 0x3b5   : > { %4877 = vmatpush1.bf16.msra.mxu0 %v4876_v60  ;;  %v2347_v60 = vld [vmem:[%s9584_s4 + $0x330] sm:$0xff]  ;;  %v2364_v0 = vld [vmem:[%s9584_s4 + $0x3b8] sm:$0xff]  ;;  %v4914_v63 = vpack.c.bf16 %v2434_v56, %v2426_v53  ;;  %v2474_v35 = vld [vmem:[%s9584_s4 + $0x728] sm:$0xff] }
 0x3b6   : > { %5005 = vmatpush1.bf16.msra.mxu1 %v5004_v61  ;;  %4879 = vmatprep.subr.bf16.mxu0 %v4878_v22  ;;  %v5022_v61 = vpack.c.bf16 %v2356_v49, %v2348_v20  ;;  %v2355_v22 = vld [vmem:[%s9584_s4 + $0x370] sm:$0xff]  ;;  %v2412_v42 = vld [vmem:[%s9584_s4 + $0x538] sm:$0xff]  ;;  %v2409_v20 = vld [vmem:[%s9584_s4 + $0x520] sm:$0xff] }
 0x3b7   : > { %5007 = vmatprep.subr.bf16.mxu1 %v5006_v1  ;;  %v2372_v1 = vld [vmem:[%s9584_s4 + $0x3f8] sm:$0xff]  ;;  %v5024_v3 = vpack.c.bf16 %v2355_v22, %v2347_v60  ;;  %v2417_v49 = vld [vmem:[%s9584_s4 + $0x560] sm:$0xff]  ;;  %v2482_v36 = vld [vmem:[%s9584_s4 + $0x768] sm:$0xff] }
 0x3b8   : > { %v2428_v60 = vld [vmem:[%s9584_s4 + $0x5b8] sm:$0xff]  ;;  %v4912_v22 = vpack.c.bf16 %v2417_v49, %v2409_v20  ;;  %v4926_v6 = vpack.c.bf16 %v2482_v36, %v2474_v35  ;;  %v2490_v20 = vld [vmem:[%s9584_s4 + $0x7a8] sm:$0xff] }
 0x3b9   : > { %4881 = vmatpush1.bf16.msra.mxu0 %v4880_v9  ;;  %v2363_v9 = vld [vmem:[%s9584_s4 + $0x3b0] sm:$0xff]  ;;  %v2498_v49 = vld [vmem:[%s9584_s4 + $0x7e8] sm:$0xff] }
 0x3ba   : > { %5009 = vmatpush1.bf16.msra.mxu1 %v5008_v10  ;;  %4883 = vmatprep.subr.bf16.mxu0 %v4882_v11  ;;  %v5026_v10 = vpack.c.bf16 %v2372_v1, %v2364_v0  ;;  %v2371_v11 = vld [vmem:[%s9584_s4 + $0x3f0] sm:$0xff]  ;;  %v2425_v0 = vld [vmem:[%s9584_s4 + $0x5a0] sm:$0xff]  ;;  %v4930_v56 = vpack.c.bf16 %v2498_v49, %v2490_v20 }
 0x3bb   : > { %5011 = vmatprep.subr.bf16.mxu1 %v5010_v16  ;;  %v2388_v16 = vld [vmem:[%s9584_s4 + $0x478] sm:$0xff]  ;;  %v5028_v19 = vpack.c.bf16 %v2371_v11, %v2363_v9  ;;  %v2433_v1 = vld [vmem:[%s9584_s4 + $0x5e0] sm:$0xff] }
 0x3bc   : > { %v2444_v9 = vld [vmem:[%s9584_s4 + $0x638] sm:$0xff]  ;;  %v4916_v11 = vpack.c.bf16 %v2433_v1, %v2425_v0  ;;  %v2506_v0 = vld [vmem:[%s9584_s4 + $0x828] sm:$0xff]  ;;  %v2553_v49 = vld [vmem:[%s9584_s4 + $0x9a0] sm:$0xff] }
 0x3bd   : > { %4885 = vmatpush1.bf16.msra.mxu0 %v4884_v25  ;;  %v2379_v25 = vld [vmem:[%s9584_s4 + $0x430] sm:$0xff]  ;;  %v2514_v1 = vld [vmem:[%s9584_s4 + $0x868] sm:$0xff] }
 0x3be   : > { %5013 = vmatpush1.bf16.msra.mxu1 %v5012_v26  ;;  %4887 = vmatprep.subr.bf16.mxu0 %v4886_v27  ;;  %v5030_v26 = vpack.c.bf16 %v2388_v16, %v2380_v14  ;;  %v2387_v27 = vld [vmem:[%s9584_s4 + $0x470] sm:$0xff]  ;;  %v2441_v14 = vld [vmem:[%s9584_s4 + $0x620] sm:$0xff]  ;;  %v4934_v8 = vpack.c.bf16 %v2514_v1, %v2506_v0 }
 0x3bf   : > { %5015 = vmatprep.subr.bf16.mxu1 %v5014_v31  ;;  %v2404_v31 = vld [vmem:[%s9584_s4 + $0x4f8] sm:$0xff]  ;;  %v5032_v33 = vpack.c.bf16 %v2387_v27, %v2379_v25  ;;  %v2449_v16 = vld [vmem:[%s9584_s4 + $0x660] sm:$0xff] }
 0x3c0   : > { %v2460_v25 = vld [vmem:[%s9584_s4 + $0x6b8] sm:$0xff]  ;;  %v4920_v27 = vpack.c.bf16 %v2449_v16, %v2441_v14  ;;  %v2522_v14 = vld [vmem:[%s9584_s4 + $0x8a8] sm:$0xff]  ;;  %v2569_v0 = vld [vmem:[%s9584_s4 + $0xa20] sm:$0xff] }
 0x3c1   : > { %4889 = vmatpush1.bf16.msra.mxu0 %v4888_v37  ;;  %v2395_v37 = vld [vmem:[%s9584_s4 + $0x4b0] sm:$0xff]  ;;  %v2530_v16 = vld [vmem:[%s9584_s4 + $0x8e8] sm:$0xff]  ;;  %v2577_v1 = vld [vmem:[%s9584_s4 + $0xa60] sm:$0xff] }
 0x3c2   : > { %5017 = vmatpush1.bf16.msra.mxu1 %v5016_v38  ;;  %4891 = vmatprep.subr.bf16.mxu0 %v4890_v39  ;;  %v5034_v38 = vpack.c.bf16 %v2404_v31, %v2396_v30  ;;  %v2403_v39 = vld [vmem:[%s9584_s4 + $0x4f0] sm:$0xff]  ;;  %v2457_v30 = vld [vmem:[%s9584_s4 + $0x6a0] sm:$0xff]  ;;  %v4938_v24 = vpack.c.bf16 %v2530_v16, %v2522_v14 }
 0x3c3   : > { %5019 = vmatprep.subr.bf16.mxu1 %v5018_v45  ;;  %v2420_v45 = vld [vmem:[%s9584_s4 + $0x578] sm:$0xff]  ;;  %v5036_v47 = vpack.c.bf16 %v2403_v39, %v2395_v37  ;;  %v2465_v31 = vld [vmem:[%s9584_s4 + $0x6e0] sm:$0xff] }
 0x3c4   : > { %v2476_v37 = vld [vmem:[%s9584_s4 + $0x738] sm:$0xff]  ;;  %v4924_v39 = vpack.c.bf16 %v2465_v31, %v2457_v30  ;;  %v2538_v30 = vld [vmem:[%s9584_s4 + $0x928] sm:$0xff]  ;;  %v2585_v14 = vld [vmem:[%s9584_s4 + $0xaa0] sm:$0xff] }
 0x3c5   : > { %4893 = vmatpush1.bf16.msra.mxu0 %v4892_v50  ;;  %v2411_v50 = vld [vmem:[%s9584_s4 + $0x530] sm:$0xff]  ;;  %v2546_v31 = vld [vmem:[%s9584_s4 + $0x968] sm:$0xff]  ;;  %v2593_v16 = vld [vmem:[%s9584_s4 + $0xae0] sm:$0xff] }
 0x3c6   : > { %5021 = vmatpush1.bf16.msra.mxu1 %v5020_v51  ;;  %4895 = vmatprep.subr.bf16.mxu0 %v4894_v52  ;;  %v5038_v51 = vpack.c.bf16 %v2420_v45, %v2412_v42  ;;  %v2419_v52 = vld [vmem:[%s9584_s4 + $0x570] sm:$0xff]  ;;  %v2473_v42 = vld [vmem:[%s9584_s4 + $0x720] sm:$0xff]  ;;  %v4942_v36 = vpack.c.bf16 %v2546_v31, %v2538_v30 }
 0x3c7   : > { %5023 = vmatprep.subr.bf16.mxu1 %v5022_v61  ;;  %v2436_v61 = vld [vmem:[%s9584_s4 + $0x5f8] sm:$0xff]  ;;  %v5040_v54 = vpack.c.bf16 %v2419_v52, %v2411_v50  ;;  %v2481_v45 = vld [vmem:[%s9584_s4 + $0x760] sm:$0xff] }
 0x3c8   : > { %v2492_v50 = vld [vmem:[%s9584_s4 + $0x7b8] sm:$0xff]  ;;  %v4928_v52 = vpack.c.bf16 %v2481_v45, %v2473_v42  ;;  %v2562_v42 = vld [vmem:[%s9584_s4 + $0x9e8] sm:$0xff]  ;;  %v2601_v30 = vld [vmem:[%s9584_s4 + $0xb20] sm:$0xff] }
 0x3c9   : > { %4897 = vmatpush1.bf16.msra.mxu0 %v4896_v55  ;;  %v2427_v55 = vld [vmem:[%s9584_s4 + $0x5b0] sm:$0xff]  ;;  %v2556_v45 = vld [vmem:[%s9584_s4 + $0x9b8] sm:$0xff]  ;;  %v2609_v31 = vld [vmem:[%s9584_s4 + $0xb60] sm:$0xff] }
 0x3ca   : > { %5025 = vmatpush1.bf16.msra.mxu1 %v5024_v3  ;;  %4899 = vmatprep.subr.bf16.mxu0 %v4898_v4  ;;  %v5042_v3 = vpack.c.bf16 %v2436_v61, %v2428_v60  ;;  %v2435_v4 = vld [vmem:[%s9584_s4 + $0x5f0] sm:$0xff]  ;;  %v2489_v60 = vld [vmem:[%s9584_s4 + $0x7a0] sm:$0xff] }
 0x3cb   : > { %5027 = vmatprep.subr.bf16.mxu1 %v5026_v10  ;;  %v2452_v10 = vld [vmem:[%s9584_s4 + $0x678] sm:$0xff]  ;;  %v5044_v12 = vpack.c.bf16 %v2435_v4, %v2427_v55  ;;  %v2497_v61 = vld [vmem:[%s9584_s4 + $0x7e0] sm:$0xff] }
 0x3cc   : > { %v2508_v55 = vld [vmem:[%s9584_s4 + $0x838] sm:$0xff]  ;;  %v4932_v4 = vpack.c.bf16 %v2497_v61, %v2489_v60 }
 0x3cd   : > { %4901 = vmatpush1.bf16.msra.mxu0 %v4900_v18  ;;  %v2443_v18 = vld [vmem:[%s9584_s4 + $0x630] sm:$0xff]  ;;  %v2572_v60 = vld [vmem:[%s9584_s4 + $0xa38] sm:$0xff] }
 0x3ce   : > { %5029 = vmatpush1.bf16.msra.mxu1 %v5028_v19  ;;  %4903 = vmatprep.subr.bf16.mxu0 %v4902_v21  ;;  %v5046_v19 = vpack.c.bf16 %v2452_v10, %v2444_v9  ;;  %v2451_v21 = vld [vmem:[%s9584_s4 + $0x670] sm:$0xff]  ;;  %v2505_v9 = vld [vmem:[%s9584_s4 + $0x820] sm:$0xff]  ;;  %v2580_v61 = vld [vmem:[%s9584_s4 + $0xa78] sm:$0xff] }
 0x3cf   : > { %5031 = vmatprep.subr.bf16.mxu1 %v5030_v26  ;;  %v2468_v26 = vld [vmem:[%s9584_s4 + $0x6f8] sm:$0xff]  ;;  %v5048_v28 = vpack.c.bf16 %v2451_v21, %v2443_v18  ;;  %v2513_v10 = vld [vmem:[%s9584_s4 + $0x860] sm:$0xff] }
 0x3d0   : > { %v2524_v18 = vld [vmem:[%s9584_s4 + $0x8b8] sm:$0xff]  ;;  %v4936_v21 = vpack.c.bf16 %v2513_v10, %v2505_v9 }
 0x3d1   : > { %4905 = vmatpush1.bf16.msra.mxu0 %v4904_v32  ;;  %v2459_v32 = vld [vmem:[%s9584_s4 + $0x6b0] sm:$0xff]  ;;  %v2588_v9 = vld [vmem:[%s9584_s4 + $0xab8] sm:$0xff] }
 0x3d2   : > { %5033 = vmatpush1.bf16.msra.mxu1 %v5032_v33  ;;  %4907 = vmatprep.subr.bf16.mxu0 %v4906_v34  ;;  %v5050_v33 = vpack.c.bf16 %v2468_v26, %v2460_v25  ;;  %v2467_v34 = vld [vmem:[%s9584_s4 + $0x6f0] sm:$0xff]  ;;  %v2521_v25 = vld [vmem:[%s9584_s4 + $0x8a0] sm:$0xff]  ;;  %v2596_v10 = vld [vmem:[%s9584_s4 + $0xaf8] sm:$0xff] }
 0x3d3   : > { %5035 = vmatprep.subr.bf16.mxu1 %v5034_v38  ;;  %v2484_v38 = vld [vmem:[%s9584_s4 + $0x778] sm:$0xff]  ;;  %v5052_v40 = vpack.c.bf16 %v2467_v34, %v2459_v32  ;;  %v2529_v26 = vld [vmem:[%s9584_s4 + $0x8e0] sm:$0xff] }
 0x3d4   : > { %v2540_v32 = vld [vmem:[%s9584_s4 + $0x938] sm:$0xff]  ;;  %v4940_v34 = vpack.c.bf16 %v2529_v26, %v2521_v25 }
 0x3d5   : > { %4909 = vmatpush1.bf16.msra.mxu0 %v4908_v46  ;;  %v2475_v46 = vld [vmem:[%s9584_s4 + $0x730] sm:$0xff]  ;;  %v2604_v25 = vld [vmem:[%s9584_s4 + $0xb38] sm:$0xff] }
 0x3d6   : > { %5037 = vmatpush1.bf16.msra.mxu1 %v5036_v47  ;;  %4911 = vmatprep.subr.bf16.mxu0 %v4910_v48  ;;  %v5054_v47 = vpack.c.bf16 %v2484_v38, %v2476_v37  ;;  %v2483_v48 = vld [vmem:[%s9584_s4 + $0x770] sm:$0xff]  ;;  %v2537_v37 = vld [vmem:[%s9584_s4 + $0x920] sm:$0xff]  ;;  %v2612_v26 = vld [vmem:[%s9584_s4 + $0xb78] sm:$0xff] }
 0x3d7   : > { %5039 = vmatprep.subr.bf16.mxu1 %v5038_v51  ;;  %v2500_v51 = vld [vmem:[%s9584_s4 + $0x7f8] sm:$0xff]  ;;  %v5056_v53 = vpack.c.bf16 %v2483_v48, %v2475_v46  ;;  %v2545_v38 = vld [vmem:[%s9584_s4 + $0x960] sm:$0xff] }
 0x3d8   : > { %v2564_v46 = vld [vmem:[%s9584_s4 + $0x9f8] sm:$0xff] }
 0x3d9   : > { %4913 = vmatpush1.bf16.msra.mxu0 %v4912_v22  ;;  %v2491_v22 = vld [vmem:[%s9584_s4 + $0x7b0] sm:$0xff] }
 0x3da   : > { %5041 = vmatpush1.bf16.msra.mxu1 %v5040_v54  ;;  %4915 = vmatprep.subr.bf16.mxu0 %v4914_v63  ;;  %v5058_v54 = vpack.c.bf16 %v2500_v51, %v2492_v50  ;;  %v2499_v63 = vld [vmem:[%s9584_s4 + $0x7f0] sm:$0xff]  ;;  %v2561_v50 = vld [vmem:[%s9584_s4 + $0x9e0] sm:$0xff] }
 0x3db   : > { %5043 = vmatprep.subr.bf16.mxu1 %v5042_v3  ;;  %v2516_v3 = vld [vmem:[%s9584_s4 + $0x878] sm:$0xff]  ;;  %v5060_v5 = vpack.c.bf16 %v2499_v63, %v2491_v22  ;;  %v2555_v51 = vld [vmem:[%s9584_s4 + $0x9b0] sm:$0xff]  ;;  %v4948_v22 = vpack.c.bf16 %v2561_v50, %v2553_v49 }
 0x3dc   : > { %v2636_v49 = vld [vmem:[%s9584_s4 + $0xc38] sm:$0xff] }
 0x3dd   : > { %4917 = vmatpush1.bf16.msra.mxu0 %v4916_v11  ;;  %v2507_v11 = vld [vmem:[%s9584_s4 + $0x830] sm:$0xff]  ;;  %v2644_v50 = vld [vmem:[%s9584_s4 + $0xc78] sm:$0xff] }
 0x3de   : > { %5045 = vmatpush1.bf16.msra.mxu1 %v5044_v12  ;;  %4919 = vmatprep.subr.bf16.mxu0 %v4918_v13  ;;  %v5062_v12 = vpack.c.bf16 %v2516_v3, %v2508_v55  ;;  %v2515_v13 = vld [vmem:[%s9584_s4 + $0x870] sm:$0xff]  ;;  %v5078_v3 = vpack.c.bf16 %v2580_v61, %v2572_v60  ;;  %v5094_v61 = vpack.c.bf16 %v2644_v50, %v2636_v49 }
 0x3df   : > { %5047 = vmatprep.subr.bf16.mxu1 %v5046_v19  ;;  %v2532_v19 = vld [vmem:[%s9584_s4 + $0x8f8] sm:$0xff]  ;;  %v5064_v23 = vpack.c.bf16 %v2515_v13, %v2507_v11  ;;  %v2571_v55 = vld [vmem:[%s9584_s4 + $0xa30] sm:$0xff]  ;;  %v4952_v11 = vpack.c.bf16 %v2577_v1, %v2569_v0 }
 0x3e0   : > { %v2635_v60 = vld [vmem:[%s9584_s4 + $0xc30] sm:$0xff]  ;;  %v2652_v0 = vld [vmem:[%s9584_s4 + $0xcb8] sm:$0xff] }
 0x3e1   : > { %4921 = vmatpush1.bf16.msra.mxu0 %v4920_v27  ;;  %v2523_v27 = vld [vmem:[%s9584_s4 + $0x8b0] sm:$0xff]  ;;  %v2660_v1 = vld [vmem:[%s9584_s4 + $0xcf8] sm:$0xff] }
 0x3e2   : > { %5049 = vmatpush1.bf16.msra.mxu1 %v5048_v28  ;;  %4923 = vmatprep.subr.bf16.mxu0 %v4922_v29  ;;  %v5066_v28 = vpack.c.bf16 %v2532_v19, %v2524_v18  ;;  %v2531_v29 = vld [vmem:[%s9584_s4 + $0x8f0] sm:$0xff]  ;;  %v5082_v19 = vpack.c.bf16 %v2596_v10, %v2588_v9  ;;  %v5098_v10 = vpack.c.bf16 %v2660_v1, %v2652_v0 }
 0x3e3   : > { %5051 = vmatprep.subr.bf16.mxu1 %v5050_v33  ;;  %v2548_v33 = vld [vmem:[%s9584_s4 + $0x978] sm:$0xff]  ;;  %v5068_v35 = vpack.c.bf16 %v2531_v29, %v2523_v27  ;;  %v2587_v18 = vld [vmem:[%s9584_s4 + $0xab0] sm:$0xff]  ;;  %v4956_v27 = vpack.c.bf16 %v2593_v16, %v2585_v14 }
 0x3e4   : > { %v2651_v9 = vld [vmem:[%s9584_s4 + $0xcb0] sm:$0xff]  ;;  %v2668_v14 = vld [vmem:[%s9584_s4 + $0xd38] sm:$0xff] }
 0x3e5   : > { %4925 = vmatpush1.bf16.msra.mxu0 %v4924_v39  ;;  %v2539_v39 = vld [vmem:[%s9584_s4 + $0x930] sm:$0xff]  ;;  %v2676_v16 = vld [vmem:[%s9584_s4 + $0xd78] sm:$0xff] }
 0x3e6   : > { %5053 = vmatpush1.bf16.msra.mxu1 %v5052_v40  ;;  %4927 = vmatprep.subr.bf16.mxu0 %v4926_v6  ;;  %v2547_v40 = vld [vmem:[%s9584_s4 + $0x970] sm:$0xff]  ;;  %v2554_v6 = vld [vmem:[%s9584_s4 + $0x9a8] sm:$0xff] }
 0x3e7   : > { %5055 = vmatprep.subr.bf16.mxu1 %v5054_v47  ;;  %v4944_v47 = vpack.c.bf16 %v2545_v38, %v2537_v37  ;;  %v5072_v48 = vpack.c.bf16 %v2547_v40, %v2539_v39  ;;  %v4946_v20 = vpack.c.bf16 %v2562_v42, %v2554_v6  ;;  %v2620_v37 = vld [vmem:[%s9584_s4 + $0xbb8] sm:$0xff]  ;;  %v4960_v39 = vpack.c.bf16 %v2609_v31, %v2601_v30  ;;  %v2617_v6 = vld [vmem:[%s9584_s4 + $0xba0] sm:$0xff]  ;;  %v2699_v49 = vld [vmem:[%s9584_s4 + $0xe30] sm:$0xff] }
 0x3e8   : > { %v2628_v38 = vld [vmem:[%s9584_s4 + $0xbf8] sm:$0xff]  ;;  %v2625_v42 = vld [vmem:[%s9584_s4 + $0xbe0] sm:$0xff]  ;;  %v2715_v0 = vld [vmem:[%s9584_s4 + $0xeb0] sm:$0xff] }
 0x3e9   : > { %4929 = vmatpush1.bf16.msra.mxu0 %v4928_v52  ;;  %v2563_v52 = vld [vmem:[%s9584_s4 + $0x9f0] sm:$0xff]  ;;  %v2684_v30 = vld [vmem:[%s9584_s4 + $0xdb8] sm:$0xff] }
 0x3ea   : > { %5057 = vmatpush1.bf16.msra.mxu1 %v5056_v53  ;;  %4931 = vmatprep.subr.bf16.mxu0 %v4930_v56  ;;  %v2570_v53 = vld [vmem:[%s9584_s4 + $0xa28] sm:$0xff]  ;;  %v2692_v31 = vld [vmem:[%s9584_s4 + $0xdf8] sm:$0xff] }
 0x3eb   : > { %5059 = vmatprep.subr.bf16.mxu1 %v5058_v54  ;;  %v2578_v56 = vld [vmem:[%s9584_s4 + $0xa68] sm:$0xff]  ;;  %v5076_v54 = vpack.c.bf16 %v2563_v52, %v2555_v51  ;;  %v4964_v51 = vpack.c.bf16 %v2625_v42, %v2617_v6  ;;  %v2700_v6 = vld [vmem:[%s9584_s4 + $0xe38] sm:$0xff] }
 0x3ec   : > { %v4950_v63 = vpack.c.bf16 %v2578_v56, %v2570_v53  ;;  %v2633_v53 = vld [vmem:[%s9584_s4 + $0xc20] sm:$0xff]  ;;  %v2708_v42 = vld [vmem:[%s9584_s4 + $0xe78] sm:$0xff] }
 0x3ed   : > { %4933 = vmatpush1.bf16.msra.mxu0 %v4932_v4  ;;  %v2579_v4 = vld [vmem:[%s9584_s4 + $0xa70] sm:$0xff]  ;;  %v2641_v56 = vld [vmem:[%s9584_s4 + $0xc60] sm:$0xff]  ;;  %v5110_v50 = vpack.c.bf16 %v2708_v42, %v2700_v6 }
 0x3ee   : > { %5061 = vmatpush1.bf16.msra.mxu1 %v5060_v5  ;;  %4935 = vmatprep.subr.bf16.mxu0 %v4934_v8  ;;  %v2586_v5 = vld [vmem:[%s9584_s4 + $0xaa8] sm:$0xff] }
 0x3ef   : > { %5063 = vmatprep.subr.bf16.mxu1 %v5062_v12  ;;  %v2594_v8 = vld [vmem:[%s9584_s4 + $0xae8] sm:$0xff]  ;;  %v5080_v12 = vpack.c.bf16 %v2579_v4, %v2571_v55  ;;  %v4968_v55 = vpack.c.bf16 %v2641_v56, %v2633_v53  ;;  %v2716_v53 = vld [vmem:[%s9584_s4 + $0xeb8] sm:$0xff] }
 0x3f0   : > { %3148 = vmatmul.mubr.f32.vlgmr.msra.gmra.mrb[10].mxu0 %v8317_v2  ;;  %v4954_v13 = vpack.c.bf16 %v2594_v8, %v2586_v5  ;;  %v2649_v5 = vld [vmem:[%s9584_s4 + $0xca0] sm:$0xff]  ;;  %v2724_v56 = vld [vmem:[%s9584_s4 + $0xef8] sm:$0xff] }
 0x3f1   : > { %3290 = vmatmul.mubr.f32.vlgmr.msra.gmra.mrb[10].mxu1 %v8317_v2  ;;  %4937 = vmatpush1.bf16.msra.mxu0 %v4936_v21  ;;  %v5070_v2 = vpack.c.bf16 %v2548_v33, %v2540_v32  ;;  %v2595_v21 = vld [vmem:[%s9584_s4 + $0xaf0] sm:$0xff]  ;;  %v5086_v33 = vpack.c.bf16 %v2612_v26, %v2604_v25  ;;  %v2657_v8 = vld [vmem:[%s9584_s4 + $0xce0] sm:$0xff]  ;;  %v5102_v26 = vpack.c.bf16 %v2676_v16, %v2668_v14 }
 0x3f2   : > { %5065 = vmatpush1.bf16.msra.mxu1 %v5064_v23  ;;  %4939 = vmatprep.subr.bf16.mxu0 %v4938_v24  ;;  %v2602_v23 = vld [vmem:[%s9584_s4 + $0xb28] sm:$0xff]  ;;  %v2603_v32 = vld [vmem:[%s9584_s4 + $0xb30] sm:$0xff]  ;;  %v5114_v1 = vpack.c.bf16 %v2724_v56, %v2716_v53 }
 0x3f3   : > { %5067 = vmatprep.subr.bf16.mxu1 %v5066_v28  ;;  %3218 = vmatprep.mubr.f32.mxu0 %v8362_v17  ;;  %v2610_v24 = vld [vmem:[%s9584_s4 + $0xb68] sm:$0xff]  ;;  %v5084_v28 = vpack.c.bf16 %v2595_v21, %v2587_v18  ;;  %v4972_v18 = vpack.c.bf16 %v2657_v8, %v2649_v5  ;;  %v2667_v25 = vld [vmem:[%s9584_s4 + $0xd30] sm:$0xff]  ;;  %v2732_v5 = vld [vmem:[%s9584_s4 + $0xf38] sm:$0xff] }
 0x3f4   : > { %3360 = vmatprep.mubr.f32.mxu1 %v8362_v17  ;;  %v5074_v17 = vpack.c.bf16 %v2564_v46, %v2556_v45  ;;  %v4958_v29 = vpack.c.bf16 %v2610_v24, %v2602_v23  ;;  %v2619_v45 = vld [vmem:[%s9584_s4 + $0xbb0] sm:$0xff]  ;;  %v5090_v46 = vpack.c.bf16 %v2628_v38, %v2620_v37  ;;  %v2665_v23 = vld [vmem:[%s9584_s4 + $0xd20] sm:$0xff]  ;;  %v5106_v38 = vpack.c.bf16 %v2692_v31, %v2684_v30  ;;  %v2740_v8 = vld [vmem:[%s9584_s4 + $0xf78] sm:$0xff] }
 0x3f5   : > { %4941 = vmatpush1.bf16.msra.mxu0 %v4940_v34  ;;  %v2611_v34 = vld [vmem:[%s9584_s4 + $0xb70] sm:$0xff]  ;;  %v2673_v24 = vld [vmem:[%s9584_s4 + $0xd60] sm:$0xff]  ;;  %v5118_v16 = vpack.c.bf16 %v2740_v8, %v2732_v5 }
 0x3f6   : > { %5069 = vmatpush1.bf16.msra.mxu1 %v5068_v35  ;;  %4943 = vmatprep.subr.bf16.mxu0 %v4942_v36  ;;  %v2618_v35 = vld [vmem:[%s9584_s4 + $0xba8] sm:$0xff]  ;;  %v2683_v37 = vld [vmem:[%s9584_s4 + $0xdb0] sm:$0xff] }
 0x3f7   : > { %5071 = vmatprep.subr.bf16.mxu1 %v5070_v2  ;;  %v2626_v36 = vld [vmem:[%s9584_s4 + $0xbe8] sm:$0xff]  ;;  %v5088_v2 = vpack.c.bf16 %v2611_v34, %v2603_v32  ;;  %v4976_v32 = vpack.c.bf16 %v2673_v24, %v2665_v23  ;;  %v2731_v14 = vld [vmem:[%s9584_s4 + $0xf30] sm:$0xff]  ;;  %v2748_v23 = vld [vmem:[%s9584_s4 + $0xfb8] sm:$0xff] }
 0x3f8   : > { %v4962_v40 = vpack.c.bf16 %v2626_v36, %v2618_v35  ;;  %v2681_v35 = vld [vmem:[%s9584_s4 + $0xda0] sm:$0xff]  ;;  %v2756_v24 = vld [vmem:[%s9584_s4 + $0xff8] sm:$0xff]  ;;  %v2747_v31 = vld [vmem:[%s9584_s4 + $0xfb0] sm:$0xff] }
 0x3f9   : > { %4945 = vmatpush1.bf16.msra.mxu0 %v4944_v47  ;;  %v2627_v47 = vld [vmem:[%s9584_s4 + $0xbf0] sm:$0xff]  ;;  %v2689_v36 = vld [vmem:[%s9584_s4 + $0xde0] sm:$0xff]  ;;  %v5122_v30 = vpack.c.bf16 %v2756_v24, %v2748_v23 }
 0x3fa   : > { %5073 = vmatpush1.bf16.msra.mxu1 %v5072_v48  ;;  %4947 = vmatprep.subr.bf16.mxu0 %v4946_v20  ;;  %v2634_v48 = vld [vmem:[%s9584_s4 + $0xc28] sm:$0xff] }
 0x3fb   : > { %5075 = vmatprep.subr.bf16.mxu1 %v5074_v17  ;;  %v2642_v20 = vld [vmem:[%s9584_s4 + $0xc68] sm:$0xff]  ;;  %v5092_v17 = vpack.c.bf16 %v2627_v47, %v2619_v45  ;;  %v4980_v45 = vpack.c.bf16 %v2689_v36, %v2681_v35  ;;  %v5328_v35 = vld.sshfl [vmem:[#allocation6] sm:$0x33 pattern:$0x76325410] }
 0x3fc   : > { %v4966_v52 = vpack.c.bf16 %v2642_v20, %v2634_v48  ;;  %v2697_v48 = vld [vmem:[%s9584_s4 + $0xe20] sm:$0xff] }
 0x3fd   : > { %4949 = vmatpush1.bf16.msra.mxu0 %v4948_v22  ;;  %v2643_v22 = vld [vmem:[%s9584_s4 + $0xc70] sm:$0xff]  ;;  %v2705_v20 = vld [vmem:[%s9584_s4 + $0xe60] sm:$0xff] }
 0x3fe   : > { %5077 = vmatpush1.bf16.msra.mxu1 %v5076_v54  ;;  %4951 = vmatprep.subr.bf16.mxu0 %v4950_v63  ;;  %v2650_v54 = vld [vmem:[%s9584_s4 + $0xca8] sm:$0xff] }
 0x3ff   : > { %5079 = vmatprep.subr.bf16.mxu1 %v5078_v3  ;;  %v2658_v63 = vld [vmem:[%s9584_s4 + $0xce8] sm:$0xff]  ;;  %v5096_v3 = vpack.c.bf16 %v2643_v22, %v2635_v60  ;;  %v4984_v60 = vpack.c.bf16 %v2705_v20, %v2697_v48 }
 0x400   : > { %v4970_v4 = vpack.c.bf16 %v2658_v63, %v2650_v54  ;;  %v2713_v54 = vld [vmem:[%s9584_s4 + $0xea0] sm:$0xff] }
 0x401   : > { %4953 = vmatpush1.bf16.msra.mxu0 %v4952_v11  ;;  %v2659_v11 = vld [vmem:[%s9584_s4 + $0xcf0] sm:$0xff]  ;;  %v2721_v63 = vld [vmem:[%s9584_s4 + $0xee0] sm:$0xff] }
 0x402   : > { %5081 = vmatpush1.bf16.msra.mxu1 %v5080_v12  ;;  %4955 = vmatprep.subr.bf16.mxu0 %v4954_v13  ;;  %v2666_v12 = vld [vmem:[%s9584_s4 + $0xd28] sm:$0xff] }
 0x403   : > { %5083 = vmatprep.subr.bf16.mxu1 %v5082_v19  ;;  %v2674_v13 = vld [vmem:[%s9584_s4 + $0xd68] sm:$0xff]  ;;  %v5100_v19 = vpack.c.bf16 %v2659_v11, %v2651_v9  ;;  %v4988_v9 = vpack.c.bf16 %v2721_v63, %v2713_v54 }
 0x404   : > { %v4974_v21 = vpack.c.bf16 %v2674_v13, %v2666_v12  ;;  %v2729_v12 = vld [vmem:[%s9584_s4 + $0xf20] sm:$0xff] }
 0x405   : > { %4957 = vmatpush1.bf16.msra.mxu0 %v4956_v27  ;;  %v2675_v27 = vld [vmem:[%s9584_s4 + $0xd70] sm:$0xff]  ;;  %v2737_v13 = vld [vmem:[%s9584_s4 + $0xf60] sm:$0xff] }
 0x406   : > { %5085 = vmatpush1.bf16.msra.mxu1 %v5084_v28  ;;  %4959 = vmatprep.subr.bf16.mxu0 %v4958_v29  ;;  %v2682_v28 = vld [vmem:[%s9584_s4 + $0xda8] sm:$0xff] }
 0x407   : > { %5087 = vmatprep.subr.bf16.mxu1 %v5086_v33  ;;  %v2690_v29 = vld [vmem:[%s9584_s4 + $0xde8] sm:$0xff]  ;;  %v5104_v33 = vpack.c.bf16 %v2675_v27, %v2667_v25  ;;  %v4992_v25 = vpack.c.bf16 %v2737_v13, %v2729_v12 }
 0x408   : > { %v4978_v34 = vpack.c.bf16 %v2690_v29, %v2682_v28  ;;  %v2745_v28 = vld [vmem:[%s9584_s4 + $0xfa0] sm:$0xff] }
 0x409   : > { %4961 = vmatpush1.bf16.msra.mxu0 %v4960_v39  ;;  %v2691_v39 = vld [vmem:[%s9584_s4 + $0xdf0] sm:$0xff]  ;;  %v2753_v29 = vld [vmem:[%s9584_s4 + $0xfe0] sm:$0xff] }
 0x40a   : > { %5089 = vmatpush1.bf16.msra.mxu1 %v5088_v2  ;;  %4963 = vmatprep.subr.bf16.mxu0 %v4962_v40  ;;  %v2698_v2 = vld [vmem:[%s9584_s4 + $0xe28] sm:$0xff] }
 0x40b   : > { %5091 = vmatprep.subr.bf16.mxu1 %v5090_v46  ;;  %v2706_v40 = vld [vmem:[%s9584_s4 + $0xe68] sm:$0xff]  ;;  %v5108_v46 = vpack.c.bf16 %v2691_v39, %v2683_v37 }
 0x40c   : > { %v4982_v47 = vpack.c.bf16 %v2706_v40, %v2698_v2  ;;  %v2757_v2 = vld [vmem:[%s9585_s5] sm:$0xff] }
 0x40d   : > { %4965 = vmatpush1.bf16.msra.mxu0 %v4964_v51  ;;  %v2707_v51 = vld [vmem:[%s9584_s4 + $0xe70] sm:$0xff]  ;;  %v2762_v40 = vrot.slane %v2757_v2, %v1543_v41  ;;  %v2770_v6 = vrot.slane %v2757_v2, %v1551_v43  ;;  %v2766_v42 = vrot.slane %v2757_v2, %v1547_v7  ;;  %v2782_v54 = vrot.slane %v2757_v2, %v1563_v58 }
 0x40e   : > { %5093 = vmatpush1.bf16.msra.mxu1 %v5092_v17  ;;  %4967 = vmatprep.subr.bf16.mxu0 %v4966_v52  ;;  %v2714_v17 = vld [vmem:[%s9584_s4 + $0xea8] sm:$0xff]  ;;  %v2790_v63 = vrot.slane %v2757_v2, %v1571_v62  ;;  %v3748_v58 = vld.sshfl [vmem:[#allocation7] sm:$0x33 pattern:$0x76325410] }
 0x40f   : > { %5095 = vmatprep.subr.bf16.mxu1 %v5094_v61  ;;  %v2722_v52 = vld [vmem:[%s9584_s4 + $0xee8] sm:$0xff]  ;;  %v5112_v61 = vpack.c.bf16 %v2707_v51, %v2699_v49 }
 0x410   : > { %v4986_v22 = vpack.c.bf16 %v2722_v52, %v2714_v17 }
 0x411   : > { %4969 = vmatpush1.bf16.msra.mxu0 %v4968_v55  ;;  %v2723_v55 = vld [vmem:[%s9584_s4 + $0xef0] sm:$0xff] }
 0x412   : > { %5097 = vmatpush1.bf16.msra.mxu1 %v5096_v3  ;;  %4971 = vmatprep.subr.bf16.mxu0 %v4970_v4  ;;  %v2730_v3 = vld [vmem:[%s9584_s4 + $0xf28] sm:$0xff] }
 0x413   : > { %5099 = vmatprep.subr.bf16.mxu1 %v5098_v10  ;;  %v2738_v4 = vld [vmem:[%s9584_s4 + $0xf68] sm:$0xff]  ;;  %v5116_v10 = vpack.c.bf16 %v2723_v55, %v2715_v0 }
 0x414   : > { %v4990_v11 = vpack.c.bf16 %v2738_v4, %v2730_v3 }
 0x415   : > { %4973 = vmatpush1.bf16.msra.mxu0 %v4972_v18  ;;  %v2739_v18 = vld [vmem:[%s9584_s4 + $0xf70] sm:$0xff] }
 0x416   : > { %5101 = vmatpush1.bf16.msra.mxu1 %v5100_v19  ;;  %4975 = vmatprep.subr.bf16.mxu0 %v4974_v21  ;;  %v2746_v19 = vld [vmem:[%s9584_s4 + $0xfa8] sm:$0xff] }
 0x417   : > { %5103 = vmatprep.subr.bf16.mxu1 %v5102_v26  ;;  %v2754_v21 = vld [vmem:[%s9584_s4 + $0xfe8] sm:$0xff]  ;;  %v5120_v26 = vpack.c.bf16 %v2739_v18, %v2731_v14 }
 0x418   : > { %v4994_v27 = vpack.c.bf16 %v2754_v21, %v2746_v19 }
 0x419   : > { %4977 = vmatpush1.bf16.msra.mxu0 %v4976_v32  ;;  %v2755_v32 = vld [vmem:[%s9584_s4 + $0xff0] sm:$0xff] }
 0x41a   : > { %5105 = vmatpush1.bf16.msra.mxu1 %v5104_v33  ;;  %4979 = vmatprep.subr.bf16.mxu0 %v4978_v34  ;;  %v4996_v33 = vpack.c.bf16 %v2753_v29, %v2745_v28  ;;  %v5124_v34 = vpack.c.bf16 %v2755_v32, %v2747_v31 }
 0x41b   : > { %5107 = vmatprep.subr.bf16.mxu1 %v5106_v38 }
 0x41d   : > { %4981 = vmatpush1.bf16.msra.mxu0 %v4980_v45  ;;  %v2774_v45 = vrot.slane %v2757_v2, %v1555_v44  ;;  %v2778_v44 = vrot.slane %v2757_v2, %v1559_v59 }
 0x41e   : > { %5109 = vmatpush1.bf16.msra.mxu1 %v5108_v46  ;;  %4983 = vmatprep.subr.bf16.mxu0 %v4982_v47 }
 0x41f   : > { %5111 = vmatprep.subr.bf16.mxu1 %v5110_v50 }
 0x421   : > { %4985 = vmatpush1.bf16.msra.mxu0 %v4984_v60 }
 0x422   : > { %5113 = vmatpush1.bf16.msra.mxu1 %v5112_v61  ;;  %4987 = vmatprep.subr.bf16.mxu0 %v4986_v22  ;;  %v2786_v22 = vrot.slane %v2757_v2, %v1567_v57 }
 0x423   : > { %5115 = vmatprep.subr.bf16.mxu1 %v5114_v1 }
 0x425   : > { %4989 = vmatpush1.bf16.msra.mxu0 %v4988_v9 }
 0x426   : > { %5117 = vmatpush1.bf16.msra.mxu1 %v5116_v10  ;;  %4991 = vmatprep.subr.bf16.mxu0 %v4990_v11  ;;  %v3414_v11 = vcombine.high %v3748_v58, %v3748_v58 }
 0x427   : > { %5119 = vmatprep.subr.bf16.mxu1 %v5118_v16 }
 0x429   : > { %4993 = vmatpush1.bf16.msra.mxu0 %v4992_v25 }
 0x42a   : > { %5121 = vmatpush1.bf16.msra.mxu1 %v5120_v26  ;;  %4995 = vmatprep.subr.bf16.mxu0 %v4994_v27 }
 0x42b   : > { %5123 = vmatprep.subr.bf16.mxu1 %v5122_v30 }
 0x42d   : > { %4997 = vmatpush1.bf16.msra.mxu0 %v4996_v33 }
 0x42e   : > { %5125 = vmatpush1.bf16.msra.mxu1 %v5124_v34 }
 0x430   : > { %3219 = vmatmul.mubr.f32.vlgmr.msra.gmra.mrb[10].mxu0 %v5328_v35 }
 0x431   : > { %3361 = vmatmul.mubr.f32.vlgmr.msra.gmra.mrb[10].mxu1 %v5328_v35 }
 0x483   : > { %v2936_v36 = vpop.f32.mrb[8].mxu0  ;;  %v3078_v37 = vpop.f32.mrb[8].mxu1 }
 0x484   : > { %v2938_v38 = vpop.f32.mrb[9].mxu0  ;;  %v3080_v39 = vpop.f32.mrb[9].mxu1  ;;  %v5190_v46 = vadd.f32 %v2936_v36, %v2762_v40  ;;  %v5192_v47 = vadd.f32 %v3078_v37, %v2770_v6  ;;  %v3471_v37 = vld [vmem:[#allocation8 + $0x80] sm:$0xff] (!%p3751_p4)  ;;  %v3456_v40 = vld [vmem:[#allocation8 + $0x8] sm:$0xff] (!%p3751_p4)  ;;  %v3473_v6 = vld [vmem:[#allocation8 + $0x90] sm:$0xff] (!%p3751_p4) }
 0x485   : > { %v5191_v48 = vadd.f32 %v2938_v38, %v2766_v42  ;;  %v5193_v20 = vadd.f32 %v3080_v39, %v2774_v45  ;;  %v3472_v38 = vld [vmem:[#allocation8 + $0x88] sm:$0xff] (!%p3751_p4)  ;;  %v3455_v39 = vld [vmem:[#allocation8] sm:$0xff] (!%p3751_p4)  ;;  %v3474_v42 = vld [vmem:[#allocation8 + $0x98] sm:$0xff] (!%p3751_p4)  ;;  %v5404_v45 = vmov (!%p3751_p4), 0.0|0.0  }
 0x486   : > { %v3742_v49 = vmul.f32 -1.442695, %v5190_v46  ;;  %v3744_v50 = vmul.f32 -1.442695, %v5192_v47  ;;  %v5126_v2 = vpack.c.bf16 (!%p3751_p4), %v3472_v38, %v3471_v37  ;;  %5158 = vmatprep.subr.bf16.mxu1 (!%p3751_p4), %v5404_v45  ;;  %v5128_v46 = vpack.c.bf16 (!%p3751_p4), %v3456_v40, %v3455_v39  ;;  %v3575_v37 = vld [vmem:[%s9588_s8 + $0x50] sm:$0xff] (!%p3751_p4)  ;;  %v3576_v38 = vld [vmem:[%s9588_s8 + $0x58] sm:$0xff] (!%p3751_p4) }
 0x487   : > { %v3743_v51 = vmul.f32 -1.442695, %v5191_v48  ;;  %v3745_v17 = vmul.f32 -1.442695, %v5193_v20  ;;  %v5130_v47 = vpack.c.bf16 (!%p3751_p4), %v3474_v42, %v3473_v6  ;;  %v3457_v48 = vld [vmem:[#allocation8 + $0x10] sm:$0xff] (!%p3751_p4)  ;;  %v3458_v20 = vld [vmem:[#allocation8 + $0x18] sm:$0xff] (!%p3751_p4) }
 0x488   : > { %5295 = vpow2.f32 %v3742_v49  ;;  %v3475_v49 = vld [vmem:[#allocation8 + $0xa0] sm:$0xff] (!%p3751_p4)  ;;  %5127 = vmatprep.subr.bf16.mxu0 (!%p3751_p4), %v5126_v2  ;;  %v5174_v2 = vpack.c.bf16 (!%p3751_p4), %v3576_v38, %v3575_v37  ;;  %v3577_v40 = vld [vmem:[%s9588_s8 + $0x60] sm:$0xff] (!%p3751_p4)  ;;  %v3578_v6 = vld [vmem:[%s9588_s8 + $0x68] sm:$0xff] (!%p3751_p4) }
 0x489   : > { %5297 = vpow2.f32 %v3744_v50  ;;  %v3476_v50 = vld [vmem:[#allocation8 + $0xa8] sm:$0xff] (!%p3751_p4)  ;;  %5129 = vmatpush3.bf16.msra.mxu0 (!%p3751_p4), %v5128_v46  ;;  %v5177_v42 = vpack.c.bf16 (!%p3751_p4), %v3578_v6, %v3577_v40  ;;  %v3579_v46 = vld [vmem:[%s9588_s8 + $0x70] sm:$0xff] (!%p3751_p4) }
 0x48a   : > { %5299 = vpow2.f32 %v3743_v51  ;;  %v5132_v51 = vpack.c.bf16 (!%p3751_p4), %v3458_v20, %v3457_v48  ;;  %5131 = vmatprep.subr.bf16.mxu0 (!%p3751_p4), %v5130_v47  ;;  %v5406_v48 = vmov (!%p3751_p4), 0.0  }
 0x48b   : > { %5301 = vpow2.f32 %v3745_v17  ;;  %v5134_v17 = vpack.c.bf16 (!%p3751_p4), %v3476_v50, %v3475_v49  ;;  %3843 = vmatprep.mubr.msk.f32.mxu1 (!%p3751_p4), %vm5405_vm0, %v5406_v48  ;;  %v3752_v49 = vld [vmem:[%s9587_s7] ss:$0 sm:$0xff] (!%p3751_p4) }
 0x48d   : > { %5133 = vmatpush3.bf16.msra.mxu0 (!%p3751_p4), %v5132_v51 }
 0x48e   : > { %5135 = vmatprep.subr.bf16.mxu0 (!%p3751_p4), %v5134_v17 }
 0x492   : > { %v5296_v41 = vpop.eup %5295 }
 0x493   : > { %v5298_v43 = vpop.eup %5297  ;;  %v3374_v7 = vadd.f32 1.0, %v5296_v41  ;;  %v3459_v41 = vld [vmem:[#allocation8 + $0x20] sm:$0xff] (!%p3751_p4) }
 0x494   : > { %v5300_v52 = vpop.eup %5299  ;;  %v3386_v56 = vadd.f32 1.0, %v5298_v43  ;;  %v3460_v43 = vld [vmem:[#allocation8 + $0x28] sm:$0xff] (!%p3751_p4) }
 0x495   : > { %v5302_v53 = vpop.eup %5301  ;;  %v3375_v60 = vadd.f32 1.0, %v5300_v52  ;;  %5303 = vrcp.f32 %v3374_v7  ;;  %v3477_v52 = vld [vmem:[#allocation8 + $0xb0] sm:$0xff] (!%p3751_p4)  ;;  %v5136_v7 = vpack.c.bf16 (!%p3751_p4), %v3460_v43, %v3459_v41  ;;  %v3753_v41 = vld [vmem:[%s9589_s9] ss:$0 sm:$0xff] (!%p3751_p4) }
 0x496   : > { %v3387_v61 = vadd.f32 1.0, %v5302_v53  ;;  %5305 = vrcp.f32 %v3386_v56  ;;  %v3478_v53 = vld [vmem:[#allocation8 + $0xb8] sm:$0xff] (!%p3751_p4) }
 0x497   : > { %5307 = vrcp.f32 %v3375_v60  ;;  %v5138_v56 = vpack.c.bf16 (!%p3751_p4), %v3478_v53, %v3477_v52  ;;  %v3461_v60 = vld [vmem:[#allocation8 + $0x30] sm:$0xff] (!%p3751_p4)  ;;  %5137 = vmatpush3.bf16.msra.mxu0 (!%p3751_p4), %v5136_v7 }
 0x498   : > { %5309 = vrcp.f32 %v3387_v61  ;;  %v3479_v61 = vld [vmem:[#allocation8 + $0xc0] sm:$0xff] (!%p3751_p4) }
 0x499   : > { %5139 = vmatprep.subr.bf16.mxu0 (!%p3751_p4), %v5138_v56 }
 0x49f   : > { %v5304_v15 = vpop.eup %5303 }
 0x4a0   : > { %v5306_v62 = vpop.eup %5305 }
 0x4a1   : > { %v5308_v10 = vpop.eup %5307  ;;  %v3417_v16 = vmul.f32 %v5306_v62, %v3748_v58  ;;  %v3569_v58 = vld [vmem:[%s9588_s8 + $0x20] sm:$0xff] (!%p3751_p4) }
 0x4a2   : > { %v5310_v12 = vpop.eup %5309 }
 0x4a3   : > { %v3418_v19 = vmul.f32 %v5310_v12, %v3414_v11  ;;  %v3465_v11 = vld [vmem:[#allocation8 + $0x50] sm:$0xff] (!%p3751_p4)  ;;  %v3466_v12 = vld [vmem:[#allocation8 + $0x58] sm:$0xff] (!%p3751_p4) }
 0x503   : > { %v3220_v0 = vpop.f32.mrb[10].mxu0 }
 0x504   : > { %v5194_v1 = vadd.f32 %v3220_v0, %v2778_v44  ;;  %v3362_v55 = vpop.f32.mrb[10].mxu1  ;;  %v3222_v3 = vpop.f32.mrb[11].mxu0  ;;  %v3462_v44 = vld [vmem:[#allocation8 + $0x38] sm:$0xff] (!%p3751_p4) }
 0x505   : > { %v5196_v4 = vadd.f32 %v3362_v55, %v2786_v22  ;;  %v5195_v59 = vadd.f32 %v3222_v3, %v2782_v54  ;;  %v3364_v5 = vpop.f32.mrb[11].mxu1  ;;  %v3480_v22 = vld [vmem:[#allocation8 + $0xc8] sm:$0xff] (!%p3751_p4)  ;;  %v3567_v0 = vld [vmem:[%s9588_s8 + $0x10] sm:$0xff] (!%p3751_p4)  ;;  %v5140_v55 = vpack.c.bf16 (!%p3751_p4), %v3462_v44, %v3461_v60 }
 0x506   : > { %5311 = vtanh.f32 %v5194_v1  ;;  %v5197_v8 = vadd.f32 %v3364_v5, %v2790_v63  ;;  %v3565_v54 = vld [vmem:[%s9588_s8] sm:$0xff] (!%p3751_p4)  ;;  %v3566_v63 = vld [vmem:[%s9588_s8 + $0x8] sm:$0xff] (!%p3751_p4)  ;;  %v3568_v1 = vld [vmem:[%s9588_s8 + $0x18] sm:$0xff] (!%p3751_p4) }
 0x507   : > { %v3746_v57 = vmul.f32 -1.442695, %v5196_v4  ;;  %5313 = vtanh.f32 %v5195_v59  ;;  %v5159_v3 = vpack.c.bf16 (!%p3751_p4), %v3566_v63, %v3565_v54  ;;  %v5142_v4 = vpack.c.bf16 (!%p3751_p4), %v3480_v22, %v3479_v61  ;;  %v3463_v59 = vld [vmem:[#allocation8 + $0x40] sm:$0xff] (!%p3751_p4)  ;;  %v3464_v5 = vld [vmem:[#allocation8 + $0x48] sm:$0xff] (!%p3751_p4)  ;;  %5141 = vmatpush3.bf16.msra.mxu0 (!%p3751_p4), %v5140_v55 }
 0x508   : > { %v3747_v9 = vmul.f32 -1.442695, %v5197_v8  ;;  %v3481_v8 = vld [vmem:[#allocation8 + $0xd0] sm:$0xff] (!%p3751_p4)  ;;  %v5144_v62 = vpack.c.bf16 (!%p3751_p4), %v3464_v5, %v3463_v59 }
 0x509   : > { %5315 = vpow2.f32 %v3746_v57  ;;  %v3482_v57 = vld [vmem:[#allocation8 + $0xd8] sm:$0xff] (!%p3751_p4)  ;;  %5160 = vmatpush3.bf16.msra.mxu1 (!%p3751_p4), %v5159_v3  ;;  %5143 = vmatprep.subr.bf16.mxu0 (!%p3751_p4), %v5142_v4 }
 0x50a   : > { %5317 = vpow2.f32 %v3747_v9  ;;  %v5162_v9 = vpack.c.bf16 (!%p3751_p4), %v3568_v1, %v3567_v0  ;;  %5161 = vmatprep.subr.bf16.mxu1 (!%p3751_p4), %v5404_v45 }
 0x50b   : > { %5145 = vmatpush3.bf16.msra.mxu0 (!%p3751_p4), %v5144_v62 }
 0x50d   : > { %5163 = vmatpush3.bf16.msra.mxu1 (!%p3751_p4), %v5162_v9 }
 0x50e   : > { %5164 = vmatprep.subr.bf16.mxu1 (!%p3751_p4), %v5404_v45 }
 0x510   : > { %v5312_v13 = vpop.eup %5311 }
 0x511   : > { %v5314_v14 = vpop.eup %5313  ;;  %v3419_v18 = vmul.f32 %v5312_v13, %v5304_v15  ;;  %v3570_v15 = vld [vmem:[%s9588_s8 + $0x28] sm:$0xff] (!%p3751_p4)  ;;  %v3483_v13 = vld [vmem:[#allocation8 + $0xe0] sm:$0xff] (!%p3751_p4) }
 0x512   : > { %v3420_v21 = vmul.f32 %v5314_v14, %v5308_v10  ;;  %v5146_v10 = vpack.c.bf16 (!%p3751_p4), %v3482_v57, %v3481_v8  ;;  %v3484_v14 = vld [vmem:[#allocation8 + $0xe8] sm:$0xff] (!%p3751_p4) }
 0x513   : > { %v5316_v23 = vpop.eup %5315  ;;  %v3421_v24 = vadd.f32 %v3419_v18, %v3417_v16  ;;  %v5165_v16 = vpack.c.bf16 (!%p3751_p4), %v3570_v15, %v3569_v58  ;;  %v3571_v18 = vld [vmem:[%s9588_s8 + $0x30] sm:$0xff] (!%p3751_p4) }
 0x514   : > { %v5318_v25 = vpop.eup %5317  ;;  %v3400_v26 = vadd.f32 1.0, %v5316_v23  ;;  %v3422_v27 = vadd.f32 %v3420_v21, %v3418_v19  ;;  %v3572_v19 = vld [vmem:[%s9588_s8 + $0x38] sm:$0xff] (!%p3751_p4)  ;;  %v5148_v21 = vpack.c.bf16 (!%p3751_p4), %v3466_v12, %v3465_v11  ;;  %5147 = vmatprep.subr.bf16.mxu0 (!%p3751_p4), %v5146_v10  ;;  %v5150_v23 = vpack.c.bf16 (!%p3751_p4), %v3484_v14, %v3483_v13 }
 0x515   : > { %5319 = vtanh.f32 %v3421_v24  ;;  %v3401_v28 = vadd.f32 1.0, %v5318_v25  ;;  %v3468_v25 = vld [vmem:[#allocation8 + $0x68] sm:$0xff] (!%p3751_p4)  ;;  %5166 = vmatpush3.bf16.msra.mxu1 (!%p3751_p4), %v5165_v16 }
 0x516   : > { %5321 = vrcp.f32 %v3400_v26  ;;  %v3441_v29 = vcombine.low %v3421_v24, %v3422_v27  ;;  %v3467_v24 = vld [vmem:[#allocation8 + $0x60] sm:$0xff] (!%p3751_p4)  ;;  %v3485_v26 = vld [vmem:[#allocation8 + $0xf0] sm:$0xff] (!%p3751_p4)  ;;  %5167 = vmatprep.subr.bf16.mxu1 (!%p3751_p4), %v5404_v45  ;;  %5149 = vmatpush3.bf16.msra.mxu0 (!%p3751_p4), %v5148_v21 }
 0x517   : > { %5323 = vtanh.f32 %v3422_v27  ;;  %v3486_v27 = vld [vmem:[#allocation8 + $0xf8] sm:$0xff] (!%p3751_p4)  ;;  %5151 = vmatprep.subr.bf16.mxu0 (!%p3751_p4), %v5150_v23 }
 0x518   : > { %3750 = vst.sshfl [vmem:[#allocation7] sm:$0x33 pattern:$0x76325410] %v3441_v29  ;;  %5325 = vrcp.f32 %v3401_v28  ;;  %v5168_v28 = vpack.c.bf16 (!%p3751_p4), %v3572_v19, %v3571_v18  ;;  %v3573_v29 = vld [vmem:[%s9588_s8 + $0x40] sm:$0xff] (!%p3751_p4) }
 0x51a   : > { %5169 = vmatpush3.bf16.msra.mxu1 (!%p3751_p4), %v5168_v28 }
 0x51b   : > { %5170 = vmatprep.subr.bf16.mxu1 (!%p3751_p4), %v5404_v45 }
 0x51f   : > { %v5320_v30 = vpop.eup %5319 }
 0x520   : > { %v5322_v31 = vpop.eup %5321 }
 0x521   : > { %v5324_v32 = vpop.eup %5323  ;;  %v9487_v33 = vmul.f32 %v5322_v31, %v5320_v30  ;;  %3454 = sbr.rel (%p3751_p4) target bundleno = 1757 (0x6dd), region = 72  ;;  %v3574_v30 = vld [vmem:[%s9588_s8 + $0x48] sm:$0xff] (!%p3751_p4)  ;;  %v5152_v31 = vpack.c.bf16 (!%p3751_p4), %v3468_v25, %v3467_v24 }
 0x522   : > { %v5326_v34 = vpop.eup %5325 }
 0x523   : > { %v3426_v35 = vmul.f32 %v5326_v34, %v5324_v32  ;;  %v5154_v32 = vpack.c.bf16 (!%p3751_p4), %v3486_v27, %v3485_v26  ;;  %v3469_v34 = vld [vmem:[#allocation8 + $0x70] sm:$0xff] (!%p3751_p4)  ;;  %5153 = vmatpush3.bf16.msra.mxu0 (!%p3751_p4), %v5152_v31 }
 0x525   : > { %v3429_v36 = vcombine.low %v9487_v33, %v3426_v35  ;;  %3558 = vmatprep.mubr.f32.mxu0 (!%p3751_p4), %v3426_v35  ;;  %v3470_v35 = vld [vmem:[#allocation8 + $0x78] sm:$0xff] (!%p3751_p4)  ;;  %5155 = vmatprep.subr.bf16.mxu0 (!%p3751_p4), %v5154_v32 }
 0x526   : > { %v5156_v39 = vpack.c.bf16 (!%p3751_p4), %v3470_v35, %v3469_v34 }
 0x527   : > { %3749 = vst.sshfl [vmem:[#allocation6] sm:$0x33 pattern:$0x76325410] %v3429_v36  ;;  %v5171_v36 = vpack.c.bf16 (!%p3751_p4), %v3574_v30, %v3573_v29 }
 0x528   : > { %5157 = vmatpush3.bf16.msra.mxu0 %v5156_v39 }
 0x529   : > { %5172 = vmatpush3.bf16.msra.mxu1 %v5171_v36 }
 0x52a   : > { %5173 = vmatprep.subr.bf16.mxu1 %v5404_v45 }
 0x52b   : > { %3559 = vmatmul.mubr.f32.vlgmr.msra.gmra.mrb[0].mxu0 %v9487_v33  ;;  %v3580_v33 = vld [vmem:[%s9588_s8 + $0x78] sm:$0xff] }
 0x52c   : > { %v5180_v47 = vpack.c.bf16 %v3580_v33, %v3579_v46 }
 0x52d   : > { %5175 = vmatpush3.bf16.msra.mxu1 %v5174_v2 }
 0x52e   : > { %5176 = vmatprep.subr.bf16.mxu1 %v5404_v45 }
 0x531   : > { %5178 = vmatpush3.bf16.msra.mxu1 %v5177_v42 }
 0x532   : > { %5179 = vmatprep.subr.bf16.mxu1 %v5404_v45 }
 0x535   : > { %5181 = vmatpush3.bf16.msra.mxu1 %v5180_v47 }
 0x5fe   : > { %v3791_v20 = vpop.f32.mrb[0].mxu0 }
 0x5ff   : > { %v3792_v50 = vpop.f32.mrb[1].mxu0 }
 0x600   : > { %v3793_v45 = vadd.f32 %v3792_v50, %v3791_v20 }
 0x602   : > { %v3561_v51 = vadd.f32 %v3793_v45, %v3752_v49 }
 0x604   : > { %v3564_v17 = vmax.f32 %v3561_v51, 0.0 }
 0x606   : > { %3844 = vmatmul.mubr.f32.vlgmr.msra.gmra.mrb[0].mxu1 %v3564_v17 }
 0x6d9   : > { %v3654_v43 = vpop.f32.mrb[0].mxu1 }
 0x6da   : > { %v3655_v52 = vadd.f32 %v3753_v41, %v3654_v43  ;;  %v3845_v53 = vpop.f32.mrb[1].mxu1 }
 0x6dc   : > { %3659 = vst.msk [vmem:[#allocation11] sm:$0x3] %vm3658_vm1, %v3655_v52 }
 0x6dd PF: > { %p5228_p6 = scmp.eq.s32.totalorder %s5469_s14, 7  ;;  %s5407_s18 = smov [#allocation11]  }
 0x6de   : > { %s3667_s16 = sshll.u32 %s5407_s18, 4  ;;  %s3668_s16 = int_to_ptr.vmem [resolvable:$true] %s3667_s16 }
 0x6df   : > { %s5357_s17 = scalar_lea.vmem %s3668_s16, 32  ;;  %p5364_p13 = scmp.lt.s32.totalorder %s3668_s16, %s3668_s16 }
 0x6e0   : > { %p5358_p10 = scmp.ne.s32.totalorder %s3668_s16, %s5357_s17  ;;  %p5365_p0 = scmp.lt.s32.totalorder %s5357_s17, %s5357_s17 }
 0x6e2   : > { %p5359_p11 = pnand %p5358_p10, %p5228_p6  ;;  %p5366_p1 = por %p5365_p0, %p5364_p13 }
 0x6e4   : > { %p5360_p12 = pneg %p5359_p11 }
 0x6e6   : > { %p5367_p5 = pnand %p5366_p1, %p5360_p12 }
 0x6e8   : > { %5370 = shalt.err (!%p5367_p5)
}
 0x6e9   : > { %s5371_s22 = scalar_lea.hbm %s9590_s10, 32 }
 0x6ea   : > { %p5372_p7 = scmp.ne.s32.totalorder %s9590_s10, %s5371_s22  ;;  %p5377_p2 = scmp.lt.u32.totalorder %s5371_s22, %s9590_s10 }
 0x6ec   : > { %p5373_p9 = pnand %p5372_p7, %p5228_p6 }
 0x6ee   : > { %p5374_p8 = pneg %p5373_p9 }
 0x6f0   : > { %p5379_p3 = pnand %p5377_p2, %p5374_p8 }
 0x6f2   : > { %5382 = shalt.err (!%p5379_p3)
}
 0x6f3   : > { %5219 = dma.vmem_to_hbm [thread:$0]  (%p5228_p6), %s3668_s16, 32, %s9590_s10, [#allocation10]  }
 0x6f4   : > { %5392 = dma.done.wait (%p5228_p6), [#allocation10], 32  }
 0x6f5   : > { %5394 = vsyncadd (%p5228_p6), [#allocation10], 4294967264 }
 0x6f6 PF: > { %s22_s13 = sadd.s32 1, %s5397_s13  }
 0x6f7   : > { %p19_p4 = scmp.ge.s32.totalorder %s22_s13, 10  }
 0x6f9   :  { %21 = sbr.rel (!%p19_p4) target bundleno = 2 (0x2), region = 100 }
 0x700   :  { %3680 = vsyncpa [#allocation9], 1 }
 0x701   :  { %3682 = vsyncpa [#allocation9 + $0x1], 1 }
 0x702   :  { %3683 = vsyncpa [#allocation10], 1 }
 0x703   :  { %3685 = vsyncpa [#allocation10 + $0x1], 1 }

// kernel: lrcn_forward.2
= control target key start
LH: loop header
LB: loop body
LE: loop exit
PB: predicated region body
PF: predicated region fallthrough
CT: control target
= control target key end

     0   :  { %18 = vsyncpa [#allocation4], 0  ;;  %s13570_s0 = inlined_call_operand.vmem [shape: f32[16,256,3], index: 0, kind: input, shape index: {}]   ;;  %s13571_s1 = inlined_call_operand.vmem [shape: f32[3,2048], index: 1, kind: input, shape index: {}]   ;;  %s13572_s2 = inlined_call_operand.vmem [shape: f32[1,2048], index: 2, kind: input, shape index: {}]   ;;  %s13573_s3 = inlined_call_operand.vmem [shape: f32[1,2048], index: 3, kind: input, shape index: {}]   ;;  %s13574_s4 = inlined_call_operand.vmem [shape: f32[1,2048], index: 4, kind: input, shape index: {}]   ;;  %s13575_s5 = inlined_call_operand.vmem [shape: bf16[2048,512], index: 5, kind: input, shape index: {}]   ;;  %s13576_s6 = inlined_call_operand.vmem [shape: f32[1,512], index: 6, kind: input, shape index: {}]   ;;  %s13577_s7 = inlined_call_operand.vmem [shape: f32[1,512], index: 7, kind: input, shape index: {}]   ;;  %s13578_s8 = inlined_call_operand.vmem [shape: f32[1,512], index: 8, kind: input, shape index: {}]   ;;  %s13579_s9 = inlined_call_operand.hbm [shape: bf16[512,128], index: 9, kind: input, shape index: {}]   ;;  %s13580_s10 = inlined_call_operand.vmem [shape: f32[1,128], index: 10, kind: input, shape index: {}]   ;;  %s13581_s11 = inlined_call_operand.hbm [shape: bf16[128,1024], index: 11, kind: input, shape index: {}]   ;;  %s13582_s12 = inlined_call_operand.vmem [shape: f32[1,1024], index: 12, kind: input, shape index: {}]   ;;  %s13583_s13 = inlined_call_operand.vmem [shape: f32[16,1024], index: 13, kind: output, shape index: {}]  }
   0x1   :  { %19 = vsyncpa [#allocation6], 0  ;;  %s9193_s25 = smov [#allocation3]   ;;  %s9145_s29 = scalar_lea.hbm %s13579_s9, 4096 }
   0x2   :  { %s43_s26 = sshll.u32 %s9193_s25, 4  ;;  %p9146_p0 = scmp.ne.s32.totalorder %s13579_s9, %s9145_s29  ;;  %s44_s26 = int_to_ptr.vmem [resolvable:$true] %s43_s26 }
   0x3   :  { %p9149_p1 = scmp.lt.u32.totalorder %s9145_s29, %s13579_s9 }
   0x5   :  { %p9151_p2 = pnand %p9149_p1, %p9146_p0 }
   0x7   :  { %9154 = shalt.err (!%p9151_p2)
}
   0x8   :  { %s9155_s17 = scalar_lea.vmem %s44_s26, 4096  ;;  %p9160_p4 = scmp.lt.s32.totalorder %s44_s26, %s44_s26 }
   0x9   :  { %p9156_p3 = scmp.ne.s32.totalorder %s44_s26, %s9155_s17  ;;  %p9161_p5 = scmp.lt.s32.totalorder %s9155_s17, %s9155_s17 }
   0xb   :  { %p9162_p6 = por %p9161_p5, %p9160_p4 }
   0xd   :  { %p9163_p7 = pnand %p9162_p6, %p9156_p3 }
   0xf   :  { %9166 = shalt.err (!%p9163_p7)
}
  0x10   :  { %s9194_s18 = smov 64   ;;  %s9195_s19 = smov 4  }
  0x11   :  { %49 = dma.hbm_to_vmem [thread:$0]  %s13579_s9, 4096, %s44_s26, [#allocation4], %s9194_s18, %s9194_s18, %s9195_s19  }
  0x12   :  { %s9196_s22 = smov [#allocation5]   ;;  %s9167_s27 = scalar_lea.hbm %s13581_s11, 8192 }
  0x13   :  { %s57_s23 = sshll.u32 %s9196_s22, 4  ;;  %p9168_p8 = scmp.ne.s32.totalorder %s13581_s11, %s9167_s27  ;;  %s58_s23 = int_to_ptr.vmem [resolvable:$true] %s57_s23 }
  0x14   :  { %p9171_p9 = scmp.lt.u32.totalorder %s9167_s27, %s13581_s11 }
  0x16   :  { %p9173_p10 = pnand %p9171_p9, %p9168_p8 }
  0x18   :  { %9176 = shalt.err (!%p9173_p10)
}
  0x19   :  { %s9177_s15 = scalar_lea.vmem %s58_s23, 8192  ;;  %p9182_p12 = scmp.lt.s32.totalorder %s58_s23, %s58_s23 }
  0x1a   :  { %p9178_p11 = scmp.ne.s32.totalorder %s58_s23, %s9177_s15  ;;  %p9183_p13 = scmp.lt.s32.totalorder %s9177_s15, %s9177_s15 }
  0x1c   :  { %p9184_p0 = por %p9183_p13, %p9182_p12 }
  0x1e   :  { %p9185_p1 = pnand %p9184_p0, %p9178_p11 }
  0x20   :  { %9188 = shalt.err (!%p9185_p1)
}
  0x21   :  { %s9197_s9 = smov 512   ;;  %s9198_s26 = smov 32  }
  0x22   :  { %63 = dma.hbm_to_vmem [thread:$0]  %s13581_s11, 8192, %s58_s23, [#allocation6], %s9197_s9, %s9197_s9, %s9198_s26  }
  0x23   :  { %9189 = dma.done.wait [#allocation4], 4096  }
  0x24   :  { %9190 = vsyncadd [#allocation4], 4294963200 }
  0x25   :  { %9191 = dma.done.wait [#allocation6], 8192  }
  0x26   :  { %9192 = vsyncadd [#allocation6], 4294959104  ;;  %vm77_vm0 = vcmask 23552   ;;  %v9199_v0 = vmov 0.0   ;;  %v1749_v1 = vld [vmem:[%s13571_s1] sm:$0x77] }
  0x27   :  { %1960 = vmatprep.mubr.f32.mxu0 %v9199_v0  ;;  %78 = vst.msk [vmem:[#allocation2] sm:$0xff] %vm77_vm0, %v9199_v0  ;;  %79 = vst.msk [vmem:[#allocation2 + $0x8] sm:$0xff] %vm77_vm0, %v9199_v0  ;;  %2037 = vmatprep.mubr.f32.mxu1 %v9199_v0  ;;  %vm1863_vm1 = vcmask 1042432   ;;  %v82_v2 = vld [vmem:[%s13570_s0] sm:$0xff]  ;;  %v83_v3 = vld [vmem:[%s13570_s0 + $0x8] sm:$0xff]  ;;  %v1849_v4 = vcombine.high %v1749_v1, %v1749_v1  ;;  %vm1715_vm2 = vcmask 1041409  }
  0x28   :  { %v84_v5 = vld [vmem:[%s13570_s0 + $0x10] sm:$0xff]  ;;  %v85_v6 = vld [vmem:[%s13570_s0 + $0x18] sm:$0xff]  ;;  %v595_v7 = vsel %vm77_vm0, %v82_v2, 0.0  ;;  %v596_v8 = vsel %vm77_vm0, %v83_v3, 0.0  ;;  %v86_v9 = vld [vmem:[%s13570_s0 + $0x20] sm:$0xff]  ;;  %vm1717_vm3 = vcmask 1042434  }
  0x29   :  { %v597_v10 = vadd.f32 %v596_v8, %v595_v7  ;;  %v598_v11 = vsel %vm77_vm0, %v84_v5, 0.0  ;;  %7580 = vmatprep.subr.msk.mxu0 %vm1863_vm1, %v1849_v4  ;;  %v600_v12 = vsel %vm77_vm0, %v85_v6, 0.0  ;;  %v87_v13 = vld [vmem:[%s13570_s0 + $0x28] sm:$0xff]  ;;  %v602_v15 = vsel %vm77_vm0, %v86_v9, 0.0  ;;  %v88_v16 = vld [vmem:[%s13570_s0 + $0x30] sm:$0xff]  ;;  %v89_v19 = vld [vmem:[%s13570_s0 + $0x38] sm:$0xff] }
  0x2a   :  { %7581 = vmatpush1.msk.msra.mxu0 %vm1863_vm1, %v1749_v1  ;;  %v604_v18 = vsel %vm77_vm0, %v87_v13, 0.0  ;;  %v606_v21 = vsel %vm77_vm0, %v88_v16, 0.0  ;;  %v90_v22 = vld [vmem:[%s13570_s0 + $0x40] sm:$0xff]  ;;  %v115_v25 = vld [vmem:[%s13570_s0 + $0x108] sm:$0xff]  ;;  %v608_v26 = vsel %vm77_vm0, %v89_v19, 0.0  ;;  %v116_v28 = vld [vmem:[%s13570_s0 + $0x110] sm:$0xff] }
  0x2b   :  { %v599_v14 = vadd.f32 %v598_v11, %v597_v10  ;;  %v114_v24 = vld [vmem:[%s13570_s0 + $0x100] sm:$0xff]  ;;  %v91_v27 = vld [vmem:[%s13570_s0 + $0x48] sm:$0xff]  ;;  %v117_v29 = vld [vmem:[%s13570_s0 + $0x118] sm:$0xff]  ;;  %v665_v32 = vsel %vm77_vm0, %v115_v25, 0.0  ;;  %v610_v34 = vsel %vm77_vm0, %v90_v22, 0.0  ;;  %v667_v36 = vsel %vm77_vm0, %v116_v28, 0.0 }
  0x2c   :  { %v664_v31 = vsel %vm77_vm0, %v114_v24, 0.0  ;;  %v118_v33 = vld [vmem:[%s13570_s0 + $0x120] sm:$0xff]  ;;  %v92_v37 = vld [vmem:[%s13570_s0 + $0x50] sm:$0xff]  ;;  %v669_v39 = vsel %vm77_vm0, %v117_v29, 0.0  ;;  %v119_v40 = vld [vmem:[%s13570_s0 + $0x128] sm:$0xff]  ;;  %v612_v41 = vsel %vm77_vm0, %v91_v27, 0.0 }
  0x2d   :  { %v601_v17 = vadd.f32 %v600_v12, %v599_v14  ;;  %v666_v35 = vadd.f32 %v665_v32, %v664_v31  ;;  %v93_v43 = vld [vmem:[%s13570_s0 + $0x58] sm:$0xff]  ;;  %v671_v45 = vsel %vm77_vm0, %v118_v33, 0.0  ;;  %v120_v46 = vld [vmem:[%s13570_s0 + $0x130] sm:$0xff]  ;;  %v614_v47 = vsel %vm77_vm0, %v92_v37, 0.0  ;;  %v94_v49 = vld [vmem:[%s13570_s0 + $0x60] sm:$0xff] }
  0x2e   :  { %v673_v51 = vsel %vm77_vm0, %v119_v40, 0.0  ;;  %v95_v52 = vld [vmem:[%s13570_s0 + $0x68] sm:$0xff]  ;;  %v121_v53 = vld [vmem:[%s13570_s0 + $0x138] sm:$0xff]  ;;  %v616_v54 = vsel %vm77_vm0, %v93_v43, 0.0  ;;  %v675_v57 = vsel %vm77_vm0, %v120_v46, 0.0  ;;  %v96_v58 = vld [vmem:[%s13570_s0 + $0x70] sm:$0xff] }
  0x2f   :  { %v603_v20 = vadd.f32 %v602_v15, %v601_v17  ;;  %v668_v42 = vadd.f32 %v667_v36, %v666_v35  ;;  %v122_v59 = vld [vmem:[%s13570_s0 + $0x140] sm:$0xff]  ;;  %v618_v60 = vsel %vm77_vm0, %v94_v49, 0.0  ;;  %v147_v63 = vld [vmem:[%s13570_s0 + $0x208] sm:$0xff]  ;;  %v148_v1 = vld [vmem:[%s13570_s0 + $0x210] sm:$0xff]  ;;  %v620_v3 = vsel %vm77_vm0, %v95_v52, 0.0 }
  0x30   :  { %v146_v62 = vld [vmem:[%s13570_s0 + $0x200] sm:$0xff]  ;;  %v677_v4 = vsel %vm77_vm0, %v121_v53, 0.0  ;;  %v123_v5 = vld [vmem:[%s13570_s0 + $0x148] sm:$0xff]  ;;  %v149_v6 = vld [vmem:[%s13570_s0 + $0x218] sm:$0xff]  ;;  %v734_v9 = vsel %vm77_vm0, %v147_v63, 0.0  ;;  %v736_v10 = vsel %vm77_vm0, %v148_v1, 0.0 }
  0x31   :  { %v605_v23 = vadd.f32 %v604_v18, %v603_v20  ;;  %v670_v48 = vadd.f32 %v669_v39, %v668_v42  ;;  %v733_v8 = vsel %vm77_vm0, %v146_v62, 0.0  ;;  %v97_v11 = vld [vmem:[%s13570_s0 + $0x78] sm:$0xff]  ;;  %v150_v12 = vld [vmem:[%s13570_s0 + $0x220] sm:$0xff]  ;;  %v679_v14 = vsel %vm77_vm0, %v122_v59, 0.0  ;;  %v124_v16 = vld [vmem:[%s13570_s0 + $0x150] sm:$0xff] }
  0x32   :  { %v735_v15 = vadd.f32 %v734_v9, %v733_v8  ;;  %v622_v17 = vsel %vm77_vm0, %v96_v58, 0.0  ;;  %v738_v19 = vsel %vm77_vm0, %v149_v6, 0.0  ;;  %v98_v20 = vld [vmem:[%s13570_s0 + $0x80] sm:$0xff]  ;;  %v125_v25 = vld [vmem:[%s13570_s0 + $0x158] sm:$0xff]  ;;  %v740_v28 = vsel %vm77_vm0, %v150_v12, 0.0  ;;  %v99_v29 = vld [vmem:[%s13570_s0 + $0x88] sm:$0xff] }
  0x33   :  { %v607_v30 = vadd.f32 %v606_v21, %v605_v23  ;;  %v672_v55 = vadd.f32 %v671_v45, %v670_v48  ;;  %v151_v21 = vld [vmem:[%s13570_s0 + $0x228] sm:$0xff]  ;;  %v681_v23 = vsel %vm77_vm0, %v123_v5, 0.0  ;;  %v683_v32 = vsel %vm77_vm0, %v124_v16, 0.0  ;;  %v100_v46 = vld [vmem:[%s13570_s0 + $0x90] sm:$0xff]  ;;  %v178_v48 = vld [vmem:[%s13570_s0 + $0x300] sm:$0xff] }
  0x34   :  { %v737_v24 = vadd.f32 %v736_v10, %v735_v15  ;;  %v626_v35 = vsel %vm77_vm0, %v98_v20, 0.0  ;;  %v742_v37 = vsel %vm77_vm0, %v151_v21, 0.0  ;;  %v685_v40 = vsel %vm77_vm0, %v125_v25, 0.0  ;;  %v127_v42 = vld [vmem:[%s13570_s0 + $0x168] sm:$0xff]  ;;  %v128_v52 = vld [vmem:[%s13570_s0 + $0x170] sm:$0xff]  ;;  %v181_v62 = vld [vmem:[%s13570_s0 + $0x318] sm:$0xff] }
  0x35   :  { %v609_v38 = vadd.f32 %v608_v26, %v607_v30  ;;  %v674_v61 = vadd.f32 %v673_v51, %v672_v55  ;;  %v624_v26 = vsel %vm77_vm0, %v97_v11, 0.0  ;;  %v152_v30 = vld [vmem:[%s13570_s0 + $0x230] sm:$0xff]  ;;  %v628_v43 = vsel %vm77_vm0, %v99_v29, 0.0  ;;  %v179_v53 = vld [vmem:[%s13570_s0 + $0x308] sm:$0xff]  ;;  %v182_v10 = vld [vmem:[%s13570_s0 + $0x320] sm:$0xff] }
  0x36   :  { %v739_v33 = vadd.f32 %v738_v19, %v737_v24  ;;  %v744_v45 = vsel %vm77_vm0, %v152_v30, 0.0  ;;  %v689_v59 = vsel %vm77_vm0, %v127_v42, 0.0  ;;  %v630_v63 = vsel %vm77_vm0, %v100_v46, 0.0  ;;  %v156_v5 = vld [vmem:[%s13570_s0 + $0x250] sm:$0xff]  ;;  %v157_v15 = vld [vmem:[%s13570_s0 + $0x258] sm:$0xff]  ;;  %v183_v20 = vld [vmem:[%s13570_s0 + $0x328] sm:$0xff] }
  0x37   :  { %v611_v44 = vadd.f32 %v610_v34, %v609_v38  ;;  %v676_v7 = vadd.f32 %v675_v57, %v674_v61  ;;  %v126_v34 = vld [vmem:[%s13570_s0 + $0x160] sm:$0xff]  ;;  %v153_v38 = vld [vmem:[%s13570_s0 + $0x238] sm:$0xff]  ;;  %v155_v57 = vld [vmem:[%s13570_s0 + $0x248] sm:$0xff]  ;;  %v691_v6 = vsel %vm77_vm0, %v128_v52, 0.0  ;;  %v803_v8 = vsel %vm77_vm0, %v179_v53, 0.0 }
  0x38   :  { %v129_v61 = vld [vmem:[%s13570_s0 + $0x178] sm:$0xff]  ;;  %v750_v12 = vsel %vm77_vm0, %v155_v57, 0.0  ;;  %v807_v19 = vsel %vm77_vm0, %v181_v62, 0.0  ;;  %v102_v25 = vld [vmem:[%s13570_s0 + $0xa0] sm:$0xff]  ;;  %v184_v29 = vld [vmem:[%s13570_s0 + $0x330] sm:$0xff]  ;;  %vm1719_vm4 = vcmask 1043459  }
  0x39   :  { %v613_v50 = vadd.f32 %v612_v41, %v611_v44  ;;  %v678_v18 = vadd.f32 %v677_v4, %v676_v7  ;;  %v741_v41 = vadd.f32 %v740_v28, %v739_v33  ;;  %v101_v4 = vld [vmem:[%s13570_s0 + $0x98] sm:$0xff]  ;;  %v809_v28 = vsel %vm77_vm0, %v182_v10, 0.0  ;;  %v132_v52 = vld [vmem:[%s13570_s0 + $0x190] sm:$0xff]  ;;  %v162_v62 = vld [vmem:[%s13570_s0 + $0x280] sm:$0xff] }
  0x3a   :  { %v632_v21 = vsel %vm77_vm0, %v101_v4, 0.0  ;;  %v161_v53 = vld [vmem:[%s13570_s0 + $0x278] sm:$0xff]  ;;  %v104_v57 = vld [vmem:[%s13570_s0 + $0xb0] sm:$0xff]  ;;  %vm1721_vm5 = vcmask 1044484   ;;  %vm1723_vm6 = vcmask 1045509   ;;  %vm1725_vm7 = vcmask 1046534  }
  0x3b   :  { %v615_v56 = vadd.f32 %v614_v47, %v613_v50  ;;  %v680_v27 = vadd.f32 %v679_v14, %v678_v18  ;;  %v154_v47 = vld [vmem:[%s13570_s0 + $0x240] sm:$0xff]  ;;  %v687_v50 = vsel %vm77_vm0, %v126_v34, 0.0  ;;  %v743_v51 = vadd.f32 %v742_v37, %v741_v41  ;;  %v131_v34 = vld [vmem:[%s13570_s0 + $0x188] sm:$0xff]  ;;  %v133_v10 = vld [vmem:[%s13570_s0 + $0x198] sm:$0xff] }
  0x3c   :  { %v130_v14 = vld [vmem:[%s13570_s0 + $0x180] sm:$0xff]  ;;  %vm1727_vm8 = vcmask 1047559  }
  0x3d   :  { %v617_v2 = vadd.f32 %v616_v54, %v615_v56  ;;  %v682_v36 = vadd.f32 %v681_v23, %v680_v27  ;;  %v180_v54 = vld [vmem:[%s13570_s0 + $0x310] sm:$0xff]  ;;  %v746_v56 = vsel %vm77_vm0, %v153_v38, 0.0  ;;  %v752_v23 = vsel %vm77_vm0, %v156_v5, 0.0  ;;  %v211_v5 = vld [vmem:[%s13570_s0 + $0x408] sm:$0xff] }
  0x3e   :  { %v805_v9 = vsel %vm77_vm0, %v180_v54, 0.0  ;;  %v811_v38 = vsel %vm77_vm0, %v183_v20, 0.0 }
  0x3f   :  { %v619_v13 = vadd.f32 %v618_v60, %v617_v2  ;;  %v684_v44 = vadd.f32 %v683_v32, %v682_v36  ;;  %v745_v60 = vadd.f32 %v744_v45, %v743_v51  ;;  %v748_v2 = vsel %vm77_vm0, %v154_v47, 0.0 }
  0x40   :  { %v754_v32 = vsel %vm77_vm0, %v157_v15, 0.0  ;;  %v813_v47 = vsel %vm77_vm0, %v184_v29, 0.0  ;;  %v214_v29 = vld [vmem:[%s13570_s0 + $0x420] sm:$0xff] }
  0x41   :  { %v621_v22 = vadd.f32 %v620_v3, %v619_v13  ;;  %v686_v55 = vadd.f32 %v685_v40, %v684_v44  ;;  %v802_v3 = vsel %vm77_vm0, %v178_v48, 0.0  ;;  %v747_v7 = vadd.f32 %v746_v56, %v745_v60  ;;  %v160_v44 = vld [vmem:[%s13570_s0 + $0x270] sm:$0xff]  ;;  %v186_v48 = vld [vmem:[%s13570_s0 + $0x340] sm:$0xff] }
  0x42   :  { %v804_v13 = vadd.f32 %v803_v8, %v802_v3  ;;  %v634_v40 = vsel %vm77_vm0, %v102_v25, 0.0  ;;  %v760_v60 = vsel %vm77_vm0, %v160_v44, 0.0  ;;  %v817_v4 = vsel %vm77_vm0, %v186_v48, 0.0 }
  0x43   :  { %v623_v31 = vadd.f32 %v622_v17, %v621_v22  ;;  %v688_v1 = vadd.f32 %v687_v50, %v686_v55  ;;  %v693_v17 = vsel %vm77_vm0, %v129_v61, 0.0  ;;  %v749_v18 = vadd.f32 %v748_v2, %v747_v7 }
  0x44   :  { %v806_v24 = vadd.f32 %v805_v9, %v804_v13  ;;  %v699_v7 = vsel %vm77_vm0, %v132_v52, 0.0  ;;  %v762_v8 = vsel %vm77_vm0, %v161_v53, 0.0  ;;  %v638_v13 = vsel %vm77_vm0, %v104_v57, 0.0  ;;  %v192_v52 = vld [vmem:[%s13570_s0 + $0x370] sm:$0xff] }
  0x45   :  { %v625_v39 = vadd.f32 %v624_v26, %v623_v31  ;;  %v690_v11 = vadd.f32 %v689_v59, %v688_v1  ;;  %v158_v26 = vld [vmem:[%s13570_s0 + $0x260] sm:$0xff]  ;;  %v751_v27 = vadd.f32 %v750_v12, %v749_v18  ;;  %v695_v31 = vsel %vm77_vm0, %v130_v14, 0.0  ;;  %v216_v53 = vld [vmem:[%s13570_s0 + $0x430] sm:$0xff] }
  0x46   :  { %v808_v33 = vadd.f32 %v807_v19, %v806_v24  ;;  %v756_v41 = vsel %vm77_vm0, %v158_v26, 0.0  ;;  %v210_v1 = vld [vmem:[%s13570_s0 + $0x400] sm:$0xff]  ;;  %v764_v18 = vsel %vm77_vm0, %v162_v62, 0.0  ;;  %v872_v26 = vsel %vm77_vm0, %v211_v5, 0.0  ;;  %v108_v57 = vld [vmem:[%s13570_s0 + $0xd0] sm:$0xff] }
  0x47   :  { %v627_v49 = vadd.f32 %v626_v35, %v625_v39  ;;  %v692_v22 = vadd.f32 %v691_v6, %v690_v11  ;;  %v159_v35 = vld [vmem:[%s13570_s0 + $0x268] sm:$0xff]  ;;  %v753_v37 = vadd.f32 %v752_v23, %v751_v27  ;;  %v185_v39 = vld [vmem:[%s13570_s0 + $0x338] sm:$0xff]  ;;  %v212_v6 = vld [vmem:[%s13570_s0 + $0x410] sm:$0xff] }
  0x48   :  { %v810_v42 = vadd.f32 %v809_v28, %v808_v33  ;;  %v758_v50 = vsel %vm77_vm0, %v159_v35, 0.0  ;;  %v815_v56 = vsel %vm77_vm0, %v185_v39, 0.0  ;;  %v163_v11 = vld [vmem:[%s13570_s0 + $0x288] sm:$0xff]  ;;  %v164_v23 = vld [vmem:[%s13570_s0 + $0x290] sm:$0xff]  ;;  %v874_v27 = vsel %vm77_vm0, %v212_v6, 0.0  ;;  %v190_v28 = vld [vmem:[%s13570_s0 + $0x360] sm:$0xff] }
  0x49   :  { %v629_v58 = vadd.f32 %v628_v43, %v627_v49  ;;  %v694_v30 = vadd.f32 %v693_v17, %v692_v22  ;;  %v103_v43 = vld [vmem:[%s13570_s0 + $0xa8] sm:$0xff]  ;;  %v755_v46 = vadd.f32 %v754_v32, %v753_v37  ;;  %v697_v49 = vsel %vm77_vm0, %v131_v34, 0.0  ;;  %v213_v17 = vld [vmem:[%s13570_s0 + $0x418] sm:$0xff]  ;;  %v134_v34 = vld [vmem:[%s13570_s0 + $0x1a0] sm:$0xff] }
  0x4a   :  { %v812_v51 = vadd.f32 %v811_v38, %v810_v42  ;;  %v636_v59 = vsel %vm77_vm0, %v103_v43, 0.0  ;;  %v105_v22 = vld [vmem:[%s13570_s0 + $0xb8] sm:$0xff]  ;;  %v876_v38 = vsel %vm77_vm0, %v213_v17, 0.0  ;;  %v106_v39 = vld [vmem:[%s13570_s0 + $0xc0] sm:$0xff]  ;;  %v768_v43 = vsel %vm77_vm0, %v164_v23, 0.0 }
  0x4b   :  { %v631_v16 = vadd.f32 %v630_v63, %v629_v58  ;;  %v696_v45 = vadd.f32 %v695_v31, %v694_v30  ;;  %v757_v55 = vadd.f32 %v756_v41, %v755_v46  ;;  %v187_v58 = vld [vmem:[%s13570_s0 + $0x348] sm:$0xff]  ;;  %v188_v63 = vld [vmem:[%s13570_s0 + $0x350] sm:$0xff]  ;;  %v701_v30 = vsel %vm77_vm0, %v133_v10, 0.0 }
  0x4c   :  { %v814_v61 = vadd.f32 %v813_v47, %v812_v51  ;;  %v819_v15 = vsel %vm77_vm0, %v187_v58, 0.0  ;;  %v821_v20 = vsel %vm77_vm0, %v188_v63, 0.0  ;;  %v766_v31 = vsel %vm77_vm0, %v163_v11, 0.0  ;;  %v215_v41 = vld [vmem:[%s13570_s0 + $0x428] sm:$0xff]  ;;  %v165_v51 = vld [vmem:[%s13570_s0 + $0x298] sm:$0xff] }
  0x4d   :  { %v633_v36 = vadd.f32 %v632_v21, %v631_v16  ;;  %v698_v2 = vadd.f32 %v697_v49, %v696_v45  ;;  %v759_v3 = vadd.f32 %v758_v50, %v757_v55  ;;  %v189_v16 = vld [vmem:[%s13570_s0 + $0x358] sm:$0xff]  ;;  %v871_v21 = vsel %vm77_vm0, %v210_v1, 0.0  ;;  %v107_v46 = vld [vmem:[%s13570_s0 + $0xc8] sm:$0xff] }
  0x4e   :  { %v816_v9 = vadd.f32 %v815_v56, %v814_v61  ;;  %v873_v33 = vadd.f32 %v872_v26, %v871_v21  ;;  %v823_v37 = vsel %vm77_vm0, %v189_v16, 0.0  ;;  %v640_v42 = vsel %vm77_vm0, %v105_v22, 0.0  ;;  %v135_v58 = vld [vmem:[%s13570_s0 + $0x1a8] sm:$0xff]  ;;  %v109_v63 = vld [vmem:[%s13570_s0 + $0xd8] sm:$0xff] }
  0x4f   :  { %v635_v54 = vadd.f32 %v634_v40, %v633_v36  ;;  %v761_v14 = vadd.f32 %v760_v60, %v759_v3  ;;  %v700_v24 = vadd.f32 %v699_v7, %v698_v2  ;;  %v191_v40 = vld [vmem:[%s13570_s0 + $0x368] sm:$0xff]  ;;  %v825_v49 = vsel %vm77_vm0, %v190_v28, 0.0  ;;  %v193_v1 = vld [vmem:[%s13570_s0 + $0x378] sm:$0xff]  ;;  %v110_v7 = vld [vmem:[%s13570_s0 + $0xe0] sm:$0xff] }
  0x50   :  { %v818_v19 = vadd.f32 %v817_v4, %v816_v9  ;;  %v875_v45 = vadd.f32 %v874_v27, %v873_v33  ;;  %v878_v50 = vsel %vm77_vm0, %v214_v29, 0.0  ;;  %v642_v60 = vsel %vm77_vm0, %v106_v39, 0.0  ;;  %v217_v2 = vld [vmem:[%s13570_s0 + $0x438] sm:$0xff]  ;;  %v195_v26 = vld [vmem:[%s13570_s0 + $0x388] sm:$0xff]  ;;  %v220_v39 = vld [vmem:[%s13570_s0 + $0x450] sm:$0xff] }
  0x51   :  { %v637_v12 = vadd.f32 %v636_v59, %v635_v54  ;;  %v763_v25 = vadd.f32 %v762_v8, %v761_v14  ;;  %v702_v47 = vadd.f32 %v701_v30, %v700_v24  ;;  %v703_v54 = vsel %vm77_vm0, %v134_v34, 0.0  ;;  %v218_v14 = vld [vmem:[%s13570_s0 + $0x440] sm:$0xff]  ;;  %v219_v27 = vld [vmem:[%s13570_s0 + $0x448] sm:$0xff] }
  0x52   :  { %v820_v32 = vadd.f32 %v819_v15, %v818_v19  ;;  %v877_v56 = vadd.f32 %v876_v38, %v875_v45  ;;  %v827_v61 = vsel %vm77_vm0, %v191_v40, 0.0  ;;  %v880_v62 = vsel %vm77_vm0, %v215_v41, 0.0  ;;  %v111_v19 = vld [vmem:[%s13570_s0 + $0xe8] sm:$0xff] }
  0x53   :  { %v639_v35 = vadd.f32 %v638_v13, %v637_v12  ;;  %v765_v36 = vadd.f32 %v764_v18, %v763_v25  ;;  %v644_v3 = vsel %vm77_vm0, %v107_v46, 0.0  ;;  %v704_v8 = vadd.f32 %v703_v54, %v702_v47  ;;  %v166_v12 = vld [vmem:[%s13570_s0 + $0x2a0] sm:$0xff]  ;;  %v112_v25 = vld [vmem:[%s13570_s0 + $0xf0] sm:$0xff]  ;;  %v167_v38 = vld [vmem:[%s13570_s0 + $0x2a8] sm:$0xff] }
  0x54   :  { %v822_v44 = vadd.f32 %v821_v20, %v820_v32  ;;  %v879_v6 = vadd.f32 %v878_v50, %v877_v56  ;;  %v770_v9 = vsel %vm77_vm0, %v165_v51, 0.0  ;;  %v829_v10 = vsel %vm77_vm0, %v192_v52, 0.0  ;;  %v194_v13 = vld [vmem:[%s13570_s0 + $0x380] sm:$0xff]  ;;  %v136_v20 = vld [vmem:[%s13570_s0 + $0x1b0] sm:$0xff]  ;;  %v113_v32 = vld [vmem:[%s13570_s0 + $0xf8] sm:$0xff] }
  0x55   :  { %v767_v48 = vadd.f32 %v766_v31, %v765_v36  ;;  %v641_v59 = vadd.f32 %v640_v42, %v639_v35  ;;  %v882_v11 = vsel %vm77_vm0, %v216_v53, 0.0  ;;  %v646_v15 = vsel %vm77_vm0, %v108_v57, 0.0  ;;  %v139_v45 = vld [vmem:[%s13570_s0 + $0x1c8] sm:$0xff]  ;;  %v140_v50 = vld [vmem:[%s13570_s0 + $0x1d0] sm:$0xff]  ;;  %v221_v52 = vld [vmem:[%s13570_s0 + $0x458] sm:$0xff] }
  0x56   :  { %v824_v55 = vadd.f32 %v823_v37, %v822_v44  ;;  %v705_v16 = vsel %vm77_vm0, %v135_v58, 0.0  ;;  %v881_v18 = vadd.f32 %v880_v62, %v879_v6  ;;  %v9698_v22 = vsel %vm77_vm0, %v109_v63, 0.0  ;;  %v137_v37 = vld [vmem:[%s13570_s0 + $0x1b8] sm:$0xff]  ;;  %v138_v44 = vld [vmem:[%s13570_s0 + $0x1c0] sm:$0xff]  ;;  %v196_v51 = vld [vmem:[%s13570_s0 + $0x390] sm:$0xff] }
  0x57   :  { %v769_v4 = vadd.f32 %v768_v43, %v767_v48  ;;  %v643_v21 = vadd.f32 %v642_v60, %v641_v59  ;;  %v831_v23 = vsel %vm77_vm0, %v193_v1, 0.0  ;;  %v884_v24 = vsel %vm77_vm0, %v217_v2, 0.0  ;;  %v141_v57 = vld [vmem:[%s13570_s0 + $0x1d8] sm:$0xff]  ;;  %v142_v58 = vld [vmem:[%s13570_s0 + $0x1e0] sm:$0xff]  ;;  %v168_v63 = vld [vmem:[%s13570_s0 + $0x2b0] sm:$0xff] }
  0x58   :  { %v826_v5 = vadd.f32 %v825_v49, %v824_v55  ;;  %v9712_v28 = vsel %vm77_vm0, %v110_v7, 0.0  ;;  %v883_v31 = vadd.f32 %v882_v11, %v881_v18  ;;  %v706_v33 = vadd.f32 %v705_v16, %v704_v8  ;;  %v222_v1 = vld [vmem:[%s13570_s0 + $0x460] sm:$0xff]  ;;  %v197_v7 = vld [vmem:[%s13570_s0 + $0x398] sm:$0xff]  ;;  %v243_v8 = vld [vmem:[%s13570_s0 + $0x508] sm:$0xff] }
  0x59   :  { %v771_v29 = vadd.f32 %v770_v9, %v769_v4  ;;  %v772_v34 = vsel %vm77_vm0, %v166_v12, 0.0  ;;  %v833_v35 = vsel %vm77_vm0, %v194_v13, 0.0  ;;  %v886_v36 = vsel %vm77_vm0, %v218_v14, 0.0  ;;  %v242_v2 = vld [vmem:[%s13570_s0 + $0x500] sm:$0xff]  ;;  %v223_v13 = vld [vmem:[%s13570_s0 + $0x468] sm:$0xff]  ;;  %v244_v14 = vld [vmem:[%s13570_s0 + $0x510] sm:$0xff] }
  0x5a   :  { %v828_v17 = vadd.f32 %v827_v61, %v826_v5  ;;  %v9730_v40 = vsel %vm77_vm0, %v111_v19, 0.0  ;;  %v707_v41 = vsel %vm77_vm0, %v136_v20, 0.0  ;;  %v885_v43 = vadd.f32 %v884_v24, %v883_v31  ;;  %v143_v19 = vld [vmem:[%s13570_s0 + $0x1e8] sm:$0xff]  ;;  %v245_v20 = vld [vmem:[%s13570_s0 + $0x518] sm:$0xff] }
  0x5b   :  { %v645_v46 = vadd.f32 %v644_v3, %v643_v21  ;;  %v9740_v47 = vsel %vm77_vm0, %v112_v25, 0.0  ;;  %v835_v48 = vsel %vm77_vm0, %v195_v26, 0.0  ;;  %v888_v49 = vsel %vm77_vm0, %v219_v27, 0.0  ;;  %v169_v26 = vld [vmem:[%s13570_s0 + $0x2b8] sm:$0xff]  ;;  %v224_v27 = vld [vmem:[%s13570_s0 + $0x470] sm:$0xff] }
  0x5c   :  { %v830_v30 = vadd.f32 %v829_v10, %v828_v17  ;;  %v9754_v53 = vsel %vm77_vm0, %v113_v32, 0.0  ;;  %v773_v54 = vadd.f32 %v772_v34, %v771_v29  ;;  %v887_v56 = vadd.f32 %v886_v36, %v885_v43  ;;  %v246_v34 = vld [vmem:[%s13570_s0 + $0x520] sm:$0xff] }
  0x5d   :  { %v708_v59 = vadd.f32 %v707_v41, %v706_v33  ;;  %v709_v60 = vsel %vm77_vm0, %v137_v37, 0.0  ;;  %v774_v61 = vsel %vm77_vm0, %v167_v38, 0.0  ;;  %v890_v62 = vsel %vm77_vm0, %v220_v39, 0.0  ;;  %v144_v33 = vld [vmem:[%s13570_s0 + $0x1f0] sm:$0xff]  ;;  %v198_v39 = vld [vmem:[%s13570_s0 + $0x3a0] sm:$0xff]  ;;  %v225_v41 = vld [vmem:[%s13570_s0 + $0x478] sm:$0xff] }
  0x5e   :  { %v832_v42 = vadd.f32 %v831_v23, %v830_v30  ;;  %v711_v3 = vsel %vm77_vm0, %v138_v44, 0.0  ;;  %v9776_v4 = vsel %vm77_vm0, %v139_v45, 0.0  ;;  %v889_v6 = vadd.f32 %v888_v49, %v887_v56  ;;  %v145_v45 = vld [vmem:[%s13570_s0 + $0x1f8] sm:$0xff] }
  0x5f   :  { %v647_v9 = vadd.f32 %v646_v15, %v645_v46  ;;  %v9785_v10 = vsel %vm77_vm0, %v140_v50, 0.0  ;;  %v837_v11 = vsel %vm77_vm0, %v196_v51, 0.0  ;;  %v892_v12 = vsel %vm77_vm0, %v221_v52, 0.0  ;;  %v247_v46 = vld [vmem:[%s13570_s0 + $0x528] sm:$0xff]  ;;  %v170_v52 = vld [vmem:[%s13570_s0 + $0x2c0] sm:$0xff] }
  0x60   :  { %v834_v55 = vadd.f32 %v833_v35, %v832_v42  ;;  %v9796_v16 = vsel %vm77_vm0, %v141_v57, 0.0  ;;  %v9799_v15 = vsel %vm77_vm0, %v142_v58, 0.0  ;;  %v775_v17 = vadd.f32 %v774_v61, %v773_v54  ;;  %v171_v54 = vld [vmem:[%s13570_s0 + $0x2c8] sm:$0xff] }
  0x61   :  { %v891_v18 = vadd.f32 %v890_v62, %v889_v6  ;;  %v710_v21 = vadd.f32 %v709_v60, %v708_v59  ;;  %v776_v23 = vsel %vm77_vm0, %v168_v63, 0.0  ;;  %v894_v24 = vsel %vm77_vm0, %v222_v1, 0.0  ;;  %v226_v59 = vld [vmem:[%s13570_s0 + $0x480] sm:$0xff]  ;;  %v248_v60 = vld [vmem:[%s13570_s0 + $0x530] sm:$0xff] }
  0x62   :  { %v836_v5 = vadd.f32 %v835_v48, %v834_v55  ;;  %v940_v25 = vsel %vm77_vm0, %v242_v2, 0.0  ;;  %v839_v30 = vsel %vm77_vm0, %v197_v7, 0.0  ;;  %v941_v32 = vsel %vm77_vm0, %v243_v8, 0.0  ;;  %v172_v2 = vld [vmem:[%s13570_s0 + $0x2d0] sm:$0xff]  ;;  %v173_v8 = vld [vmem:[%s13570_s0 + $0x2d8] sm:$0xff] }
  0x63   :  { %v893_v31 = vadd.f32 %v892_v12, %v891_v18  ;;  %v649_v35 = vadd.f32 %v9698_v22, %v647_v9  ;;  %v896_v36 = vsel %vm77_vm0, %v223_v13, 0.0  ;;  %v942_v37 = vadd.f32 %v941_v32, %v940_v25  ;;  %v174_v9 = vld [vmem:[%s13570_s0 + $0x2e0] sm:$0xff]  ;;  %v175_v18 = vld [vmem:[%s13570_s0 + $0x2e8] sm:$0xff]  ;;  %v200_v32 = vld [vmem:[%s13570_s0 + $0x3b0] sm:$0xff] }
  0x64   :  { %v838_v29 = vadd.f32 %v837_v11, %v836_v5  ;;  %v943_v38 = vsel %vm77_vm0, %v244_v14, 0.0  ;;  %v9834_v42 = vsel %vm77_vm0, %v143_v19, 0.0  ;;  %v777_v43 = vadd.f32 %v776_v23, %v775_v17  ;;  %v249_v11 = vld [vmem:[%s13570_s0 + $0x538] sm:$0xff]  ;;  %v250_v25 = vld [vmem:[%s13570_s0 + $0x540] sm:$0xff] }
  0x65   :  { %v895_v44 = vadd.f32 %v894_v24, %v893_v31  ;;  %v945_v22 = vsel %vm77_vm0, %v245_v20, 0.0  ;;  %v712_v48 = vadd.f32 %v711_v3, %v710_v21  ;;  %v778_v49 = vsel %vm77_vm0, %v169_v26, 0.0  ;;  %v199_v3 = vld [vmem:[%s13570_s0 + $0x3a8] sm:$0xff]  ;;  %v176_v24 = vld [vmem:[%s13570_s0 + $0x2f0] sm:$0xff]  ;;  %v177_v31 = vld [vmem:[%s13570_s0 + $0x2f8] sm:$0xff] }
  0x66   :  { %v898_v50 = vsel %vm77_vm0, %v224_v27, 0.0  ;;  %v944_v51 = vadd.f32 %v943_v38, %v942_v37  ;;  %v9852_v55 = vsel %vm77_vm0, %v144_v33, 0.0  ;;  %v840_v56 = vadd.f32 %v839_v30, %v838_v29  ;;  %v202_v37 = vld [vmem:[%s13570_s0 + $0x3c0] sm:$0xff]  ;;  %v251_v38 = vld [vmem:[%s13570_s0 + $0x548] sm:$0xff] }
  0x67   :  { %v897_v57 = vadd.f32 %v896_v36, %v895_v44  ;;  %v947_v58 = vsel %vm77_vm0, %v246_v34, 0.0  ;;  %v651_v61 = vadd.f32 %v9712_v28, %v649_v35  ;;  %v841_v62 = vsel %vm77_vm0, %v198_v39, 0.0  ;;  %v201_v36 = vld [vmem:[%s13570_s0 + $0x3b8] sm:$0xff] }
  0x68   :  { %v900_v63 = vsel %vm77_vm0, %v225_v41, 0.0  ;;  %v946_v1 = vadd.f32 %v945_v22, %v944_v51  ;;  %v9871_v5 = vsel %vm77_vm0, %v145_v45, 0.0  ;;  %v779_v6 = vadd.f32 %v778_v49, %v777_v43  ;;  %v203_v22 = vld [vmem:[%s13570_s0 + $0x3c8] sm:$0xff]  ;;  %v252_v51 = vld [vmem:[%s13570_s0 + $0x550] sm:$0xff] }
  0x69   :  { %v899_v7 = vadd.f32 %v898_v50, %v897_v57  ;;  %v949_v28 = vsel %vm77_vm0, %v247_v46, 0.0  ;;  %v714_v12 = vadd.f32 %v9776_v4, %v712_v48  ;;  %v780_v13 = vsel %vm77_vm0, %v170_v52, 0.0  ;;  %v227_v4 = vld [vmem:[%s13570_s0 + $0x488] sm:$0xff]  ;;  %v228_v50 = vld [vmem:[%s13570_s0 + $0x490] sm:$0xff] }
  0x6a   :  { %v782_v14 = vsel %vm77_vm0, %v171_v54, 0.0  ;;  %v948_v17 = vadd.f32 %v947_v58, %v946_v1  ;;  %v842_v19 = vadd.f32 %v841_v62, %v840_v56  ;;  %v902_v21 = vsel %vm77_vm0, %v226_v59, 0.0  ;;  %v205_v58 = vld [vmem:[%s13570_s0 + $0x3d8] sm:$0xff]  ;;  %v206_v59 = vld [vmem:[%s13570_s0 + $0x3e0] sm:$0xff] }
  0x6b   :  { %v901_v20 = vadd.f32 %v900_v63, %v899_v7  ;;  %v951_v23 = vsel %vm77_vm0, %v248_v60, 0.0  ;;  %v653_v26 = vadd.f32 %v9730_v40, %v651_v61  ;;  %v784_v27 = vsel %vm77_vm0, %v172_v2, 0.0  ;;  %v207_v63 = vld [vmem:[%s13570_s0 + $0x3e8] sm:$0xff]  ;;  %v229_v1 = vld [vmem:[%s13570_s0 + $0x498] sm:$0xff] }
  0x6c   :  { %v843_v29 = vsel %vm77_vm0, %v199_v3, 0.0  ;;  %v950_v30 = vadd.f32 %v949_v28, %v948_v17  ;;  %v781_v33 = vadd.f32 %v780_v13, %v779_v6  ;;  %v9910_v34 = vsel %vm77_vm0, %v173_v8, 0.0  ;;  %v253_v2 = vld [vmem:[%s13570_s0 + $0x558] sm:$0xff]  ;;  %v274_v8 = vld [vmem:[%s13570_s0 + $0x600] sm:$0xff]  ;;  %v276_v17 = vld [vmem:[%s13570_s0 + $0x610] sm:$0xff] }
  0x6d   :  { %v9913_v35 = vsel %vm77_vm0, %v174_v9, 0.0  ;;  %v953_v40 = vsel %vm77_vm0, %v249_v11, 0.0  ;;  %v716_v39 = vadd.f32 %v9785_v10, %v714_v12  ;;  %v9927_v41 = vsel %vm77_vm0, %v175_v18, 0.0  ;;  %v204_v10 = vld [vmem:[%s13570_s0 + $0x3d0] sm:$0xff] }
  0x6e   :  { %v903_v43 = vadd.f32 %v902_v21, %v901_v20  ;;  %v952_v44 = vadd.f32 %v951_v23, %v950_v30  ;;  %v9933_v45 = vsel %vm77_vm0, %v176_v24, 0.0  ;;  %v844_v46 = vadd.f32 %v843_v29, %v842_v19  ;;  %v208_v23 = vld [vmem:[%s13570_s0 + $0x3f0] sm:$0xff]  ;;  %v255_v29 = vld [vmem:[%s13570_s0 + $0x568] sm:$0xff]  ;;  %v277_v30 = vld [vmem:[%s13570_s0 + $0x618] sm:$0xff] }
  0x6f   :  { %v904_v48 = vsel %vm77_vm0, %v227_v4, 0.0  ;;  %v955_v49 = vsel %vm77_vm0, %v250_v25, 0.0  ;;  %v655_v52 = vadd.f32 %v9740_v47, %v653_v26  ;;  %v9948_v54 = vsel %vm77_vm0, %v177_v31, 0.0 }
  0x70   :  { %v845_v56 = vsel %vm77_vm0, %v200_v32, 0.0  ;;  %v954_v57 = vadd.f32 %v953_v40, %v952_v44  ;;  %v783_v60 = vadd.f32 %v782_v14, %v781_v33  ;;  %v847_v61 = vsel %vm77_vm0, %v201_v36, 0.0  ;;  %v275_v14 = vld [vmem:[%s13570_s0 + $0x608] sm:$0xff] }
  0x71   :  { %v849_v62 = vsel %vm77_vm0, %v202_v37, 0.0  ;;  %v957_v47 = vsel %vm77_vm0, %v251_v38, 0.0  ;;  %v718_v3 = vadd.f32 %v9796_v16, %v716_v39  ;;  %v9971_v6 = vsel %vm77_vm0, %v203_v22, 0.0  ;;  %v254_v16 = vld [vmem:[%s13570_s0 + $0x560] sm:$0xff] }
  0x72   :  { %v905_v7 = vadd.f32 %v904_v48, %v903_v43  ;;  %v956_v28 = vadd.f32 %v955_v49, %v954_v57  ;;  %v846_v9 = vadd.f32 %v845_v56, %v844_v46  ;;  %v9977_v11 = vsel %vm77_vm0, %v204_v10, 0.0  ;;  %v230_v39 = vld [vmem:[%s13570_s0 + $0x4a0] sm:$0xff]  ;;  %v256_v43 = vld [vmem:[%s13570_s0 + $0x570] sm:$0xff]  ;;  %v231_v49 = vld [vmem:[%s13570_s0 + $0x4a8] sm:$0xff] }
  0x73   :  { %v906_v12 = vsel %vm77_vm0, %v228_v50, 0.0  ;;  %v959_v13 = vsel %vm77_vm0, %v252_v51, 0.0  ;;  %v657_v18 = vadd.f32 %v9754_v53, %v655_v52  ;;  %v9992_v19 = vsel %vm77_vm0, %v205_v58, 0.0  ;;  %v209_v53 = vld [vmem:[%s13570_s0 + $0x3f8] sm:$0xff]  ;;  %v232_v56 = vld [vmem:[%s13570_s0 + $0x4b0] sm:$0xff]  ;;  %v279_v58 = vld [vmem:[%s13570_s0 + $0x628] sm:$0xff] }
  0x74   :  { %v9995_v20 = vsel %vm77_vm0, %v206_v59, 0.0  ;;  %v958_v21 = vadd.f32 %v957_v47, %v956_v28  ;;  %v785_v24 = vadd.f32 %v784_v27, %v783_v60  ;;  %v10001_v4 = vsel %vm77_vm0, %v207_v63, 0.0  ;;  %v257_v57 = vld [vmem:[%s13570_s0 + $0x578] sm:$0xff] }
  0x75   :  { %v908_v25 = vsel %vm77_vm0, %v229_v1, 0.0  ;;  %v961_v26 = vsel %vm77_vm0, %v253_v2, 0.0  ;;  %v720_v27 = vadd.f32 %v9799_v15, %v718_v3  ;;  %v907_v31 = vadd.f32 %v906_v12, %v905_v7  ;;  %v278_v15 = vld [vmem:[%s13570_s0 + $0x620] sm:$0xff]  ;;  %v233_v3 = vld [vmem:[%s13570_s0 + $0x4b8] sm:$0xff] }
  0x76   :  { %v960_v32 = vadd.f32 %v959_v13, %v958_v21  ;;  %v1009_v33 = vsel %vm77_vm0, %v274_v8, 0.0  ;;  %v848_v40 = vadd.f32 %v847_v61, %v846_v9  ;;  %v963_v36 = vsel %vm77_vm0, %v254_v16, 0.0  ;;  %v258_v7 = vld [vmem:[%s13570_s0 + $0x580] sm:$0xff]  ;;  %v259_v21 = vld [vmem:[%s13570_s0 + $0x588] sm:$0xff] }
  0x77   :  { %v1010_v37 = vsel %vm77_vm0, %v275_v14, 0.0  ;;  %v1012_v38 = vsel %vm77_vm0, %v276_v17, 0.0  ;;  %v658_v44 = vrot.slane %v657_v18, 4  ;;  %v10029_v22 = vsel %vm77_vm0, %v208_v23, 0.0  ;;  %v234_v12 = vld [vmem:[%s13570_s0 + $0x4c0] sm:$0xff]  ;;  %v281_v23 = vld [vmem:[%s13570_s0 + $0x638] sm:$0xff] }
  0x78   :  { %v962_v46 = vadd.f32 %v961_v26, %v960_v32  ;;  %v1011_v48 = vadd.f32 %v1010_v37, %v1009_v33  ;;  %v787_v10 = vadd.f32 %v9910_v34, %v785_v24  ;;  %v10036_v50 = vsel %vm77_vm0, %v209_v53, 0.0  ;;  %v282_v32 = vld [vmem:[%s13570_s0 + $0x640] sm:$0xff]  ;;  %v237_v37 = vld [vmem:[%s13570_s0 + $0x4d8] sm:$0xff] }
  0x79   :  { %v965_v51 = vsel %vm77_vm0, %v255_v29, 0.0  ;;  %v1014_v52 = vsel %vm77_vm0, %v277_v30, 0.0  ;;  %v722_v34 = vadd.f32 %v9834_v42, %v720_v27  ;;  %v909_v59 = vadd.f32 %v908_v25, %v907_v31  ;;  %v280_v42 = vld [vmem:[%s13570_s0 + $0x630] sm:$0xff] }
  0x7a   :  { %v964_v60 = vadd.f32 %v963_v36, %v962_v46  ;;  %v1013_v61 = vadd.f32 %v1012_v38, %v1011_v48  ;;  %v850_v47 = vadd.f32 %v849_v62, %v848_v40  ;;  %v910_v63 = vsel %vm77_vm0, %v230_v39, 0.0  ;;  %v236_v31 = vld [vmem:[%s13570_s0 + $0x4d0] sm:$0xff]  ;;  %v261_v46 = vld [vmem:[%s13570_s0 + $0x598] sm:$0xff]  ;;  %v283_v48 = vld [vmem:[%s13570_s0 + $0x648] sm:$0xff] }
  0x7b   :  { %v967_v1 = vsel %vm77_vm0, %v256_v43, 0.0  ;;  %v1016_v2 = vsel %vm77_vm0, %v278_v15, 0.0  ;;  %v659_v28 = vadd.f32 %v658_v44, %v657_v18  ;;  %v912_v62 = vsel %vm77_vm0, %v231_v49, 0.0  ;;  %v235_v18 = vld [vmem:[%s13570_s0 + $0x4c8] sm:$0xff]  ;;  %v238_v44 = vld [vmem:[%s13570_s0 + $0x4e0] sm:$0xff] }
  0x7c   :  { %v966_v8 = vadd.f32 %v965_v51, %v964_v60  ;;  %v1015_v9 = vadd.f32 %v1014_v52, %v1013_v61  ;;  %v789_v13 = vadd.f32 %v9913_v35, %v787_v10  ;;  %v914_v16 = vsel %vm77_vm0, %v232_v56, 0.0 }
  0x7d   :  { %v969_v14 = vsel %vm77_vm0, %v257_v57, 0.0  ;;  %v1018_v17 = vsel %vm77_vm0, %v279_v58, 0.0  ;;  %v724_v35 = vadd.f32 %v9852_v55, %v722_v34  ;;  %v911_v24 = vadd.f32 %v910_v63, %v909_v59  ;;  %v260_v55 = vld [vmem:[%s13570_s0 + $0x590] sm:$0xff]  ;;  %v262_v34 = vld [vmem:[%s13570_s0 + $0x5a0] sm:$0xff]  ;;  %v307_v63 = vld [vmem:[%s13570_s0 + $0x708] sm:$0xff] }
  0x7e   :  { %v968_v25 = vadd.f32 %v967_v1, %v966_v8  ;;  %v1017_v26 = vadd.f32 %v1016_v2, %v1015_v9  ;;  %v852_v53 = vadd.f32 %v9971_v6, %v850_v47  ;;  %v10082_v29 = vsel %vm77_vm0, %v233_v3, 0.0  ;;  %v306_v59 = vld [vmem:[%s13570_s0 + $0x700] sm:$0xff]  ;;  %v308_v1 = vld [vmem:[%s13570_s0 + $0x710] sm:$0xff] }
  0x7f   :  { %v971_v30 = vsel %vm77_vm0, %v258_v7, 0.0  ;;  %v1020_v27 = vsel %vm77_vm0, %v280_v42, 0.0  ;;  %v660_v6 = vrot.slane %v659_v28, 2  ;;  %v10096_v33 = vsel %vm77_vm0, %v234_v12, 0.0 }
  0x80   :  { %v970_v40 = vadd.f32 %v969_v14, %v968_v25  ;;  %v1019_v36 = vadd.f32 %v1018_v17, %v1017_v26  ;;  %v791_v38 = vadd.f32 %v9927_v41, %v789_v13  ;;  %v10103_v39 = vsel %vm77_vm0, %v235_v18, 0.0  ;;  %v310_v26 = vld [vmem:[%s13570_s0 + $0x720] sm:$0xff] }
  0x81   :  { %v973_v43 = vsel %vm77_vm0, %v259_v21, 0.0  ;;  %v1022_v15 = vsel %vm77_vm0, %v281_v23, 0.0  ;;  %v726_v41 = vadd.f32 %v9871_v5, %v724_v35  ;;  %v913_v49 = vadd.f32 %v912_v62, %v911_v24  ;;  %v284_v5 = vld [vmem:[%s13570_s0 + $0x650] sm:$0xff]  ;;  %v285_v62 = vld [vmem:[%s13570_s0 + $0x658] sm:$0xff] }
  0x82   :  { %v972_v10 = vadd.f32 %v971_v30, %v970_v40  ;;  %v1021_v51 = vadd.f32 %v1020_v27, %v1019_v36  ;;  %v854_v52 = vadd.f32 %v9977_v11, %v852_v53  ;;  %v10119_v56 = vsel %vm77_vm0, %v236_v31, 0.0  ;;  %v264_v23 = vld [vmem:[%s13570_s0 + $0x5b0] sm:$0xff] }
  0x83   :  { %v975_v57 = vsel %vm77_vm0, %v260_v55, 0.0  ;;  %v1024_v58 = vsel %vm77_vm0, %v282_v32, 0.0  ;;  %v10132_v11 = vadd.f32 %v660_v6, %v659_v28  ;;  %v10135_v60 = vsel %vm77_vm0, %v237_v37, 0.0  ;;  %v263_v28 = vld [vmem:[%s13570_s0 + $0x5a8] sm:$0xff]  ;;  %v265_v55 = vld [vmem:[%s13570_s0 + $0x5b8] sm:$0xff] }
  0x84   :  { %v974_v61 = vadd.f32 %v973_v43, %v972_v10  ;;  %v1023_v47 = vadd.f32 %v1022_v15, %v1021_v51  ;;  %v793_v2 = vadd.f32 %v9933_v45, %v791_v38  ;;  %v10145_v3 = vsel %vm77_vm0, %v238_v44, 0.0  ;;  %v309_v45 = vld [vmem:[%s13570_s0 + $0x718] sm:$0xff]  ;;  %v287_v32 = vld [vmem:[%s13570_s0 + $0x668] sm:$0xff] }
  0x85   :  { %v977_v7 = vsel %vm77_vm0, %v261_v46, 0.0  ;;  %v1026_v42 = vsel %vm77_vm0, %v283_v48, 0.0  ;;  %v727_v8 = vrot.slane %v726_v41, 4  ;;  %v915_v9 = vadd.f32 %v914_v16, %v913_v49  ;;  %v286_v16 = vld [vmem:[%s13570_s0 + $0x660] sm:$0xff]  ;;  %v239_v46 = vld [vmem:[%s13570_s0 + $0x4e8] sm:$0xff] }
  0x86   :  { %v976_v12 = vadd.f32 %v975_v57, %v974_v61  ;;  %v1025_v13 = vadd.f32 %v1024_v58, %v1023_v47  ;;  %v856_v14 = vadd.f32 %v9992_v19, %v854_v52  ;;  %v979_v17 = vsel %vm77_vm0, %v262_v34, 0.0  ;;  %v312_v52 = vld [vmem:[%s13570_s0 + $0x730] sm:$0xff] }
  0x87   :  { %v1028_v18 = vsel %vm77_vm0, %v284_v5, 0.0  ;;  %v1078_v21 = vsel %vm77_vm0, %v306_v59, 0.0  ;;  %v1079_v25 = vsel %vm77_vm0, %v307_v63, 0.0  ;;  %v1081_v19 = vsel %vm77_vm0, %v308_v1, 0.0  ;;  %v289_v59 = vld [vmem:[%s13570_s0 + $0x678] sm:$0xff] }
  0x88   :  { %v978_v35 = vadd.f32 %v977_v7, %v976_v12  ;;  %v1027_v24 = vadd.f32 %v1026_v42, %v1025_v13  ;;  %v795_v53 = vadd.f32 %v9948_v54, %v793_v2  ;;  %v981_v30 = vsel %vm77_vm0, %v263_v28, 0.0  ;;  %v311_v54 = vld [vmem:[%s13570_s0 + $0x728] sm:$0xff]  ;;  %v313_v2 = vld [vmem:[%s13570_s0 + $0x738] sm:$0xff] }
  0x89   :  { %v1030_v27 = vsel %vm77_vm0, %v285_v62, 0.0  ;;  %v1080_v31 = vadd.f32 %v1079_v25, %v1078_v21  ;;  %v917_v6 = vadd.f32 %v10082_v29, %v915_v9  ;;  %v1083_v37 = vsel %vm77_vm0, %v309_v45, 0.0  ;;  %v288_v29 = vld [vmem:[%s13570_s0 + $0x670] sm:$0xff]  ;;  %v267_v45 = vld [vmem:[%s13570_s0 + $0x5c8] sm:$0xff] }
  0x8a   :  { %v980_v40 = vadd.f32 %v979_v17, %v978_v35  ;;  %v1029_v36 = vadd.f32 %v1028_v18, %v1027_v24  ;;  %v858_v38 = vadd.f32 %v9995_v20, %v856_v14  ;;  %v983_v43 = vsel %vm77_vm0, %v264_v23, 0.0  ;;  %v266_v20 = vld [vmem:[%s13570_s0 + $0x5c0] sm:$0xff]  ;;  %v291_v35 = vld [vmem:[%s13570_s0 + $0x688] sm:$0xff] }
  0x8b   :  { %v1032_v15 = vsel %vm77_vm0, %v286_v16, 0.0  ;;  %v1082_v44 = vadd.f32 %v1081_v19, %v1080_v31  ;;  %v728_v48 = vadd.f32 %v727_v8, %v726_v41  ;;  %v1085_v51 = vsel %vm77_vm0, %v310_v26, 0.0  ;;  %v240_v41 = vld [vmem:[%s13570_s0 + $0x4f0] sm:$0xff]  ;;  %v314_v14 = vld [vmem:[%s13570_s0 + $0x740] sm:$0xff] }
  0x8c   :  { %v982_v49 = vadd.f32 %v981_v30, %v980_v40  ;;  %v1031_v10 = vadd.f32 %v1030_v27, %v1029_v36  ;;  %v796_v57 = vrot.slane %v795_v53, 4  ;;  %v985_v58 = vsel %vm77_vm0, %v265_v55, 0.0  ;;  %v268_v16 = vld [vmem:[%s13570_s0 + $0x5d0] sm:$0xff]  ;;  %v315_v30 = vld [vmem:[%s13570_s0 + $0x748] sm:$0xff] }
  0x8d   :  { %v1034_v34 = vsel %vm77_vm0, %v287_v32, 0.0  ;;  %v1084_v5 = vadd.f32 %v1083_v37, %v1082_v44  ;;  %v919_v61 = vadd.f32 %v10096_v33, %v917_v6  ;;  %v1087_v1 = vsel %vm77_vm0, %v311_v54, 0.0  ;;  %v290_v33 = vld [vmem:[%s13570_s0 + $0x680] sm:$0xff]  ;;  %v292_v6 = vld [vmem:[%s13570_s0 + $0x690] sm:$0xff] }
  0x8e   :  { %v984_v47 = vadd.f32 %v983_v43, %v982_v49  ;;  %v1033_v63 = vadd.f32 %v1032_v15, %v1031_v10  ;;  %v860_v7 = vadd.f32 %v10001_v4, %v858_v38  ;;  %v10218_v42 = vsel %vm77_vm0, %v239_v46, 0.0  ;;  %v241_v4 = vld [vmem:[%s13570_s0 + $0x4f8] sm:$0xff]  ;;  %v270_v37 = vld [vmem:[%s13570_s0 + $0x5e0] sm:$0xff]  ;;  %v316_v54 = vld [vmem:[%s13570_s0 + $0x750] sm:$0xff] }
  0x8f   :  { %v1036_v28 = vsel %vm77_vm0, %v288_v29, 0.0  ;;  %v1086_v62 = vadd.f32 %v1085_v51, %v1084_v5  ;;  %v987_v9 = vsel %vm77_vm0, %v266_v20, 0.0  ;;  %v1089_v13 = vsel %vm77_vm0, %v312_v52, 0.0  ;;  %v271_v46 = vld [vmem:[%s13570_s0 + $0x5e8] sm:$0xff]  ;;  %v272_v29 = vld [vmem:[%s13570_s0 + $0x5f0] sm:$0xff]  ;;  %v293_v49 = vld [vmem:[%s13570_s0 + $0x698] sm:$0xff] }
  0x90   :  { %v986_v8 = vadd.f32 %v985_v58, %v984_v47  ;;  %v1035_v12 = vadd.f32 %v1034_v34, %v1033_v63  ;;  %v729_v17 = vrot.slane %v728_v48, 2  ;;  %v10236_v18 = vsel %vm77_vm0, %v240_v41, 0.0  ;;  %v317_v52 = vld [vmem:[%s13570_s0 + $0x758] sm:$0xff]  ;;  %v294_v41 = vld [vmem:[%s13570_s0 + $0x6a0] sm:$0xff] }
  0x91   :  { %v1038_v21 = vsel %vm77_vm0, %v289_v59, 0.0  ;;  %v1088_v23 = vadd.f32 %v1087_v1, %v1086_v62  ;;  %v797_v24 = vadd.f32 %v796_v57, %v795_v53  ;;  %v921_v25 = vadd.f32 %v10103_v39, %v919_v61  ;;  %v339_v62 = vld [vmem:[%s13570_s0 + $0x808] sm:$0xff] }
  0x92   :  { %v1037_v19 = vadd.f32 %v1036_v28, %v1035_v12  ;;  %v1091_v26 = vsel %vm77_vm0, %v313_v2, 0.0  ;;  %v862_v27 = vadd.f32 %v10029_v22, %v860_v7  ;;  %v988_v31 = vadd.f32 %v987_v9, %v986_v8  ;;  %v269_v22 = vld [vmem:[%s13570_s0 + $0x5d8] sm:$0xff]  ;;  %v338_v28 = vld [vmem:[%s13570_s0 + $0x800] sm:$0xff] }
  0x93   :  { %v1040_v55 = vsel %vm77_vm0, %v290_v33, 0.0  ;;  %v1090_v32 = vadd.f32 %v1089_v13, %v1088_v23  ;;  %v10256_v53 = vsel %vm77_vm0, %v241_v4, 0.0  ;;  %v989_v39 = vsel %vm77_vm0, %v267_v45, 0.0  ;;  %v295_v33 = vld [vmem:[%s13570_s0 + $0x6a8] sm:$0xff]  ;;  %v340_v4 = vld [vmem:[%s13570_s0 + $0x810] sm:$0xff] }
  0x94   :  { %v1039_v40 = vadd.f32 %v1038_v21, %v1037_v19  ;;  %v1093_v36 = vsel %vm77_vm0, %v314_v14, 0.0  ;;  %v10269_v38 = vadd.f32 %v729_v17, %v728_v48  ;;  %v991_v43 = vsel %vm77_vm0, %v268_v16, 0.0  ;;  %v319_v45 = vld [vmem:[%s13570_s0 + $0x768] sm:$0xff]  ;;  %v296_v16 = vld [vmem:[%s13570_s0 + $0x6b0] sm:$0xff] }
  0x95   :  { %v1042_v15 = vsel %vm77_vm0, %v291_v35, 0.0  ;;  %v1092_v44 = vadd.f32 %v1091_v26, %v1090_v32  ;;  %v798_v10 = vrot.slane %v797_v24, 2  ;;  %v923_v48 = vadd.f32 %v10119_v56, %v921_v25  ;;  %v320_v26 = vld [vmem:[%s13570_s0 + $0x770] sm:$0xff] }
  0x96   :  { %v1041_v51 = vadd.f32 %v1040_v55, %v1039_v40  ;;  %v1095_v20 = vsel %vm77_vm0, %v315_v30, 0.0  ;;  %v864_v57 = vadd.f32 %v10036_v50, %v862_v27  ;;  %v990_v58 = vadd.f32 %v989_v39, %v988_v31  ;;  %v318_v50 = vld [vmem:[%s13570_s0 + $0x760] sm:$0xff]  ;;  %v297_v39 = vld [vmem:[%s13570_s0 + $0x6b8] sm:$0xff] }
  0x97   :  { %v1044_v34 = vsel %vm77_vm0, %v292_v6, 0.0  ;;  %v1094_v5 = vadd.f32 %v1093_v36, %v1092_v44  ;;  %v993_v59 = vsel %vm77_vm0, %v269_v22, 0.0  ;;  %v10294_v56 = vsel %vm77_vm0, %v270_v37, 0.0  ;;  %v342_v31 = vld [vmem:[%s13570_s0 + $0x820] sm:$0xff]  ;;  %v273_v6 = vld [vmem:[%s13570_s0 + $0x5f8] sm:$0xff] }
  0x98   :  { %v1043_v61 = vadd.f32 %v1042_v15, %v1041_v51  ;;  %v1097_v47 = vsel %vm77_vm0, %v316_v54, 0.0  ;;  %v10301_v63 = vsel %vm77_vm0, %v271_v46, 0.0  ;;  %v10304_v1 = vsel %vm77_vm0, %v272_v29, 0.0  ;;  %v321_v54 = vld [vmem:[%s13570_s0 + $0x778] sm:$0xff]  ;;  %v343_v46 = vld [vmem:[%s13570_s0 + $0x828] sm:$0xff] }
  0x99   :  { %v1046_v2 = vsel %vm77_vm0, %v293_v49, 0.0  ;;  %v1096_v7 = vadd.f32 %v1095_v20, %v1094_v5  ;;  %v10316_v8 = vadd.f32 %v798_v10, %v797_v24  ;;  %v925_v9 = vadd.f32 %v10135_v60, %v923_v48  ;;  %v341_v60 = vld [vmem:[%s13570_s0 + $0x818] sm:$0xff]  ;;  %v322_v20 = vld [vmem:[%s13570_s0 + $0x780] sm:$0xff] }
  0x9a   :  { %v1045_v12 = vadd.f32 %v1044_v34, %v1043_v61  ;;  %v1099_v13 = vsel %vm77_vm0, %v317_v52, 0.0  ;;  %v865_v14 = vrot.slane %v864_v57, 4  ;;  %v992_v17 = vadd.f32 %v991_v43, %v990_v58 }
  0x9b   :  { %v1048_v21 = vsel %vm77_vm0, %v294_v41, 0.0  ;;  %v1098_v23 = vadd.f32 %v1097_v47, %v1096_v7  ;;  %v1101_v24 = vsel %vm77_vm0, %v318_v50, 0.0  ;;  %v1147_v25 = vsel %vm77_vm0, %v338_v28, 0.0  ;;  %v299_v41 = vld [vmem:[%s13570_s0 + $0x6c8] sm:$0xff] }
  0x9c   :  { %v1047_v35 = vadd.f32 %v1046_v2, %v1045_v12  ;;  %v1148_v19 = vsel %vm77_vm0, %v339_v62, 0.0  ;;  %v1050_v30 = vsel %vm77_vm0, %v295_v33, 0.0  ;;  %v1150_v32 = vsel %vm77_vm0, %v340_v4, 0.0  ;;  %v323_v7 = vld [vmem:[%s13570_s0 + $0x788] sm:$0xff] }
  0x9d   :  { %v1100_v27 = vadd.f32 %v1099_v13, %v1098_v23  ;;  %v1149_v55 = vadd.f32 %v1148_v19, %v1147_v25  ;;  %v927_v40 = vadd.f32 %v10145_v3, %v925_v9  ;;  %v1103_v22 = vsel %vm77_vm0, %v319_v45, 0.0  ;;  %v298_v3 = vld [vmem:[%s13570_s0 + $0x6c0] sm:$0xff]  ;;  %v345_v9 = vld [vmem:[%s13570_s0 + $0x838] sm:$0xff]  ;;  %v304_v25 = vld [vmem:[%s13570_s0 + $0x6f0] sm:$0xff] }
  0x9e   :  { %v1049_v36 = vadd.f32 %v1048_v21, %v1047_v35  ;;  %v1152_v37 = vsel %vm77_vm0, %v341_v60, 0.0  ;;  %v994_v43 = vadd.f32 %v993_v59, %v992_v17  ;;  %v1052_v15 = vsel %vm77_vm0, %v296_v16, 0.0  ;;  %v300_v59 = vld [vmem:[%s13570_s0 + $0x6d0] sm:$0xff]  ;;  %v346_v16 = vld [vmem:[%s13570_s0 + $0x840] sm:$0xff] }
  0x9f   :  { %v1102_v44 = vadd.f32 %v1101_v24, %v1100_v27  ;;  %v1151_v29 = vadd.f32 %v1150_v32, %v1149_v55  ;;  %v10363_v49 = vadd.f32 %v865_v14, %v864_v57  ;;  %v1105_v48 = vsel %vm77_vm0, %v320_v26, 0.0  ;;  %v344_v57 = vld [vmem:[%s13570_s0 + $0x830] sm:$0xff]  ;;  %v303_v24 = vld [vmem:[%s13570_s0 + $0x6e8] sm:$0xff] }
  0xa0   :  { %v1051_v10 = vadd.f32 %v1050_v30, %v1049_v36  ;;  %v1154_v51 = vsel %vm77_vm0, %v342_v31, 0.0  ;;  %v10371_v52 = vsel %vm77_vm0, %v273_v6, 0.0  ;;  %v1054_v58 = vsel %vm77_vm0, %v297_v39, 0.0  ;;  %v324_v17 = vld [vmem:[%s13570_s0 + $0x790] sm:$0xff]  ;;  %v325_v31 = vld [vmem:[%s13570_s0 + $0x798] sm:$0xff]  ;;  %v347_v39 = vld [vmem:[%s13570_s0 + $0x848] sm:$0xff] }
  0xa1   :  { %v1104_v34 = vadd.f32 %v1103_v22, %v1102_v44  ;;  %v1153_v5 = vadd.f32 %v1152_v37, %v1151_v29  ;;  %v929_v61 = vadd.f32 %v10218_v42, %v927_v40  ;;  %v1107_v50 = vsel %vm77_vm0, %v321_v54, 0.0  ;;  %v301_v42 = vld [vmem:[%s13570_s0 + $0x6d8] sm:$0xff]  ;;  %v348_v44 = vld [vmem:[%s13570_s0 + $0x850] sm:$0xff]  ;;  %v371_v29 = vld [vmem:[%s13570_s0 + $0x908] sm:$0xff] }
  0xa2   :  { %v1053_v47 = vadd.f32 %v1052_v15, %v1051_v10  ;;  %v1156_v2 = vsel %vm77_vm0, %v343_v46, 0.0  ;;  %v996_v28 = vadd.f32 %v10294_v56, %v994_v43  ;;  %v1056_v62 = vsel %vm77_vm0, %v298_v3, 0.0  ;;  %v302_v56 = vld [vmem:[%s13570_s0 + $0x6e0] sm:$0xff] }
  0xa3   :  { %v1106_v33 = vadd.f32 %v1105_v48, %v1104_v34  ;;  %v1155_v12 = vadd.f32 %v1154_v51, %v1153_v5  ;;  %v867_v13 = vrot.slane %v10363_v49, 2  ;;  %v1109_v45 = vsel %vm77_vm0, %v322_v20, 0.0  ;;  %v370_v46 = vld [vmem:[%s13570_s0 + $0x900] sm:$0xff]  ;;  %v372_v20 = vld [vmem:[%s13570_s0 + $0x910] sm:$0xff]  ;;  %v327_v34 = vld [vmem:[%s13570_s0 + $0x7a8] sm:$0xff] }
  0xa4   :  { %v1055_v4 = vadd.f32 %v1054_v58, %v1053_v47  ;;  %v1158_v14 = vsel %vm77_vm0, %v344_v57, 0.0  ;;  %v1058_v21 = vsel %vm77_vm0, %v299_v41, 0.0  ;;  %v1060_v23 = vsel %vm77_vm0, %v300_v59, 0.0  ;;  %v373_v59 = vld [vmem:[%s13570_s0 + $0x918] sm:$0xff] }
  0xa5   :  { %v1108_v60 = vadd.f32 %v1107_v50, %v1106_v33  ;;  %v1157_v35 = vadd.f32 %v1156_v2, %v1155_v12  ;;  %v931_v19 = vadd.f32 %v10236_v18, %v929_v61  ;;  %v1111_v30 = vsel %vm77_vm0, %v323_v7, 0.0  ;;  %v326_v18 = vld [vmem:[%s13570_s0 + $0x7a0] sm:$0xff] }
  0xa6   :  { %v1057_v26 = vadd.f32 %v1056_v62, %v1055_v4  ;;  %v1160_v27 = vsel %vm77_vm0, %v345_v9, 0.0  ;;  %v998_v55 = vadd.f32 %v10301_v63, %v996_v28  ;;  %v1062_v32 = vsel %vm77_vm0, %v301_v42, 0.0  ;;  %v328_v28 = vld [vmem:[%s13570_s0 + $0x7b0] sm:$0xff] }
  0xa7   :  { %v1110_v6 = vadd.f32 %v1109_v45, %v1108_v60  ;;  %v1159_v40 = vadd.f32 %v1158_v14, %v1157_v35  ;;  %v1064_v22 = vsel %vm77_vm0, %v302_v56, 0.0  ;;  %v1113_v37 = vsel %vm77_vm0, %v324_v17, 0.0  ;;  %v350_v45 = vld [vmem:[%s13570_s0 + $0x860] sm:$0xff]  ;;  %v329_v17 = vld [vmem:[%s13570_s0 + $0x7b8] sm:$0xff] }
  0xa8   :  { %v1059_v36 = vadd.f32 %v1058_v21, %v1057_v26  ;;  %v1162_v54 = vsel %vm77_vm0, %v346_v16, 0.0  ;;  %v1066_v63 = vsel %vm77_vm0, %v303_v24, 0.0  ;;  %v1068_v43 = vsel %vm77_vm0, %v304_v25, 0.0  ;;  %v374_v60 = vld [vmem:[%s13570_s0 + $0x920] sm:$0xff] }
  0xa9   :  { %v1112_v15 = vadd.f32 %v1111_v30, %v1110_v6  ;;  %v1161_v3 = vadd.f32 %v1160_v27, %v1159_v40  ;;  %v933_v10 = vadd.f32 %v10256_v53, %v931_v19  ;;  %v1115_v51 = vsel %vm77_vm0, %v325_v31, 0.0  ;;  %v349_v53 = vld [vmem:[%s13570_s0 + $0x858] sm:$0xff]  ;;  %v330_v30 = vld [vmem:[%s13570_s0 + $0x7c0] sm:$0xff]  ;;  %v351_v40 = vld [vmem:[%s13570_s0 + $0x868] sm:$0xff] }
  0xaa   :  { %v1061_v48 = vadd.f32 %v1060_v23, %v1059_v36  ;;  %v1164_v58 = vsel %vm77_vm0, %v347_v39, 0.0  ;;  %v1000_v57 = vadd.f32 %v10304_v1, %v998_v55  ;;  %v1117_v41 = vsel %vm77_vm0, %v326_v18, 0.0  ;;  %v305_v1 = vld [vmem:[%s13570_s0 + $0x6f8] sm:$0xff]  ;;  %v331_v36 = vld [vmem:[%s13570_s0 + $0x7c8] sm:$0xff] }
  0xab   :  { %v1114_v5 = vadd.f32 %v1113_v37, %v1112_v15  ;;  %v1163_v61 = vadd.f32 %v1162_v54, %v1161_v3  ;;  %v1166_v50 = vsel %vm77_vm0, %v348_v44, 0.0  ;;  %v1216_v2 = vsel %vm77_vm0, %v370_v46, 0.0  ;;  %v332_v44 = vld [vmem:[%s13570_s0 + $0x7d0] sm:$0xff] }
  0xac   :  { %v1063_v47 = vadd.f32 %v1062_v32, %v1061_v48  ;;  %v1217_v7 = vsel %vm77_vm0, %v371_v29, 0.0  ;;  %v1219_v12 = vsel %vm77_vm0, %v372_v20, 0.0  ;;  %v1119_v4 = vsel %vm77_vm0, %v327_v34, 0.0 }
  0xad   :  { %v1116_v62 = vadd.f32 %v1115_v51, %v1114_v5  ;;  %v1165_v33 = vadd.f32 %v1164_v58, %v1163_v61  ;;  %v1218_v9 = vadd.f32 %v1217_v7, %v1216_v2  ;;  %v1168_v14 = vsel %vm77_vm0, %v349_v53, 0.0  ;;  %v352_v58 = vld [vmem:[%s13570_s0 + $0x870] sm:$0xff]  ;;  %v334_v61 = vld [vmem:[%s13570_s0 + $0x7e0] sm:$0xff] }
  0xae   :  { %v1065_v42 = vadd.f32 %v1064_v22, %v1063_v47  ;;  %v1221_v56 = vsel %vm77_vm0, %v373_v59, 0.0  ;;  %v934_v21 = vrot.slane %v933_v10, 4  ;;  %v1002_v24 = vadd.f32 %v10371_v52, %v1000_v57  ;;  %v333_v57 = vld [vmem:[%s13570_s0 + $0x7d8] sm:$0xff]  ;;  %v376_v59 = vld [vmem:[%s13570_s0 + $0x930] sm:$0xff] }
  0xaf   :  { %v1118_v23 = vadd.f32 %v1117_v41, %v1116_v62  ;;  %v1167_v16 = vadd.f32 %v1166_v50, %v1165_v33  ;;  %v1220_v35 = vadd.f32 %v1219_v12, %v1218_v9  ;;  %v1070_v19 = vsel %vm77_vm0, %v305_v1, 0.0  ;;  %v336_v1 = vld [vmem:[%s13570_s0 + $0x7f0] sm:$0xff] }
  0xb0   :  { %v1067_v25 = vadd.f32 %v1066_v63, %v1065_v42  ;;  %v1121_v26 = vsel %vm77_vm0, %v328_v28, 0.0  ;;  %v1170_v55 = vsel %vm77_vm0, %v350_v45, 0.0  ;;  %v868_v6 = vadd.f32 %v867_v13, %v10363_v49  ;;  %v375_v49 = vld [vmem:[%s13570_s0 + $0x928] sm:$0xff] }
  0xb1   :  { %v1120_v27 = vadd.f32 %v1119_v4, %v1118_v23  ;;  %v1169_v31 = vadd.f32 %v1168_v14, %v1167_v16  ;;  %v1222_v32 = vadd.f32 %v1221_v56, %v1220_v35  ;;  %v1123_v52 = vsel %vm77_vm0, %v329_v17, 0.0  ;;  %v353_v4 = vld [vmem:[%s13570_s0 + $0x878] sm:$0xff]  ;;  %v403_v23 = vld [vmem:[%s13570_s0 + $0xa08] sm:$0xff] }
  0xb2   :  { %v1069_v39 = vadd.f32 %v1068_v43, %v1067_v25  ;;  %v1223_v18 = vsel %vm77_vm0, %v374_v60, 0.0  ;;  %v662_v22 = vrot.slane %v10132_v11, 1  ;;  %v935_v37 = vadd.f32 %v934_v21, %v933_v10  ;;  %v377_v21 = vld [vmem:[%s13570_s0 + $0x938] sm:$0xff] }
  0xb3   :  { %v1122_v54 = vadd.f32 %v1121_v26, %v1120_v27  ;;  %v731_v13 = vrot.slane %v10269_v38, 1  ;;  %v1125_v43 = vsel %vm77_vm0, %v330_v30, 0.0  ;;  %v1171_v15 = vadd.f32 %v1170_v55, %v1169_v31  ;;  %v404_v30 = vld [vmem:[%s13570_s0 + $0xa10] sm:$0xff]  ;;  %v405_v27 = vld [vmem:[%s13570_s0 + $0xa18] sm:$0xff] }
  0xb4   :  { %v1071_v63 = vadd.f32 %v1070_v19, %v1069_v39  ;;  %v1003_v46 = vrot.slane %v1002_v24, 4  ;;  %v1172_v3 = vsel %vm77_vm0, %v351_v40, 0.0  ;;  %v1224_v10 = vadd.f32 %v1223_v18, %v1222_v32  ;;  %v337_v40 = vld [vmem:[%s13570_s0 + $0x7f8] sm:$0xff] }
  0xb5   :  { %v1124_v29 = vadd.f32 %v1123_v52, %v1122_v54  ;;  %v800_v48 = vrot.slane %v10316_v8, 1  ;;  %v869_v51 = vrot.slane %v868_v6, 1  ;;  %v1127_v20 = vsel %vm77_vm0, %v331_v36, 0.0  ;;  %v378_v36 = vld [vmem:[%s13570_s0 + $0x940] sm:$0xff] }
  0xb6   :  { %v1225_v34 = vsel %vm77_vm0, %v375_v49, 0.0  ;;  %v663_v5 = vadd.f32 %v662_v22, %v10132_v11  ;;  %v936_v41 = vrot.slane %v935_v37, 2  ;;  %v732_v47 = vadd.f32 %v731_v13, %v10269_v38  ;;  %v335_v11 = vld [vmem:[%s13570_s0 + $0x7e8] sm:$0xff]  ;;  %v406_v22 = vld [vmem:[%s13570_s0 + $0xa20] sm:$0xff] }
  0xb7   :  { %v1126_v53 = vadd.f32 %v1125_v43, %v1124_v29  ;;  %v1072_v50 = vrot.slane %v1071_v63, 4  ;;  %v1129_v2 = vsel %vm77_vm0, %v332_v44, 0.0  ;;  %v1173_v7 = vadd.f32 %v1172_v3, %v1171_v15  ;;  %v407_v29 = vld [vmem:[%s13570_s0 + $0xa28] sm:$0xff] }
  0xb8   :  { %v1004_v28 = vadd.f32 %v1003_v46, %v1002_v24  ;;  %v1174_v33 = vsel %vm77_vm0, %v352_v58, 0.0  ;;  %v1226_v9 = vadd.f32 %v1225_v34, %v1224_v10  ;;  %v801_v12 = vadd.f32 %v800_v48, %v10316_v8  ;;  %v402_v8 = vld [vmem:[%s13570_s0 + $0xa00] sm:$0xff]  ;;  %v355_v46 = vld [vmem:[%s13570_s0 + $0x888] sm:$0xff] }
  0xb9   :  { %v1128_v62 = vadd.f32 %v1127_v20, %v1126_v53  ;;  %v10538_v38 = vadd.f32 %v869_v51, %v868_v6  ;;  %v1131_v42 = vsel %vm77_vm0, %v333_v57, 0.0  ;;  %v1227_v45 = vsel %vm77_vm0, %v376_v59, 0.0  ;;  %v354_v24 = vld [vmem:[%s13570_s0 + $0x880] sm:$0xff] }
  0xba   :  { %v937_v14 = vadd.f32 %v936_v41, %v935_v37  ;;  %v1133_v17 = vsel %vm77_vm0, %v334_v61, 0.0  ;;  %v1073_v60 = vadd.f32 %v1072_v50, %v1071_v63  ;;  %v1135_v16 = vsel %vm77_vm0, %v335_v11, 0.0  ;;  %v408_v41 = vld [vmem:[%s13570_s0 + $0xa30] sm:$0xff] }
  0xbb   :  { %v1130_v56 = vadd.f32 %v1129_v2, %v1128_v62  ;;  %v1137_v35 = vsel %vm77_vm0, %v336_v1, 0.0  ;;  %v1175_v25 = vadd.f32 %v1174_v33, %v1173_v7  ;;  %v1005_v19 = vrot.slane %v1004_v28, 2  ;;  %v356_v11 = vld [vmem:[%s13570_s0 + $0x890] sm:$0xff] }
  0xbc   :  { %v1176_v31 = vsel %vm77_vm0, %v353_v4, 0.0  ;;  %v1228_v55 = vadd.f32 %v1227_v45, %v1226_v9  ;;  %v1716_v32 = vsel %vm1715_vm2, %v732_v47, %v663_v5  ;;  %v1229_v6 = vsel %vm77_vm0, %v377_v21, 0.0  ;;  %v379_v5 = vld [vmem:[%s13570_s0 + $0x948] sm:$0xff]  ;;  %v380_v1 = vld [vmem:[%s13570_s0 + $0x950] sm:$0xff]  ;;  %v409_v9 = vld [vmem:[%s13570_s0 + $0xa38] sm:$0xff] }
  0xbd   :  { %v1132_v26 = vadd.f32 %v1131_v42, %v1130_v56  ;;  %v1285_v39 = vsel %vm77_vm0, %v402_v8, 0.0  ;;  %v1286_v52 = vsel %vm77_vm0, %v403_v23, 0.0  ;;  %v1178_v37 = vsel %vm77_vm0, %v354_v24, 0.0  ;;  %v357_v21 = vld [vmem:[%s13570_s0 + $0x898] sm:$0xff] }
  0xbe   :  { %v1287_v54 = vadd.f32 %v1286_v52, %v1285_v39  ;;  %v1074_v49 = vrot.slane %v1073_v60, 2  ;;  %v1177_v13 = vadd.f32 %v1176_v31, %v1175_v25  ;;  %v1288_v63 = vsel %vm77_vm0, %v404_v30, 0.0  ;;  %v410_v25 = vld [vmem:[%s13570_s0 + $0xa40] sm:$0xff]  ;;  %v435_v31 = vld [vmem:[%s13570_s0 + $0xb08] sm:$0xff] }
  0xbf   :  { %v1134_v18 = vadd.f32 %v1133_v17, %v1132_v26  ;;  %v1290_v43 = vsel %vm77_vm0, %v405_v27, 0.0  ;;  %v1006_v15 = vadd.f32 %v1005_v19, %v1004_v28  ;;  %v1230_v3 = vadd.f32 %v1229_v6, %v1228_v55  ;;  %v434_v27 = vld [vmem:[%s13570_s0 + $0xb00] sm:$0xff] }
  0xc0   :  { %v1289_v10 = vadd.f32 %v1288_v63, %v1287_v54  ;;  %v938_v48 = vrot.slane %v937_v14, 1  ;;  %v1139_v51 = vsel %vm77_vm0, %v337_v40, 0.0  ;;  %v1231_v20 = vsel %vm77_vm0, %v378_v36, 0.0  ;;  %v382_v36 = vld [vmem:[%s13570_s0 + $0x960] sm:$0xff] }
  0xc1   :  { %v1136_v44 = vadd.f32 %v1135_v16, %v1134_v18  ;;  %v1292_v58 = vsel %vm77_vm0, %v406_v22, 0.0  ;;  %v1718_v57 = vsel %vm1717_vm3, %v801_v12, %v1716_v32  ;;  %v1075_v59 = vadd.f32 %v1074_v49, %v1073_v60  ;;  %v381_v16 = vld [vmem:[%s13570_s0 + $0x958] sm:$0xff]  ;;  %v436_v32 = vld [vmem:[%s13570_s0 + $0xb10] sm:$0xff]  ;;  %v358_v18 = vld [vmem:[%s13570_s0 + $0x8a0] sm:$0xff] }
  0xc2   :  { %v1291_v53 = vadd.f32 %v1290_v43, %v1289_v10  ;;  %v1179_v61 = vadd.f32 %v1178_v37, %v1177_v13  ;;  %v1180_v47 = vsel %vm77_vm0, %v355_v46, 0.0  ;;  %v1294_v50 = vsel %vm77_vm0, %v407_v29, 0.0  ;;  %v411_v22 = vld [vmem:[%s13570_s0 + $0xa48] sm:$0xff]  ;;  %v437_v49 = vld [vmem:[%s13570_s0 + $0xb18] sm:$0xff]  ;;  %v80_v43 = vld [vmem:[#allocation2] sm:$0xff] }
  0xc3   :  { %v1138_v34 = vadd.f32 %v1137_v35, %v1136_v44  ;;  %v1007_v2 = vrot.slane %v1006_v15, 1  ;;  %v1232_v28 = vadd.f32 %v1231_v20, %v1230_v3  ;;  %v939_v33 = vadd.f32 %v938_v48, %v937_v14  ;;  %v438_v46 = vld [vmem:[%s13570_s0 + $0xb20] sm:$0xff]  ;;  %v383_v20 = vld [vmem:[%s13570_s0 + $0x968] sm:$0xff] }
  0xc4   :  { %v1293_v62 = vadd.f32 %v1292_v58, %v1291_v53  ;;  %v1233_v12 = vsel %vm77_vm0, %v379_v5, 0.0  ;;  %v1296_v42 = vsel %vm77_vm0, %v408_v41, 0.0  ;;  %v1720_v45 = vsel %vm1719_vm4, %v10538_v38, %v1718_v57  ;;  %v412_v58 = vld [vmem:[%s13570_s0 + $0xa50] sm:$0xff]  ;;  %v439_v41 = vld [vmem:[%s13570_s0 + $0xb28] sm:$0xff] }
  0xc5   :  { %v1140_v7 = vadd.f32 %v1139_v51, %v1138_v34  ;;  %v1076_v17 = vrot.slane %v1075_v59, 1  ;;  %v1181_v14 = vadd.f32 %v1180_v47, %v1179_v61  ;;  %v1182_v8 = vsel %vm77_vm0, %v356_v11, 0.0  ;;  %v359_v51 = vld [vmem:[%s13570_s0 + $0x8a8] sm:$0xff]  ;;  %v440_v11 = vld [vmem:[%s13570_s0 + $0xb30] sm:$0xff] }
  0xc6   :  { %v1295_v56 = vadd.f32 %v1294_v50, %v1293_v62  ;;  %v1008_v23 = vadd.f32 %v1007_v2, %v1006_v15  ;;  %v1234_v35 = vadd.f32 %v1233_v12, %v1232_v28  ;;  %v1722_v38 = vsel %vm1721_vm5, %v939_v33, %v1720_v45  ;;  %v360_v28 = vld [vmem:[%s13570_s0 + $0x8b0] sm:$0xff]  ;;  %v413_v33 = vld [vmem:[%s13570_s0 + $0xa58] sm:$0xff] }
  0xc7   :  { %v1141_v4 = vrot.slane %v1140_v7, 4  ;;  %v1235_v19 = vsel %vm77_vm0, %v380_v1, 0.0  ;;  %v1298_v26 = vsel %vm77_vm0, %v409_v9, 0.0  ;;  %v1077_v55 = vadd.f32 %v1076_v17, %v1075_v59  ;;  %v384_v62 = vld [vmem:[%s13570_s0 + $0x970] sm:$0xff]  ;;  %v441_v45 = vld [vmem:[%s13570_s0 + $0xb38] sm:$0xff] }
  0xc8   :  { %v1297_v24 = vadd.f32 %v1296_v42, %v1295_v56  ;;  %v1183_v6 = vadd.f32 %v1182_v8, %v1181_v14  ;;  %v1184_v39 = vsel %vm77_vm0, %v357_v21, 0.0  ;;  %v1724_v40 = vsel %vm1723_vm6, %v1008_v23, %v1722_v38  ;;  %v361_v8 = vld [vmem:[%s13570_s0 + $0x8b8] sm:$0xff] }
  0xc9   :  { %v1142_v60 = vadd.f32 %v1141_v4, %v1140_v7  ;;  %v1236_v37 = vadd.f32 %v1235_v19, %v1234_v35  ;;  %v1237_v13 = vsel %vm77_vm0, %v381_v16, 0.0  ;;  %v1300_v63 = vsel %vm77_vm0, %v410_v25, 0.0  ;;  %v385_v35 = vld [vmem:[%s13570_s0 + $0x978] sm:$0xff] }
  0xca   :  { %v1299_v54 = vadd.f32 %v1298_v26, %v1297_v24  ;;  %v1726_v44 = vsel %vm1725_vm7, %v1077_v55, %v1724_v40  ;;  %v1185_v29 = vadd.f32 %v1184_v39, %v1183_v6  ;;  %v1354_v3 = vsel %vm77_vm0, %v434_v27, 0.0  ;;  %v414_v24 = vld [vmem:[%s13570_s0 + $0xa60] sm:$0xff]  ;;  %v443_v27 = vld [vmem:[%s13570_s0 + $0xb48] sm:$0xff]  ;;  %v365_v40 = vld [vmem:[%s13570_s0 + $0x8d8] sm:$0xff] }
  0xcb   :  { %v1143_v30 = vrot.slane %v1142_v60, 2  ;;  %v1355_v10 = vsel %vm77_vm0, %v435_v31, 0.0  ;;  %v1238_v34 = vadd.f32 %v1237_v13, %v1236_v37  ;;  %v1357_v5 = vsel %vm77_vm0, %v436_v32, 0.0  ;;  %v363_v39 = vld [vmem:[%s13570_s0 + $0x8c8] sm:$0xff] }
  0xcc   :  { %v1301_v57 = vadd.f32 %v1300_v63, %v1299_v54  ;;  %v1186_v53 = vsel %vm77_vm0, %v358_v18, 0.0  ;;  %v1239_v59 = vsel %vm77_vm0, %v382_v36, 0.0  ;;  %v1302_v61 = vsel %vm77_vm0, %v411_v22, 0.0  ;;  %v444_v36 = vld [vmem:[%s13570_s0 + $0xb50] sm:$0xff]  ;;  %v467_v13 = vld [vmem:[%s13570_s0 + $0xc08] sm:$0xff] }
  0xcd   :  { %v1144_v52 = vadd.f32 %v1143_v30, %v1142_v60  ;;  %v1356_v47 = vadd.f32 %v1355_v10, %v1354_v3  ;;  %v1359_v2 = vsel %vm77_vm0, %v437_v49, 0.0  ;;  %v1187_v9 = vadd.f32 %v1186_v53, %v1185_v29  ;;  %v442_v60 = vld [vmem:[%s13570_s0 + $0xb40] sm:$0xff]  ;;  %v468_v63 = vld [vmem:[%s13570_s0 + $0xc10] sm:$0xff] }
  0xce   :  { %v1240_v12 = vadd.f32 %v1239_v59, %v1238_v34  ;;  %v1303_v42 = vadd.f32 %v1302_v61, %v1301_v57  ;;  %v1361_v4 = vsel %vm77_vm0, %v438_v46, 0.0  ;;  %v1188_v56 = vsel %vm77_vm0, %v359_v51, 0.0  ;;  %v362_v30 = vld [vmem:[%s13570_s0 + $0x8c0] sm:$0xff]  ;;  %v367_v34 = vld [vmem:[%s13570_s0 + $0x8e8] sm:$0xff]  ;;  %v368_v57 = vld [vmem:[%s13570_s0 + $0x8f0] sm:$0xff] }
  0xcf   :  { %v1145_v15 = vrot.slane %v1144_v52, 1  ;;  %v1358_v1 = vadd.f32 %v1357_v5, %v1356_v47  ;;  %v1241_v17 = vsel %vm77_vm0, %v383_v20, 0.0  ;;  %v1304_v21 = vsel %vm77_vm0, %v412_v58, 0.0  ;;  %v466_v49 = vld [vmem:[%s13570_s0 + $0xc00] sm:$0xff]  ;;  %v469_v5 = vld [vmem:[%s13570_s0 + $0xc18] sm:$0xff] }
  0xd0   :  { %v1363_v23 = vsel %vm77_vm0, %v439_v41, 0.0  ;;  %v1189_v38 = vadd.f32 %v1188_v56, %v1187_v9  ;;  %v1242_v25 = vadd.f32 %v1241_v17, %v1240_v12  ;;  %v1305_v19 = vadd.f32 %v1304_v21, %v1303_v42  ;;  %v366_v3 = vld [vmem:[%s13570_s0 + $0x8e0] sm:$0xff]  ;;  %v369_v59 = vld [vmem:[%s13570_s0 + $0x8f8] sm:$0xff]  ;;  %v388_v12 = vld [vmem:[%s13570_s0 + $0x990] sm:$0xff] }
  0xd1   :  { %v1146_v48 = vadd.f32 %v1145_v15, %v1144_v52  ;;  %v1360_v14 = vadd.f32 %v1359_v2, %v1358_v1  ;;  %v1365_v26 = vsel %vm77_vm0, %v440_v11, 0.0  ;;  %v1190_v31 = vsel %vm77_vm0, %v360_v28, 0.0  ;;  %v364_v52 = vld [vmem:[%s13570_s0 + $0x8d0] sm:$0xff]  ;;  %v386_v10 = vld [vmem:[%s13570_s0 + $0x980] sm:$0xff]  ;;  %v445_v61 = vld [vmem:[%s13570_s0 + $0xb58] sm:$0xff] }
  0xd2   :  { %v1243_v55 = vsel %vm77_vm0, %v384_v62, 0.0  ;;  %v1306_v32 = vsel %vm77_vm0, %v413_v33, 0.0  ;;  %v1367_v18 = vsel %vm77_vm0, %v441_v45, 0.0  ;;  %v1192_v22 = vsel %vm77_vm0, %v361_v8, 0.0  ;;  %v387_v11 = vld [vmem:[%s13570_s0 + $0x988] sm:$0xff]  ;;  %v470_v1 = vld [vmem:[%s13570_s0 + $0xc20] sm:$0xff] }
  0xd3   :  { %v1728_v50 = vsel %vm1727_vm8, %v1146_v48, %v1726_v44  ;;  %v1362_v16 = vadd.f32 %v1361_v4, %v1360_v14  ;;  %v1244_v15 = vadd.f32 %v1243_v55, %v1242_v25  ;;  %v1307_v44 = vadd.f32 %v1306_v32, %v1305_v19  ;;  %v415_v48 = vld [vmem:[%s13570_s0 + $0xa68] sm:$0xff]  ;;  %v389_v42 = vld [vmem:[%s13570_s0 + $0x998] sm:$0xff]  ;;  %v416_v4 = vld [vmem:[%s13570_s0 + $0xa70] sm:$0xff] }
  0xd4   :  { %v1738_v7 = vadd.f32 %v1728_v50, %v80_v43  ;;  %v1191_v43 = vadd.f32 %v1190_v31, %v1189_v38  ;;  %v1369_v46 = vsel %vm77_vm0, %v442_v60, 0.0  ;;  %v1245_v51 = vsel %vm77_vm0, %v385_v35, 0.0  ;;  %v390_v14 = vld [vmem:[%s13570_s0 + $0x9a0] sm:$0xff]  ;;  %v391_v8 = vld [vmem:[%s13570_s0 + $0x9a8] sm:$0xff]  ;;  %v392_v38 = vld [vmem:[%s13570_s0 + $0x9b0] sm:$0xff] }
  0xd5   :  { %v1364_v6 = vadd.f32 %v1363_v23, %v1362_v16  ;;  %v1308_v20 = vsel %vm77_vm0, %v414_v24, 0.0  ;;  %v1194_v41 = vsel %vm77_vm0, %v362_v30, 0.0  ;;  %v1371_v53 = vsel %vm77_vm0, %v443_v27, 0.0  ;;  %v471_v23 = vld [vmem:[%s13570_s0 + $0xc28] sm:$0xff]  ;;  %v446_v25 = vld [vmem:[%s13570_s0 + $0xb60] sm:$0xff]  ;;  %v393_v31 = vld [vmem:[%s13570_s0 + $0x9b8] sm:$0xff] }
  0xd6   :  { %1740 = vst.msk [vmem:[#allocation2] sm:$0xff] %vm77_vm0, %v1738_v7  ;;  %v1196_v47 = vsel %vm77_vm0, %v363_v39, 0.0  ;;  %v10777_v50 = vsel %vm77_vm0, %v364_v52, 0.0  ;;  %v10780_v2 = vsel %vm77_vm0, %v365_v40, 0.0  ;;  %v1193_v28 = vadd.f32 %v1192_v22, %v1191_v43  ;;  %v472_v55 = vld [vmem:[%s13570_s0 + $0xc30] sm:$0xff]  ;;  %v394_v40 = vld [vmem:[%s13570_s0 + $0x9c0] sm:$0xff] }
  0xd7   :  { %v1366_v37 = vadd.f32 %v1365_v26, %v1364_v6  ;;  %v1246_v62 = vadd.f32 %v1245_v51, %v1244_v15  ;;  %v1309_v33 = vadd.f32 %v1308_v20, %v1307_v44  ;;  %v1373_v9 = vsel %vm77_vm0, %v444_v36, 0.0  ;;  %v417_v36 = vld [vmem:[%s13570_s0 + $0xa78] sm:$0xff] }
  0xd8   :  { %v1423_v56 = vsel %vm77_vm0, %v466_v49, 0.0  ;;  %v1424_v17 = vsel %vm77_vm0, %v467_v13, 0.0  ;;  %v1426_v21 = vsel %vm77_vm0, %v468_v63, 0.0  ;;  %v10812_v60 = vsel %vm77_vm0, %v366_v3, 0.0  ;;  %v396_v13 = vld [vmem:[%s13570_s0 + $0x9d0] sm:$0xff]  ;;  %v397_v63 = vld [vmem:[%s13570_s0 + $0x9d8] sm:$0xff] }
  0xd9   :  { %v1368_v58 = vadd.f32 %v1367_v18, %v1366_v37  ;;  %v1247_v16 = vsel %vm77_vm0, %v386_v10, 0.0  ;;  %v1310_v35 = vsel %vm77_vm0, %v415_v48, 0.0  ;;  %v1425_v24 = vadd.f32 %v1424_v17, %v1423_v56  ;;  %v395_v18 = vld [vmem:[%s13570_s0 + $0x9c8] sm:$0xff]  ;;  %v473_v43 = vld [vmem:[%s13570_s0 + $0xc38] sm:$0xff]  ;;  %v398_v10 = vld [vmem:[%s13570_s0 + $0x9e0] sm:$0xff] }
  0xda   :  { %v10823_v19 = vsel %vm77_vm0, %v367_v34, 0.0  ;;  %v10826_v26 = vsel %vm77_vm0, %v368_v57, 0.0  ;;  %v1428_v27 = vsel %vm77_vm0, %v469_v5, 0.0  ;;  %v1195_v32 = vadd.f32 %v1194_v41, %v1193_v28  ;;  %v447_v48 = vld [vmem:[%s13570_s0 + $0xb68] sm:$0xff]  ;;  %v474_v5 = vld [vmem:[%s13570_s0 + $0xc40] sm:$0xff] }
  0xdb   :  { %v1370_v7 = vadd.f32 %v1369_v46, %v1368_v58  ;;  %v10836_v6 = vsel %vm77_vm0, %v369_v59, 0.0  ;;  %v1375_v39 = vsel %vm77_vm0, %v445_v61, 0.0  ;;  %v1427_v52 = vadd.f32 %v1426_v21, %v1425_v24  ;;  %v399_v57 = vld [vmem:[%s13570_s0 + $0x9e8] sm:$0xff]  ;;  %v421_v21 = vld [vmem:[%s13570_s0 + $0xa98] sm:$0xff]  ;;  %v476_v24 = vld [vmem:[%s13570_s0 + $0xc50] sm:$0xff] }
  0xdc   :  { %v1248_v22 = vadd.f32 %v1247_v16, %v1246_v62  ;;  %v1249_v37 = vsel %vm77_vm0, %v387_v11, 0.0  ;;  %v1430_v49 = vsel %vm77_vm0, %v470_v1, 0.0  ;;  %v1251_v15 = vsel %vm77_vm0, %v388_v12, 0.0  ;;  %v401_v11 = vld [vmem:[%s13570_s0 + $0x9f8] sm:$0xff]  ;;  %v418_v1 = vld [vmem:[%s13570_s0 + $0xa80] sm:$0xff]  ;;  %v420_v12 = vld [vmem:[%s13570_s0 + $0xa90] sm:$0xff] }
  0xdd   :  { %v1745_v54 = vld [vmem:[#allocation2] sm:$0xff]  ;;  %v1372_v45 = vadd.f32 %v1371_v53, %v1370_v7  ;;  %v10861_v44 = vsel %vm77_vm0, %v389_v42, 0.0  ;;  %v1312_v46 = vsel %vm77_vm0, %v416_v4, 0.0  ;;  %v1429_v3 = vadd.f32 %v1428_v27, %v1427_v52  ;;  %v400_v7 = vld [vmem:[%s13570_s0 + $0x9f0] sm:$0xff]  ;;  %v475_v42 = vld [vmem:[%s13570_s0 + $0xc48] sm:$0xff] }
  0xde   :  { %v10743_v29 = vmul.f32 0.00390625, %v1745_v54  ;;  %v1311_v54 = vadd.f32 %v1310_v35, %v1309_v33  ;;  %v10871_v51 = vsel %vm77_vm0, %v390_v14, 0.0  ;;  %v10874_v20 = vsel %vm77_vm0, %v391_v8, 0.0  ;;  %v448_v14 = vld [vmem:[%s13570_s0 + $0xb70] sm:$0xff] }
  0xdf   :  { %v1374_v30 = vadd.f32 %v1373_v9, %v1372_v45  ;;  %v1432_v34 = vsel %vm77_vm0, %v471_v23, 0.0  ;;  %v1197_v41 = vadd.f32 %v1196_v47, %v1195_v32  ;;  %v10884_v53 = vsel %vm77_vm0, %v392_v38, 0.0  ;;  %v419_v9 = vld [vmem:[%s13570_s0 + $0xa88] sm:$0xff]  ;;  %v498_v38 = vld [vmem:[%s13570_s0 + $0xd00] sm:$0xff] }
  0xe0   :  { %7582 = vmatmul.mubr.msk.f32.vlgmr.msra.gmra.mrb[0].mxu0 %vm77_vm0, %v10743_v29  ;;  %v1377_v59 = vsel %vm77_vm0, %v446_v25, 0.0  ;;  %v1431_v61 = vadd.f32 %v1430_v49, %v1429_v3  ;;  %v1250_v28 = vadd.f32 %v1249_v37, %v1248_v22  ;;  %v10897_v47 = vsel %vm77_vm0, %v393_v31, 0.0  ;;  %v423_v32 = vld [vmem:[%s13570_s0 + $0xaa8] sm:$0xff]  ;;  %v500_v22 = vld [vmem:[%s13570_s0 + $0xd10] sm:$0xff] }
  0xe1   :  { %1966 = vmatprep.mubr.f32.mxu0 %v9199_v0  ;;  %v1376_v58 = vadd.f32 %v1375_v39, %v1374_v30  ;;  %v1313_v62 = vadd.f32 %v1312_v46, %v1311_v54  ;;  %v1434_v33 = vsel %vm77_vm0, %v472_v55, 0.0  ;;  %v10910_v4 = vsel %vm77_vm0, %v394_v40, 0.0  ;;  %v422_v55 = vld [vmem:[%s13570_s0 + $0xaa0] sm:$0xff]  ;;  %v499_v39 = vld [vmem:[%s13570_s0 + $0xd08] sm:$0xff] }
  0xe2   :  { %v10913_v45 = vsel %vm77_vm0, %v395_v18, 0.0  ;;  %v1314_v56 = vsel %vm77_vm0, %v417_v36, 0.0  ;;  %v1433_v17 = vadd.f32 %v1432_v34, %v1431_v61  ;;  %v10923_v8 = vsel %vm77_vm0, %v396_v13, 0.0  ;;  %v477_v36 = vld [vmem:[%s13570_s0 + $0xc58] sm:$0xff]  ;;  %v502_v61 = vld [vmem:[%s13570_s0 + $0xd20] sm:$0xff] }
  0xe3   :  { %v10926_v23 = vsel %vm77_vm0, %v397_v63, 0.0  ;;  %v1378_v16 = vadd.f32 %v1377_v59, %v1376_v58  ;;  %v1436_v35 = vsel %vm77_vm0, %v473_v43, 0.0  ;;  %v1199_v25 = vadd.f32 %v10777_v50, %v1197_v41  ;;  %v449_v63 = vld [vmem:[%s13570_s0 + $0xb78] sm:$0xff]  ;;  %v424_v41 = vld [vmem:[%s13570_s0 + $0xab0] sm:$0xff] }
  0xe4   :  { %v10937_v30 = vsel %vm77_vm0, %v398_v10, 0.0  ;;  %v1379_v27 = vsel %vm77_vm0, %v447_v48, 0.0  ;;  %v1435_v31 = vadd.f32 %v1434_v33, %v1433_v17  ;;  %v1252_v52 = vadd.f32 %v1251_v15, %v1250_v28  ;;  %v501_v43 = vld [vmem:[%s13570_s0 + $0xd18] sm:$0xff]  ;;  %v478_v48 = vld [vmem:[%s13570_s0 + $0xc60] sm:$0xff] }
  0xe5   :  { %v10950_v50 = vsel %vm77_vm0, %v399_v57, 0.0  ;;  %v1315_v40 = vadd.f32 %v1314_v56, %v1313_v62  ;;  %v1438_v18 = vsel %vm77_vm0, %v474_v5, 0.0  ;;  %v10960_v37 = vsel %vm77_vm0, %v400_v7, 0.0  ;;  %v425_v59 = vld [vmem:[%s13570_s0 + $0xab8] sm:$0xff]  ;;  %v426_v28 = vld [vmem:[%s13570_s0 + $0xac0] sm:$0xff]  ;;  %v479_v62 = vld [vmem:[%s13570_s0 + $0xc68] sm:$0xff] }
  0xe6   :  { %v10963_v54 = vsel %vm77_vm0, %v401_v11, 0.0  ;;  %v1316_v49 = vsel %vm77_vm0, %v418_v1, 0.0  ;;  %v1437_v13 = vadd.f32 %v1436_v35, %v1435_v31  ;;  %v1318_v15 = vsel %vm77_vm0, %v419_v9, 0.0  ;;  %v503_v35 = vld [vmem:[%s13570_s0 + $0xd28] sm:$0xff] }
  0xe7   :  { %v1320_v46 = vsel %vm77_vm0, %v420_v12, 0.0  ;;  %v1380_v3 = vadd.f32 %v1379_v27, %v1378_v16  ;;  %v1440_v10 = vsel %vm77_vm0, %v475_v42, 0.0  ;;  %v1201_v58 = vadd.f32 %v10780_v2, %v1199_v25  ;;  %v450_v42 = vld [vmem:[%s13570_s0 + $0xb80] sm:$0xff]  ;;  %v480_v16 = vld [vmem:[%s13570_s0 + $0xc70] sm:$0xff]  ;;  %v427_v31 = vld [vmem:[%s13570_s0 + $0xac8] sm:$0xff] }
  0xe8   :  { %v10980_v34 = vsel %vm77_vm0, %v421_v21, 0.0  ;;  %v1381_v57 = vsel %vm77_vm0, %v448_v14, 0.0  ;;  %v1439_v5 = vadd.f32 %v1438_v18, %v1437_v13  ;;  %v1254_v2 = vadd.f32 %v10861_v44, %v1252_v52  ;;  %v429_v18 = vld [vmem:[%s13570_s0 + $0xad8] sm:$0xff] }
  0xe9   :  { %v1317_v7 = vadd.f32 %v1316_v49, %v1315_v40  ;;  %v1442_v11 = vsel %vm77_vm0, %v476_v24, 0.0  ;;  %v1492_v1 = vsel %vm77_vm0, %v498_v38, 0.0  ;;  %v11002_v33 = vsel %vm77_vm0, %v422_v55, 0.0  ;;  %v428_v55 = vld [vmem:[%s13570_s0 + $0xad0] sm:$0xff] }
  0xea   :  { %v11005_v9 = vsel %vm77_vm0, %v423_v32, 0.0  ;;  %v1441_v44 = vadd.f32 %v1440_v10, %v1439_v5  ;;  %v1493_v12 = vsel %vm77_vm0, %v499_v39, 0.0  ;;  %v1382_v56 = vadd.f32 %v1381_v57, %v1380_v3  ;;  %v504_v32 = vld [vmem:[%s13570_s0 + $0xd30] sm:$0xff] }
  0xeb   :  { %v1444_v17 = vsel %vm77_vm0, %v477_v36, 0.0  ;;  %v1494_v21 = vadd.f32 %v1493_v12, %v1492_v1  ;;  %v1495_v14 = vsel %vm77_vm0, %v500_v22, 0.0  ;;  %v1203_v24 = vadd.f32 %v10812_v60, %v1201_v58  ;;  %v481_v36 = vld [vmem:[%s13570_s0 + $0xc78] sm:$0xff]  ;;  %v482_v58 = vld [vmem:[%s13570_s0 + $0xc80] sm:$0xff] }
  0xec   :  { %v1383_v38 = vsel %vm77_vm0, %v449_v63, 0.0  ;;  %v1443_v25 = vadd.f32 %v1442_v11, %v1441_v44  ;;  %v1497_v27 = vsel %vm77_vm0, %v501_v43, 0.0  ;;  %v1256_v39 = vadd.f32 %v10871_v51, %v1254_v2  ;;  %v451_v63 = vld [vmem:[%s13570_s0 + $0xb88] sm:$0xff]  ;;  %v505_v43 = vld [vmem:[%s13570_s0 + $0xd38] sm:$0xff] }
  0xed   :  { %v1319_v60 = vadd.f32 %v1318_v15, %v1317_v7  ;;  %v1446_v52 = vsel %vm77_vm0, %v478_v48, 0.0  ;;  %v1496_v40 = vadd.f32 %v1495_v14, %v1494_v21  ;;  %v11040_v22 = vsel %vm77_vm0, %v424_v41, 0.0  ;;  %v431_v2 = vld [vmem:[%s13570_s0 + $0xae8] sm:$0xff]  ;;  %v506_v7 = vld [vmem:[%s13570_s0 + $0xd40] sm:$0xff] }
  0xee   :  { %v11043_v49 = vsel %vm77_vm0, %v425_v59, 0.0  ;;  %v1445_v13 = vadd.f32 %v1444_v17, %v1443_v25  ;;  %v1499_v51 = vsel %vm77_vm0, %v502_v61, 0.0  ;;  %v11053_v15 = vsel %vm77_vm0, %v426_v28, 0.0  ;;  %v430_v61 = vld [vmem:[%s13570_s0 + $0xae0] sm:$0xff] }
  0xef   :  { %v1384_v3 = vadd.f32 %v1383_v38, %v1382_v56  ;;  %v1448_v10 = vsel %vm77_vm0, %v479_v62, 0.0  ;;  %v1498_v48 = vadd.f32 %v1497_v27, %v1496_v40  ;;  %v1205_v57 = vadd.f32 %v10823_v19, %v1203_v24  ;;  %v432_v62 = vld [vmem:[%s13570_s0 + $0xaf0] sm:$0xff]  ;;  %v507_v24 = vld [vmem:[%s13570_s0 + $0xd48] sm:$0xff] }
  0xf0   :  { %v1385_v5 = vsel %vm77_vm0, %v450_v42, 0.0  ;;  %v1447_v41 = vadd.f32 %v1446_v52, %v1445_v13  ;;  %v1501_v59 = vsel %vm77_vm0, %v503_v35, 0.0  ;;  %v1258_v11 = vadd.f32 %v10874_v20, %v1256_v39  ;;  %v452_v20 = vld [vmem:[%s13570_s0 + $0xb90] sm:$0xff]  ;;  %v483_v35 = vld [vmem:[%s13570_s0 + $0xc88] sm:$0xff]  ;;  %v530_v39 = vld [vmem:[%s13570_s0 + $0xe00] sm:$0xff] }
  0xf1   :  { %v1321_v19 = vadd.f32 %v1320_v46, %v1319_v60  ;;  %v1450_v1 = vsel %vm77_vm0, %v480_v16, 0.0  ;;  %v1500_v28 = vadd.f32 %v1499_v51, %v1498_v48  ;;  %v11077_v44 = vsel %vm77_vm0, %v427_v31, 0.0  ;;  %v433_v16 = vld [vmem:[%s13570_s0 + $0xaf8] sm:$0xff] }
  0xf2   :  { %v11080_v12 = vsel %vm77_vm0, %v428_v55, 0.0  ;;  %v1449_v42 = vadd.f32 %v1448_v10, %v1447_v41  ;;  %v1503_v56 = vsel %vm77_vm0, %v504_v32, 0.0  ;;  %v11087_v46 = vsel %vm77_vm0, %v429_v18, 0.0  ;;  %v484_v55 = vld [vmem:[%s13570_s0 + $0xc90] sm:$0xff]  ;;  %v531_v18 = vld [vmem:[%s13570_s0 + $0xe08] sm:$0xff] }
  0xf3   :  { %v1386_v17 = vadd.f32 %v1385_v5, %v1384_v3  ;;  %v1452_v21 = vsel %vm77_vm0, %v481_v36, 0.0  ;;  %v1502_v14 = vadd.f32 %v1501_v59, %v1500_v28  ;;  %v1207_v38 = vadd.f32 %v10826_v26, %v1205_v57  ;;  %v508_v32 = vld [vmem:[%s13570_s0 + $0xd50] sm:$0xff]  ;;  %v533_v57 = vld [vmem:[%s13570_s0 + $0xe18] sm:$0xff] }
  0xf4   :  { %v1387_v25 = vsel %vm77_vm0, %v451_v63, 0.0  ;;  %v1451_v27 = vadd.f32 %v1450_v1, %v1449_v42  ;;  %v1505_v31 = vsel %vm77_vm0, %v505_v43, 0.0  ;;  %v1260_v60 = vadd.f32 %v10884_v53, %v1258_v11  ;;  %v532_v36 = vld [vmem:[%s13570_s0 + $0xe10] sm:$0xff]  ;;  %v453_v63 = vld [vmem:[%s13570_s0 + $0xb98] sm:$0xff] }
  0xf5   :  { %v1323_v26 = vadd.f32 %v10980_v34, %v1321_v19  ;;  %v1454_v52 = vsel %vm77_vm0, %v482_v58, 0.0  ;;  %v1504_v40 = vadd.f32 %v1503_v56, %v1502_v14  ;;  %v11121_v13 = vsel %vm77_vm0, %v430_v61, 0.0  ;;  %v509_v43 = vld [vmem:[%s13570_s0 + $0xd58] sm:$0xff] }
  0xf6   :  { %v11124_v51 = vsel %vm77_vm0, %v431_v2, 0.0  ;;  %v1453_v53 = vadd.f32 %v1452_v21, %v1451_v27  ;;  %v1507_v34 = vsel %vm77_vm0, %v506_v7, 0.0  ;;  %v11134_v3 = vsel %vm77_vm0, %v432_v62, 0.0  ;;  %v454_v2 = vld [vmem:[%s13570_s0 + $0xba0] sm:$0xff]  ;;  %v456_v27 = vld [vmem:[%s13570_s0 + $0xbb0] sm:$0xff] }
  0xf7   :  { %v1388_v10 = vadd.f32 %v1387_v25, %v1386_v17  ;;  %v1456_v48 = vsel %vm77_vm0, %v483_v35, 0.0  ;;  %v1506_v58 = vadd.f32 %v1505_v31, %v1504_v40  ;;  %v11141_v5 = vadd.f32 %v10836_v6, %v1207_v38  ;;  %v510_v7 = vld [vmem:[%s13570_s0 + $0xd60] sm:$0xff]  ;;  %v455_v25 = vld [vmem:[%s13570_s0 + $0xba8] sm:$0xff] }
  0xf8   :  { %v1389_v41 = vsel %vm77_vm0, %v452_v20, 0.0  ;;  %v1455_v59 = vadd.f32 %v1454_v52, %v1453_v53  ;;  %v1509_v61 = vsel %vm77_vm0, %v507_v24, 0.0  ;;  %v1262_v11 = vadd.f32 %v10897_v47, %v1260_v60  ;;  %v485_v47 = vld [vmem:[%s13570_s0 + $0xc98] sm:$0xff]  ;;  %v511_v31 = vld [vmem:[%s13570_s0 + $0xd68] sm:$0xff] }
  0xf9   :  { %v1325_v19 = vadd.f32 %v11002_v33, %v1323_v26  ;;  %v11154_v6 = vsel %vm77_vm0, %v433_v16, 0.0  ;;  %v1508_v1 = vadd.f32 %v1507_v34, %v1506_v58  ;;  %v1458_v62 = vsel %vm77_vm0, %v484_v55, 0.0  ;;  %v534_v33 = vld [vmem:[%s13570_s0 + $0xe20] sm:$0xff]  ;;  %v535_v26 = vld [vmem:[%s13570_s0 + $0xe28] sm:$0xff]  ;;  %v457_v53 = vld [vmem:[%s13570_s0 + $0xbb8] sm:$0xff] }
  0xfa   :  { %v1457_v28 = vadd.f32 %v1456_v48, %v1455_v59  ;;  %v1511_v42 = vsel %vm77_vm0, %v508_v32, 0.0  ;;  %v1561_v56 = vsel %vm77_vm0, %v530_v39, 0.0  ;;  %v1390_v20 = vadd.f32 %v1389_v41, %v1388_v10  ;;  %v486_v10 = vld [vmem:[%s13570_s0 + $0xca0] sm:$0xff]  ;;  %v536_v48 = vld [vmem:[%s13570_s0 + $0xe30] sm:$0xff] }
  0xfb   :  { %v1510_v17 = vadd.f32 %v1509_v61, %v1508_v1  ;;  %v1562_v21 = vsel %vm77_vm0, %v531_v18, 0.0  ;;  %v1564_v14 = vsel %vm77_vm0, %v532_v36, 0.0  ;;  %v1210_v16 = vrot.slane %v11141_v5, 4  ;;  %v458_v61 = vld [vmem:[%s13570_s0 + $0xbc0] sm:$0xff] }
  0xfc   :  { %v1391_v35 = vsel %vm77_vm0, %v453_v63, 0.0  ;;  %v1513_v24 = vsel %vm77_vm0, %v509_v43, 0.0  ;;  %v1563_v38 = vadd.f32 %v1562_v21, %v1561_v56  ;;  %v1264_v55 = vadd.f32 %v10910_v4, %v1262_v11  ;;  %v512_v4 = vld [vmem:[%s13570_s0 + $0xd70] sm:$0xff]  ;;  %v537_v56 = vld [vmem:[%s13570_s0 + $0xe38] sm:$0xff] }
  0xfd   :  { %v1327_v32 = vadd.f32 %v11005_v9, %v1325_v19  ;;  %v1512_v39 = vadd.f32 %v1511_v42, %v1510_v17  ;;  %v1566_v60 = vsel %vm77_vm0, %v533_v57, 0.0  ;;  %v1393_v52 = vsel %vm77_vm0, %v454_v2, 0.0  ;;  %v459_v2 = vld [vmem:[%s13570_s0 + $0xbc8] sm:$0xff]  ;;  %v461_v21 = vld [vmem:[%s13570_s0 + $0xbd8] sm:$0xff] }
  0xfe   :  { %v1459_v40 = vadd.f32 %v1458_v62, %v1457_v28  ;;  %v1515_v18 = vsel %vm77_vm0, %v510_v7, 0.0  ;;  %v1565_v36 = vadd.f32 %v1564_v14, %v1563_v38  ;;  %v1392_v9 = vadd.f32 %v1391_v35, %v1390_v20  ;;  %v513_v7 = vld [vmem:[%s13570_s0 + $0xd78] sm:$0xff]  ;;  %v460_v62 = vld [vmem:[%s13570_s0 + $0xbd0] sm:$0xff]  ;;  %v487_v42 = vld [vmem:[%s13570_s0 + $0xca8] sm:$0xff] }
  0xff   :  { %v1460_v34 = vsel %vm77_vm0, %v485_v47, 0.0  ;;  %v1514_v63 = vadd.f32 %v1513_v24, %v1512_v39  ;;  %v1568_v43 = vsel %vm77_vm0, %v534_v33, 0.0  ;;  %v1395_v58 = vsel %vm77_vm0, %v455_v25, 0.0  ;;  %v462_v14 = vld [vmem:[%s13570_s0 + $0xbe0] sm:$0xff]  ;;  %v515_v33 = vld [vmem:[%s13570_s0 + $0xd88] sm:$0xff] }
 0x100   :  { %v11203_v57 = vsel %vm77_vm0, %v456_v27, 0.0  ;;  %v1517_v41 = vsel %vm77_vm0, %v511_v31, 0.0  ;;  %v1567_v59 = vadd.f32 %v1566_v60, %v1565_v36  ;;  %v1266_v11 = vadd.f32 %v10913_v45, %v1264_v55  ;;  %v514_v47 = vld [vmem:[%s13570_s0 + $0xd80] sm:$0xff]  ;;  %v488_v60 = vld [vmem:[%s13570_s0 + $0xcb0] sm:$0xff] }
 0x101   :  { %v1329_v19 = vadd.f32 %v11040_v22, %v1327_v32  ;;  %v1516_v1 = vadd.f32 %v1515_v18, %v1514_v63  ;;  %v1570_v28 = vsel %vm77_vm0, %v535_v26, 0.0  ;;  %v11228_v20 = vsel %vm77_vm0, %v457_v53, 0.0  ;;  %v538_v35 = vld [vmem:[%s13570_s0 + $0xe40] sm:$0xff]  ;;  %v516_v36 = vld [vmem:[%s13570_s0 + $0xd90] sm:$0xff]  ;;  %v539_v53 = vld [vmem:[%s13570_s0 + $0xe48] sm:$0xff] }
 0x102   :  { %v1461_v45 = vadd.f32 %v1460_v34, %v1459_v40  ;;  %v1519_v22 = vsel %vm77_vm0, %v512_v4, 0.0  ;;  %v1569_v17 = vadd.f32 %v1568_v43, %v1567_v59  ;;  %v1394_v24 = vadd.f32 %v1393_v52, %v1392_v9  ;;  %v540_v4 = vld [vmem:[%s13570_s0 + $0xe50] sm:$0xff]  ;;  %v517_v63 = vld [vmem:[%s13570_s0 + $0xd98] sm:$0xff]  ;;  %v562_v43 = vld [vmem:[%s13570_s0 + $0xf00] sm:$0xff] }
 0x103   :  { %v1462_v38 = vsel %vm77_vm0, %v486_v10, 0.0  ;;  %v1518_v25 = vadd.f32 %v1517_v41, %v1516_v1  ;;  %v1572_v27 = vsel %vm77_vm0, %v536_v48, 0.0  ;;  %v11249_v31 = vsel %vm77_vm0, %v458_v61, 0.0  ;;  %v563_v10 = vld [vmem:[%s13570_s0 + $0xf08] sm:$0xff] }
 0x104   :  { %v11252_v55 = vsel %vm77_vm0, %v459_v2, 0.0  ;;  %v1521_v32 = vsel %vm77_vm0, %v513_v7, 0.0  ;;  %v1571_v39 = vadd.f32 %v1570_v28, %v1569_v17  ;;  %v1268_v26 = vadd.f32 %v10923_v8, %v1266_v11  ;;  %v564_v2 = vld [vmem:[%s13570_s0 + $0xf10] sm:$0xff] }
 0x105   :  { %v1331_v52 = vadd.f32 %v11043_v49, %v1329_v19  ;;  %v1520_v40 = vadd.f32 %v1519_v22, %v1518_v25  ;;  %v1574_v18 = vsel %vm77_vm0, %v537_v56, 0.0  ;;  %v11271_v9 = vsel %vm77_vm0, %v460_v62, 0.0  ;;  %v489_v56 = vld [vmem:[%s13570_s0 + $0xcb8] sm:$0xff] }
 0x106   :  { %v1463_v8 = vadd.f32 %v1462_v38, %v1461_v45  ;;  %v1523_v49 = vsel %vm77_vm0, %v514_v47, 0.0  ;;  %v1573_v34 = vadd.f32 %v1572_v27, %v1571_v39  ;;  %v1396_v48 = vadd.f32 %v1395_v58, %v1394_v24  ;;  %v518_v45 = vld [vmem:[%s13570_s0 + $0xda0] sm:$0xff]  ;;  %v541_v22 = vld [vmem:[%s13570_s0 + $0xe58] sm:$0xff] }
 0x107   :  { %v1464_v41 = vsel %vm77_vm0, %v487_v42, 0.0  ;;  %v1522_v59 = vadd.f32 %v1521_v32, %v1520_v40  ;;  %v1576_v61 = vsel %vm77_vm0, %v538_v35, 0.0  ;;  %v11289_v7 = vsel %vm77_vm0, %v461_v21, 0.0  ;;  %v542_v47 = vld [vmem:[%s13570_s0 + $0xe60] sm:$0xff] }
 0x108   :  { %v11292_v11 = vsel %vm77_vm0, %v462_v14, 0.0  ;;  %v1525_v19 = vsel %vm77_vm0, %v515_v33, 0.0  ;;  %v1575_v1 = vadd.f32 %v1574_v18, %v1573_v34  ;;  %v11296_v58 = vadd.f32 %v10926_v23, %v1268_v26  ;;  %v519_v14 = vld [vmem:[%s13570_s0 + $0xda8] sm:$0xff]  ;;  %v565_v33 = vld [vmem:[%s13570_s0 + $0xf18] sm:$0xff]  ;;  %v566_v27 = vld [vmem:[%s13570_s0 + $0xf20] sm:$0xff] }
 0x109   :  { %v1333_v28 = vadd.f32 %v11053_v15, %v1331_v52  ;;  %v1524_v62 = vadd.f32 %v1523_v49, %v1522_v59  ;;  %v1578_v42 = vsel %vm77_vm0, %v539_v53, 0.0  ;;  %v1465_v17 = vadd.f32 %v1464_v41, %v1463_v8  ;;  %v520_v53 = vld [vmem:[%s13570_s0 + $0xdb0] sm:$0xff] }
 0x10a   :  { %v1466_v23 = vsel %vm77_vm0, %v488_v60, 0.0  ;;  %v1527_v15 = vsel %vm77_vm0, %v516_v36, 0.0  ;;  %v1577_v21 = vadd.f32 %v1576_v61, %v1575_v1  ;;  %v1398_v35 = vadd.f32 %v11203_v57, %v1396_v48  ;;  %v490_v36 = vld [vmem:[%s13570_s0 + $0xcc0] sm:$0xff]  ;;  %v567_v48 = vld [vmem:[%s13570_s0 + $0xf28] sm:$0xff]  ;;  %v568_v41 = vld [vmem:[%s13570_s0 + $0xf30] sm:$0xff] }
 0x10b   :  { %v1526_v24 = vadd.f32 %v1525_v19, %v1524_v62  ;;  %v1580_v38 = vsel %vm77_vm0, %v540_v4, 0.0  ;;  %v1630_v25 = vsel %vm77_vm0, %v562_v43, 0.0  ;;  %v1529_v32 = vsel %vm77_vm0, %v517_v63, 0.0  ;;  %v543_v4 = vld [vmem:[%s13570_s0 + $0xe68] sm:$0xff]  ;;  %v521_v43 = vld [vmem:[%s13570_s0 + $0xdb8] sm:$0xff] }
 0x10c   :  { %v1579_v39 = vadd.f32 %v1578_v42, %v1577_v21  ;;  %v1631_v60 = vsel %vm77_vm0, %v563_v10, 0.0  ;;  %v1633_v26 = vsel %vm77_vm0, %v564_v2, 0.0  ;;  %v1468_v52 = vsel %vm77_vm0, %v489_v56, 0.0  ;;  %v544_v10 = vld [vmem:[%s13570_s0 + $0xe70] sm:$0xff] }
 0x10d   :  { %v1528_v40 = vadd.f32 %v1527_v15, %v1526_v24  ;;  %v1582_v57 = vsel %vm77_vm0, %v541_v22, 0.0  ;;  %v1632_v18 = vadd.f32 %v1631_v60, %v1630_v25  ;;  %v1467_v8 = vadd.f32 %v1466_v23, %v1465_v17  ;;  %v522_v15 = vld [vmem:[%s13570_s0 + $0xdc0] sm:$0xff] }
 0x10e   :  { %v1531_v49 = vsel %vm77_vm0, %v518_v45, 0.0  ;;  %v1581_v34 = vadd.f32 %v1580_v38, %v1579_v39  ;;  %v1635_v63 = vsel %vm77_vm0, %v565_v33, 0.0  ;;  %v1400_v59 = vadd.f32 %v11228_v20, %v1398_v35  ;;  %v491_v20 = vld [vmem:[%s13570_s0 + $0xcc8] sm:$0xff]  ;;  %v546_v33 = vld [vmem:[%s13570_s0 + $0xe80] sm:$0xff]  ;;  %v569_v35 = vld [vmem:[%s13570_s0 + $0xf38] sm:$0xff] }
 0x10f   :  { %v1530_v61 = vadd.f32 %v1529_v32, %v1528_v40  ;;  %v1584_v2 = vsel %vm77_vm0, %v542_v47, 0.0  ;;  %v1634_v19 = vadd.f32 %v1633_v26, %v1632_v18  ;;  %v1335_v1 = vadd.f32 %v11077_v44, %v1333_v28  ;;  %v545_v44 = vld [vmem:[%s13570_s0 + $0xe78] sm:$0xff]  ;;  %v570_v24 = vld [vmem:[%s13570_s0 + $0xf40] sm:$0xff]  ;;  %v492_v39 = vld [vmem:[%s13570_s0 + $0xcd0] sm:$0xff] }
 0x110   :  { %v1533_v62 = vsel %vm77_vm0, %v519_v14, 0.0  ;;  %v1583_v42 = vadd.f32 %v1582_v57, %v1581_v34  ;;  %v1637_v56 = vsel %vm77_vm0, %v566_v27, 0.0  ;;  %v1470_v45 = vsel %vm77_vm0, %v490_v36, 0.0 }
 0x111   :  { %v1532_v22 = vadd.f32 %v1531_v49, %v1530_v61  ;;  %v1586_v17 = vsel %vm77_vm0, %v543_v4, 0.0  ;;  %v1636_v23 = vadd.f32 %v1635_v63, %v1634_v19  ;;  %v1469_v28 = vadd.f32 %v1468_v52, %v1467_v8  ;;  %v523_v4 = vld [vmem:[%s13570_s0 + $0xdc8] sm:$0xff] }
 0x112   :  { %v1535_v21 = vsel %vm77_vm0, %v520_v53, 0.0  ;;  %v1585_v14 = vadd.f32 %v1584_v2, %v1583_v42  ;;  %v1639_v47 = vsel %vm77_vm0, %v567_v48, 0.0  ;;  %v1402_v38 = vadd.f32 %v11249_v31, %v1400_v59  ;;  %v493_v53 = vld [vmem:[%s13570_s0 + $0xcd8] sm:$0xff]  ;;  %v571_v48 = vld [vmem:[%s13570_s0 + $0xf48] sm:$0xff] }
 0x113   :  { %v1534_v25 = vadd.f32 %v1533_v62, %v1532_v22  ;;  %v1588_v27 = vsel %vm77_vm0, %v544_v10, 0.0  ;;  %v1638_v32 = vadd.f32 %v1637_v56, %v1636_v23  ;;  %v1337_v60 = vadd.f32 %v11080_v12, %v1335_v1  ;;  %v547_v12 = vld [vmem:[%s13570_s0 + $0xe88] sm:$0xff]  ;;  %v548_v10 = vld [vmem:[%s13570_s0 + $0xe90] sm:$0xff]  ;;  %v549_v1 = vld [vmem:[%s13570_s0 + $0xe98] sm:$0xff] }
 0x114   :  { %v1537_v26 = vsel %vm77_vm0, %v521_v43, 0.0  ;;  %v1587_v52 = vadd.f32 %v1586_v17, %v1585_v14  ;;  %v1641_v40 = vsel %vm77_vm0, %v568_v41, 0.0  ;;  %v1472_v57 = vsel %vm77_vm0, %v491_v20, 0.0  ;;  %v524_v43 = vld [vmem:[%s13570_s0 + $0xdd0] sm:$0xff]  ;;  %v573_v22 = vld [vmem:[%s13570_s0 + $0xf58] sm:$0xff] }
 0x115   :  { %v1536_v18 = vadd.f32 %v1535_v21, %v1534_v25  ;;  %v1590_v31 = vsel %vm77_vm0, %v545_v44, 0.0  ;;  %v1640_v36 = vadd.f32 %v1639_v47, %v1638_v32  ;;  %v1471_v8 = vadd.f32 %v1470_v45, %v1469_v28  ;;  %v572_v41 = vld [vmem:[%s13570_s0 + $0xf50] sm:$0xff]  ;;  %v1752_v14 = vld [vmem:[%s13571_s1 + $0x18] sm:$0x77]  ;;  %v574_v47 = vld [vmem:[%s13570_s0 + $0xf60] sm:$0xff] }
 0x116   :  { %v1539_v49 = vsel %vm77_vm0, %v522_v15, 0.0  ;;  %v1589_v34 = vadd.f32 %v1588_v27, %v1587_v52  ;;  %v1643_v63 = vsel %vm77_vm0, %v569_v35, 0.0  ;;  %v1404_v59 = vadd.f32 %v11252_v55, %v1402_v38  ;;  %v1750_v55 = vld [vmem:[%s13571_s1 + $0x8] sm:$0x77]  ;;  %v1751_v21 = vld [vmem:[%s13571_s1 + $0x10] sm:$0x77] }
 0x117   :  { %v1538_v61 = vadd.f32 %v1537_v26, %v1536_v18  ;;  %v1592_v2 = vsel %vm77_vm0, %v546_v33, 0.0  ;;  %v1642_v19 = vadd.f32 %v1641_v40, %v1640_v36  ;;  %v1272_v62 = vadd.f32 %v10937_v30, %v11296_v58  ;;  %v550_v30 = vld [vmem:[%s13570_s0 + $0xea0] sm:$0xff]  ;;  %v11456_v27 = vld [vmem:[%s13571_s1 + $0x28] sm:$0x77]  ;;  %v525_v26 = vld [vmem:[%s13570_s0 + $0xdd8] sm:$0xff] }
 0x118   :  { %v1339_v42 = vadd.f32 %v11087_v46, %v1337_v60  ;;  %v1591_v56 = vadd.f32 %v1590_v31, %v1589_v34  ;;  %v1645_v45 = vsel %vm77_vm0, %v570_v24, 0.0  ;;  %v1474_v17 = vsel %vm77_vm0, %v492_v39, 0.0  ;;  %v11451_v25 = vld [vmem:[%s13571_s1 + $0x20] sm:$0x77]  ;;  %v552_v36 = vld [vmem:[%s13570_s0 + $0xeb0] sm:$0xff]  ;;  %v575_v34 = vld [vmem:[%s13570_s0 + $0xf68] sm:$0xff] }
 0x119   :  { %v1540_v23 = vadd.f32 %v1539_v49, %v1538_v61  ;;  %v1594_v20 = vsel %vm77_vm0, %v547_v12, 0.0  ;;  %v1644_v15 = vadd.f32 %v1643_v63, %v1642_v19  ;;  %v1473_v46 = vadd.f32 %v1472_v57, %v1471_v8  ;;  %v494_v31 = vld [vmem:[%s13570_s0 + $0xce0] sm:$0xff]  ;;  %v463_v49 = vld [vmem:[%s13570_s0 + $0xbe8] sm:$0xff]  ;;  %v576_v63 = vld [vmem:[%s13570_s0 + $0xf70] sm:$0xff] }
 0x11a   :  { %v1541_v58 = vsel %vm77_vm0, %v523_v4, 0.0  ;;  %v1593_v44 = vadd.f32 %v1592_v2, %v1591_v56  ;;  %v1647_v28 = vsel %vm77_vm0, %v571_v48, 0.0  ;;  %v1406_v33 = vadd.f32 %v11271_v9, %v1404_v59 }
 0x11b   :  { %v1476_v35 = vsel %vm77_vm0, %v493_v53, 0.0  ;;  %v1596_v24 = vsel %vm77_vm0, %v548_v10, 0.0  ;;  %v1646_v38 = vadd.f32 %v1645_v45, %v1644_v15  ;;  %v1341_v32 = vadd.f32 %v11121_v13, %v1339_v42  ;;  %v551_v13 = vld [vmem:[%s13570_s0 + $0xea8] sm:$0xff]  ;;  %v464_v15 = vld [vmem:[%s13570_s0 + $0xbf0] sm:$0xff] }
 0x11c   :  { %v1543_v39 = vsel %vm77_vm0, %v524_v43, 0.0  ;;  %v1595_v9 = vadd.f32 %v1594_v20, %v1593_v44  ;;  %v1649_v60 = vsel %vm77_vm0, %v572_v41, 0.0  ;;  %v1542_v52 = vadd.f32 %v1541_v58, %v1540_v23 }
 0x11d   :  { %v1598_v40 = vsel %vm77_vm0, %v549_v1, 0.0  ;;  %v1648_v57 = vadd.f32 %v1647_v28, %v1646_v38  ;;  %v1850_v18 = vcombine.high %v1750_v55, %v1750_v55  ;;  %v1475_v53 = vadd.f32 %v1474_v17, %v1473_v46  ;;  %v578_v46 = vld [vmem:[%s13570_s0 + $0xf80] sm:$0xff] }
 0x11e   :  { %v1597_v4 = vadd.f32 %v1596_v24, %v1595_v9  ;;  %v1651_v12 = vsel %vm77_vm0, %v573_v22, 0.0  ;;  %v1851_v8 = vcombine.high %v1751_v21, %v1751_v21  ;;  %v1408_v43 = vadd.f32 %v11289_v7, %v1406_v33  ;;  %v526_v7 = vld [vmem:[%s13570_s0 + $0xde0] sm:$0xff]  ;;  %v553_v22 = vld [vmem:[%s13570_s0 + $0xeb8] sm:$0xff] }
 0x11f   :  { %v1600_v10 = vsel %vm77_vm0, %v550_v30, 0.0  ;;  %v1650_v48 = vadd.f32 %v1649_v60, %v1648_v57  ;;  %7584 = vmatprep.subr.msk.mxu1 %vm1863_vm1, %v1850_v18  ;;  %v1852_v41 = vcombine.high %v1752_v14, %v1752_v14  ;;  %v1653_v61 = vsel %vm77_vm0, %v574_v47, 0.0  ;;  %v577_v30 = vld [vmem:[%s13570_s0 + $0xf78] sm:$0xff]  ;;  %v556_v60 = vld [vmem:[%s13570_s0 + $0xed0] sm:$0xff]  ;;  %v579_v18 = vld [vmem:[%s13570_s0 + $0xf88] sm:$0xff] }
 0x120   :  { %v1599_v59 = vadd.f32 %v1598_v40, %v1597_v4  ;;  %7585 = vmatpush1.msk.msra.mxu1 %vm1863_vm1, %v1750_v55  ;;  %7588 = vmatprep.subr.msk.mxu0 %vm1863_vm1, %v1851_v8  ;;  %v1853_v2 = vcombine.high %v11451_v25, %v11451_v25  ;;  %v1854_v19 = vcombine.high %v11456_v27, %v11456_v27  ;;  %v1602_v56 = vsel %vm77_vm0, %v551_v13, 0.0  ;;  %v495_v55 = vld [vmem:[%s13570_s0 + $0xce8] sm:$0xff]  ;;  %v465_v57 = vld [vmem:[%s13570_s0 + $0xbf8] sm:$0xff] }
 0x121   :  { %v1274_v1 = vadd.f32 %v10950_v50, %v1272_v62  ;;  %v1544_v42 = vadd.f32 %v1543_v39, %v1542_v52  ;;  %v1652_v45 = vadd.f32 %v1651_v12, %v1650_v48  ;;  %7586 = vmatmul.mubr.msk.f32.vlgmr.msra.gmra.mrb[0].mxu1 %vm77_vm0, %v10743_v29  ;;  %7589 = vmatpush1.msk.msra.mxu0 %vm1863_vm1, %v1751_v21  ;;  %v554_v50 = vld [vmem:[%s13570_s0 + $0xec0] sm:$0xff]  ;;  %v1545_v17 = vsel %vm77_vm0, %v525_v26, 0.0  ;;  %v557_v12 = vld [vmem:[%s13570_s0 + $0xed8] sm:$0xff] }
 0x122   :  { %v1477_v62 = vadd.f32 %v1476_v35, %v1475_v53  ;;  %v1601_v23 = vadd.f32 %v1600_v10, %v1599_v59  ;;  %v1655_v20 = vsel %vm77_vm0, %v575_v34, 0.0  ;;  %2043 = vmatprep.mubr.f32.mxu1 %v9199_v0  ;;  %7592 = vmatprep.subr.msk.mxu1 %vm1863_vm1, %v1852_v41  ;;  %v1410_v58 = vadd.f32 %v11292_v11, %v1408_v43  ;;  %v527_v11 = vld [vmem:[%s13570_s0 + $0xde8] sm:$0xff]  ;;  %v528_v43 = vld [vmem:[%s13570_s0 + $0xdf0] sm:$0xff] }
 0x123   :  { %v1478_v44 = vsel %vm77_vm0, %v494_v31, 0.0  ;;  %v1604_v28 = vsel %vm77_vm0, %v552_v36, 0.0  ;;  %v1654_v21 = vadd.f32 %v1653_v61, %v1652_v45  ;;  %7593 = vmatpush1.msk.msra.mxu1 %vm1863_vm1, %v1752_v14  ;;  %7596 = vmatprep.subr.msk.mxu0 %vm1863_vm1, %v1853_v2  ;;  %v1343_v47 = vadd.f32 %v11124_v51, %v1341_v32  ;;  %v496_v51 = vld [vmem:[%s13570_s0 + $0xcf0] sm:$0xff]  ;;  %v555_v32 = vld [vmem:[%s13570_s0 + $0xec8] sm:$0xff]  ;;  %v497_v61 = vld [vmem:[%s13570_s0 + $0xcf8] sm:$0xff] }
 0x124   :  { %v1411_v33 = vsel %vm77_vm0, %v463_v49, 0.0  ;;  %v1603_v35 = vadd.f32 %v1602_v56, %v1601_v23  ;;  %v1657_v24 = vsel %vm77_vm0, %v576_v63, 0.0  ;;  %7600 = vmatprep.subr.msk.mxu1 %vm1863_vm1, %v1854_v19  ;;  %v1276_v38 = vadd.f32 %v10960_v37, %v1274_v1  ;;  %v580_v31 = vld [vmem:[%s13570_s0 + $0xf90] sm:$0xff]  ;;  %v581_v2 = vld [vmem:[%s13570_s0 + $0xf98] sm:$0xff] }
 0x125   :  { %v1546_v39 = vadd.f32 %v1545_v17, %v1544_v42  ;;  %v1606_v14 = vsel %vm77_vm0, %v553_v22, 0.0  ;;  %v1656_v9 = vadd.f32 %v1655_v20, %v1654_v21  ;;  %v1479_v26 = vadd.f32 %v1478_v44, %v1477_v62  ;;  %v582_v42 = vld [vmem:[%s13570_s0 + $0xfa0] sm:$0xff] }
 0x126   :  { %v1547_v52 = vsel %vm77_vm0, %v526_v7, 0.0  ;;  %v1605_v37 = vadd.f32 %v1604_v28, %v1603_v35  ;;  %v1659_v40 = vsel %vm77_vm0, %v577_v30, 0.0  ;;  %v1412_v13 = vadd.f32 %v1411_v33, %v1410_v58  ;;  %v583_v30 = vld [vmem:[%s13570_s0 + $0xfa8] sm:$0xff] }
 0x127   :  { %v1480_v36 = vsel %vm77_vm0, %v495_v55, 0.0  ;;  %v1608_v53 = vsel %vm77_vm0, %v554_v50, 0.0  ;;  %v1658_v4 = vadd.f32 %v1657_v24, %v1656_v9  ;;  %v1345_v8 = vadd.f32 %v11134_v3, %v1343_v47  ;;  %v558_v3 = vld [vmem:[%s13570_s0 + $0xee0] sm:$0xff]  ;;  %v559_v50 = vld [vmem:[%s13570_s0 + $0xee8] sm:$0xff]  ;;  %v584_v9 = vld [vmem:[%s13570_s0 + $0xfb0] sm:$0xff] }
 0x128   :  { %v1413_v49 = vsel %vm77_vm0, %v464_v15, 0.0  ;;  %v1607_v34 = vadd.f32 %v1606_v14, %v1605_v37  ;;  %v1661_v63 = vsel %vm77_vm0, %v578_v46, 0.0  ;;  %v1278_v10 = vadd.f32 %v10963_v54, %v1276_v38  ;;  %v529_v15 = vld [vmem:[%s13570_s0 + $0xdf8] sm:$0xff] }
 0x129   :  { %v1548_v48 = vadd.f32 %v1547_v52, %v1546_v39  ;;  %v1610_v41 = vsel %vm77_vm0, %v555_v32, 0.0  ;;  %v1660_v59 = vadd.f32 %v1659_v40, %v1658_v4  ;;  %v1481_v19 = vadd.f32 %v1480_v36, %v1479_v26  ;;  %v560_v39 = vld [vmem:[%s13570_s0 + $0xef0] sm:$0xff]  ;;  %v561_v14 = vld [vmem:[%s13570_s0 + $0xef8] sm:$0xff] }
 0x12a   :  { %v1549_v7 = vsel %vm77_vm0, %v527_v11, 0.0  ;;  %v1609_v54 = vadd.f32 %v1608_v53, %v1607_v34  ;;  %v1663_v1 = vsel %vm77_vm0, %v579_v18, 0.0  ;;  %v1414_v56 = vadd.f32 %v1413_v49, %v1412_v13  ;;  %v585_v52 = vld [vmem:[%s13570_s0 + $0xfb8] sm:$0xff] }
 0x12b   :  { %v1482_v45 = vsel %vm77_vm0, %v496_v51, 0.0  ;;  %v1612_v55 = vsel %vm77_vm0, %v556_v60, 0.0  ;;  %v1662_v22 = vadd.f32 %v1661_v63, %v1660_v59  ;;  %v1347_v62 = vadd.f32 %v11154_v6, %v1345_v8 }
 0x12c   :  { %v1415_v17 = vsel %vm77_vm0, %v465_v57, 0.0  ;;  %v1611_v23 = vadd.f32 %v1610_v41, %v1609_v54  ;;  %v1665_v20 = vsel %vm77_vm0, %v580_v31, 0.0  ;;  %v1279_v46 = vrot.slane %v1278_v10, 4 }
 0x12d   :  { %v1550_v58 = vadd.f32 %v1549_v7, %v1548_v48  ;;  %v1614_v44 = vsel %vm77_vm0, %v557_v12, 0.0  ;;  %v1664_v28 = vadd.f32 %v1663_v1, %v1662_v22  ;;  %v1483_v21 = vadd.f32 %v1482_v45, %v1481_v19  ;;  %v588_v19 = vld [vmem:[%s13570_s0 + $0xfd0] sm:$0xff]  ;;  %v589_v45 = vld [vmem:[%s13570_s0 + $0xfd8] sm:$0xff] }
 0x12e   :  { %v1551_v6 = vsel %vm77_vm0, %v528_v43, 0.0  ;;  %v1613_v47 = vadd.f32 %v1612_v55, %v1611_v23  ;;  %v1667_v33 = vsel %vm77_vm0, %v581_v2, 0.0  ;;  %v1416_v35 = vadd.f32 %v1415_v17, %v1414_v56  ;;  %v587_v43 = vld [vmem:[%s13570_s0 + $0xfc8] sm:$0xff] }
 0x12f   :  { %v1484_v24 = vsel %vm77_vm0, %v497_v61, 0.0  ;;  %v1616_v11 = vsel %vm77_vm0, %v558_v3, 0.0  ;;  %v1666_v38 = vadd.f32 %v1665_v20, %v1664_v28  ;;  %v1211_v51 = vadd.f32 %v1210_v16, %v11141_v5  ;;  %v586_v5 = vld [vmem:[%s13570_s0 + $0xfc0] sm:$0xff]  ;;  %v591_v28 = vld [vmem:[%s13570_s0 + $0xfe8] sm:$0xff] }
 0x130   :  { %v1348_v32 = vrot.slane %v1347_v62, 4  ;;  %v1615_v60 = vadd.f32 %v1614_v44, %v1613_v47  ;;  %v1669_v26 = vsel %vm77_vm0, %v582_v42, 0.0  ;;  %v1280_v37 = vadd.f32 %v1279_v46, %v1278_v10  ;;  %v590_v20 = vld [vmem:[%s13570_s0 + $0xfe0] sm:$0xff] }
 0x131   :  { %v1552_v40 = vadd.f32 %v1551_v6, %v1550_v58  ;;  %v1618_v57 = vsel %vm77_vm0, %v559_v50, 0.0  ;;  %v1668_v18 = vadd.f32 %v1667_v33, %v1666_v38  ;;  %v1485_v31 = vadd.f32 %v1484_v24, %v1483_v21 }
 0x132   :  { %v1553_v13 = vsel %vm77_vm0, %v529_v15, 0.0  ;;  %v1617_v36 = vadd.f32 %v1616_v11, %v1615_v60  ;;  %v1671_v53 = vsel %vm77_vm0, %v583_v30, 0.0  ;;  %v1417_v16 = vrot.slane %v1416_v35, 4  ;;  %v592_v11 = vld [vmem:[%s13570_s0 + $0xff0] sm:$0xff] }
 0x133   :  { %v1620_v4 = vsel %vm77_vm0, %v560_v39, 0.0  ;;  %v1670_v12 = vadd.f32 %v1669_v26, %v1668_v18  ;;  %v1212_v8 = vrot.slane %v1211_v51, 2  ;;  %v1349_v49 = vadd.f32 %v1348_v32, %v1347_v62  ;;  %v593_v32 = vld [vmem:[%s13570_s0 + $0xff8] sm:$0xff] }
 0x134   :  { %v1619_v34 = vadd.f32 %v1618_v57, %v1617_v36  ;;  %v1673_v63 = vsel %vm77_vm0, %v584_v9, 0.0  ;;  %v1281_v10 = vrot.slane %v1280_v37, 2  ;;  %v1554_v48 = vadd.f32 %v1553_v13, %v1552_v40 }
 0x135   :  { %v1622_v41 = vsel %vm77_vm0, %v561_v14, 0.0  ;;  %v1672_v59 = vadd.f32 %v1671_v53, %v1670_v12  ;;  %v1486_v61 = vrot.slane %v1485_v31, 4  ;;  %v1675_v2 = vsel %vm77_vm0, %v585_v52, 0.0 }
 0x136   :  { %v1621_v3 = vadd.f32 %v1620_v4, %v1619_v34  ;;  %v1418_v7 = vadd.f32 %v1417_v16, %v1416_v35  ;;  %v1350_v1 = vrot.slane %v1349_v49, 2  ;;  %v1677_v56 = vsel %vm77_vm0, %v586_v5, 0.0 }
 0x137   :  { %v1674_v54 = vadd.f32 %v1673_v63, %v1672_v59  ;;  %v1213_v55 = vadd.f32 %v1212_v8, %v1211_v51  ;;  %v1282_v22 = vadd.f32 %v1281_v10, %v1280_v37  ;;  %v1555_v50 = vrot.slane %v1554_v48, 4 }
 0x138   :  { %v1623_v42 = vadd.f32 %v1622_v41, %v1621_v3  ;;  %v1487_v17 = vadd.f32 %v1486_v61, %v1485_v31  ;;  %v1679_v23 = vsel %vm77_vm0, %v587_v43, 0.0  ;;  %v1419_v15 = vrot.slane %v1418_v7, 2 }
 0x139   :  { %v1676_v62 = vadd.f32 %v1675_v2, %v1674_v54  ;;  %v1351_v46 = vadd.f32 %v1350_v1, %v1349_v49  ;;  %v1681_v44 = vsel %vm77_vm0, %v588_v19, 0.0  ;;  %v1214_v21 = vrot.slane %v1213_v55, 1 }
 0x13a   :  { %v1624_v58 = vrot.slane %v1623_v42, 4  ;;  %v1283_v6 = vrot.slane %v1282_v22, 1  ;;  %v1556_v47 = vadd.f32 %v1555_v50, %v1554_v48  ;;  %v1488_v35 = vrot.slane %v1487_v17, 2 }
 0x13b   :  { %v1678_v30 = vadd.f32 %v1677_v56, %v1676_v62  ;;  %v1683_v24 = vsel %vm77_vm0, %v589_v45, 0.0  ;;  %v1420_v38 = vadd.f32 %v1419_v15, %v1418_v7  ;;  %v1352_v14 = vrot.slane %v1351_v46, 1  ;;  %v81_v45 = vld [vmem:[#allocation2 + $0x8] sm:$0xff]  ;;  %v1755_v15 = vld [vmem:[%s13571_s1 + $0x30] sm:$0x77] }
 0x13c   :  { %v1625_v9 = vadd.f32 %v1624_v58, %v1623_v42  ;;  %v1685_v51 = vsel %vm77_vm0, %v590_v20, 0.0  ;;  %v1215_v60 = vadd.f32 %v1214_v21, %v1213_v55  ;;  %v1284_v26 = vadd.f32 %v1283_v6, %v1282_v22  ;;  %v8353_v21 = vld [vmem:[%s13575_s5 + $0x24] ss:$16 sps:$4 sm:$0xff]   ;;  %v8356_v6 = vld [vmem:[%s13575_s5 + $0x2c] ss:$16 sps:$4 sm:$0xff]  }
 0x13d   :  { %v1680_v33 = vadd.f32 %v1679_v23, %v1678_v30  ;;  %v1557_v52 = vrot.slane %v1556_v47, 2  ;;  %v1489_v40 = vadd.f32 %v1488_v35, %v1487_v17  ;;  %v1687_v57 = vsel %vm77_vm0, %v591_v28, 0.0  ;;  %v1756_v30 = vld [vmem:[%s13571_s1 + $0x38] sm:$0x77]  ;;  %v8359_v35 = vld [vmem:[%s13575_s5 + $0x44] ss:$16 sps:$4 sm:$0xff]  }
 0x13e   :  { %v1421_v18 = vrot.slane %v1420_v38, 1  ;;  %v1353_v13 = vadd.f32 %v1352_v14, %v1351_v46  ;;  %v1626_v36 = vrot.slane %v1625_v9, 2  ;;  %v1689_v53 = vsel %vm77_vm0, %v592_v11, 0.0  ;;  %v8348_v28 = vld [vmem:[%s13575_s5 + $0x8] ss:$16 sps:$4 sm:$0xff]  }
 0x13f   :  { %v1682_v39 = vadd.f32 %v1681_v44, %v1680_v33  ;;  %v1558_v5 = vadd.f32 %v1557_v52, %v1556_v47  ;;  %v1729_v4 = vsel %vm1715_vm2, %v1284_v26, %v1215_v60  ;;  %v1490_v12 = vrot.slane %v1489_v40, 1  ;;  %v8347_v44 = vld [vmem:[%s13575_s5 + $0x4] ss:$16 sps:$4 sm:$0xff]   ;;  %v8351_v47 = vld [vmem:[%s13575_s5 + $0x20] ss:$16 sps:$4 sm:$0xff]  }
 0x140   :  { %v1691_v8 = vsel %vm77_vm0, %v593_v32, 0.0  ;;  %v1422_v49 = vadd.f32 %v1421_v18, %v1420_v38  ;;  %v1627_v63 = vadd.f32 %v1626_v36, %v1625_v9  ;;  %v1730_v43 = vsel %vm1717_vm3, %v1353_v13, %v1729_v4  ;;  %v8354_v33 = vld [vmem:[%s13575_s5 + $0x28] ss:$16 sps:$4 sm:$0xff]   ;;  %v8365_v11 = vld [vmem:[%s13575_s5 + $0x64] ss:$16 sps:$4 sm:$0xff]  }
 0x141   :  { %v1684_v37 = vadd.f32 %v1683_v24, %v1682_v39  ;;  %v1559_v10 = vrot.slane %v1558_v5, 1  ;;  %v1491_v41 = vadd.f32 %v1490_v12, %v1489_v40  ;;  %v1855_v46 = vcombine.high %v1755_v15, %v1755_v15  ;;  %v8360_v24 = vld [vmem:[%s13575_s5 + $0x48] ss:$16 sps:$4 sm:$0xff]   ;;  %v8368_v38 = vld [vmem:[%s13575_s5 + $0x6c] ss:$16 sps:$4 sm:$0xff]  }
 0x142   :  { %v1731_v61 = vsel %vm1719_vm4, %v1422_v49, %v1730_v43  ;;  %v1628_v3 = vrot.slane %v1627_v63, 1  ;;  %v1856_v58 = vcombine.high %v1756_v30, %v1756_v30  ;;  %v8363_v39 = vld [vmem:[%s13575_s5 + $0x60] ss:$16 sps:$4 sm:$0xff]   ;;  %v8366_v14 = vld [vmem:[%s13575_s5 + $0x68] ss:$16 sps:$4 sm:$0xff]  }
 0x143   :  { %v1686_v31 = vadd.f32 %v1685_v51, %v1684_v37  ;;  %v1560_v2 = vadd.f32 %v1559_v10, %v1558_v5  ;;  %v1732_v7 = vsel %vm1721_vm5, %v1491_v41, %v1731_v61  ;;  %v8371_v9 = vld [vmem:[%s13575_s5 + $0x84] ss:$16 sps:$4 sm:$0xff]   ;;  %v8374_v51 = vld [vmem:[%s13575_s5 + $0x8c] ss:$16 sps:$4 sm:$0xff]   ;;  %v8369_v32 = vld [vmem:[%s13575_s5 + $0x80] ss:$16 sps:$4 sm:$0xff]  }
 0x144   :  { %v1629_v1 = vadd.f32 %v1628_v3, %v1627_v63  ;;  %v8372_v60 = vld [vmem:[%s13575_s5 + $0x88] ss:$16 sps:$4 sm:$0xff]   ;;  %v8377_v26 = vld [vmem:[%s13575_s5 + $0xa4] ss:$16 sps:$4 sm:$0xff]   ;;  %v8380_v52 = vld [vmem:[%s13575_s5 + $0xac] ss:$16 sps:$4 sm:$0xff]  }
 0x145   :  { %v1688_v16 = vadd.f32 %v1687_v57, %v1686_v31  ;;  %v1733_v56 = vsel %vm1723_vm6, %v1560_v2, %v1732_v7  ;;  %v8375_v37 = vld [vmem:[%s13575_s5 + $0xa0] ss:$16 sps:$4 sm:$0xff]   ;;  %v8378_v40 = vld [vmem:[%s13575_s5 + $0xa8] ss:$16 sps:$4 sm:$0xff]   ;;  %v8383_v57 = vld [vmem:[%s13575_s5 + $0xc4] ss:$16 sps:$4 sm:$0xff]  }
 0x146   :  { %v1734_v22 = vsel %vm1725_vm7, %v1629_v1, %v1733_v56  ;;  %v8386_v18 = vld [vmem:[%s13575_s5 + $0xcc] ss:$16 sps:$4 sm:$0xff]   ;;  %v8381_v31 = vld [vmem:[%s13575_s5 + $0xc0] ss:$16 sps:$4 sm:$0xff]   ;;  %v8384_v13 = vld [vmem:[%s13575_s5 + $0xc8] ss:$16 sps:$4 sm:$0xff]  }
 0x147   :  { %v1690_v34 = vadd.f32 %v1689_v53, %v1688_v16  ;;  %v8389_v36 = vld [vmem:[%s13575_s5 + $0xe4] ss:$16 sps:$4 sm:$0xff]   ;;  %v8392_v53 = vld [vmem:[%s13575_s5 + $0xec] ss:$16 sps:$4 sm:$0xff]   ;;  %v8387_v5 = vld [vmem:[%s13575_s5 + $0xe0] ss:$16 sps:$4 sm:$0xff]  }
 0x148   :  { %v8390_v16 = vld [vmem:[%s13575_s5 + $0xe8] ss:$16 sps:$4 sm:$0xff]   ;;  %v8395_v4 = vld [vmem:[%s13575_s5 + $0x104] ss:$16 sps:$4 sm:$0xff]   ;;  %v8398_v12 = vld [vmem:[%s13575_s5 + $0x10c] ss:$16 sps:$4 sm:$0xff]  }
 0x149   :  { %v1692_v48 = vadd.f32 %v1691_v8, %v1690_v34  ;;  %v8393_v8 = vld [vmem:[%s13575_s5 + $0x100] ss:$16 sps:$4 sm:$0xff]   ;;  %v8396_v49 = vld [vmem:[%s13575_s5 + $0x108] ss:$16 sps:$4 sm:$0xff]   ;;  %v8401_v34 = vld [vmem:[%s13575_s5 + $0x124] ss:$16 sps:$4 sm:$0xff]  }
 0x14a   :  { %v8404_v63 = vld [vmem:[%s13575_s5 + $0x12c] ss:$16 sps:$4 sm:$0xff]   ;;  %v8399_v43 = vld [vmem:[%s13575_s5 + $0x120] ss:$16 sps:$4 sm:$0xff]   ;;  %v8402_v10 = vld [vmem:[%s13575_s5 + $0x128] ss:$16 sps:$4 sm:$0xff]  }
 0x14b   :  { %v1693_v59 = vrot.slane %v1692_v48, 4  ;;  %v8410_v41 = vld [vmem:[%s13575_s5 + $0x14c] ss:$16 sps:$4 sm:$0xff]   ;;  %v8408_v61 = vld [vmem:[%s13575_s5 + $0x148] ss:$16 sps:$4 sm:$0xff]  }
 0x14c   :  { %v8413_v3 = vld [vmem:[%s13575_s5 + $0x164] ss:$16 sps:$4 sm:$0xff]   ;;  %v8416_v2 = vld [vmem:[%s13575_s5 + $0x16c] ss:$16 sps:$4 sm:$0xff]   ;;  %v8414_v7 = vld [vmem:[%s13575_s5 + $0x168] ss:$16 sps:$4 sm:$0xff]  }
 0x14d   :  { %v1694_v19 = vadd.f32 %v1693_v59, %v1692_v48  ;;  %v8407_v48 = vld [vmem:[%s13575_s5 + $0x144] ss:$16 sps:$4 sm:$0xff]   ;;  %v8405_v59 = vld [vmem:[%s13575_s5 + $0x140] ss:$16 sps:$4 sm:$0xff]   ;;  %v8422_v1 = vld [vmem:[%s13575_s5 + $0x18c] ss:$16 sps:$4 sm:$0xff]  }
 0x14e   :  { %v8420_v56 = vld [vmem:[%s13575_s5 + $0x188] ss:$16 sps:$4 sm:$0xff]  }
 0x14f   :  { %v1695_v54 = vrot.slane %v1694_v19, 2 }
 0x151   :  { %v1696_v42 = vadd.f32 %v1695_v54, %v1694_v19  ;;  %v8411_v19 = vld [vmem:[%s13575_s5 + $0x160] ss:$16 sps:$4 sm:$0xff]   ;;  %v8419_v54 = vld [vmem:[%s13575_s5 + $0x184] ss:$16 sps:$4 sm:$0xff]  }
 0x153   :  { %v1697_v55 = vrot.slane %v1696_v42, 1 }
 0x155   :  { %v1698_v50 = vadd.f32 %v1697_v55, %v1696_v42  ;;  %v8417_v42 = vld [vmem:[%s13575_s5 + $0x180] ss:$16 sps:$4 sm:$0xff]   ;;  %v8428_v55 = vld [vmem:[%s13575_s5 + $0x1ac] ss:$16 sps:$4 sm:$0xff]  }
 0x157   :  { %v1735_v62 = vsel %vm1727_vm8, %v1698_v50, %v1734_v22  ;;  %v8423_v50 = vld [vmem:[%s13575_s5 + $0x1a0] ss:$16 sps:$4 sm:$0xff]  }
 0x158   :  { %v1739_v17 = vadd.f32 %v1735_v62, %v81_v45  ;;  %v8425_v45 = vld [vmem:[%s13575_s5 + $0x1a4] ss:$16 sps:$4 sm:$0xff]   ;;  %v8426_v62 = vld [vmem:[%s13575_s5 + $0x1a8] ss:$16 sps:$4 sm:$0xff]  }
 0x15a   :  { %1741 = vst.msk [vmem:[#allocation2 + $0x8] sm:$0xff] %vm77_vm0, %v1739_v17 }
 0x161   :  { %v1746_v23 = vld [vmem:[#allocation2 + $0x8] sm:$0xff] }
 0x162   :  { %v1748_v20 = vmul.f32 0.00390625, %v1746_v23  ;;  %v8431_v23 = vld [vmem:[%s13575_s5 + $0x1c4] ss:$16 sps:$4 sm:$0xff]  }
 0x164   :  { %7583 = vmatmul.mubr.msk.f32.gmra.mrb[2].mxu0 %vm77_vm0, %v1748_v20  ;;  %7587 = vmatmul.mubr.msk.f32.gmra.mrb[2].mxu1 %vm77_vm0, %v1748_v20 }
 0x165   :  { %2114 = vmatprep.mubr.f32.mxu0 %v9199_v0  ;;  %2191 = vmatprep.mubr.f32.mxu1 %v9199_v0 }
 0x168   :  { %7590 = vmatmul.mubr.msk.f32.vlgmr.msra.gmra.mrb[4].mxu0 %vm77_vm0, %v10743_v29  ;;  %7594 = vmatmul.mubr.msk.f32.vlgmr.msra.gmra.mrb[4].mxu1 %vm77_vm0, %v10743_v29 }
 0x169   :  { %2120 = vmatprep.mubr.f32.mxu0 %v9199_v0  ;;  %2197 = vmatprep.mubr.f32.mxu1 %v9199_v0 }
 0x16a   :  { %7597 = vmatpush1.msk.msra.mxu0 %vm1863_vm1, %v11451_v25  ;;  %7601 = vmatpush1.msk.msra.mxu1 %vm1863_vm1, %v11456_v27  ;;  %v8350_v25 = vld [vmem:[%s13575_s5 + $0xc] ss:$16 sps:$4 sm:$0xff]   ;;  %v8345_v27 = vld [vmem:[%s13575_s5] ss:$16 sps:$4 sm:$0xff]  }
 0x16b   :  { %7604 = vmatprep.subr.msk.mxu0 %vm1863_vm1, %v1855_v46  ;;  %7608 = vmatprep.subr.msk.mxu1 %vm1863_vm1, %v1856_v58  ;;  %v8437_v46 = vld [vmem:[%s13575_s5 + $0x1e4] ss:$16 sps:$4 sm:$0xff]   ;;  %v8440_v58 = vld [vmem:[%s13575_s5 + $0x1ec] ss:$16 sps:$4 sm:$0xff]  }
 0x16c   :  { %7591 = vmatmul.mubr.msk.f32.gmra.mrb[6].mxu0 %vm77_vm0, %v1748_v20  ;;  %7595 = vmatmul.mubr.msk.f32.gmra.mrb[6].mxu1 %vm77_vm0, %v1748_v20 }
 0x16d   :  { %2268 = vmatprep.mubr.f32.mxu0 %v9199_v0  ;;  %2345 = vmatprep.mubr.f32.mxu1 %v9199_v0 }
 0x170   :  { %7598 = vmatmul.mubr.msk.f32.vlgmr.msra.gmra.mrb[8].mxu0 %vm77_vm0, %v10743_v29  ;;  %7602 = vmatmul.mubr.msk.f32.vlgmr.msra.gmra.mrb[8].mxu1 %vm77_vm0, %v10743_v29 }
 0x171   :  { %2274 = vmatprep.mubr.f32.mxu0 %v9199_v0  ;;  %2351 = vmatprep.mubr.f32.mxu1 %v9199_v0 }
 0x172   :  { %7605 = vmatpush1.msk.msra.mxu0 %vm1863_vm1, %v1755_v15  ;;  %7609 = vmatpush1.msk.msra.mxu1 %vm1863_vm1, %v1756_v30  ;;  %v8429_v15 = vld [vmem:[%s13575_s5 + $0x1c0] ss:$16 sps:$4 sm:$0xff]   ;;  %v8432_v30 = vld [vmem:[%s13575_s5 + $0x1c8] ss:$16 sps:$4 sm:$0xff]  }
 0x173   :  { %5854 = vmatprep.subr.bf16.mxu0 %v8347_v44  ;;  %6198 = vmatprep.subr.bf16.mxu1 %v8350_v25  ;;  %v8435_v44 = vld [vmem:[%s13575_s5 + $0x1e0] ss:$16 sps:$4 sm:$0xff]   ;;  %v8438_v25 = vld [vmem:[%s13575_s5 + $0x1e8] ss:$16 sps:$4 sm:$0xff]  }
 0x174   :  { %7599 = vmatmul.mubr.msk.f32.gmra.mrb[10].mxu0 %vm77_vm0, %v1748_v20  ;;  %7603 = vmatmul.mubr.msk.f32.gmra.mrb[10].mxu1 %vm77_vm0, %v1748_v20 }
 0x175   :  { %2422 = vmatprep.mubr.f32.mxu0 %v9199_v0  ;;  %2499 = vmatprep.mubr.f32.mxu1 %v9199_v0 }
 0x178   :  { %7606 = vmatmul.mubr.msk.f32.vlgmr.msra.gmra.mrb[12].mxu0 %vm77_vm0, %v10743_v29  ;;  %7610 = vmatmul.mubr.msk.f32.vlgmr.msra.gmra.mrb[12].mxu1 %vm77_vm0, %v10743_v29  ;;  %v8362_v29 = vld [vmem:[%s13575_s5 + $0x4c] ss:$16 sps:$4 sm:$0xff]  }
 0x179   :  { %2428 = vmatprep.mubr.f32.mxu0 %v9199_v0  ;;  %2505 = vmatprep.mubr.f32.mxu1 %v9199_v0  ;;  %v8357_v0 = vld [vmem:[%s13575_s5 + $0x40] ss:$16 sps:$4 sm:$0xff]  }
 0x17a   :  { %5855 = vmatpush1.bf16.msra.mxu0 %v8345_v27  ;;  %6199 = vmatpush1.bf16.msra.mxu1 %v8348_v28  ;;  %v8443_v27 = vld [vmem:[%s13575_s5 + $0x204] ss:$16 sps:$4 sm:$0xff]   ;;  %v8446_v28 = vld [vmem:[%s13575_s5 + $0x20c] ss:$16 sps:$4 sm:$0xff]  }
 0x17b   :  { %5856 = vmatprep.subr.bf16.mxu0 %v8353_v21  ;;  %6200 = vmatprep.subr.bf16.mxu1 %v8356_v6 }
 0x17c   :  { %7607 = vmatmul.mubr.msk.f32.gmra.mrb[14].mxu0 %vm77_vm0, %v1748_v20  ;;  %7611 = vmatmul.mubr.msk.f32.gmra.mrb[14].mxu1 %vm77_vm0, %v1748_v20  ;;  %v8434_v20 = vld [vmem:[%s13575_s5 + $0x1cc] ss:$16 sps:$4 sm:$0xff]  }
 0x17e   :  { %5857 = vmatpush1.bf16.msra.mxu0 %v8351_v47  ;;  %6201 = vmatpush1.bf16.msra.mxu1 %v8354_v33  ;;  %v1761_v47 = vlaneseq }
 0x17f   :  { %5858 = vmatprep.subr.bf16.mxu0 %v8359_v35  ;;  %6202 = vmatprep.subr.bf16.mxu1 %v8362_v29 }
 0x180   :  { %v11911_v33 = vshrl.u32 %v1761_v47, 7  ;;  %v8441_v47 = vld [vmem:[%s13575_s5 + $0x200] ss:$16 sps:$4 sm:$0xff]  }
 0x182   :  { %5859 = vmatpush1.bf16.msra.mxu0 %v8357_v0  ;;  %6203 = vmatpush1.bf16.msra.mxu1 %v8360_v24  ;;  %v11914_v35 = vsub.s32 2, %v11911_v33  ;;  %v11917_v29 = vsub.s32 3, %v11911_v33  ;;  %v11920_v0 = vsub.s32 0, %v11911_v33  ;;  %v11925_v24 = vld [vmem:[%s13572_s2] sm:$0xff] }
 0x183   :  { %5860 = vmatprep.subr.bf16.mxu0 %v8365_v11  ;;  %6204 = vmatprep.subr.bf16.mxu1 %v8368_v38  ;;  %v11928_v11 = vsub.s32 1, %v11911_v33 }
 0x184   :  { %v1772_v38 = vrot.slane %v11925_v24, %v11914_v35 }
 0x186   :  { %5861 = vmatpush1.bf16.msra.mxu0 %v8363_v39  ;;  %6205 = vmatpush1.bf16.msra.mxu1 %v8366_v14  ;;  %v1776_v39 = vrot.slane %v11925_v24, %v11917_v29  ;;  %v1764_v14 = vrot.slane %v11925_v24, %v11920_v0 }
 0x187   :  { %5862 = vmatprep.subr.bf16.mxu0 %v8371_v9  ;;  %6206 = vmatprep.subr.bf16.mxu1 %v8374_v51  ;;  %v11939_v9 = vld [vmem:[%s13573_s3] sm:$0xff]  ;;  %v1768_v51 = vrot.slane %v11925_v24, %v11928_v11 }
 0x18a   :  { %5863 = vmatpush1.bf16.msra.mxu0 %v8369_v32  ;;  %6207 = vmatpush1.bf16.msra.mxu1 %v8372_v60  ;;  %v2527_v60 = vrot.slane %v11939_v9, %v11914_v35 }
 0x18b   :  { %5864 = vmatprep.subr.bf16.mxu0 %v8377_v26  ;;  %6208 = vmatprep.subr.bf16.mxu1 %v8380_v52  ;;  %v2531_v52 = vrot.slane %v11939_v9, %v11917_v29 }
 0x18e   :  { %5865 = vmatpush1.bf16.msra.mxu0 %v8375_v37  ;;  %6209 = vmatpush1.bf16.msra.mxu1 %v8378_v40  ;;  %v2519_v40 = vrot.slane %v11939_v9, %v11920_v0 }
 0x18f   :  { %5866 = vmatprep.subr.bf16.mxu0 %v8383_v57  ;;  %6210 = vmatprep.subr.bf16.mxu1 %v8386_v18  ;;  %v11952_v57 = vld [vmem:[%s13574_s4] sm:$0xff]  ;;  %v11955_v18 = vsub.s32 4, %v11911_v33 }
 0x192   :  { %5867 = vmatpush1.bf16.msra.mxu0 %v8381_v31  ;;  %6211 = vmatpush1.bf16.msra.mxu1 %v8384_v13  ;;  %v2523_v13 = vrot.slane %v11939_v9, %v11928_v11 }
 0x193   :  { %5868 = vmatprep.subr.bf16.mxu0 %v8389_v36  ;;  %6212 = vmatprep.subr.bf16.mxu1 %v8392_v53  ;;  %v11960_v36 = vsub.s32 5, %v11911_v33 }
 0x196   :  { %5869 = vmatpush1.bf16.msra.mxu0 %v8387_v5  ;;  %6213 = vmatpush1.bf16.msra.mxu1 %v8390_v16  ;;  %v2643_v5 = vrot.slane %v11952_v57, %v11914_v35  ;;  %v2635_v16 = vrot.slane %v11952_v57, %v11920_v0 }
 0x197   :  { %5870 = vmatprep.subr.bf16.mxu0 %v8395_v4  ;;  %6214 = vmatprep.subr.bf16.mxu1 %v8398_v12  ;;  %v2639_v4 = vrot.slane %v11952_v57, %v11928_v11 }
 0x19a   :  { %5871 = vmatpush1.bf16.msra.mxu0 %v8393_v8  ;;  %6215 = vmatpush1.bf16.msra.mxu1 %v8396_v49  ;;  %v2647_v49 = vrot.slane %v11952_v57, %v11917_v29 }
 0x19b   :  { %5872 = vmatprep.subr.bf16.mxu0 %v8401_v34  ;;  %6216 = vmatprep.subr.bf16.mxu1 %v8404_v63 }
 0x19e   :  { %5873 = vmatpush1.bf16.msra.mxu0 %v8399_v43  ;;  %6217 = vmatpush1.bf16.msra.mxu1 %v8402_v10 }
 0x19f   :  { %5874 = vmatprep.subr.bf16.mxu0 %v8407_v48  ;;  %6218 = vmatprep.subr.bf16.mxu1 %v8410_v41 }
 0x1a2   :  { %5875 = vmatpush1.bf16.msra.mxu0 %v8405_v59  ;;  %6219 = vmatpush1.bf16.msra.mxu1 %v8408_v61  ;;  %v1780_v59 = vrot.slane %v11925_v24, %v11955_v18 }
 0x1a3   :  { %5876 = vmatprep.subr.bf16.mxu0 %v8413_v3  ;;  %6220 = vmatprep.subr.bf16.mxu1 %v8416_v2 }
 0x1a6   :  { %5877 = vmatpush1.bf16.msra.mxu0 %v8411_v19  ;;  %6221 = vmatpush1.bf16.msra.mxu1 %v8414_v7  ;;  %v1784_v19 = vrot.slane %v11925_v24, %v11960_v36 }
 0x1a7   :  { %5878 = vmatprep.subr.bf16.mxu0 %v8419_v54  ;;  %6222 = vmatprep.subr.bf16.mxu1 %v8422_v1 }
 0x1aa   :  { %5879 = vmatpush1.bf16.msra.mxu0 %v8417_v42  ;;  %6223 = vmatpush1.bf16.msra.mxu1 %v8420_v56  ;;  %v2535_v42 = vrot.slane %v11939_v9, %v11955_v18 }
 0x1ab   :  { %5880 = vmatprep.subr.bf16.mxu0 %v8425_v45  ;;  %6224 = vmatprep.subr.bf16.mxu1 %v8428_v55 }
 0x1ae   :  { %5881 = vmatpush1.bf16.msra.mxu0 %v8423_v50  ;;  %6225 = vmatpush1.bf16.msra.mxu1 %v8426_v62  ;;  %v2539_v50 = vrot.slane %v11939_v9, %v11960_v36 }
 0x1af   :  { %5882 = vmatprep.subr.bf16.mxu0 %v8431_v23  ;;  %6226 = vmatprep.subr.bf16.mxu1 %v8434_v20 }
 0x1b2   :  { %5883 = vmatpush1.bf16.msra.mxu0 %v8429_v15  ;;  %6227 = vmatpush1.bf16.msra.mxu1 %v8432_v30 }
 0x1b3   :  { %v1962_v22 = vpop.f32.mrb[0].mxu0  ;;  %5884 = vmatprep.subr.bf16.mxu0 %v8437_v46  ;;  %6228 = vmatprep.subr.bf16.mxu1 %v8440_v58 }
 0x1b4   :  { %v1964_v17 = vpop.f32.mrb[1].mxu0  ;;  %v1963_v37 = vadd.f32 %v1962_v22, %v1764_v14 }
 0x1b5   :  { %v1965_v31 = vadd.f32 %v1964_v17, %v1768_v51 }
 0x1b6   :  { %5885 = vmatpush1.bf16.msra.mxu0 %v8435_v44  ;;  %6229 = vmatpush1.bf16.msra.mxu1 %v8438_v25  ;;  %v2596_v63 = vmul.f32 %v2519_v40, %v1963_v37 }
 0x1b7   :  { %5897 = vmatprep.subr.bf16.mxu0 %v8443_v27  ;;  %6241 = vmatprep.subr.bf16.mxu1 %v8446_v28  ;;  %v2597_v61 = vmul.f32 %v2523_v13, %v1965_v31  ;;  %v8447_v31 = vld [vmem:[%s13575_s5 + $0x220] ss:$16 sps:$4 sm:$0xff]  }
 0x1b8   :  { %v2712_v62 = vadd.f32 %v2635_v16, %v2596_v63  ;;  %v8458_v63 = vld [vmem:[%s13575_s5 + $0x24c] ss:$16 sps:$4 sm:$0xff]  }
 0x1b9   :  { %v2713_v30 = vadd.f32 %v2639_v4, %v2597_v61 }
 0x1f4   :  { %v2039_v21 = vpop.f32.mrb[0].mxu1 }
 0x1f5   :  { %v2041_v6 = vpop.f32.mrb[1].mxu1  ;;  %v2040_v32 = vadd.f32 %v2039_v21, %v1772_v38  ;;  %v2651_v21 = vrot.slane %v11952_v57, %v11955_v18 }
 0x1f6   :  { %v2042_v26 = vadd.f32 %v2041_v6, %v1776_v39 }
 0x1f7   :  { %v2598_v53 = vmul.f32 %v2527_v60, %v2040_v32 }
 0x1f8   :  { %v2599_v8 = vmul.f32 %v2531_v52, %v2042_v26  ;;  %v8452_v26 = vld [vmem:[%s13575_s5 + $0x22c] ss:$16 sps:$4 sm:$0xff]  }
 0x1f9   :  { %v2714_v54 = vadd.f32 %v2643_v5, %v2598_v53 }
 0x1fa   :  { %v2715_v45 = vadd.f32 %v2647_v49, %v2599_v8 }
 0x237   :  { %v1968_v12 = vpop.f32.mrb[2].mxu0  ;;  %v2045_v34 = vpop.f32.mrb[2].mxu1 }
 0x238   :  { %v1969_v43 = vadd.f32 %v1968_v12, %v1764_v14  ;;  %v1970_v10 = vpop.f32.mrb[3].mxu0  ;;  %v2046_v48 = vadd.f32 %v2045_v34, %v1772_v38  ;;  %v2047_v41 = vpop.f32.mrb[3].mxu1  ;;  %v8444_v38 = vld [vmem:[%s13575_s5 + $0x208] ss:$16 sps:$4 sm:$0xff]   ;;  %v12003_v12 = vsub.s32 6, %v11911_v33 }
 0x239   :  { %v1971_v3 = vadd.f32 %v1970_v10, %v1768_v51  ;;  %v2048_v2 = vadd.f32 %v2047_v41, %v1776_v39  ;;  %v2655_v51 = vrot.slane %v11952_v57, %v11960_v36  ;;  %v8455_v34 = vld [vmem:[%s13575_s5 + $0x244] ss:$16 sps:$4 sm:$0xff]  }
 0x23a   :  { %v2612_v7 = vmul.f32 %v2519_v40, %v1969_v43  ;;  %v2614_v1 = vmul.f32 %v2527_v60, %v2046_v48  ;;  %v8449_v60 = vld [vmem:[%s13575_s5 + $0x224] ss:$16 sps:$4 sm:$0xff]   ;;  %v1788_v41 = vrot.slane %v11925_v24, %v12003_v12 }
 0x23b   :  { %v2613_v56 = vmul.f32 %v2523_v13, %v1971_v3  ;;  %v2615_v55 = vmul.f32 %v2531_v52, %v2048_v2  ;;  %v2116_v22 = vpop.f32.mrb[4].mxu0  ;;  %v2193_v8 = vpop.f32.mrb[4].mxu1  ;;  %v2659_v3 = vrot.slane %v11952_v57, %v12003_v12 }
 0x23c   :  { %v2728_v17 = vadd.f32 %v2635_v16, %v2612_v7  ;;  %v2730_v23 = vadd.f32 %v2643_v5, %v2614_v1  ;;  %v2117_v20 = vadd.f32 %v2116_v22, %v1780_v59  ;;  %v2118_v15 = vpop.f32.mrb[5].mxu0  ;;  %v8450_v5 = vld [vmem:[%s13575_s5 + $0x228] ss:$16 sps:$4 sm:$0xff]   ;;  %v2195_v10 = vpop.f32.mrb[5].mxu1  ;;  %v8453_v7 = vld [vmem:[%s13575_s5 + $0x240] ss:$16 sps:$4 sm:$0xff]  }
 0x23d   :  { %v2729_v46 = vadd.f32 %v2639_v4, %v2613_v56  ;;  %v2731_v58 = vadd.f32 %v2647_v49, %v2615_v55  ;;  %v2119_v44 = vadd.f32 %v2118_v15, %v1784_v19  ;;  %v12006_v49 = vsub.s32 7, %v11911_v33  ;;  %v12057_v15 = vld [vmem:[%s13574_s4 + $0x8] sm:$0xff] }
 0x23e   :  { %v2744_v25 = vpack.c.bf16 %v2728_v17, %v2712_v62  ;;  %v11978_v27 = vpack.c.bf16 %v2730_v23, %v2714_v54  ;;  %v2600_v28 = vmul.f32 %v2535_v42, %v2117_v20  ;;  %v2543_v33 = vrot.slane %v11939_v9, %v12003_v12  ;;  %v8456_v54 = vld [vmem:[%s13575_s5 + $0x248] ss:$16 sps:$4 sm:$0xff]  }
 0x23f   :  { %v2745_v6 = vpack.c.bf16 %v2729_v46, %v2713_v30  ;;  %v2747_v39 = vpack.c.bf16 %v2731_v58, %v2715_v45  ;;  %v2601_v14 = vmul.f32 %v2539_v50, %v2119_v44  ;;  %v2122_v32 = vpop.f32.mrb[6].mxu0  ;;  %v1792_v2 = vrot.slane %v11925_v24, %v12006_v49  ;;  %v8464_v45 = vld [vmem:[%s13575_s5 + $0x26c] ss:$16 sps:$4 sm:$0xff]  }
 0x240   :  { %v2123_v52 = vadd.f32 %v2122_v32, %v1780_v59  ;;  %v2124_v37 = vpop.f32.mrb[7].mxu0  ;;  %v2716_v13 = vadd.f32 %v2651_v21, %v2600_v28  ;;  %v2199_v59 = vpop.f32.mrb[6].mxu1  ;;  %v2663_v56 = vrot.slane %v11952_v57, %v12006_v49  ;;  %v12045_v62 = vld [vmem:[%s13572_s2 + $0x8] sm:$0xff] }
 0x241   :  { %5886 = vmatprep.mubr.bf16.mxu0 %v2745_v6  ;;  %6230 = vmatprep.mubr.bf16.mxu1 %v2745_v6  ;;  %v2125_v40 = vadd.f32 %v2124_v37, %v1784_v19  ;;  %v2717_v16 = vadd.f32 %v2655_v51, %v2601_v14  ;;  %v2547_v19 = vrot.slane %v11939_v9, %v12006_v49  ;;  %v2201_v24 = vpop.f32.mrb[7].mxu1  ;;  %v8461_v9 = vld [vmem:[%s13575_s5 + $0x264] ss:$16 sps:$4 sm:$0xff]   ;;  %v12052_v20 = vld [vmem:[%s13573_s3 + $0x8] sm:$0xff] }
 0x242   :  { %5887 = vmatmul.mubr.bf16.vlgmr.msra.gmra.mrb[16].mxu0 %v2744_v25  ;;  %6231 = vmatmul.mubr.bf16.vlgmr.msra.gmra.mrb[16].mxu1 %v2744_v25  ;;  %v2616_v53 = vmul.f32 %v2535_v42, %v2123_v52  ;;  %v2194_v42 = vadd.f32 %v2193_v8, %v1788_v41  ;;  %v2196_v55 = vadd.f32 %v2195_v10, %v1792_v2  ;;  %v8459_v25 = vld [vmem:[%s13575_s5 + $0x260] ss:$16 sps:$4 sm:$0xff]   ;;  %v8462_v28 = vld [vmem:[%s13575_s5 + $0x268] ss:$16 sps:$4 sm:$0xff]   ;;  %v8467_v14 = vld [vmem:[%s13575_s5 + $0x284] ss:$16 sps:$4 sm:$0xff]  }
 0x243   :  { %5898 = vmatpush1.bf16.msra.mxu0 %v8441_v47  ;;  %6242 = vmatpush1.bf16.msra.mxu1 %v8444_v38  ;;  %v2617_v4 = vmul.f32 %v2539_v50, %v2125_v40  ;;  %v2200_v22 = vadd.f32 %v2199_v59, %v1788_v41  ;;  %v2202_v50 = vadd.f32 %v2201_v24, %v1792_v2  ;;  %v2270_v57 = vpop.f32.mrb[8].mxu0  ;;  %v8468_v10 = vld [vmem:[%s13575_s5 + $0x288] ss:$16 sps:$4 sm:$0xff]   ;;  %v8476_v2 = vld [vmem:[%s13575_s5 + $0x2ac] ss:$16 sps:$4 sm:$0xff]  }
 0x244   :  { %5899 = vmatprep.subr.bf16.mxu0 %v8449_v60  ;;  %6243 = vmatprep.subr.bf16.mxu1 %v8452_v26  ;;  %v2732_v43 = vadd.f32 %v2651_v21, %v2616_v53  ;;  %v2602_v17 = vmul.f32 %v2543_v33, %v2194_v42  ;;  %v1796_v23 = vrot.slane %v12045_v62, %v11920_v0  ;;  %v2272_v38 = vpop.f32.mrb[9].mxu0 }
 0x245   :  { %5929 = vmatprep.mubr.bf16.mxu0 %v2747_v39  ;;  %6273 = vmatprep.mubr.bf16.mxu1 %v2747_v39  ;;  %v2733_v48 = vadd.f32 %v2655_v51, %v2617_v4  ;;  %v2603_v30 = vmul.f32 %v2547_v19, %v2196_v55  ;;  %v2618_v46 = vmul.f32 %v2543_v33, %v2200_v22  ;;  %v2347_v39 = vpop.f32.mrb[8].mxu1  ;;  %v8470_v51 = vld [vmem:[%s13575_s5 + $0x28c] ss:$16 sps:$4 sm:$0xff]  }
 0x246   :  { %v12018_v61 = vpack.c.bf16 %v2732_v43, %v2716_v13  ;;  %v2619_v58 = vmul.f32 %v2547_v19, %v2202_v50  ;;  %v2551_v44 = vrot.slane %v12052_v20, %v11920_v0  ;;  %v2718_v21 = vadd.f32 %v2659_v3, %v2602_v17  ;;  %v2349_v37 = vpop.f32.mrb[9].mxu1  ;;  %v8465_v43 = vld [vmem:[%s13575_s5 + $0x280] ss:$16 sps:$4 sm:$0xff]  }
 0x247   :  { %5900 = vmatpush1.bf16.msra.mxu0 %v8447_v31  ;;  %6244 = vmatpush1.bf16.msra.mxu1 %v8450_v5  ;;  %v12032_v1 = vpack.c.bf16 %v2733_v48, %v2717_v16  ;;  %v2271_v6 = vadd.f32 %v2270_v57, %v1796_v23  ;;  %v2667_v47 = vrot.slane %v12057_v15, %v11920_v0  ;;  %v2276_v52 = vpop.f32.mrb[10].mxu0  ;;  %v2353_v16 = vpop.f32.mrb[10].mxu1  ;;  %v8471_v17 = vld [vmem:[%s13575_s5 + $0x2a0] ss:$16 sps:$4 sm:$0xff]  }
 0x248   :  { %5901 = vmatprep.subr.bf16.mxu0 %v8455_v34  ;;  %6245 = vmatprep.subr.bf16.mxu1 %v8458_v63  ;;  %v2719_v32 = vadd.f32 %v2663_v56, %v2603_v30  ;;  %v2734_v60 = vadd.f32 %v2659_v3, %v2618_v46  ;;  %v2735_v26 = vadd.f32 %v2663_v56, %v2619_v58  ;;  %v2278_v5 = vpop.f32.mrb[11].mxu0  ;;  %v2355_v59 = vpop.f32.mrb[11].mxu1  ;;  %v8473_v3 = vld [vmem:[%s13575_s5 + $0x2a4] ss:$16 sps:$4 sm:$0xff]  }
 0x249   :  { %v2604_v40 = vmul.f32 %v2551_v44, %v2271_v6  ;;  %v1800_v31 = vrot.slane %v12045_v62, %v11928_v11  ;;  %v2555_v13 = vrot.slane %v12052_v20, %v11928_v11  ;;  %v2671_v53 = vrot.slane %v12057_v15, %v11928_v11 }
 0x24a   :  { %v12081_v4 = vpack.c.bf16 %v2734_v60, %v2718_v21  ;;  %v2277_v8 = vadd.f32 %v2276_v52, %v1796_v23  ;;  %v1804_v34 = vrot.slane %v12045_v62, %v11914_v35  ;;  %v2559_v63 = vrot.slane %v12052_v20, %v11914_v35  ;;  %v8474_v23 = vld [vmem:[%s13575_s5 + $0x2a8] ss:$16 sps:$4 sm:$0xff]   ;;  %v8482_v21 = vld [vmem:[%s13575_s5 + $0x2cc] ss:$16 sps:$4 sm:$0xff]  }
 0x24b   :  { %5902 = vmatpush1.bf16.msra.mxu0 %v8453_v7  ;;  %6246 = vmatpush1.bf16.msra.mxu1 %v8456_v54  ;;  %v2720_v48 = vadd.f32 %v2667_v47, %v2604_v40  ;;  %v2273_v41 = vadd.f32 %v2272_v38, %v1800_v31  ;;  %v2675_v33 = vrot.slane %v12057_v15, %v11914_v35  ;;  %v2424_v42 = vpop.f32.mrb[12].mxu0 }
 0x24c   :  { %5903 = vmatprep.subr.bf16.mxu0 %v8461_v9  ;;  %6247 = vmatprep.subr.bf16.mxu1 %v8464_v45  ;;  %v2620_v19 = vmul.f32 %v2551_v44, %v2277_v8  ;;  %v2348_v7 = vadd.f32 %v2347_v39, %v1804_v34  ;;  %v2279_v54 = vadd.f32 %v2278_v5, %v1800_v31  ;;  %v2426_v44 = vpop.f32.mrb[13].mxu0 }
 0x24d   :  { %v2605_v56 = vmul.f32 %v2555_v13, %v2273_v41  ;;  %v1808_v24 = vrot.slane %v12045_v62, %v11917_v29  ;;  %v2563_v9 = vrot.slane %v12052_v20, %v11917_v29  ;;  %v2679_v45 = vrot.slane %v12057_v15, %v11917_v29 }
 0x24e   :  { %v2736_v55 = vadd.f32 %v2667_v47, %v2620_v19  ;;  %v2606_v22 = vmul.f32 %v2559_v63, %v2348_v7  ;;  %v2621_v50 = vmul.f32 %v2555_v13, %v2279_v54  ;;  %v2354_v57 = vadd.f32 %v2353_v16, %v1804_v34 }
 0x24f   :  { %5904 = vmatpush1.bf16.msra.mxu0 %v8459_v25  ;;  %6248 = vmatpush1.bf16.msra.mxu1 %v8462_v28  ;;  %v12113_v30 = vadd.f32 %v2671_v53, %v2605_v56  ;;  %v2350_v46 = vadd.f32 %v2349_v37, %v1808_v24  ;;  %v2356_v58 = vadd.f32 %v2355_v59, %v1808_v24  ;;  %v2501_v25 = vpop.f32.mrb[12].mxu1  ;;  %v8479_v28 = vld [vmem:[%s13575_s5 + $0x2c4] ss:$16 sps:$4 sm:$0xff]   ;;  %v2430_v39 = vpop.f32.mrb[14].mxu0 }
 0x250   :  { %5905 = vmatprep.subr.bf16.mxu0 %v8467_v14  ;;  %6249 = vmatprep.subr.bf16.mxu1 %v8470_v51  ;;  %v12121_v6 = vpack.c.bf16 %v2736_v55, %v2720_v48  ;;  %v2722_v47 = vadd.f32 %v2675_v33, %v2606_v22  ;;  %v12123_v38 = vadd.f32 %v2671_v53, %v2621_v50  ;;  %v2503_v14 = vpop.f32.mrb[13].mxu1  ;;  %v2432_v40 = vpop.f32.mrb[15].mxu0  ;;  %v8488_v48 = vld [vmem:[%s13575_s5 + $0x2ec] ss:$16 sps:$4 sm:$0xff]  }
 0x251   :  { %v2607_v51 = vmul.f32 %v2563_v9, %v2350_v46  ;;  %v2622_v60 = vmul.f32 %v2559_v63, %v2354_v57  ;;  %v2623_v52 = vmul.f32 %v2563_v9, %v2356_v58  ;;  %v12125_v37 = vpack.c.bf16 %v2735_v26, %v2719_v32  ;;  %v2507_v31 = vpop.f32.mrb[14].mxu1  ;;  %v8477_v32 = vld [vmem:[%s13575_s5 + $0x2c0] ss:$16 sps:$4 sm:$0xff]   ;;  %v8480_v26 = vld [vmem:[%s13575_s5 + $0x2c8] ss:$16 sps:$4 sm:$0xff]  }
 0x252   :  { %v1812_v13 = vrot.slane %v12045_v62, %v11955_v18  ;;  %v2567_v5 = vrot.slane %v12052_v20, %v11955_v18  ;;  %v2683_v16 = vrot.slane %v12057_v15, %v11955_v18  ;;  %v1816_v53 = vrot.slane %v12045_v62, %v11960_v36  ;;  %v8483_v9 = vld [vmem:[%s13575_s5 + $0x2e0] ss:$16 sps:$4 sm:$0xff]   ;;  %v8491_v57 = vld [vmem:[%s13575_s5 + $0x304] ss:$16 sps:$4 sm:$0xff]  }
 0x253   :  { %5906 = vmatpush1.bf16.msra.mxu0 %v8465_v43  ;;  %6250 = vmatpush1.bf16.msra.mxu1 %v8468_v10  ;;  %v2723_v8 = vadd.f32 %v2679_v45, %v2607_v51  ;;  %v2738_v34 = vadd.f32 %v2675_v33, %v2622_v60  ;;  %v2739_v63 = vadd.f32 %v2679_v45, %v2623_v52  ;;  %v2509_v43 = vpop.f32.mrb[15].mxu1  ;;  %v8485_v10 = vld [vmem:[%s13575_s5 + $0x2e4] ss:$16 sps:$4 sm:$0xff]   ;;  %v8486_v45 = vld [vmem:[%s13575_s5 + $0x2e8] ss:$16 sps:$4 sm:$0xff]  }
 0x254   :  { %5907 = vmatprep.subr.bf16.mxu0 %v8473_v3  ;;  %6251 = vmatprep.subr.bf16.mxu1 %v8476_v2  ;;  %v2425_v41 = vadd.f32 %v2424_v42, %v1812_v13  ;;  %v2427_v59 = vadd.f32 %v2426_v44, %v1816_v53  ;;  %v2571_v3 = vrot.slane %v12052_v20, %v11960_v36  ;;  %v8489_v52 = vld [vmem:[%s13575_s5 + $0x300] ss:$16 sps:$4 sm:$0xff]  }
 0x255   :  { %v12149_v2 = vpack.c.bf16 %v2738_v34, %v2722_v47  ;;  %v2687_v33 = vrot.slane %v12057_v15, %v11960_v36  ;;  %v2431_v19 = vadd.f32 %v2430_v39, %v1812_v13  ;;  %v1820_v7 = vrot.slane %v12045_v62, %v12003_v12 }
 0x256   :  { %v2608_v54 = vmul.f32 %v2567_v5, %v2425_v41  ;;  %v2609_v56 = vmul.f32 %v2571_v3, %v2427_v59  ;;  %v2575_v24 = vrot.slane %v12052_v20, %v12003_v12  ;;  %v2691_v42 = vrot.slane %v12057_v15, %v12003_v12  ;;  %v8498_v41 = vld [vmem:[%s13575_s5 + $0x328] ss:$16 sps:$4 sm:$0xff]   ;;  %v8501_v59 = vld [vmem:[%s13575_s5 + $0x340] ss:$16 sps:$4 sm:$0xff]  }
 0x257   :  { %5908 = vmatpush1.bf16.msra.mxu0 %v8471_v17  ;;  %6252 = vmatpush1.bf16.msra.mxu1 %v8474_v23  ;;  %v2624_v55 = vmul.f32 %v2567_v5, %v2431_v19  ;;  %v2502_v22 = vadd.f32 %v2501_v25, %v1820_v7  ;;  %v2433_v50 = vadd.f32 %v2432_v40, %v1816_v53  ;;  %v8494_v17 = vld [vmem:[%s13575_s5 + $0x30c] ss:$16 sps:$4 sm:$0xff]  }
 0x258   :  { %5909 = vmatprep.subr.bf16.mxu0 %v8479_v28  ;;  %6253 = vmatprep.subr.bf16.mxu1 %v8482_v21  ;;  %v2724_v23 = vadd.f32 %v2683_v16, %v2608_v54  ;;  %v2725_v46 = vadd.f32 %v2687_v33, %v2609_v56  ;;  %v1824_v58 = vrot.slane %v12045_v62, %v12006_v49  ;;  %v8492_v62 = vld [vmem:[%s13575_s5 + $0x308] ss:$16 sps:$4 sm:$0xff]   ;;  %v8512_v19 = vld [vmem:[%s13575_s5 + $0x36c] ss:$16 sps:$4 sm:$0xff]   ;;  %v8515_v56 = vld [vmem:[%s13575_s5 + $0x384] ss:$16 sps:$4 sm:$0xff]  }
 0x259   :  { %v2740_v44 = vadd.f32 %v2683_v16, %v2624_v55  ;;  %v2610_v28 = vmul.f32 %v2575_v24, %v2502_v22  ;;  %v2625_v21 = vmul.f32 %v2571_v3, %v2433_v50  ;;  %v2579_v25 = vrot.slane %v12052_v20, %v12006_v49  ;;  %v8504_v3 = vld [vmem:[%s13575_s5 + $0x348] ss:$16 sps:$4 sm:$0xff]   ;;  %v8524_v55 = vld [vmem:[%s13575_s5 + $0x3ac] ss:$16 sps:$4 sm:$0xff]   ;;  %v8519_v22 = vld [vmem:[%s13575_s5 + $0x3a0] ss:$16 sps:$4 sm:$0xff]  }
 0x25a   :  { %v2504_v47 = vadd.f32 %v2503_v14, %v1824_v58  ;;  %v2695_v39 = vrot.slane %v12057_v15, %v12006_v49  ;;  %v2508_v51 = vadd.f32 %v2507_v31, %v1820_v7  ;;  %v2510_v60 = vadd.f32 %v2509_v43, %v1824_v58  ;;  %v8497_v15 = vld [vmem:[%s13575_s5 + $0x324] ss:$16 sps:$4 sm:$0xff]   ;;  %v8500_v14 = vld [vmem:[%s13575_s5 + $0x32c] ss:$16 sps:$4 sm:$0xff]   ;;  %v8507_v7 = vld [vmem:[%s13575_s5 + $0x360] ss:$16 sps:$4 sm:$0xff]  }
 0x25b   :  { %5910 = vmatpush1.bf16.msra.mxu0 %v8477_v32  ;;  %6254 = vmatpush1.bf16.msra.mxu1 %v8480_v26  ;;  %v12183_v40 = vpack.c.bf16 %v2740_v44, %v2724_v23  ;;  %v2726_v13 = vadd.f32 %v2691_v42, %v2610_v28  ;;  %v2741_v20 = vadd.f32 %v2687_v33, %v2625_v21  ;;  %v8509_v33 = vld [vmem:[%s13575_s5 + $0x364] ss:$16 sps:$4 sm:$0xff]   ;;  %v8510_v54 = vld [vmem:[%s13575_s5 + $0x368] ss:$16 sps:$4 sm:$0xff]   ;;  %v8525_v23 = vld [vmem:[%s13575_s5 + $0x3c0] ss:$16 sps:$4 sm:$0xff]  }
 0x25c   :  { %5911 = vmatprep.subr.bf16.mxu0 %v8485_v10  ;;  %6255 = vmatprep.subr.bf16.mxu1 %v8488_v48  ;;  %v2611_v31 = vmul.f32 %v2579_v25, %v2504_v47  ;;  %v2626_v5 = vmul.f32 %v2575_v24, %v2508_v51  ;;  %v2627_v16 = vmul.f32 %v2579_v25, %v2510_v60  ;;  %v8495_v48 = vld [vmem:[%s13575_s5 + $0x320] ss:$16 sps:$4 sm:$0xff]   ;;  %v8518_v24 = vld [vmem:[%s13575_s5 + $0x38c] ss:$16 sps:$4 sm:$0xff]   ;;  %v8522_v50 = vld [vmem:[%s13575_s5 + $0x3a8] ss:$16 sps:$4 sm:$0xff]  }
 0x25d   :  { %v12193_v53 = vpack.c.bf16 %v12123_v38, %v12113_v30  ;;  %v12195_v32 = vpack.c.bf16 %v2739_v63, %v2723_v8  ;;  %v12197_v26 = vpack.c.bf16 %v2741_v20, %v2725_v46  ;;  %v8503_v30 = vld [vmem:[%s13575_s5 + $0x344] ss:$16 sps:$4 sm:$0xff]   ;;  %v8506_v38 = vld [vmem:[%s13575_s5 + $0x34c] ss:$16 sps:$4 sm:$0xff]   ;;  %v8528_v46 = vld [vmem:[%s13575_s5 + $0x3c8] ss:$16 sps:$4 sm:$0xff]  }
 0x25e   :  { %v2727_v34 = vadd.f32 %v2695_v39, %v2611_v31  ;;  %v2742_v43 = vadd.f32 %v2691_v42, %v2626_v5  ;;  %v2743_v10 = vadd.f32 %v2695_v39, %v2627_v16  ;;  %v8513_v42 = vld [vmem:[%s13575_s5 + $0x380] ss:$16 sps:$4 sm:$0xff]   ;;  %v8533_v58 = vld [vmem:[%s13575_s5 + $0x3e4] ss:$16 sps:$4 sm:$0xff]   ;;  %v8536_v44 = vld [vmem:[%s13575_s5 + $0x3ec] ss:$16 sps:$4 sm:$0xff]  }
 0x25f   :  { %5912 = vmatpush1.bf16.msra.mxu0 %v8483_v9  ;;  %6256 = vmatpush1.bf16.msra.mxu1 %v8486_v45  ;;  %v8516_v9 = vld [vmem:[%s13575_s5 + $0x388] ss:$16 sps:$4 sm:$0xff]   ;;  %v8521_v45 = vld [vmem:[%s13575_s5 + $0x3a4] ss:$16 sps:$4 sm:$0xff]   ;;  %v8531_v28 = vld [vmem:[%s13575_s5 + $0x3e0] ss:$16 sps:$4 sm:$0xff]  }
 0x260   :  { %5913 = vmatprep.subr.bf16.mxu0 %v8491_v57  ;;  %6257 = vmatprep.subr.bf16.mxu1 %v8494_v17  ;;  %v12211_v8 = vpack.c.bf16 %v2742_v43, %v2726_v13  ;;  %v12213_v63 = vpack.c.bf16 %v2743_v10, %v2727_v34  ;;  %v8527_v57 = vld [vmem:[%s13575_s5 + $0x3c4] ss:$16 sps:$4 sm:$0xff]   ;;  %v8530_v17 = vld [vmem:[%s13575_s5 + $0x3cc] ss:$16 sps:$4 sm:$0xff]   ;;  %v8534_v21 = vld [vmem:[%s13575_s5 + $0x3e8] ss:$16 sps:$4 sm:$0xff]  }
 0x261   :  { %v8539_v25 = vld [vmem:[%s13575_s5 + $0x404] ss:$16 sps:$4 sm:$0xff]   ;;  %v8542_v47 = vld [vmem:[%s13575_s5 + $0x40c] ss:$16 sps:$4 sm:$0xff]   ;;  %v8537_v39 = vld [vmem:[%s13575_s5 + $0x400] ss:$16 sps:$4 sm:$0xff]  }
 0x262   :  { %v8540_v51 = vld [vmem:[%s13575_s5 + $0x408] ss:$16 sps:$4 sm:$0xff]   ;;  %v8545_v60 = vld [vmem:[%s13575_s5 + $0x424] ss:$16 sps:$4 sm:$0xff]   ;;  %v8555_v5 = vld [vmem:[%s13575_s5 + $0x460] ss:$16 sps:$4 sm:$0xff]  }
 0x263   :  { %5914 = vmatpush1.bf16.msra.mxu0 %v8489_v52  ;;  %6258 = vmatpush1.bf16.msra.mxu1 %v8492_v62  ;;  %v8548_v52 = vld [vmem:[%s13575_s5 + $0x42c] ss:$16 sps:$4 sm:$0xff]   ;;  %v8543_v62 = vld [vmem:[%s13575_s5 + $0x420] ss:$16 sps:$4 sm:$0xff]   ;;  %v8546_v13 = vld [vmem:[%s13575_s5 + $0x428] ss:$16 sps:$4 sm:$0xff]  }
 0x264   :  { %5915 = vmatprep.subr.bf16.mxu0 %v8497_v15  ;;  %6259 = vmatprep.subr.bf16.mxu1 %v8500_v14  ;;  %v8551_v20 = vld [vmem:[%s13575_s5 + $0x444] ss:$16 sps:$4 sm:$0xff]   ;;  %v8549_v15 = vld [vmem:[%s13575_s5 + $0x440] ss:$16 sps:$4 sm:$0xff]   ;;  %v8552_v14 = vld [vmem:[%s13575_s5 + $0x448] ss:$16 sps:$4 sm:$0xff]  }
 0x265   :  { %v8557_v31 = vld [vmem:[%s13575_s5 + $0x464] ss:$16 sps:$4 sm:$0xff]   ;;  %v8558_v16 = vld [vmem:[%s13575_s5 + $0x468] ss:$16 sps:$4 sm:$0xff]   ;;  %v8566_v43 = vld [vmem:[%s13575_s5 + $0x48c] ss:$16 sps:$4 sm:$0xff]  }
 0x266   :  { %v8563_v34 = vld [vmem:[%s13575_s5 + $0x484] ss:$16 sps:$4 sm:$0xff]   ;;  %v8561_v10 = vld [vmem:[%s13575_s5 + $0x480] ss:$16 sps:$4 sm:$0xff]  }
 0x267   :  { %5916 = vmatpush1.bf16.msra.mxu0 %v8495_v48  ;;  %6260 = vmatpush1.bf16.msra.mxu1 %v8498_v41  ;;  %v8564_v48 = vld [vmem:[%s13575_s5 + $0x488] ss:$16 sps:$4 sm:$0xff]   ;;  %v8569_v41 = vld [vmem:[%s13575_s5 + $0x4a4] ss:$16 sps:$4 sm:$0xff]  }
 0x268   :  { %5917 = vmatprep.subr.bf16.mxu0 %v8503_v30  ;;  %6261 = vmatprep.subr.bf16.mxu1 %v8506_v38  ;;  %v8572_v30 = vld [vmem:[%s13575_s5 + $0x4ac] ss:$16 sps:$4 sm:$0xff]   ;;  %v8567_v38 = vld [vmem:[%s13575_s5 + $0x4a0] ss:$16 sps:$4 sm:$0xff]  }
 0x26b   :  { %5918 = vmatpush1.bf16.msra.mxu0 %v8501_v59  ;;  %6262 = vmatpush1.bf16.msra.mxu1 %v8504_v3  ;;  %v8570_v59 = vld [vmem:[%s13575_s5 + $0x4a8] ss:$16 sps:$4 sm:$0xff]   ;;  %v8575_v3 = vld [vmem:[%s13575_s5 + $0x4c4] ss:$16 sps:$4 sm:$0xff]  }
 0x26c   :  { %5919 = vmatprep.subr.bf16.mxu0 %v8509_v33  ;;  %6263 = vmatprep.subr.bf16.mxu1 %v8512_v19  ;;  %v8578_v33 = vld [vmem:[%s13575_s5 + $0x4cc] ss:$16 sps:$4 sm:$0xff]   ;;  %v8573_v19 = vld [vmem:[%s13575_s5 + $0x4c0] ss:$16 sps:$4 sm:$0xff]  }
 0x26f   :  { %5920 = vmatpush1.bf16.msra.mxu0 %v8507_v7  ;;  %6264 = vmatpush1.bf16.msra.mxu1 %v8510_v54  ;;  %v8576_v7 = vld [vmem:[%s13575_s5 + $0x4c8] ss:$16 sps:$4 sm:$0xff]   ;;  %v8581_v54 = vld [vmem:[%s13575_s5 + $0x4e4] ss:$16 sps:$4 sm:$0xff]  }
 0x270   :  { %5921 = vmatprep.subr.bf16.mxu0 %v8515_v56  ;;  %6265 = vmatprep.subr.bf16.mxu1 %v8518_v24  ;;  %v8584_v56 = vld [vmem:[%s13575_s5 + $0x4ec] ss:$16 sps:$4 sm:$0xff]   ;;  %v8579_v24 = vld [vmem:[%s13575_s5 + $0x4e0] ss:$16 sps:$4 sm:$0xff]  }
 0x273   :  { %5922 = vmatpush1.bf16.msra.mxu0 %v8513_v42  ;;  %6266 = vmatpush1.bf16.msra.mxu1 %v8516_v9  ;;  %v8582_v42 = vld [vmem:[%s13575_s5 + $0x4e8] ss:$16 sps:$4 sm:$0xff]   ;;  %v8587_v9 = vld [vmem:[%s13575_s5 + $0x504] ss:$16 sps:$4 sm:$0xff]  }
 0x274   :  { %5923 = vmatprep.subr.bf16.mxu0 %v8521_v45  ;;  %6267 = vmatprep.subr.bf16.mxu1 %v8524_v55  ;;  %v8590_v45 = vld [vmem:[%s13575_s5 + $0x50c] ss:$16 sps:$4 sm:$0xff]   ;;  %v8585_v55 = vld [vmem:[%s13575_s5 + $0x500] ss:$16 sps:$4 sm:$0xff]  }
 0x277   :  { %5924 = vmatpush1.bf16.msra.mxu0 %v8519_v22  ;;  %6268 = vmatpush1.bf16.msra.mxu1 %v8522_v50  ;;  %v8588_v22 = vld [vmem:[%s13575_s5 + $0x508] ss:$16 sps:$4 sm:$0xff]   ;;  %v8593_v50 = vld [vmem:[%s13575_s5 + $0x524] ss:$16 sps:$4 sm:$0xff]  }
 0x278   :  { %5925 = vmatprep.subr.bf16.mxu0 %v8527_v57  ;;  %6269 = vmatprep.subr.bf16.mxu1 %v8530_v17  ;;  %v8596_v57 = vld [vmem:[%s13575_s5 + $0x52c] ss:$16 sps:$4 sm:$0xff]   ;;  %v8591_v17 = vld [vmem:[%s13575_s5 + $0x520] ss:$16 sps:$4 sm:$0xff]  }
 0x27b   :  { %5926 = vmatpush1.bf16.msra.mxu0 %v8525_v23  ;;  %6270 = vmatpush1.bf16.msra.mxu1 %v8528_v46  ;;  %v8594_v23 = vld [vmem:[%s13575_s5 + $0x528] ss:$16 sps:$4 sm:$0xff]   ;;  %v8599_v46 = vld [vmem:[%s13575_s5 + $0x544] ss:$16 sps:$4 sm:$0xff]  }
 0x27c   :  { %5927 = vmatprep.subr.bf16.mxu0 %v8533_v58  ;;  %6271 = vmatprep.subr.bf16.mxu1 %v8536_v44  ;;  %v8602_v58 = vld [vmem:[%s13575_s5 + $0x54c] ss:$16 sps:$4 sm:$0xff]   ;;  %v8597_v44 = vld [vmem:[%s13575_s5 + $0x540] ss:$16 sps:$4 sm:$0xff]  }
 0x27f   :  { %5928 = vmatpush1.bf16.msra.mxu0 %v8531_v28  ;;  %6272 = vmatpush1.bf16.msra.mxu1 %v8534_v21  ;;  %v8600_v28 = vld [vmem:[%s13575_s5 + $0x548] ss:$16 sps:$4 sm:$0xff]   ;;  %v8605_v21 = vld [vmem:[%s13575_s5 + $0x564] ss:$16 sps:$4 sm:$0xff]  }
 0x280   :  { %5940 = vmatprep.subr.bf16.mxu0 %v8539_v25  ;;  %6284 = vmatprep.subr.bf16.mxu1 %v8542_v47  ;;  %v8608_v25 = vld [vmem:[%s13575_s5 + $0x56c] ss:$16 sps:$4 sm:$0xff]   ;;  %v8603_v47 = vld [vmem:[%s13575_s5 + $0x560] ss:$16 sps:$4 sm:$0xff]  }
 0x282   :  { %5930 = vmatmul.mubr.bf16.vlgmr.msra.gmra.mrb[16].mxu0 %v11978_v27  ;;  %6274 = vmatmul.mubr.bf16.vlgmr.msra.gmra.mrb[16].mxu1 %v11978_v27  ;;  %v8554_v27 = vld [vmem:[%s13575_s5 + $0x44c] ss:$16 sps:$4 sm:$0xff]  }
 0x283   :  { %5941 = vmatpush1.bf16.msra.mxu0 %v8537_v39  ;;  %6285 = vmatpush1.bf16.msra.mxu1 %v8540_v51  ;;  %v8606_v39 = vld [vmem:[%s13575_s5 + $0x568] ss:$16 sps:$4 sm:$0xff]   ;;  %v8611_v51 = vld [vmem:[%s13575_s5 + $0x584] ss:$16 sps:$4 sm:$0xff]  }
 0x284   :  { %5942 = vmatprep.subr.bf16.mxu0 %v8545_v60  ;;  %6286 = vmatprep.subr.bf16.mxu1 %v8548_v52  ;;  %v8614_v60 = vld [vmem:[%s13575_s5 + $0x58c] ss:$16 sps:$4 sm:$0xff]   ;;  %v8609_v52 = vld [vmem:[%s13575_s5 + $0x580] ss:$16 sps:$4 sm:$0xff]  }
 0x285   :  { %5972 = vmatprep.mubr.bf16.mxu0 %v12032_v1  ;;  %6316 = vmatprep.mubr.bf16.mxu1 %v12032_v1  ;;  %v8560_v1 = vld [vmem:[%s13575_s5 + $0x46c] ss:$16 sps:$4 sm:$0xff]  }
 0x287   :  { %5943 = vmatpush1.bf16.msra.mxu0 %v8543_v62  ;;  %6287 = vmatpush1.bf16.msra.mxu1 %v8546_v13  ;;  %v8612_v62 = vld [vmem:[%s13575_s5 + $0x588] ss:$16 sps:$4 sm:$0xff]   ;;  %v8617_v13 = vld [vmem:[%s13575_s5 + $0x5a4] ss:$16 sps:$4 sm:$0xff]  }
 0x288   :  { %5944 = vmatprep.subr.bf16.mxu0 %v8551_v20  ;;  %6288 = vmatprep.subr.bf16.mxu1 %v8554_v27  ;;  %v8620_v20 = vld [vmem:[%s13575_s5 + $0x5ac] ss:$16 sps:$4 sm:$0xff]   ;;  %v8615_v27 = vld [vmem:[%s13575_s5 + $0x5a0] ss:$16 sps:$4 sm:$0xff]  }
 0x28b   :  { %5945 = vmatpush1.bf16.msra.mxu0 %v8549_v15  ;;  %6289 = vmatpush1.bf16.msra.mxu1 %v8552_v14  ;;  %v8618_v15 = vld [vmem:[%s13575_s5 + $0x5a8] ss:$16 sps:$4 sm:$0xff]   ;;  %v8623_v14 = vld [vmem:[%s13575_s5 + $0x5c4] ss:$16 sps:$4 sm:$0xff]  }
 0x28c   :  { %5946 = vmatprep.subr.bf16.mxu0 %v8557_v31  ;;  %6290 = vmatprep.subr.bf16.mxu1 %v8560_v1  ;;  %v8626_v31 = vld [vmem:[%s13575_s5 + $0x5cc] ss:$16 sps:$4 sm:$0xff]   ;;  %v8621_v1 = vld [vmem:[%s13575_s5 + $0x5c0] ss:$16 sps:$4 sm:$0xff]  }
 0x28f   :  { %5947 = vmatpush1.bf16.msra.mxu0 %v8555_v5  ;;  %6291 = vmatpush1.bf16.msra.mxu1 %v8558_v16  ;;  %v8624_v5 = vld [vmem:[%s13575_s5 + $0x5c8] ss:$16 sps:$4 sm:$0xff]   ;;  %v8629_v16 = vld [vmem:[%s13575_s5 + $0x5e4] ss:$16 sps:$4 sm:$0xff]  }
 0x290   :  { %5948 = vmatprep.subr.bf16.mxu0 %v8563_v34  ;;  %6292 = vmatprep.subr.bf16.mxu1 %v8566_v43  ;;  %v8632_v34 = vld [vmem:[%s13575_s5 + $0x5ec] ss:$16 sps:$4 sm:$0xff]   ;;  %v8627_v43 = vld [vmem:[%s13575_s5 + $0x5e0] ss:$16 sps:$4 sm:$0xff]  }
 0x293   :  { %5949 = vmatpush1.bf16.msra.mxu0 %v8561_v10  ;;  %6293 = vmatpush1.bf16.msra.mxu1 %v8564_v48  ;;  %v8630_v10 = vld [vmem:[%s13575_s5 + $0x5e8] ss:$16 sps:$4 sm:$0xff]   ;;  %v8635_v48 = vld [vmem:[%s13575_s5 + $0x604] ss:$16 sps:$4 sm:$0xff]  }
 0x294   :  { %5950 = vmatprep.subr.bf16.mxu0 %v8569_v41  ;;  %6294 = vmatprep.subr.bf16.mxu1 %v8572_v30  ;;  %v8638_v41 = vld [vmem:[%s13575_s5 + $0x60c] ss:$16 sps:$4 sm:$0xff]   ;;  %v8633_v30 = vld [vmem:[%s13575_s5 + $0x600] ss:$16 sps:$4 sm:$0xff]  }
 0x297   :  { %5951 = vmatpush1.bf16.msra.mxu0 %v8567_v38  ;;  %6295 = vmatpush1.bf16.msra.mxu1 %v8570_v59  ;;  %v8636_v38 = vld [vmem:[%s13575_s5 + $0x608] ss:$16 sps:$4 sm:$0xff]   ;;  %v8641_v59 = vld [vmem:[%s13575_s5 + $0x624] ss:$16 sps:$4 sm:$0xff]  }
 0x298   :  { %5952 = vmatprep.subr.bf16.mxu0 %v8575_v3  ;;  %6296 = vmatprep.subr.bf16.mxu1 %v8578_v33  ;;  %v8644_v3 = vld [vmem:[%s13575_s5 + $0x62c] ss:$16 sps:$4 sm:$0xff]   ;;  %v8639_v33 = vld [vmem:[%s13575_s5 + $0x620] ss:$16 sps:$4 sm:$0xff]  }
 0x29b   :  { %5953 = vmatpush1.bf16.msra.mxu0 %v8573_v19  ;;  %6297 = vmatpush1.bf16.msra.mxu1 %v8576_v7  ;;  %v8642_v19 = vld [vmem:[%s13575_s5 + $0x628] ss:$16 sps:$4 sm:$0xff]   ;;  %v8647_v7 = vld [vmem:[%s13575_s5 + $0x644] ss:$16 sps:$4 sm:$0xff]  }
 0x29c   :  { %5954 = vmatprep.subr.bf16.mxu0 %v8581_v54  ;;  %6298 = vmatprep.subr.bf16.mxu1 %v8584_v56  ;;  %v8645_v54 = vld [vmem:[%s13575_s5 + $0x640] ss:$16 sps:$4 sm:$0xff]   ;;  %v8648_v56 = vld [vmem:[%s13575_s5 + $0x648] ss:$16 sps:$4 sm:$0xff]  }
 0x29f   :  { %5955 = vmatpush1.bf16.msra.mxu0 %v8579_v24  ;;  %6299 = vmatpush1.bf16.msra.mxu1 %v8582_v42  ;;  %v8653_v24 = vld [vmem:[%s13575_s5 + $0x664] ss:$16 sps:$4 sm:$0xff]   ;;  %v8651_v42 = vld [vmem:[%s13575_s5 + $0x660] ss:$16 sps:$4 sm:$0xff]  }
 0x2a0   :  { %5956 = vmatprep.subr.bf16.mxu0 %v8587_v9  ;;  %6300 = vmatprep.subr.bf16.mxu1 %v8590_v45  ;;  %v8654_v9 = vld [vmem:[%s13575_s5 + $0x668] ss:$16 sps:$4 sm:$0xff]   ;;  %v8659_v45 = vld [vmem:[%s13575_s5 + $0x684] ss:$16 sps:$4 sm:$0xff]  }
 0x2a3   :  { %5957 = vmatpush1.bf16.msra.mxu0 %v8585_v55  ;;  %6301 = vmatpush1.bf16.msra.mxu1 %v8588_v22  ;;  %v8662_v55 = vld [vmem:[%s13575_s5 + $0x68c] ss:$16 sps:$4 sm:$0xff]   ;;  %v8657_v22 = vld [vmem:[%s13575_s5 + $0x680] ss:$16 sps:$4 sm:$0xff]  }
 0x2a4   :  { %5958 = vmatprep.subr.bf16.mxu0 %v8593_v50  ;;  %6302 = vmatprep.subr.bf16.mxu1 %v8596_v57  ;;  %v8660_v50 = vld [vmem:[%s13575_s5 + $0x688] ss:$16 sps:$4 sm:$0xff]   ;;  %v8665_v57 = vld [vmem:[%s13575_s5 + $0x6a4] ss:$16 sps:$4 sm:$0xff]  }
 0x2a7   :  { %5959 = vmatpush1.bf16.msra.mxu0 %v8591_v17  ;;  %6303 = vmatpush1.bf16.msra.mxu1 %v8594_v23  ;;  %v8668_v17 = vld [vmem:[%s13575_s5 + $0x6ac] ss:$16 sps:$4 sm:$0xff]   ;;  %v8663_v23 = vld [vmem:[%s13575_s5 + $0x6a0] ss:$16 sps:$4 sm:$0xff]  }
 0x2a8   :  { %5960 = vmatprep.subr.bf16.mxu0 %v8599_v46  ;;  %6304 = vmatprep.subr.bf16.mxu1 %v8602_v58  ;;  %v8666_v46 = vld [vmem:[%s13575_s5 + $0x6a8] ss:$16 sps:$4 sm:$0xff]   ;;  %v8671_v58 = vld [vmem:[%s13575_s5 + $0x6c4] ss:$16 sps:$4 sm:$0xff]  }
 0x2ab   :  { %5961 = vmatpush1.bf16.msra.mxu0 %v8597_v44  ;;  %6305 = vmatpush1.bf16.msra.mxu1 %v8600_v28  ;;  %v8674_v44 = vld [vmem:[%s13575_s5 + $0x6cc] ss:$16 sps:$4 sm:$0xff]   ;;  %v8669_v28 = vld [vmem:[%s13575_s5 + $0x6c0] ss:$16 sps:$4 sm:$0xff]  }
 0x2ac   :  { %5962 = vmatprep.subr.bf16.mxu0 %v8605_v21  ;;  %6306 = vmatprep.subr.bf16.mxu1 %v8608_v25  ;;  %v8672_v21 = vld [vmem:[%s13575_s5 + $0x6c8] ss:$16 sps:$4 sm:$0xff]   ;;  %v8677_v25 = vld [vmem:[%s13575_s5 + $0x6e4] ss:$16 sps:$4 sm:$0xff]  }
 0x2af   :  { %5963 = vmatpush1.bf16.msra.mxu0 %v8603_v47  ;;  %6307 = vmatpush1.bf16.msra.mxu1 %v8606_v39  ;;  %v8680_v47 = vld [vmem:[%s13575_s5 + $0x6ec] ss:$16 sps:$4 sm:$0xff]   ;;  %v8675_v39 = vld [vmem:[%s13575_s5 + $0x6e0] ss:$16 sps:$4 sm:$0xff]  }
 0x2b0   :  { %5964 = vmatprep.subr.bf16.mxu0 %v8611_v51  ;;  %6308 = vmatprep.subr.bf16.mxu1 %v8614_v60  ;;  %v8678_v51 = vld [vmem:[%s13575_s5 + $0x6e8] ss:$16 sps:$4 sm:$0xff]   ;;  %v8683_v60 = vld [vmem:[%s13575_s5 + $0x704] ss:$16 sps:$4 sm:$0xff]  }
 0x2b3   :  { %5965 = vmatpush1.bf16.msra.mxu0 %v8609_v52  ;;  %6309 = vmatpush1.bf16.msra.mxu1 %v8612_v62  ;;  %v8686_v52 = vld [vmem:[%s13575_s5 + $0x70c] ss:$16 sps:$4 sm:$0xff]   ;;  %v8681_v62 = vld [vmem:[%s13575_s5 + $0x700] ss:$16 sps:$4 sm:$0xff]  }
 0x2b4   :  { %5966 = vmatprep.subr.bf16.mxu0 %v8617_v13  ;;  %6310 = vmatprep.subr.bf16.mxu1 %v8620_v20  ;;  %v8684_v13 = vld [vmem:[%s13575_s5 + $0x708] ss:$16 sps:$4 sm:$0xff]   ;;  %v8689_v20 = vld [vmem:[%s13575_s5 + $0x724] ss:$16 sps:$4 sm:$0xff]  }
 0x2b7   :  { %5967 = vmatpush1.bf16.msra.mxu0 %v8615_v27  ;;  %6311 = vmatpush1.bf16.msra.mxu1 %v8618_v15  ;;  %v8692_v27 = vld [vmem:[%s13575_s5 + $0x72c] ss:$16 sps:$4 sm:$0xff]   ;;  %v8687_v15 = vld [vmem:[%s13575_s5 + $0x720] ss:$16 sps:$4 sm:$0xff]  }
 0x2b8   :  { %5968 = vmatprep.subr.bf16.mxu0 %v8623_v14  ;;  %6312 = vmatprep.subr.bf16.mxu1 %v8626_v31  ;;  %v8690_v14 = vld [vmem:[%s13575_s5 + $0x728] ss:$16 sps:$4 sm:$0xff]   ;;  %v8695_v31 = vld [vmem:[%s13575_s5 + $0x744] ss:$16 sps:$4 sm:$0xff]  }
 0x2bb   :  { %5969 = vmatpush1.bf16.msra.mxu0 %v8621_v1  ;;  %6313 = vmatpush1.bf16.msra.mxu1 %v8624_v5  ;;  %v8698_v1 = vld [vmem:[%s13575_s5 + $0x74c] ss:$16 sps:$4 sm:$0xff]   ;;  %v8693_v5 = vld [vmem:[%s13575_s5 + $0x740] ss:$16 sps:$4 sm:$0xff]  }
 0x2bc   :  { %5970 = vmatprep.subr.bf16.mxu0 %v8629_v16  ;;  %6314 = vmatprep.subr.bf16.mxu1 %v8632_v34  ;;  %v8696_v16 = vld [vmem:[%s13575_s5 + $0x748] ss:$16 sps:$4 sm:$0xff]   ;;  %v8701_v34 = vld [vmem:[%s13575_s5 + $0x764] ss:$16 sps:$4 sm:$0xff]  }
 0x2bf   :  { %5971 = vmatpush1.bf16.msra.mxu0 %v8627_v43  ;;  %6315 = vmatpush1.bf16.msra.mxu1 %v8630_v10  ;;  %v8704_v43 = vld [vmem:[%s13575_s5 + $0x76c] ss:$16 sps:$4 sm:$0xff]   ;;  %v8699_v10 = vld [vmem:[%s13575_s5 + $0x760] ss:$16 sps:$4 sm:$0xff]  }
 0x2c0   :  { %5983 = vmatprep.subr.bf16.mxu0 %v8635_v48  ;;  %6327 = vmatprep.subr.bf16.mxu1 %v8638_v41  ;;  %v8702_v48 = vld [vmem:[%s13575_s5 + $0x768] ss:$16 sps:$4 sm:$0xff]   ;;  %v8707_v41 = vld [vmem:[%s13575_s5 + $0x784] ss:$16 sps:$4 sm:$0xff]  }
 0x2c2   :  { %5973 = vmatmul.mubr.bf16.vlgmr.msra.gmra.mrb[16].mxu0 %v12018_v61  ;;  %6317 = vmatmul.mubr.bf16.vlgmr.msra.gmra.mrb[16].mxu1 %v12018_v61  ;;  %v8650_v61 = vld [vmem:[%s13575_s5 + $0x64c] ss:$16 sps:$4 sm:$0xff]  }
 0x2c3   :  { %5984 = vmatpush1.bf16.msra.mxu0 %v8633_v30  ;;  %6328 = vmatpush1.bf16.msra.mxu1 %v8636_v38  ;;  %v8710_v30 = vld [vmem:[%s13575_s5 + $0x78c] ss:$16 sps:$4 sm:$0xff]   ;;  %v8705_v38 = vld [vmem:[%s13575_s5 + $0x780] ss:$16 sps:$4 sm:$0xff]  }
 0x2c4   :  { %5985 = vmatprep.subr.bf16.mxu0 %v8641_v59  ;;  %6329 = vmatprep.subr.bf16.mxu1 %v8644_v3  ;;  %v8708_v59 = vld [vmem:[%s13575_s5 + $0x788] ss:$16 sps:$4 sm:$0xff]   ;;  %v8713_v3 = vld [vmem:[%s13575_s5 + $0x7a4] ss:$16 sps:$4 sm:$0xff]  }
 0x2c5   :  { %6015 = vmatprep.mubr.bf16.mxu0 %v12125_v37  ;;  %6359 = vmatprep.mubr.bf16.mxu1 %v12125_v37  ;;  %v8656_v37 = vld [vmem:[%s13575_s5 + $0x66c] ss:$16 sps:$4 sm:$0xff]  }
 0x2c7   :  { %5986 = vmatpush1.bf16.msra.mxu0 %v8639_v33  ;;  %6330 = vmatpush1.bf16.msra.mxu1 %v8642_v19  ;;  %v8716_v33 = vld [vmem:[%s13575_s5 + $0x7ac] ss:$16 sps:$4 sm:$0xff]   ;;  %v8711_v19 = vld [vmem:[%s13575_s5 + $0x7a0] ss:$16 sps:$4 sm:$0xff]  }
 0x2c8   :  { %5987 = vmatprep.subr.bf16.mxu0 %v8647_v7  ;;  %6331 = vmatprep.subr.bf16.mxu1 %v8650_v61  ;;  %v8714_v7 = vld [vmem:[%s13575_s5 + $0x7a8] ss:$16 sps:$4 sm:$0xff]   ;;  %v8719_v61 = vld [vmem:[%s13575_s5 + $0x7c4] ss:$16 sps:$4 sm:$0xff]  }
 0x2cb   :  { %5988 = vmatpush1.bf16.msra.mxu0 %v8645_v54  ;;  %6332 = vmatpush1.bf16.msra.mxu1 %v8648_v56  ;;  %v8722_v54 = vld [vmem:[%s13575_s5 + $0x7cc] ss:$16 sps:$4 sm:$0xff]   ;;  %v8717_v56 = vld [vmem:[%s13575_s5 + $0x7c0] ss:$16 sps:$4 sm:$0xff]  }
 0x2cc   :  { %5989 = vmatprep.subr.bf16.mxu0 %v8653_v24  ;;  %6333 = vmatprep.subr.bf16.mxu1 %v8656_v37  ;;  %v8720_v24 = vld [vmem:[%s13575_s5 + $0x7c8] ss:$16 sps:$4 sm:$0xff]   ;;  %v8725_v37 = vld [vmem:[%s13575_s5 + $0x7e4] ss:$16 sps:$4 sm:$0xff]  }
 0x2cf   :  { %5990 = vmatpush1.bf16.msra.mxu0 %v8651_v42  ;;  %6334 = vmatpush1.bf16.msra.mxu1 %v8654_v9  ;;  %v8728_v42 = vld [vmem:[%s13575_s5 + $0x7ec] ss:$16 sps:$4 sm:$0xff]   ;;  %v8723_v9 = vld [vmem:[%s13575_s5 + $0x7e0] ss:$16 sps:$4 sm:$0xff]  }
 0x2d0   :  { %5991 = vmatprep.subr.bf16.mxu0 %v8659_v45  ;;  %6335 = vmatprep.subr.bf16.mxu1 %v8662_v55  ;;  %v8726_v45 = vld [vmem:[%s13575_s5 + $0x7e8] ss:$16 sps:$4 sm:$0xff]   ;;  %v8731_v55 = vld [vmem:[%s13575_s5 + $0x804] ss:$16 sps:$4 sm:$0xff]  }
 0x2d3   :  { %5992 = vmatpush1.bf16.msra.mxu0 %v8657_v22  ;;  %6336 = vmatpush1.bf16.msra.mxu1 %v8660_v50  ;;  %v8734_v22 = vld [vmem:[%s13575_s5 + $0x80c] ss:$16 sps:$4 sm:$0xff]   ;;  %v8729_v50 = vld [vmem:[%s13575_s5 + $0x800] ss:$16 sps:$4 sm:$0xff]  }
 0x2d4   :  { %5993 = vmatprep.subr.bf16.mxu0 %v8665_v57  ;;  %6337 = vmatprep.subr.bf16.mxu1 %v8668_v17  ;;  %v8732_v57 = vld [vmem:[%s13575_s5 + $0x808] ss:$16 sps:$4 sm:$0xff]   ;;  %v8737_v17 = vld [vmem:[%s13575_s5 + $0x824] ss:$16 sps:$4 sm:$0xff]  }
 0x2d7   :  { %5994 = vmatpush1.bf16.msra.mxu0 %v8663_v23  ;;  %6338 = vmatpush1.bf16.msra.mxu1 %v8666_v46  ;;  %v8740_v23 = vld [vmem:[%s13575_s5 + $0x82c] ss:$16 sps:$4 sm:$0xff]   ;;  %v8735_v46 = vld [vmem:[%s13575_s5 + $0x820] ss:$16 sps:$4 sm:$0xff]  }
 0x2d8   :  { %5995 = vmatprep.subr.bf16.mxu0 %v8671_v58  ;;  %6339 = vmatprep.subr.bf16.mxu1 %v8674_v44  ;;  %v8738_v58 = vld [vmem:[%s13575_s5 + $0x828] ss:$16 sps:$4 sm:$0xff]   ;;  %v8743_v44 = vld [vmem:[%s13575_s5 + $0x844] ss:$16 sps:$4 sm:$0xff]  }
 0x2db   :  { %5996 = vmatpush1.bf16.msra.mxu0 %v8669_v28  ;;  %6340 = vmatpush1.bf16.msra.mxu1 %v8672_v21  ;;  %v8741_v28 = vld [vmem:[%s13575_s5 + $0x840] ss:$16 sps:$4 sm:$0xff]   ;;  %v8749_v21 = vld [vmem:[%s13575_s5 + $0x864] ss:$16 sps:$4 sm:$0xff]  }
 0x2dc   :  { %5997 = vmatprep.subr.bf16.mxu0 %v8677_v25  ;;  %6341 = vmatprep.subr.bf16.mxu1 %v8680_v47  ;;  %v8752_v25 = vld [vmem:[%s13575_s5 + $0x86c] ss:$16 sps:$4 sm:$0xff]   ;;  %v8747_v47 = vld [vmem:[%s13575_s5 + $0x860] ss:$16 sps:$4 sm:$0xff]  }
 0x2df   :  { %5998 = vmatpush1.bf16.msra.mxu0 %v8675_v39  ;;  %6342 = vmatpush1.bf16.msra.mxu1 %v8678_v51  ;;  %v8750_v39 = vld [vmem:[%s13575_s5 + $0x868] ss:$16 sps:$4 sm:$0xff]   ;;  %v8755_v51 = vld [vmem:[%s13575_s5 + $0x884] ss:$16 sps:$4 sm:$0xff]  }
 0x2e0   :  { %5999 = vmatprep.subr.bf16.mxu0 %v8683_v60  ;;  %6343 = vmatprep.subr.bf16.mxu1 %v8686_v52  ;;  %v8758_v60 = vld [vmem:[%s13575_s5 + $0x88c] ss:$16 sps:$4 sm:$0xff]   ;;  %v8753_v52 = vld [vmem:[%s13575_s5 + $0x880] ss:$16 sps:$4 sm:$0xff]  }
 0x2e3   :  { %6000 = vmatpush1.bf16.msra.mxu0 %v8681_v62  ;;  %6344 = vmatpush1.bf16.msra.mxu1 %v8684_v13  ;;  %v8756_v62 = vld [vmem:[%s13575_s5 + $0x888] ss:$16 sps:$4 sm:$0xff]   ;;  %v8761_v13 = vld [vmem:[%s13575_s5 + $0x8a4] ss:$16 sps:$4 sm:$0xff]  }
 0x2e4   :  { %6001 = vmatprep.subr.bf16.mxu0 %v8689_v20  ;;  %6345 = vmatprep.subr.bf16.mxu1 %v8692_v27  ;;  %v8764_v20 = vld [vmem:[%s13575_s5 + $0x8ac] ss:$16 sps:$4 sm:$0xff]   ;;  %v8759_v27 = vld [vmem:[%s13575_s5 + $0x8a0] ss:$16 sps:$4 sm:$0xff]  }
 0x2e7   :  { %6002 = vmatpush1.bf16.msra.mxu0 %v8687_v15  ;;  %6346 = vmatpush1.bf16.msra.mxu1 %v8690_v14  ;;  %v8762_v15 = vld [vmem:[%s13575_s5 + $0x8a8] ss:$16 sps:$4 sm:$0xff]   ;;  %v8767_v14 = vld [vmem:[%s13575_s5 + $0x8c4] ss:$16 sps:$4 sm:$0xff]  }
 0x2e8   :  { %6003 = vmatprep.subr.bf16.mxu0 %v8695_v31  ;;  %6347 = vmatprep.subr.bf16.mxu1 %v8698_v1  ;;  %v8770_v31 = vld [vmem:[%s13575_s5 + $0x8cc] ss:$16 sps:$4 sm:$0xff]   ;;  %v8765_v1 = vld [vmem:[%s13575_s5 + $0x8c0] ss:$16 sps:$4 sm:$0xff]  }
 0x2eb   :  { %6004 = vmatpush1.bf16.msra.mxu0 %v8693_v5  ;;  %6348 = vmatpush1.bf16.msra.mxu1 %v8696_v16  ;;  %v8768_v5 = vld [vmem:[%s13575_s5 + $0x8c8] ss:$16 sps:$4 sm:$0xff]   ;;  %v8773_v16 = vld [vmem:[%s13575_s5 + $0x8e4] ss:$16 sps:$4 sm:$0xff]  }
 0x2ec   :  { %6005 = vmatprep.subr.bf16.mxu0 %v8701_v34  ;;  %6349 = vmatprep.subr.bf16.mxu1 %v8704_v43  ;;  %v8776_v34 = vld [vmem:[%s13575_s5 + $0x8ec] ss:$16 sps:$4 sm:$0xff]   ;;  %v8771_v43 = vld [vmem:[%s13575_s5 + $0x8e0] ss:$16 sps:$4 sm:$0xff]  }
 0x2ef   :  { %6006 = vmatpush1.bf16.msra.mxu0 %v8699_v10  ;;  %6350 = vmatpush1.bf16.msra.mxu1 %v8702_v48  ;;  %v8774_v10 = vld [vmem:[%s13575_s5 + $0x8e8] ss:$16 sps:$4 sm:$0xff]   ;;  %v8779_v48 = vld [vmem:[%s13575_s5 + $0x904] ss:$16 sps:$4 sm:$0xff]  }
 0x2f0   :  { %6007 = vmatprep.subr.bf16.mxu0 %v8707_v41  ;;  %6351 = vmatprep.subr.bf16.mxu1 %v8710_v30  ;;  %v8782_v41 = vld [vmem:[%s13575_s5 + $0x90c] ss:$16 sps:$4 sm:$0xff]   ;;  %v8777_v30 = vld [vmem:[%s13575_s5 + $0x900] ss:$16 sps:$4 sm:$0xff]  }
 0x2f3   :  { %6008 = vmatpush1.bf16.msra.mxu0 %v8705_v38  ;;  %6352 = vmatpush1.bf16.msra.mxu1 %v8708_v59  ;;  %v8780_v38 = vld [vmem:[%s13575_s5 + $0x908] ss:$16 sps:$4 sm:$0xff]   ;;  %v8785_v59 = vld [vmem:[%s13575_s5 + $0x924] ss:$16 sps:$4 sm:$0xff]  }
 0x2f4   :  { %6009 = vmatprep.subr.bf16.mxu0 %v8713_v3  ;;  %6353 = vmatprep.subr.bf16.mxu1 %v8716_v33  ;;  %v8788_v3 = vld [vmem:[%s13575_s5 + $0x92c] ss:$16 sps:$4 sm:$0xff]   ;;  %v8783_v33 = vld [vmem:[%s13575_s5 + $0x920] ss:$16 sps:$4 sm:$0xff]  }
 0x2f7   :  { %6010 = vmatpush1.bf16.msra.mxu0 %v8711_v19  ;;  %6354 = vmatpush1.bf16.msra.mxu1 %v8714_v7  ;;  %v8786_v19 = vld [vmem:[%s13575_s5 + $0x928] ss:$16 sps:$4 sm:$0xff]   ;;  %v8791_v7 = vld [vmem:[%s13575_s5 + $0x944] ss:$16 sps:$4 sm:$0xff]  }
 0x2f8   :  { %6011 = vmatprep.subr.bf16.mxu0 %v8719_v61  ;;  %6355 = vmatprep.subr.bf16.mxu1 %v8722_v54  ;;  %v8794_v61 = vld [vmem:[%s13575_s5 + $0x94c] ss:$16 sps:$4 sm:$0xff]   ;;  %v8789_v54 = vld [vmem:[%s13575_s5 + $0x940] ss:$16 sps:$4 sm:$0xff]  }
 0x2fb   :  { %6012 = vmatpush1.bf16.msra.mxu0 %v8717_v56  ;;  %6356 = vmatpush1.bf16.msra.mxu1 %v8720_v24  ;;  %v8792_v56 = vld [vmem:[%s13575_s5 + $0x948] ss:$16 sps:$4 sm:$0xff]   ;;  %v8797_v24 = vld [vmem:[%s13575_s5 + $0x964] ss:$16 sps:$4 sm:$0xff]  }
 0x2fc   :  { %6013 = vmatprep.subr.bf16.mxu0 %v8725_v37  ;;  %6357 = vmatprep.subr.bf16.mxu1 %v8728_v42  ;;  %v8800_v37 = vld [vmem:[%s13575_s5 + $0x96c] ss:$16 sps:$4 sm:$0xff]   ;;  %v8795_v42 = vld [vmem:[%s13575_s5 + $0x960] ss:$16 sps:$4 sm:$0xff]  }
 0x2ff   :  { %6014 = vmatpush1.bf16.msra.mxu0 %v8723_v9  ;;  %6358 = vmatpush1.bf16.msra.mxu1 %v8726_v45  ;;  %v8798_v9 = vld [vmem:[%s13575_s5 + $0x968] ss:$16 sps:$4 sm:$0xff]   ;;  %v8803_v45 = vld [vmem:[%s13575_s5 + $0x984] ss:$16 sps:$4 sm:$0xff]  }
 0x300   :  { %6026 = vmatprep.subr.bf16.mxu0 %v8731_v55  ;;  %6370 = vmatprep.subr.bf16.mxu1 %v8734_v22  ;;  %v8806_v55 = vld [vmem:[%s13575_s5 + $0x98c] ss:$16 sps:$4 sm:$0xff]   ;;  %v8801_v22 = vld [vmem:[%s13575_s5 + $0x980] ss:$16 sps:$4 sm:$0xff]  }
 0x302   :  { %6016 = vmatmul.mubr.bf16.vlgmr.msra.gmra.mrb[16].mxu0 %v12081_v4  ;;  %6360 = vmatmul.mubr.bf16.vlgmr.msra.gmra.mrb[16].mxu1 %v12081_v4  ;;  %v8746_v4 = vld [vmem:[%s13575_s5 + $0x84c] ss:$16 sps:$4 sm:$0xff]  }
 0x303   :  { %6027 = vmatpush1.bf16.msra.mxu0 %v8729_v50  ;;  %6058 = vmatprep.mubr.bf16.mxu0 %v12193_v53  ;;  %v8804_v50 = vld [vmem:[%s13575_s5 + $0x988] ss:$16 sps:$4 sm:$0xff]  }
 0x304   :  { %6371 = vmatpush1.bf16.msra.mxu1 %v8732_v57  ;;  %6402 = vmatprep.mubr.bf16.mxu1 %v12193_v53  ;;  %v8744_v53 = vld [vmem:[%s13575_s5 + $0x848] ss:$16 sps:$4 sm:$0xff]   ;;  %v8809_v57 = vld [vmem:[%s13575_s5 + $0x9a4] ss:$16 sps:$4 sm:$0xff]  }
 0x305   :  { %6028 = vmatprep.subr.bf16.mxu0 %v8737_v17  ;;  %6372 = vmatprep.subr.bf16.mxu1 %v8740_v23  ;;  %v8812_v17 = vld [vmem:[%s13575_s5 + $0x9ac] ss:$16 sps:$4 sm:$0xff]   ;;  %v8807_v23 = vld [vmem:[%s13575_s5 + $0x9a0] ss:$16 sps:$4 sm:$0xff]  }
 0x307   :  { %6029 = vmatpush1.bf16.msra.mxu0 %v8735_v46  ;;  %v8810_v46 = vld [vmem:[%s13575_s5 + $0x9a8] ss:$16 sps:$4 sm:$0xff]  }
 0x308   :  { %6373 = vmatpush1.bf16.msra.mxu1 %v8738_v58  ;;  %6030 = vmatprep.subr.bf16.mxu0 %v8743_v44  ;;  %v8815_v58 = vld [vmem:[%s13575_s5 + $0x9c4] ss:$16 sps:$4 sm:$0xff]   ;;  %v8818_v44 = vld [vmem:[%s13575_s5 + $0x9cc] ss:$16 sps:$4 sm:$0xff]  }
 0x309   :  { %6374 = vmatprep.subr.bf16.mxu1 %v8746_v4  ;;  %v8813_v4 = vld [vmem:[%s13575_s5 + $0x9c0] ss:$16 sps:$4 sm:$0xff]  }
 0x30b   :  { %6031 = vmatpush1.bf16.msra.mxu0 %v8741_v28  ;;  %v8816_v28 = vld [vmem:[%s13575_s5 + $0x9c8] ss:$16 sps:$4 sm:$0xff]  }
 0x30c   :  { %6375 = vmatpush1.bf16.msra.mxu1 %v8744_v53  ;;  %6032 = vmatprep.subr.bf16.mxu0 %v8749_v21  ;;  %v8821_v53 = vld [vmem:[%s13575_s5 + $0x9e4] ss:$16 sps:$4 sm:$0xff]   ;;  %v8824_v21 = vld [vmem:[%s13575_s5 + $0x9ec] ss:$16 sps:$4 sm:$0xff]  }
 0x30d   :  { %6376 = vmatprep.subr.bf16.mxu1 %v8752_v25  ;;  %v8819_v25 = vld [vmem:[%s13575_s5 + $0x9e0] ss:$16 sps:$4 sm:$0xff]  }
 0x30f   :  { %6033 = vmatpush1.bf16.msra.mxu0 %v8747_v47  ;;  %v8822_v47 = vld [vmem:[%s13575_s5 + $0x9e8] ss:$16 sps:$4 sm:$0xff]  }
 0x310   :  { %6377 = vmatpush1.bf16.msra.mxu1 %v8750_v39  ;;  %6034 = vmatprep.subr.bf16.mxu0 %v8755_v51  ;;  %v8827_v39 = vld [vmem:[%s13575_s5 + $0xa04] ss:$16 sps:$4 sm:$0xff]   ;;  %v8830_v51 = vld [vmem:[%s13575_s5 + $0xa0c] ss:$16 sps:$4 sm:$0xff]  }
 0x311   :  { %6378 = vmatprep.subr.bf16.mxu1 %v8758_v60  ;;  %v8825_v60 = vld [vmem:[%s13575_s5 + $0xa00] ss:$16 sps:$4 sm:$0xff]  }
 0x313   :  { %6035 = vmatpush1.bf16.msra.mxu0 %v8753_v52  ;;  %v8828_v52 = vld [vmem:[%s13575_s5 + $0xa08] ss:$16 sps:$4 sm:$0xff]  }
 0x314   :  { %6379 = vmatpush1.bf16.msra.mxu1 %v8756_v62  ;;  %6036 = vmatprep.subr.bf16.mxu0 %v8761_v13  ;;  %v8833_v62 = vld [vmem:[%s13575_s5 + $0xa24] ss:$16 sps:$4 sm:$0xff]   ;;  %v8836_v13 = vld [vmem:[%s13575_s5 + $0xa2c] ss:$16 sps:$4 sm:$0xff]  }
 0x315   :  { %6380 = vmatprep.subr.bf16.mxu1 %v8764_v20  ;;  %v8831_v20 = vld [vmem:[%s13575_s5 + $0xa20] ss:$16 sps:$4 sm:$0xff]  }
 0x317   :  { %6037 = vmatpush1.bf16.msra.mxu0 %v8759_v27  ;;  %v8834_v27 = vld [vmem:[%s13575_s5 + $0xa28] ss:$16 sps:$4 sm:$0xff]  }
 0x318   :  { %6381 = vmatpush1.bf16.msra.mxu1 %v8762_v15  ;;  %6038 = vmatprep.subr.bf16.mxu0 %v8767_v14  ;;  %v8839_v15 = vld [vmem:[%s13575_s5 + $0xa44] ss:$16 sps:$4 sm:$0xff]   ;;  %v8837_v14 = vld [vmem:[%s13575_s5 + $0xa40] ss:$16 sps:$4 sm:$0xff]  }
 0x319   :  { %6382 = vmatprep.subr.bf16.mxu1 %v8770_v31  ;;  %v8840_v31 = vld [vmem:[%s13575_s5 + $0xa48] ss:$16 sps:$4 sm:$0xff]  }
 0x31b   :  { %6039 = vmatpush1.bf16.msra.mxu0 %v8765_v1  ;;  %v8848_v1 = vld [vmem:[%s13575_s5 + $0xa6c] ss:$16 sps:$4 sm:$0xff]  }
 0x31c   :  { %6383 = vmatpush1.bf16.msra.mxu1 %v8768_v5  ;;  %6040 = vmatprep.subr.bf16.mxu0 %v8773_v16  ;;  %v8843_v5 = vld [vmem:[%s13575_s5 + $0xa60] ss:$16 sps:$4 sm:$0xff]   ;;  %v8846_v16 = vld [vmem:[%s13575_s5 + $0xa68] ss:$16 sps:$4 sm:$0xff]  }
 0x31d   :  { %6384 = vmatprep.subr.bf16.mxu1 %v8776_v34  ;;  %v8851_v34 = vld [vmem:[%s13575_s5 + $0xa84] ss:$16 sps:$4 sm:$0xff]  }
 0x31f   :  { %6041 = vmatpush1.bf16.msra.mxu0 %v8771_v43  ;;  %v8854_v43 = vld [vmem:[%s13575_s5 + $0xa8c] ss:$16 sps:$4 sm:$0xff]  }
 0x320   :  { %6385 = vmatpush1.bf16.msra.mxu1 %v8774_v10  ;;  %6042 = vmatprep.subr.bf16.mxu0 %v8779_v48  ;;  %v8849_v10 = vld [vmem:[%s13575_s5 + $0xa80] ss:$16 sps:$4 sm:$0xff]   ;;  %v8852_v48 = vld [vmem:[%s13575_s5 + $0xa88] ss:$16 sps:$4 sm:$0xff]  }
 0x321   :  { %6386 = vmatprep.subr.bf16.mxu1 %v8782_v41  ;;  %v8857_v41 = vld [vmem:[%s13575_s5 + $0xaa4] ss:$16 sps:$4 sm:$0xff]  }
 0x323   :  { %6043 = vmatpush1.bf16.msra.mxu0 %v8777_v30  ;;  %v8860_v30 = vld [vmem:[%s13575_s5 + $0xaac] ss:$16 sps:$4 sm:$0xff]  }
 0x324   :  { %6387 = vmatpush1.bf16.msra.mxu1 %v8780_v38  ;;  %6044 = vmatprep.subr.bf16.mxu0 %v8785_v59  ;;  %v8855_v38 = vld [vmem:[%s13575_s5 + $0xaa0] ss:$16 sps:$4 sm:$0xff]   ;;  %v8858_v59 = vld [vmem:[%s13575_s5 + $0xaa8] ss:$16 sps:$4 sm:$0xff]  }
 0x325   :  { %6388 = vmatprep.subr.bf16.mxu1 %v8788_v3  ;;  %v8863_v3 = vld [vmem:[%s13575_s5 + $0xac4] ss:$16 sps:$4 sm:$0xff]  }
 0x327   :  { %6045 = vmatpush1.bf16.msra.mxu0 %v8783_v33  ;;  %v8866_v33 = vld [vmem:[%s13575_s5 + $0xacc] ss:$16 sps:$4 sm:$0xff]  }
 0x328   :  { %6389 = vmatpush1.bf16.msra.mxu1 %v8786_v19  ;;  %6046 = vmatprep.subr.bf16.mxu0 %v8791_v7  ;;  %v8861_v19 = vld [vmem:[%s13575_s5 + $0xac0] ss:$16 sps:$4 sm:$0xff]   ;;  %v8864_v7 = vld [vmem:[%s13575_s5 + $0xac8] ss:$16 sps:$4 sm:$0xff]  }
 0x329   :  { %6390 = vmatprep.subr.bf16.mxu1 %v8794_v61  ;;  %v8869_v61 = vld [vmem:[%s13575_s5 + $0xae4] ss:$16 sps:$4 sm:$0xff]  }
 0x32b   :  { %6047 = vmatpush1.bf16.msra.mxu0 %v8789_v54  ;;  %v8872_v54 = vld [vmem:[%s13575_s5 + $0xaec] ss:$16 sps:$4 sm:$0xff]  }
 0x32c   :  { %6391 = vmatpush1.bf16.msra.mxu1 %v8792_v56  ;;  %6048 = vmatprep.subr.bf16.mxu0 %v8797_v24  ;;  %v8867_v56 = vld [vmem:[%s13575_s5 + $0xae0] ss:$16 sps:$4 sm:$0xff]   ;;  %v8870_v24 = vld [vmem:[%s13575_s5 + $0xae8] ss:$16 sps:$4 sm:$0xff]  }
 0x32d   :  { %6392 = vmatprep.subr.bf16.mxu1 %v8800_v37  ;;  %v8875_v37 = vld [vmem:[%s13575_s5 + $0xb04] ss:$16 sps:$4 sm:$0xff]  }
 0x32f   :  { %6049 = vmatpush1.bf16.msra.mxu0 %v8795_v42  ;;  %v8878_v42 = vld [vmem:[%s13575_s5 + $0xb0c] ss:$16 sps:$4 sm:$0xff]  }
 0x330   :  { %6393 = vmatpush1.bf16.msra.mxu1 %v8798_v9  ;;  %6050 = vmatprep.subr.bf16.mxu0 %v8803_v45  ;;  %v8873_v9 = vld [vmem:[%s13575_s5 + $0xb00] ss:$16 sps:$4 sm:$0xff]   ;;  %v8876_v45 = vld [vmem:[%s13575_s5 + $0xb08] ss:$16 sps:$4 sm:$0xff]  }
 0x331   :  { %6394 = vmatprep.subr.bf16.mxu1 %v8806_v55  ;;  %v8881_v55 = vld [vmem:[%s13575_s5 + $0xb24] ss:$16 sps:$4 sm:$0xff]  }
 0x333   :  { %6051 = vmatpush1.bf16.msra.mxu0 %v8801_v22  ;;  %v8884_v22 = vld [vmem:[%s13575_s5 + $0xb2c] ss:$16 sps:$4 sm:$0xff]  }
 0x334   :  { %6395 = vmatpush1.bf16.msra.mxu1 %v8804_v50  ;;  %6052 = vmatprep.subr.bf16.mxu0 %v8809_v57  ;;  %v8879_v50 = vld [vmem:[%s13575_s5 + $0xb20] ss:$16 sps:$4 sm:$0xff]   ;;  %v8882_v57 = vld [vmem:[%s13575_s5 + $0xb28] ss:$16 sps:$4 sm:$0xff]  }
 0x335   :  { %6396 = vmatprep.subr.bf16.mxu1 %v8812_v17  ;;  %v8887_v17 = vld [vmem:[%s13575_s5 + $0xb44] ss:$16 sps:$4 sm:$0xff]  }
 0x337   :  { %6053 = vmatpush1.bf16.msra.mxu0 %v8807_v23  ;;  %v8890_v23 = vld [vmem:[%s13575_s5 + $0xb4c] ss:$16 sps:$4 sm:$0xff]  }
 0x338   :  { %6397 = vmatpush1.bf16.msra.mxu1 %v8810_v46  ;;  %6054 = vmatprep.subr.bf16.mxu0 %v8815_v58  ;;  %v8885_v46 = vld [vmem:[%s13575_s5 + $0xb40] ss:$16 sps:$4 sm:$0xff]   ;;  %v8888_v58 = vld [vmem:[%s13575_s5 + $0xb48] ss:$16 sps:$4 sm:$0xff]  }
 0x339   :  { %6398 = vmatprep.subr.bf16.mxu1 %v8818_v44  ;;  %v8893_v44 = vld [vmem:[%s13575_s5 + $0xb64] ss:$16 sps:$4 sm:$0xff]  }
 0x33b   :  { %6055 = vmatpush1.bf16.msra.mxu0 %v8813_v4  ;;  %v8896_v4 = vld [vmem:[%s13575_s5 + $0xb6c] ss:$16 sps:$4 sm:$0xff]  }
 0x33c   :  { %6399 = vmatpush1.bf16.msra.mxu1 %v8816_v28  ;;  %6056 = vmatprep.subr.bf16.mxu0 %v8821_v53  ;;  %v8891_v28 = vld [vmem:[%s13575_s5 + $0xb60] ss:$16 sps:$4 sm:$0xff]   ;;  %v8894_v53 = vld [vmem:[%s13575_s5 + $0xb68] ss:$16 sps:$4 sm:$0xff]  }
 0x33d   :  { %6400 = vmatprep.subr.bf16.mxu1 %v8824_v21  ;;  %v8899_v21 = vld [vmem:[%s13575_s5 + $0xb84] ss:$16 sps:$4 sm:$0xff]  }
 0x33f   :  { %6057 = vmatpush1.bf16.msra.mxu0 %v8819_v25  ;;  %v8902_v25 = vld [vmem:[%s13575_s5 + $0xb8c] ss:$16 sps:$4 sm:$0xff]  }
 0x340   :  { %6401 = vmatpush1.bf16.msra.mxu1 %v8822_v47  ;;  %6069 = vmatprep.subr.bf16.mxu0 %v8827_v39  ;;  %v8897_v47 = vld [vmem:[%s13575_s5 + $0xb80] ss:$16 sps:$4 sm:$0xff]   ;;  %v8900_v39 = vld [vmem:[%s13575_s5 + $0xb88] ss:$16 sps:$4 sm:$0xff]  }
 0x341   :  { %6413 = vmatprep.subr.bf16.mxu1 %v8830_v51  ;;  %v8905_v51 = vld [vmem:[%s13575_s5 + $0xba4] ss:$16 sps:$4 sm:$0xff]  }
 0x342   :  { %6059 = vmatmul.mubr.bf16.vlgmr.msra.gmra.mrb[16].mxu0 %v12121_v6 }
 0x343   :  { %6403 = vmatmul.mubr.bf16.vlgmr.msra.gmra.mrb[16].mxu1 %v12121_v6  ;;  %6070 = vmatpush1.bf16.msra.mxu0 %v8825_v60  ;;  %v8842_v6 = vld [vmem:[%s13575_s5 + $0xa4c] ss:$16 sps:$4 sm:$0xff]  }
 0x344   :  { %6101 = vmatprep.mubr.bf16.mxu0 %v12195_v32  ;;  %6414 = vmatpush1.bf16.msra.mxu1 %v8828_v52  ;;  %v8908_v60 = vld [vmem:[%s13575_s5 + $0xbac] ss:$16 sps:$4 sm:$0xff]   ;;  %v8903_v52 = vld [vmem:[%s13575_s5 + $0xba0] ss:$16 sps:$4 sm:$0xff]  }
 0x345   :  { %6445 = vmatprep.mubr.bf16.mxu1 %v12195_v32  ;;  %6071 = vmatprep.subr.bf16.mxu0 %v8833_v62  ;;  %v8845_v32 = vld [vmem:[%s13575_s5 + $0xa64] ss:$16 sps:$4 sm:$0xff]   ;;  %v8906_v62 = vld [vmem:[%s13575_s5 + $0xba8] ss:$16 sps:$4 sm:$0xff]  }
 0x346   :  { %6415 = vmatprep.subr.bf16.mxu1 %v8836_v13  ;;  %v8911_v13 = vld [vmem:[%s13575_s5 + $0xbc4] ss:$16 sps:$4 sm:$0xff]  }
 0x347   :  { %6072 = vmatpush1.bf16.msra.mxu0 %v8831_v20  ;;  %v8914_v20 = vld [vmem:[%s13575_s5 + $0xbcc] ss:$16 sps:$4 sm:$0xff]  }
 0x348   :  { %6416 = vmatpush1.bf16.msra.mxu1 %v8834_v27  ;;  %6073 = vmatprep.subr.bf16.mxu0 %v8839_v15  ;;  %v8909_v27 = vld [vmem:[%s13575_s5 + $0xbc0] ss:$16 sps:$4 sm:$0xff]   ;;  %v8912_v15 = vld [vmem:[%s13575_s5 + $0xbc8] ss:$16 sps:$4 sm:$0xff]  }
 0x349   :  { %6417 = vmatprep.subr.bf16.mxu1 %v8842_v6  ;;  %v8917_v6 = vld [vmem:[%s13575_s5 + $0xbe4] ss:$16 sps:$4 sm:$0xff]  }
 0x34b   :  { %6074 = vmatpush1.bf16.msra.mxu0 %v8837_v14  ;;  %v8920_v14 = vld [vmem:[%s13575_s5 + $0xbec] ss:$16 sps:$4 sm:$0xff]  }
 0x34c   :  { %6418 = vmatpush1.bf16.msra.mxu1 %v8840_v31  ;;  %6075 = vmatprep.subr.bf16.mxu0 %v8845_v32  ;;  %v8915_v31 = vld [vmem:[%s13575_s5 + $0xbe0] ss:$16 sps:$4 sm:$0xff]   ;;  %v8918_v32 = vld [vmem:[%s13575_s5 + $0xbe8] ss:$16 sps:$4 sm:$0xff]  }
 0x34d   :  { %6419 = vmatprep.subr.bf16.mxu1 %v8848_v1  ;;  %v8923_v1 = vld [vmem:[%s13575_s5 + $0xc04] ss:$16 sps:$4 sm:$0xff]  }
 0x34f   :  { %6076 = vmatpush1.bf16.msra.mxu0 %v8843_v5  ;;  %v8926_v5 = vld [vmem:[%s13575_s5 + $0xc0c] ss:$16 sps:$4 sm:$0xff]  }
 0x350   :  { %6420 = vmatpush1.bf16.msra.mxu1 %v8846_v16  ;;  %6077 = vmatprep.subr.bf16.mxu0 %v8851_v34  ;;  %v8921_v16 = vld [vmem:[%s13575_s5 + $0xc00] ss:$16 sps:$4 sm:$0xff]   ;;  %v8924_v34 = vld [vmem:[%s13575_s5 + $0xc08] ss:$16 sps:$4 sm:$0xff]  }
 0x351   :  { %6421 = vmatprep.subr.bf16.mxu1 %v8854_v43  ;;  %v8929_v43 = vld [vmem:[%s13575_s5 + $0xc24] ss:$16 sps:$4 sm:$0xff]  }
 0x353   :  { %6078 = vmatpush1.bf16.msra.mxu0 %v8849_v10  ;;  %v8932_v10 = vld [vmem:[%s13575_s5 + $0xc2c] ss:$16 sps:$4 sm:$0xff]  }
 0x354   :  { %6422 = vmatpush1.bf16.msra.mxu1 %v8852_v48  ;;  %6079 = vmatprep.subr.bf16.mxu0 %v8857_v41  ;;  %v8927_v48 = vld [vmem:[%s13575_s5 + $0xc20] ss:$16 sps:$4 sm:$0xff]   ;;  %v8930_v41 = vld [vmem:[%s13575_s5 + $0xc28] ss:$16 sps:$4 sm:$0xff]  }
 0x355   :  { %6423 = vmatprep.subr.bf16.mxu1 %v8860_v30  ;;  %v8935_v30 = vld [vmem:[%s13575_s5 + $0xc44] ss:$16 sps:$4 sm:$0xff]  }
 0x357   :  { %6080 = vmatpush1.bf16.msra.mxu0 %v8855_v38  ;;  %v8933_v38 = vld [vmem:[%s13575_s5 + $0xc40] ss:$16 sps:$4 sm:$0xff]  }
 0x358   :  { %6424 = vmatpush1.bf16.msra.mxu1 %v8858_v59  ;;  %6081 = vmatprep.subr.bf16.mxu0 %v8863_v3  ;;  %v8936_v59 = vld [vmem:[%s13575_s5 + $0xc48] ss:$16 sps:$4 sm:$0xff]   ;;  %v8944_v3 = vld [vmem:[%s13575_s5 + $0xc6c] ss:$16 sps:$4 sm:$0xff]  }
 0x359   :  { %6425 = vmatprep.subr.bf16.mxu1 %v8866_v33  ;;  %v8939_v33 = vld [vmem:[%s13575_s5 + $0xc60] ss:$16 sps:$4 sm:$0xff]  }
 0x35b   :  { %6082 = vmatpush1.bf16.msra.mxu0 %v8861_v19  ;;  %v8942_v19 = vld [vmem:[%s13575_s5 + $0xc68] ss:$16 sps:$4 sm:$0xff]  }
 0x35c   :  { %6426 = vmatpush1.bf16.msra.mxu1 %v8864_v7  ;;  %6083 = vmatprep.subr.bf16.mxu0 %v8869_v61  ;;  %v8947_v7 = vld [vmem:[%s13575_s5 + $0xc84] ss:$16 sps:$4 sm:$0xff]   ;;  %v8950_v61 = vld [vmem:[%s13575_s5 + $0xc8c] ss:$16 sps:$4 sm:$0xff]  }
 0x35d   :  { %6427 = vmatprep.subr.bf16.mxu1 %v8872_v54  ;;  %v8945_v54 = vld [vmem:[%s13575_s5 + $0xc80] ss:$16 sps:$4 sm:$0xff]  }
 0x35f   :  { %6084 = vmatpush1.bf16.msra.mxu0 %v8867_v56  ;;  %v8948_v56 = vld [vmem:[%s13575_s5 + $0xc88] ss:$16 sps:$4 sm:$0xff]  }
 0x360   :  { %6428 = vmatpush1.bf16.msra.mxu1 %v8870_v24  ;;  %6085 = vmatprep.subr.bf16.mxu0 %v8875_v37  ;;  %v8953_v24 = vld [vmem:[%s13575_s5 + $0xca4] ss:$16 sps:$4 sm:$0xff]   ;;  %v8956_v37 = vld [vmem:[%s13575_s5 + $0xcac] ss:$16 sps:$4 sm:$0xff]  }
 0x361   :  { %6429 = vmatprep.subr.bf16.mxu1 %v8878_v42  ;;  %v8951_v42 = vld [vmem:[%s13575_s5 + $0xca0] ss:$16 sps:$4 sm:$0xff]  }
 0x363   :  { %6086 = vmatpush1.bf16.msra.mxu0 %v8873_v9  ;;  %v8954_v9 = vld [vmem:[%s13575_s5 + $0xca8] ss:$16 sps:$4 sm:$0xff]  }
 0x364   :  { %6430 = vmatpush1.bf16.msra.mxu1 %v8876_v45  ;;  %6087 = vmatprep.subr.bf16.mxu0 %v8881_v55  ;;  %v8959_v45 = vld [vmem:[%s13575_s5 + $0xcc4] ss:$16 sps:$4 sm:$0xff]   ;;  %v8962_v55 = vld [vmem:[%s13575_s5 + $0xccc] ss:$16 sps:$4 sm:$0xff]  }
 0x365   :  { %6431 = vmatprep.subr.bf16.mxu1 %v8884_v22  ;;  %v8957_v22 = vld [vmem:[%s13575_s5 + $0xcc0] ss:$16 sps:$4 sm:$0xff]  }
 0x367   :  { %6088 = vmatpush1.bf16.msra.mxu0 %v8879_v50  ;;  %v8960_v50 = vld [vmem:[%s13575_s5 + $0xcc8] ss:$16 sps:$4 sm:$0xff]  }
 0x368   :  { %6432 = vmatpush1.bf16.msra.mxu1 %v8882_v57  ;;  %6089 = vmatprep.subr.bf16.mxu0 %v8887_v17  ;;  %v8965_v57 = vld [vmem:[%s13575_s5 + $0xce4] ss:$16 sps:$4 sm:$0xff]   ;;  %v8968_v17 = vld [vmem:[%s13575_s5 + $0xcec] ss:$16 sps:$4 sm:$0xff]  }
 0x369   :  { %6433 = vmatprep.subr.bf16.mxu1 %v8890_v23  ;;  %v8963_v23 = vld [vmem:[%s13575_s5 + $0xce0] ss:$16 sps:$4 sm:$0xff]  }
 0x36b   :  { %6090 = vmatpush1.bf16.msra.mxu0 %v8885_v46  ;;  %v8966_v46 = vld [vmem:[%s13575_s5 + $0xce8] ss:$16 sps:$4 sm:$0xff]  }
 0x36c   :  { %6434 = vmatpush1.bf16.msra.mxu1 %v8888_v58  ;;  %6091 = vmatprep.subr.bf16.mxu0 %v8893_v44  ;;  %v8971_v58 = vld [vmem:[%s13575_s5 + $0xd04] ss:$16 sps:$4 sm:$0xff]   ;;  %v8974_v44 = vld [vmem:[%s13575_s5 + $0xd0c] ss:$16 sps:$4 sm:$0xff]  }
 0x36d   :  { %6435 = vmatprep.subr.bf16.mxu1 %v8896_v4  ;;  %v8969_v4 = vld [vmem:[%s13575_s5 + $0xd00] ss:$16 sps:$4 sm:$0xff]  }
 0x36f   :  { %6092 = vmatpush1.bf16.msra.mxu0 %v8891_v28  ;;  %v8972_v28 = vld [vmem:[%s13575_s5 + $0xd08] ss:$16 sps:$4 sm:$0xff]  }
 0x370   :  { %6436 = vmatpush1.bf16.msra.mxu1 %v8894_v53  ;;  %6093 = vmatprep.subr.bf16.mxu0 %v8899_v21  ;;  %v8977_v53 = vld [vmem:[%s13575_s5 + $0xd24] ss:$16 sps:$4 sm:$0xff]   ;;  %v8980_v21 = vld [vmem:[%s13575_s5 + $0xd2c] ss:$16 sps:$4 sm:$0xff]  }
 0x371   :  { %6437 = vmatprep.subr.bf16.mxu1 %v8902_v25  ;;  %v8975_v25 = vld [vmem:[%s13575_s5 + $0xd20] ss:$16 sps:$4 sm:$0xff]  }
 0x373   :  { %6094 = vmatpush1.bf16.msra.mxu0 %v8897_v47  ;;  %v8978_v47 = vld [vmem:[%s13575_s5 + $0xd28] ss:$16 sps:$4 sm:$0xff]  }
 0x374   :  { %6438 = vmatpush1.bf16.msra.mxu1 %v8900_v39  ;;  %6095 = vmatprep.subr.bf16.mxu0 %v8905_v51  ;;  %v8983_v39 = vld [vmem:[%s13575_s5 + $0xd44] ss:$16 sps:$4 sm:$0xff]   ;;  %v8986_v51 = vld [vmem:[%s13575_s5 + $0xd4c] ss:$16 sps:$4 sm:$0xff]  }
 0x375   :  { %6439 = vmatprep.subr.bf16.mxu1 %v8908_v60  ;;  %v8981_v60 = vld [vmem:[%s13575_s5 + $0xd40] ss:$16 sps:$4 sm:$0xff]  }
 0x377   :  { %6096 = vmatpush1.bf16.msra.mxu0 %v8903_v52  ;;  %v8984_v52 = vld [vmem:[%s13575_s5 + $0xd48] ss:$16 sps:$4 sm:$0xff]  }
 0x378   :  { %6440 = vmatpush1.bf16.msra.mxu1 %v8906_v62  ;;  %6097 = vmatprep.subr.bf16.mxu0 %v8911_v13  ;;  %v8989_v62 = vld [vmem:[%s13575_s5 + $0xd64] ss:$16 sps:$4 sm:$0xff]   ;;  %v8992_v13 = vld [vmem:[%s13575_s5 + $0xd6c] ss:$16 sps:$4 sm:$0xff]  }
 0x379   :  { %6441 = vmatprep.subr.bf16.mxu1 %v8914_v20  ;;  %v8987_v20 = vld [vmem:[%s13575_s5 + $0xd60] ss:$16 sps:$4 sm:$0xff]  }
 0x37b   :  { %6098 = vmatpush1.bf16.msra.mxu0 %v8909_v27  ;;  %v8990_v27 = vld [vmem:[%s13575_s5 + $0xd68] ss:$16 sps:$4 sm:$0xff]  }
 0x37c   :  { %6442 = vmatpush1.bf16.msra.mxu1 %v8912_v15  ;;  %6099 = vmatprep.subr.bf16.mxu0 %v8917_v6  ;;  %v8995_v15 = vld [vmem:[%s13575_s5 + $0xd84] ss:$16 sps:$4 sm:$0xff]   ;;  %v8998_v6 = vld [vmem:[%s13575_s5 + $0xd8c] ss:$16 sps:$4 sm:$0xff]  }
 0x37d   :  { %6443 = vmatprep.subr.bf16.mxu1 %v8920_v14  ;;  %v8993_v14 = vld [vmem:[%s13575_s5 + $0xd80] ss:$16 sps:$4 sm:$0xff]  }
 0x37f   :  { %6100 = vmatpush1.bf16.msra.mxu0 %v8915_v31  ;;  %v8996_v31 = vld [vmem:[%s13575_s5 + $0xd88] ss:$16 sps:$4 sm:$0xff]  }
 0x380   :  { %6444 = vmatpush1.bf16.msra.mxu1 %v8918_v32  ;;  %6112 = vmatprep.subr.bf16.mxu0 %v8923_v1  ;;  %v9001_v32 = vld [vmem:[%s13575_s5 + $0xda4] ss:$16 sps:$4 sm:$0xff]   ;;  %v9004_v1 = vld [vmem:[%s13575_s5 + $0xdac] ss:$16 sps:$4 sm:$0xff]  }
 0x381   :  { %6456 = vmatprep.subr.bf16.mxu1 %v8926_v5  ;;  %v8999_v5 = vld [vmem:[%s13575_s5 + $0xda0] ss:$16 sps:$4 sm:$0xff]  }
 0x382   :  { %6102 = vmatmul.mubr.bf16.vlgmr.msra.gmra.mrb[16].mxu0 %v12149_v2 }
 0x383   :  { %6446 = vmatmul.mubr.bf16.vlgmr.msra.gmra.mrb[16].mxu1 %v12149_v2  ;;  %6113 = vmatpush1.bf16.msra.mxu0 %v8921_v16  ;;  %v8938_v2 = vld [vmem:[%s13575_s5 + $0xc4c] ss:$16 sps:$4 sm:$0xff]   ;;  %v9002_v16 = vld [vmem:[%s13575_s5 + $0xda8] ss:$16 sps:$4 sm:$0xff]  }
 0x384   :  { %6144 = vmatprep.mubr.bf16.mxu0 %v12197_v26  ;;  %6457 = vmatpush1.bf16.msra.mxu1 %v8924_v34  ;;  %v9007_v34 = vld [vmem:[%s13575_s5 + $0xdc4] ss:$16 sps:$4 sm:$0xff]  }
 0x385   :  { %6488 = vmatprep.mubr.bf16.mxu1 %v12197_v26  ;;  %6114 = vmatprep.subr.bf16.mxu0 %v8929_v43  ;;  %v8941_v26 = vld [vmem:[%s13575_s5 + $0xc64] ss:$16 sps:$4 sm:$0xff]   ;;  %v9010_v43 = vld [vmem:[%s13575_s5 + $0xdcc] ss:$16 sps:$4 sm:$0xff]  }
 0x386   :  { %6458 = vmatprep.subr.bf16.mxu1 %v8932_v10  ;;  %v9005_v10 = vld [vmem:[%s13575_s5 + $0xdc0] ss:$16 sps:$4 sm:$0xff]  }
 0x387   :  { %6115 = vmatpush1.bf16.msra.mxu0 %v8927_v48  ;;  %v9008_v48 = vld [vmem:[%s13575_s5 + $0xdc8] ss:$16 sps:$4 sm:$0xff]  }
 0x388   :  { %6459 = vmatpush1.bf16.msra.mxu1 %v8930_v41  ;;  %6116 = vmatprep.subr.bf16.mxu0 %v8935_v30  ;;  %v9013_v41 = vld [vmem:[%s13575_s5 + $0xde4] ss:$16 sps:$4 sm:$0xff]   ;;  %v9016_v30 = vld [vmem:[%s13575_s5 + $0xdec] ss:$16 sps:$4 sm:$0xff]  }
 0x389   :  { %6460 = vmatprep.subr.bf16.mxu1 %v8938_v2  ;;  %v9011_v2 = vld [vmem:[%s13575_s5 + $0xde0] ss:$16 sps:$4 sm:$0xff]  }
 0x38b   :  { %6117 = vmatpush1.bf16.msra.mxu0 %v8933_v38  ;;  %v9014_v38 = vld [vmem:[%s13575_s5 + $0xde8] ss:$16 sps:$4 sm:$0xff]  }
 0x38c   :  { %6461 = vmatpush1.bf16.msra.mxu1 %v8936_v59  ;;  %6118 = vmatprep.subr.bf16.mxu0 %v8941_v26  ;;  %v9019_v59 = vld [vmem:[%s13575_s5 + $0xe04] ss:$16 sps:$4 sm:$0xff]   ;;  %v9022_v26 = vld [vmem:[%s13575_s5 + $0xe0c] ss:$16 sps:$4 sm:$0xff]  }
 0x38d   :  { %6462 = vmatprep.subr.bf16.mxu1 %v8944_v3  ;;  %v9017_v3 = vld [vmem:[%s13575_s5 + $0xe00] ss:$16 sps:$4 sm:$0xff]  }
 0x38f   :  { %6119 = vmatpush1.bf16.msra.mxu0 %v8939_v33  ;;  %v9020_v33 = vld [vmem:[%s13575_s5 + $0xe08] ss:$16 sps:$4 sm:$0xff]  }
 0x390   :  { %6463 = vmatpush1.bf16.msra.mxu1 %v8942_v19  ;;  %6120 = vmatprep.subr.bf16.mxu0 %v8947_v7  ;;  %v9025_v19 = vld [vmem:[%s13575_s5 + $0xe24] ss:$16 sps:$4 sm:$0xff]   ;;  %v9028_v7 = vld [vmem:[%s13575_s5 + $0xe2c] ss:$16 sps:$4 sm:$0xff]  }
 0x391   :  { %6464 = vmatprep.subr.bf16.mxu1 %v8950_v61  ;;  %v9023_v61 = vld [vmem:[%s13575_s5 + $0xe20] ss:$16 sps:$4 sm:$0xff]  }
 0x393   :  { %6121 = vmatpush1.bf16.msra.mxu0 %v8945_v54  ;;  %v9026_v54 = vld [vmem:[%s13575_s5 + $0xe28] ss:$16 sps:$4 sm:$0xff]  }
 0x394   :  { %6465 = vmatpush1.bf16.msra.mxu1 %v8948_v56  ;;  %6122 = vmatprep.subr.bf16.mxu0 %v8953_v24  ;;  %v9031_v56 = vld [vmem:[%s13575_s5 + $0xe44] ss:$16 sps:$4 sm:$0xff]   ;;  %v9029_v24 = vld [vmem:[%s13575_s5 + $0xe40] ss:$16 sps:$4 sm:$0xff]  }
 0x395   :  { %6466 = vmatprep.subr.bf16.mxu1 %v8956_v37  ;;  %v9032_v37 = vld [vmem:[%s13575_s5 + $0xe48] ss:$16 sps:$4 sm:$0xff]  }
 0x397   :  { %6123 = vmatpush1.bf16.msra.mxu0 %v8951_v42  ;;  %v9040_v42 = vld [vmem:[%s13575_s5 + $0xe6c] ss:$16 sps:$4 sm:$0xff]  }
 0x398   :  { %6467 = vmatpush1.bf16.msra.mxu1 %v8954_v9  ;;  %6124 = vmatprep.subr.bf16.mxu0 %v8959_v45  ;;  %v9035_v9 = vld [vmem:[%s13575_s5 + $0xe60] ss:$16 sps:$4 sm:$0xff]   ;;  %v9038_v45 = vld [vmem:[%s13575_s5 + $0xe68] ss:$16 sps:$4 sm:$0xff]  }
 0x399   :  { %6468 = vmatprep.subr.bf16.mxu1 %v8962_v55  ;;  %v9043_v55 = vld [vmem:[%s13575_s5 + $0xe84] ss:$16 sps:$4 sm:$0xff]  }
 0x39b   :  { %6125 = vmatpush1.bf16.msra.mxu0 %v8957_v22  ;;  %v9046_v22 = vld [vmem:[%s13575_s5 + $0xe8c] ss:$16 sps:$4 sm:$0xff]  }
 0x39c   :  { %6469 = vmatpush1.bf16.msra.mxu1 %v8960_v50  ;;  %6126 = vmatprep.subr.bf16.mxu0 %v8965_v57  ;;  %v9041_v50 = vld [vmem:[%s13575_s5 + $0xe80] ss:$16 sps:$4 sm:$0xff]   ;;  %v9044_v57 = vld [vmem:[%s13575_s5 + $0xe88] ss:$16 sps:$4 sm:$0xff]  }
 0x39d   :  { %6470 = vmatprep.subr.bf16.mxu1 %v8968_v17  ;;  %v9049_v17 = vld [vmem:[%s13575_s5 + $0xea4] ss:$16 sps:$4 sm:$0xff]  }
 0x39f   :  { %6127 = vmatpush1.bf16.msra.mxu0 %v8963_v23  ;;  %v9052_v23 = vld [vmem:[%s13575_s5 + $0xeac] ss:$16 sps:$4 sm:$0xff]  }
 0x3a0   :  { %6471 = vmatpush1.bf16.msra.mxu1 %v8966_v46  ;;  %6128 = vmatprep.subr.bf16.mxu0 %v8971_v58  ;;  %v9047_v46 = vld [vmem:[%s13575_s5 + $0xea0] ss:$16 sps:$4 sm:$0xff]   ;;  %v9050_v58 = vld [vmem:[%s13575_s5 + $0xea8] ss:$16 sps:$4 sm:$0xff]  }
 0x3a1   :  { %6472 = vmatprep.subr.bf16.mxu1 %v8974_v44  ;;  %v9055_v44 = vld [vmem:[%s13575_s5 + $0xec4] ss:$16 sps:$4 sm:$0xff]  }
 0x3a3   :  { %6129 = vmatpush1.bf16.msra.mxu0 %v8969_v4  ;;  %v9058_v4 = vld [vmem:[%s13575_s5 + $0xecc] ss:$16 sps:$4 sm:$0xff]  }
 0x3a4   :  { %6473 = vmatpush1.bf16.msra.mxu1 %v8972_v28  ;;  %6130 = vmatprep.subr.bf16.mxu0 %v8977_v53  ;;  %v9053_v28 = vld [vmem:[%s13575_s5 + $0xec0] ss:$16 sps:$4 sm:$0xff]   ;;  %v9056_v53 = vld [vmem:[%s13575_s5 + $0xec8] ss:$16 sps:$4 sm:$0xff]  }
 0x3a5   :  { %6474 = vmatprep.subr.bf16.mxu1 %v8980_v21  ;;  %v9061_v21 = vld [vmem:[%s13575_s5 + $0xee4] ss:$16 sps:$4 sm:$0xff]  }
 0x3a7   :  { %6131 = vmatpush1.bf16.msra.mxu0 %v8975_v25  ;;  %v9064_v25 = vld [vmem:[%s13575_s5 + $0xeec] ss:$16 sps:$4 sm:$0xff]  }
 0x3a8   :  { %6475 = vmatpush1.bf16.msra.mxu1 %v8978_v47  ;;  %6132 = vmatprep.subr.bf16.mxu0 %v8983_v39  ;;  %v9059_v47 = vld [vmem:[%s13575_s5 + $0xee0] ss:$16 sps:$4 sm:$0xff]   ;;  %v9062_v39 = vld [vmem:[%s13575_s5 + $0xee8] ss:$16 sps:$4 sm:$0xff]  }
 0x3a9   :  { %6476 = vmatprep.subr.bf16.mxu1 %v8986_v51  ;;  %v9067_v51 = vld [vmem:[%s13575_s5 + $0xf04] ss:$16 sps:$4 sm:$0xff]  }
 0x3ab   :  { %6133 = vmatpush1.bf16.msra.mxu0 %v8981_v60  ;;  %v9070_v60 = vld [vmem:[%s13575_s5 + $0xf0c] ss:$16 sps:$4 sm:$0xff]  }
 0x3ac   :  { %6477 = vmatpush1.bf16.msra.mxu1 %v8984_v52  ;;  %6134 = vmatprep.subr.bf16.mxu0 %v8989_v62  ;;  %v9065_v52 = vld [vmem:[%s13575_s5 + $0xf00] ss:$16 sps:$4 sm:$0xff]   ;;  %v9068_v62 = vld [vmem:[%s13575_s5 + $0xf08] ss:$16 sps:$4 sm:$0xff]  }
 0x3ad   :  { %6478 = vmatprep.subr.bf16.mxu1 %v8992_v13  ;;  %v9073_v13 = vld [vmem:[%s13575_s5 + $0xf24] ss:$16 sps:$4 sm:$0xff]  }
 0x3af   :  { %6135 = vmatpush1.bf16.msra.mxu0 %v8987_v20  ;;  %v9076_v20 = vld [vmem:[%s13575_s5 + $0xf2c] ss:$16 sps:$4 sm:$0xff]  }
 0x3b0   :  { %6479 = vmatpush1.bf16.msra.mxu1 %v8990_v27  ;;  %6136 = vmatprep.subr.bf16.mxu0 %v8995_v15  ;;  %v9071_v27 = vld [vmem:[%s13575_s5 + $0xf20] ss:$16 sps:$4 sm:$0xff]   ;;  %v9074_v15 = vld [vmem:[%s13575_s5 + $0xf28] ss:$16 sps:$4 sm:$0xff]  }
 0x3b1   :  { %6480 = vmatprep.subr.bf16.mxu1 %v8998_v6  ;;  %v9079_v6 = vld [vmem:[%s13575_s5 + $0xf44] ss:$16 sps:$4 sm:$0xff]  }
 0x3b3   :  { %6137 = vmatpush1.bf16.msra.mxu0 %v8993_v14  ;;  %v9082_v14 = vld [vmem:[%s13575_s5 + $0xf4c] ss:$16 sps:$4 sm:$0xff]  }
 0x3b4   :  { %6481 = vmatpush1.bf16.msra.mxu1 %v8996_v31  ;;  %6138 = vmatprep.subr.bf16.mxu0 %v9001_v32  ;;  %v9077_v31 = vld [vmem:[%s13575_s5 + $0xf40] ss:$16 sps:$4 sm:$0xff]   ;;  %v9080_v32 = vld [vmem:[%s13575_s5 + $0xf48] ss:$16 sps:$4 sm:$0xff]  }
 0x3b5   :  { %6482 = vmatprep.subr.bf16.mxu1 %v9004_v1  ;;  %v9085_v1 = vld [vmem:[%s13575_s5 + $0xf64] ss:$16 sps:$4 sm:$0xff]  }
 0x3b7   :  { %6139 = vmatpush1.bf16.msra.mxu0 %v8999_v5  ;;  %v9088_v5 = vld [vmem:[%s13575_s5 + $0xf6c] ss:$16 sps:$4 sm:$0xff]  }
 0x3b8   :  { %6483 = vmatpush1.bf16.msra.mxu1 %v9002_v16  ;;  %6140 = vmatprep.subr.bf16.mxu0 %v9007_v34  ;;  %v9083_v16 = vld [vmem:[%s13575_s5 + $0xf60] ss:$16 sps:$4 sm:$0xff]   ;;  %v9086_v34 = vld [vmem:[%s13575_s5 + $0xf68] ss:$16 sps:$4 sm:$0xff]  }
 0x3b9   :  { %6484 = vmatprep.subr.bf16.mxu1 %v9010_v43  ;;  %v9091_v43 = vld [vmem:[%s13575_s5 + $0xf84] ss:$16 sps:$4 sm:$0xff]  }
 0x3bb   :  { %6141 = vmatpush1.bf16.msra.mxu0 %v9005_v10  ;;  %v9094_v10 = vld [vmem:[%s13575_s5 + $0xf8c] ss:$16 sps:$4 sm:$0xff]  }
 0x3bc   :  { %6485 = vmatpush1.bf16.msra.mxu1 %v9008_v48  ;;  %6142 = vmatprep.subr.bf16.mxu0 %v9013_v41  ;;  %v9089_v48 = vld [vmem:[%s13575_s5 + $0xf80] ss:$16 sps:$4 sm:$0xff]   ;;  %v9092_v41 = vld [vmem:[%s13575_s5 + $0xf88] ss:$16 sps:$4 sm:$0xff]  }
 0x3bd   :  { %6486 = vmatprep.subr.bf16.mxu1 %v9016_v30  ;;  %v9097_v30 = vld [vmem:[%s13575_s5 + $0xfa4] ss:$16 sps:$4 sm:$0xff]  }
 0x3bf   :  { %6143 = vmatpush1.bf16.msra.mxu0 %v9011_v2  ;;  %v9100_v2 = vld [vmem:[%s13575_s5 + $0xfac] ss:$16 sps:$4 sm:$0xff]  }
 0x3c0   :  { %6487 = vmatpush1.bf16.msra.mxu1 %v9014_v38  ;;  %6155 = vmatprep.subr.bf16.mxu0 %v9019_v59  ;;  %v9095_v38 = vld [vmem:[%s13575_s5 + $0xfa0] ss:$16 sps:$4 sm:$0xff]   ;;  %v9098_v59 = vld [vmem:[%s13575_s5 + $0xfa8] ss:$16 sps:$4 sm:$0xff]  }
 0x3c1   :  { %6499 = vmatprep.subr.bf16.mxu1 %v9022_v26  ;;  %v9103_v26 = vld [vmem:[%s13575_s5 + $0xfc4] ss:$16 sps:$4 sm:$0xff]  }
 0x3c2   :  { %6145 = vmatmul.mubr.bf16.vlgmr.msra.gmra.mrb[16].mxu0 %v12183_v40 }
 0x3c3   :  { %6489 = vmatmul.mubr.bf16.vlgmr.msra.gmra.mrb[16].mxu1 %v12183_v40  ;;  %6156 = vmatpush1.bf16.msra.mxu0 %v9017_v3  ;;  %v9034_v40 = vld [vmem:[%s13575_s5 + $0xe4c] ss:$16 sps:$4 sm:$0xff]  }
 0x3c4   :  { %6187 = vmatprep.mubr.bf16.mxu0 %v12213_v63  ;;  %6500 = vmatpush1.bf16.msra.mxu1 %v9020_v33  ;;  %v9106_v3 = vld [vmem:[%s13575_s5 + $0xfcc] ss:$16 sps:$4 sm:$0xff]   ;;  %v9101_v33 = vld [vmem:[%s13575_s5 + $0xfc0] ss:$16 sps:$4 sm:$0xff]  }
 0x3c5   :  { %6531 = vmatprep.mubr.bf16.mxu1 %v12213_v63  ;;  %6157 = vmatprep.subr.bf16.mxu0 %v9025_v19  ;;  %v9037_v63 = vld [vmem:[%s13575_s5 + $0xe64] ss:$16 sps:$4 sm:$0xff]   ;;  %v9104_v19 = vld [vmem:[%s13575_s5 + $0xfc8] ss:$16 sps:$4 sm:$0xff]  }
 0x3c6   :  { %6501 = vmatprep.subr.bf16.mxu1 %v9028_v7  ;;  %v9109_v7 = vld [vmem:[%s13575_s5 + $0xfe4] ss:$16 sps:$4 sm:$0xff]  }
 0x3c7   :  { %6158 = vmatpush1.bf16.msra.mxu0 %v9023_v61  ;;  %v9112_v61 = vld [vmem:[%s13575_s5 + $0xfec] ss:$16 sps:$4 sm:$0xff]  }
 0x3c8   :  { %6502 = vmatpush1.bf16.msra.mxu1 %v9026_v54  ;;  %6159 = vmatprep.subr.bf16.mxu0 %v9031_v56  ;;  %v9107_v54 = vld [vmem:[%s13575_s5 + $0xfe0] ss:$16 sps:$4 sm:$0xff]   ;;  %v9110_v56 = vld [vmem:[%s13575_s5 + $0xfe8] ss:$16 sps:$4 sm:$0xff]  }
 0x3c9   :  { %6503 = vmatprep.subr.bf16.mxu1 %v9034_v40  ;;  %v9113_v40 = vld [vmem:[#allocation3 + $0x40] sm:$0xff]  }
 0x3cb   :  { %6160 = vmatpush1.bf16.msra.mxu0 %v9029_v24  ;;  %v9114_v24 = vld [vmem:[#allocation3 + $0xc0] sm:$0xff]  }
 0x3cc   :  { %6504 = vmatpush1.bf16.msra.mxu1 %v9032_v37  ;;  %6161 = vmatprep.subr.bf16.mxu0 %v9037_v63  ;;  %v9115_v37 = vld [vmem:[#allocation3] sm:$0xff]  }
 0x3cd   :  { %6505 = vmatprep.subr.bf16.mxu1 %v9040_v42  ;;  %v9116_v63 = vld [vmem:[#allocation3 + $0x80] sm:$0xff]   ;;  %v9117_v42 = vld [vmem:[#allocation3 + $0x48] sm:$0xff]  }
 0x3cf   :  { %6162 = vmatpush1.bf16.msra.mxu0 %v9035_v9  ;;  %v9118_v9 = vld [vmem:[#allocation3 + $0xc8] sm:$0xff]  }
 0x3d0   :  { %6506 = vmatpush1.bf16.msra.mxu1 %v9038_v45  ;;  %6163 = vmatprep.subr.bf16.mxu0 %v9043_v55  ;;  %v9119_v45 = vld [vmem:[#allocation3 + $0x8] sm:$0xff]  }
 0x3d1   :  { %6507 = vmatprep.subr.bf16.mxu1 %v9046_v22  ;;  %v9120_v55 = vld [vmem:[#allocation3 + $0x88] sm:$0xff]   ;;  %v9121_v22 = vld [vmem:[#allocation3 + $0x50] sm:$0xff]  }
 0x3d3   :  { %6164 = vmatpush1.bf16.msra.mxu0 %v9041_v50  ;;  %v9122_v50 = vld [vmem:[#allocation3 + $0xd0] sm:$0xff]  }
 0x3d4   :  { %6508 = vmatpush1.bf16.msra.mxu1 %v9044_v57  ;;  %6165 = vmatprep.subr.bf16.mxu0 %v9049_v17  ;;  %v9123_v57 = vld [vmem:[#allocation3 + $0x10] sm:$0xff]  }
 0x3d5   :  { %6509 = vmatprep.subr.bf16.mxu1 %v9052_v23  ;;  %v9124_v17 = vld [vmem:[#allocation3 + $0x90] sm:$0xff]   ;;  %v9125_v23 = vld [vmem:[#allocation3 + $0x58] sm:$0xff]  }
 0x3d7   :  { %6166 = vmatpush1.bf16.msra.mxu0 %v9047_v46  ;;  %v9126_v46 = vld [vmem:[#allocation3 + $0xd8] sm:$0xff]  }
 0x3d8   :  { %6510 = vmatpush1.bf16.msra.mxu1 %v9050_v58  ;;  %6167 = vmatprep.subr.bf16.mxu0 %v9055_v44  ;;  %v9127_v58 = vld [vmem:[#allocation3 + $0x18] sm:$0xff]   ;;  %v9129_v44 = vld [vmem:[#allocation3 + $0x60] sm:$0xff]  }
 0x3d9   :  { %6511 = vmatprep.subr.bf16.mxu1 %v9058_v4  ;;  %v9130_v4 = vld [vmem:[#allocation3 + $0xe0] sm:$0xff]  }
 0x3db   :  { %6168 = vmatpush1.bf16.msra.mxu0 %v9053_v28  ;;  %v9131_v28 = vld [vmem:[#allocation3 + $0x20] sm:$0xff]  }
 0x3dc   :  { %6512 = vmatpush1.bf16.msra.mxu1 %v9056_v53  ;;  %6169 = vmatprep.subr.bf16.mxu0 %v9061_v21  ;;  %v9132_v53 = vld [vmem:[#allocation3 + $0xa0] sm:$0xff]   ;;  %v9133_v21 = vld [vmem:[#allocation3 + $0x68] sm:$0xff]  }
 0x3dd   :  { %6513 = vmatprep.subr.bf16.mxu1 %v9064_v25  ;;  %v9134_v25 = vld [vmem:[#allocation3 + $0xe8] sm:$0xff]  }
 0x3df   :  { %6170 = vmatpush1.bf16.msra.mxu0 %v9059_v47  ;;  %v9135_v47 = vld [vmem:[#allocation3 + $0x28] sm:$0xff]  }
 0x3e0   :  { %6514 = vmatpush1.bf16.msra.mxu1 %v9062_v39  ;;  %6171 = vmatprep.subr.bf16.mxu0 %v9067_v51  ;;  %v9136_v39 = vld [vmem:[#allocation3 + $0xa8] sm:$0xff]   ;;  %v9137_v51 = vld [vmem:[#allocation3 + $0x70] sm:$0xff]  }
 0x3e1   :  { %6515 = vmatprep.subr.bf16.mxu1 %v9070_v60  ;;  %v9138_v60 = vld [vmem:[#allocation3 + $0xf0] sm:$0xff]  }
 0x3e3   :  { %6172 = vmatpush1.bf16.msra.mxu0 %v9065_v52  ;;  %v9139_v52 = vld [vmem:[#allocation3 + $0x30] sm:$0xff]  }
 0x3e4   :  { %6516 = vmatpush1.bf16.msra.mxu1 %v9068_v62  ;;  %6173 = vmatprep.subr.bf16.mxu0 %v9073_v13  ;;  %v9140_v62 = vld [vmem:[#allocation3 + $0xb0] sm:$0xff]   ;;  %v9141_v13 = vld [vmem:[#allocation3 + $0x78] sm:$0xff]  }
 0x3e5   :  { %6517 = vmatprep.subr.bf16.mxu1 %v9076_v20  ;;  %v9142_v20 = vld [vmem:[#allocation3 + $0xf8] sm:$0xff]  }
 0x3e7   :  { %6174 = vmatpush1.bf16.msra.mxu0 %v9071_v27  ;;  %v9143_v27 = vld [vmem:[#allocation3 + $0x38] sm:$0xff]  }
 0x3e8   :  { %6518 = vmatpush1.bf16.msra.mxu1 %v9074_v15  ;;  %6175 = vmatprep.subr.bf16.mxu0 %v9079_v6  ;;  %v9144_v15 = vld [vmem:[#allocation3 + $0xb8] sm:$0xff]   ;;  %v13459_v6 = vld [vmem:[#allocation5] sm:$0xff] }
 0x3e9   :  { %6519 = vmatprep.subr.bf16.mxu1 %v9082_v14  ;;  %v13461_v14 = vld [vmem:[#allocation5 + $0x20] sm:$0xff] }
 0x3eb   :  { %6176 = vmatpush1.bf16.msra.mxu0 %v9077_v31  ;;  %v13463_v31 = vld [vmem:[#allocation5 + $0x8] sm:$0xff] }
 0x3ec   :  { %6520 = vmatpush1.bf16.msra.mxu1 %v9080_v32  ;;  %6177 = vmatprep.subr.bf16.mxu0 %v9085_v1  ;;  %v8157_v32 = vcombine.low %v13459_v6, %v13461_v14  ;;  %v8158_v1 = vcombine.high %v13459_v6, %v13461_v14 }
 0x3ed   :  { %6521 = vmatprep.subr.bf16.mxu1 %v9088_v5  ;;  %v13469_v5 = vld [vmem:[#allocation5 + $0x28] sm:$0xff] }
 0x3ef   :  { %6178 = vmatpush1.bf16.msra.mxu0 %v9083_v16  ;;  %v8159_v16 = vcombine.low %v13463_v31, %v13469_v5 }
 0x3f0   :  { %6522 = vmatpush1.bf16.msra.mxu1 %v9086_v34  ;;  %6179 = vmatprep.subr.bf16.mxu0 %v9091_v43  ;;  %v8160_v34 = vcombine.high %v13463_v31, %v13469_v5  ;;  %v3272_v43 = vld [vmem:[%s13576_s6] sm:$0xf]  ;;  %v6996_v31 = vld [vmem:[#allocation5 + $0x120] sm:$0xff]  ;;  %v6993_v5 = vld [vmem:[#allocation5 + $0x108] sm:$0xff] }
 0x3f1   :  { %6523 = vmatprep.subr.bf16.mxu1 %v9094_v10  ;;  %v3277_v10 = vrot.slane %v3272_v43, %v11920_v0 }
 0x3f3   :  { %6180 = vmatpush1.bf16.msra.mxu0 %v9089_v48  ;;  %v6550_v48 = vld [vmem:[%s13577_s7] sm:$0xf] }
 0x3f4   :  { %6524 = vmatpush1.bf16.msra.mxu1 %v9092_v41  ;;  %6181 = vmatprep.subr.bf16.mxu0 %v9097_v30  ;;  %v6580_v41 = vld [vmem:[%s13578_s8] sm:$0xf]  ;;  %v3285_v30 = vrot.slane %v3272_v43, %v11914_v35 }
 0x3f5   :  { %6525 = vmatprep.subr.bf16.mxu1 %v9100_v2  ;;  %v3281_v2 = vrot.slane %v3272_v43, %v11928_v11 }
 0x3f7   :  { %6182 = vmatpush1.bf16.msra.mxu0 %v9095_v38  ;;  %v3289_v38 = vrot.slane %v3272_v43, %v11917_v29 }
 0x3f8   :  { %6526 = vmatpush1.bf16.msra.mxu1 %v9098_v59  ;;  %6183 = vmatprep.subr.bf16.mxu0 %v9103_v26  ;;  %v6555_v26 = vrot.slane %v6550_v48, %v11920_v0 }
 0x3f9   :  { %6527 = vmatprep.subr.bf16.mxu1 %v9106_v3 }
 0x3fb   :  { %6184 = vmatpush1.bf16.msra.mxu0 %v9101_v33  ;;  %v6585_v33 = vrot.slane %v6580_v41, %v11920_v0 }
 0x3fc   :  { %6528 = vmatpush1.bf16.msra.mxu1 %v9104_v19  ;;  %6185 = vmatprep.subr.bf16.mxu0 %v9109_v7  ;;  %v6563_v7 = vrot.slane %v6550_v48, %v11914_v35 }
 0x3fd   :  { %6529 = vmatprep.subr.bf16.mxu1 %v9112_v61 }
 0x3ff   :  { %6186 = vmatpush1.bf16.msra.mxu0 %v9107_v54  ;;  %v6559_v54 = vrot.slane %v6550_v48, %v11928_v11 }
 0x400   :  { %6530 = vmatpush1.bf16.msra.mxu1 %v9110_v56  ;;  %8221 = vmatprep.subr.bf16.mxu0 %v9113_v40  ;;  %v6593_v40 = vrot.slane %v6580_v41, %v11914_v35 }
 0x401   :  { %8243 = vmatprep.subr.bf16.mxu1 %v9114_v24 }
 0x402   :  { %6188 = vmatmul.mubr.bf16.vlgmr.msra.gmra.mrb[16].mxu0 %v12211_v8 }
 0x403   :  { %6532 = vmatmul.mubr.bf16.vlgmr.msra.gmra.mrb[16].mxu1 %v12211_v8  ;;  %8222 = vmatpush3.bf16.msra.mxu0 %v9115_v37  ;;  %v9128_v8 = vld [vmem:[#allocation3 + $0x98] sm:$0xff]  }
 0x404   :  { %8244 = vmatpush3.bf16.msra.mxu1 %v9116_v63  ;;  %8223 = vmatprep.subr.bf16.mxu0 %v9117_v42  ;;  %v6567_v63 = vrot.slane %v6550_v48, %v11917_v29 }
 0x405   :  { %8245 = vmatprep.subr.bf16.mxu1 %v9118_v9 }
 0x407   :  { %8224 = vmatpush3.bf16.msra.mxu0 %v9119_v45  ;;  %v6589_v45 = vrot.slane %v6580_v41, %v11928_v11 }
 0x408   :  { %8246 = vmatpush3.bf16.msra.mxu1 %v9120_v55  ;;  %8225 = vmatprep.subr.bf16.mxu0 %v9121_v22 }
 0x409   :  { %8247 = vmatprep.subr.bf16.mxu1 %v9122_v50 }
 0x40b   :  { %8226 = vmatpush3.bf16.msra.mxu0 %v9123_v57 }
 0x40c   :  { %8248 = vmatpush3.bf16.msra.mxu1 %v9124_v17  ;;  %8227 = vmatprep.subr.bf16.mxu0 %v9125_v23 }
 0x40d   :  { %8249 = vmatprep.subr.bf16.mxu1 %v9126_v46 }
 0x40f   :  { %8228 = vmatpush3.bf16.msra.mxu0 %v9127_v58 }
 0x410   :  { %8250 = vmatpush3.bf16.msra.mxu1 %v9128_v8  ;;  %8229 = vmatprep.subr.bf16.mxu0 %v9129_v44 }
 0x411   :  { %8251 = vmatprep.subr.bf16.mxu1 %v9130_v4 }
 0x413   :  { %8230 = vmatpush3.bf16.msra.mxu0 %v9131_v28 }
 0x414   :  { %8252 = vmatpush3.bf16.msra.mxu1 %v9132_v53  ;;  %8231 = vmatprep.subr.bf16.mxu0 %v9133_v21 }
 0x415   :  { %8253 = vmatprep.subr.bf16.mxu1 %v9134_v25 }
 0x417   :  { %8232 = vmatpush3.bf16.msra.mxu0 %v9135_v47 }
 0x418   :  { %8254 = vmatpush3.bf16.msra.mxu1 %v9136_v39  ;;  %8233 = vmatprep.subr.bf16.mxu0 %v9137_v51 }
 0x419   :  { %8255 = vmatprep.subr.bf16.mxu1 %v9138_v60  ;;  %v6597_v60 = vrot.slane %v6580_v41, %v11917_v29 }
 0x41b   :  { %8234 = vmatpush3.bf16.msra.mxu0 %v9139_v52 }
 0x41c   :  { %8256 = vmatpush3.bf16.msra.mxu1 %v9140_v62  ;;  %8235 = vmatprep.subr.bf16.mxu0 %v9141_v13 }
 0x41d   :  { %8257 = vmatprep.subr.bf16.mxu1 %v9142_v20 }
 0x41f   :  { %8236 = vmatpush3.bf16.msra.mxu0 %v9143_v27 }
 0x420   :  { %8258 = vmatpush3.bf16.msra.mxu1 %v9144_v15  ;;  %7386 = vmatprep.subr.bf16.mxu0 %v8158_v1 }
 0x421   :  { %7429 = vmatprep.subr.bf16.mxu1 %v8160_v34 }
 0x4d5   :  { %v6189_v59 = vpop.f32.mrb[16].mxu0 }
 0x4d6   :  { %v8265_v3 = vadd.f32 %v6189_v59, %v3277_v10  ;;  %v6533_v19 = vpop.f32.mrb[16].mxu1  ;;  %v6191_v61 = vpop.f32.mrb[17].mxu0 }
 0x4d7   :  { %v8269_v56 = vadd.f32 %v6533_v19, %v3285_v30  ;;  %v8266_v24 = vadd.f32 %v6191_v61, %v3281_v2  ;;  %v6535_v37 = vpop.f32.mrb[17].mxu1  ;;  %v6193_v42 = vpop.f32.mrb[18].mxu0  ;;  %v6969_v19 = vld [vmem:[#allocation5 + $0x48] sm:$0xff] }
 0x4d8   :  { %v6542_v9 = vmax.f32 %v8265_v3, 0.0  ;;  %v8270_v55 = vadd.f32 %v6535_v37, %v3289_v38  ;;  %v8267_v22 = vadd.f32 %v6193_v42, %v3277_v10  ;;  %v6537_v50 = vpop.f32.mrb[18].mxu1  ;;  %v6195_v57 = vpop.f32.mrb[19].mxu0  ;;  %v6973_v61 = vld [vmem:[#allocation5 + $0x68] sm:$0xff] }
 0x4d9   :  { %v6544_v17 = vmax.f32 %v8269_v56, 0.0  ;;  %v6543_v23 = vmax.f32 %v8266_v24, 0.0  ;;  %v8271_v46 = vadd.f32 %v6537_v50, %v3285_v30  ;;  %v8268_v58 = vadd.f32 %v6195_v57, %v3281_v2  ;;  %v6539_v8 = vpop.f32.mrb[19].mxu1  ;;  %v6968_v30 = vld [vmem:[#allocation5 + $0x40] sm:$0xff]  ;;  %v6977_v37 = vld [vmem:[#allocation5 + $0x88] sm:$0xff] }
 0x4da   :  { %v6572_v44 = vmul.f32 %v6555_v26, %v6542_v9  ;;  %v6545_v4 = vmax.f32 %v8270_v55, 0.0  ;;  %v6546_v28 = vmax.f32 %v8267_v22, 0.0  ;;  %v8272_v53 = vadd.f32 %v6539_v8, %v3289_v38  ;;  %v6972_v2 = vld [vmem:[#allocation5 + $0x60] sm:$0xff]  ;;  %v6985_v50 = vld [vmem:[#allocation5 + $0xc8] sm:$0xff] }
 0x4db   :  { %v6574_v21 = vmul.f32 %v6563_v7, %v6544_v17  ;;  %v6573_v25 = vmul.f32 %v6559_v54, %v6543_v23  ;;  %v6548_v47 = vmax.f32 %v8271_v46, 0.0  ;;  %v6547_v39 = vmax.f32 %v8268_v58, 0.0  ;;  %v6984_v55 = vld [vmem:[#allocation5 + $0xc0] sm:$0xff]  ;;  %v6989_v57 = vld [vmem:[#allocation5 + $0xe8] sm:$0xff] }
 0x4dc   :  { %v6575_v51 = vmul.f32 %v6567_v63, %v6545_v4  ;;  %v6576_v52 = vmul.f32 %v6555_v26, %v6546_v28  ;;  %v6549_v62 = vmax.f32 %v8272_v53, 0.0  ;;  %v6602_v27 = vadd.f32 %v6585_v33, %v6572_v44  ;;  %v6988_v22 = vld [vmem:[#allocation5 + $0xe0] sm:$0xff]  ;;  %v7001_v53 = vld [vmem:[#allocation5 + $0x148] sm:$0xff] }
 0x4dd   :  { %v6578_v13 = vmul.f32 %v6563_v7, %v6548_v47  ;;  %v6577_v20 = vmul.f32 %v6559_v54, %v6547_v39  ;;  %v6604_v34 = vadd.f32 %v6593_v40, %v6574_v21  ;;  %v6603_v43 = vadd.f32 %v6589_v45, %v6573_v25  ;;  %v6976_v54 = vld [vmem:[#allocation5 + $0x80] sm:$0xff]  ;;  %v7005_v21 = vld [vmem:[#allocation5 + $0x168] sm:$0xff] }
 0x4de   :  { %v6606_v15 = vadd.f32 %v6585_v33, %v6576_v52  ;;  %v6579_v1 = vmul.f32 %v6567_v63, %v6549_v62  ;;  %v6605_v38 = vadd.f32 %v6597_v60, %v6575_v51  ;;  %v8166_v24 = vcombine.high %v6968_v30, %v6972_v2  ;;  %v6980_v33 = vld [vmem:[#allocation5 + $0xa0] sm:$0xff] }
 0x4df   :  { %v6608_v10 = vadd.f32 %v6593_v40, %v6578_v13  ;;  %v6607_v48 = vadd.f32 %v6589_v45, %v6577_v20  ;;  %v8168_v7 = vcombine.high %v6969_v19, %v6973_v61  ;;  %v6981_v40 = vld [vmem:[#allocation5 + $0xa8] sm:$0xff]  ;;  %v8165_v63 = vcombine.low %v6968_v30, %v6972_v2  ;;  %v6992_v23 = vld [vmem:[#allocation5 + $0x100] sm:$0xff] }
 0x4e0   :  { %v6610_v59 = vpack.c.bf16 %v6606_v15, %v6602_v27  ;;  %v6609_v3 = vadd.f32 %v6597_v60, %v6579_v1  ;;  %v8167_v42 = vcombine.low %v6969_v19, %v6973_v61  ;;  %v8174_v9 = vcombine.high %v6976_v54, %v6980_v33  ;;  %v7000_v4 = vld [vmem:[#allocation5 + $0x140] sm:$0xff]  ;;  %v7009_v20 = vld [vmem:[#allocation5 + $0x188] sm:$0xff]  ;;  %v6962_v61 = vld [vmem:[#allocation5 + $0x10] sm:$0xff] }
 0x4e1   :  { %v6612_v56 = vpack.c.bf16 %v6608_v10, %v6604_v34  ;;  %v6611_v41 = vpack.c.bf16 %v6607_v48, %v6603_v43  ;;  %v8176_v45 = vcombine.high %v6977_v37, %v6981_v40  ;;  %v8173_v17 = vcombine.low %v6976_v54, %v6980_v33  ;;  %v7004_v28 = vld [vmem:[#allocation5 + $0x160] sm:$0xff]  ;;  %v7013_v15 = vld [vmem:[#allocation5 + $0x1a8] sm:$0xff]  ;;  %v6967_v54 = vld [vmem:[#allocation5 + $0x38] sm:$0xff] }
 0x4e2   :  { %v6613_v26 = vpack.c.bf16 %v6609_v3, %v6605_v38  ;;  %v8175_v6 = vcombine.low %v6977_v37, %v6981_v40  ;;  %v8182_v14 = vcombine.high %v6984_v55, %v6988_v22  ;;  %v8181_v46 = vcombine.low %v6984_v55, %v6988_v22  ;;  %v7008_v62 = vld [vmem:[#allocation5 + $0x180] sm:$0xff]  ;;  %v7017_v30 = vld [vmem:[#allocation5 + $0x1c8] sm:$0xff] }
 0x4e3   :  { %6909 = vmatprep.mubr.bf16.mxu0 %v6611_v41  ;;  %v8183_v58 = vcombine.low %v6985_v50, %v6989_v57  ;;  %v8190_v8 = vcombine.high %v6992_v23, %v6996_v31  ;;  %v8189_v25 = vcombine.low %v6992_v23, %v6996_v31  ;;  %v8198_v39 = vcombine.high %v7000_v4, %v7004_v28  ;;  %v7012_v13 = vld [vmem:[#allocation5 + $0x1a0] sm:$0xff]  ;;  %v7021_v38 = vld [vmem:[#allocation5 + $0x1e8] sm:$0xff]  ;;  %v6963_v41 = vld [vmem:[#allocation5 + $0x18] sm:$0xff] }
 0x4e4   :  { %6950 = vmatprep.mubr.bf16.mxu1 %v6613_v26  ;;  %6910 = vmatmul.mubr.bf16.vlgmr.msra.gmra.mrb[20].mxu0 %v6610_v59  ;;  %v8200_v51 = vcombine.high %v7001_v53, %v7005_v21  ;;  %v8197_v60 = vcombine.low %v7000_v4, %v7004_v28  ;;  %v8199_v52 = vcombine.low %v7001_v53, %v7005_v21  ;;  %v7016_v10 = vld [vmem:[#allocation5 + $0x1c0] sm:$0xff]  ;;  %v9200_v26 = vmov 0   ;;  %v6978_v21 = vld [vmem:[#allocation5 + $0x90] sm:$0xff] }
 0x4e5   :  { %6951 = vmatmul.mubr.bf16.vlgmr.msra.gmra.mrb[20].mxu1 %v6612_v56  ;;  %7387 = vmatpush1.bf16.msra.mxu0 %v8157_v32  ;;  %v8184_v32 = vcombine.high %v6985_v50, %v6989_v57  ;;  %v8206_v27 = vcombine.high %v7008_v62, %v7012_v13  ;;  %v8205_v1 = vcombine.low %v7008_v62, %v7012_v13  ;;  %v7020_v48 = vld [vmem:[#allocation5 + $0x1e0] sm:$0xff]  ;;  %v6966_v56 = vld [vmem:[#allocation5 + $0x30] sm:$0xff] }
 0x4e6   :  { %7430 = vmatpush1.bf16.msra.mxu1 %v8159_v16  ;;  %7388 = vmatprep.subr.bf16.mxu0 %v8166_v24  ;;  %v6997_v16 = vld [vmem:[#allocation5 + $0x128] sm:$0xff]  ;;  %v8207_v34 = vcombine.low %v7009_v20, %v7013_v15  ;;  %v8208_v43 = vcombine.high %v7009_v20, %v7013_v15  ;;  %v8214_v2 = vcombine.high %v7016_v10, %v7020_v48  ;;  %v6986_v13 = vld [vmem:[#allocation5 + $0xd0] sm:$0xff]  ;;  %v6991_v15 = vld [vmem:[#allocation5 + $0xf8] sm:$0xff] }
 0x4e7   :  { %7431 = vmatprep.subr.bf16.mxu1 %v8168_v7  ;;  %v8192_v44 = vcombine.high %v6993_v5, %v6997_v16  ;;  %v8191_v47 = vcombine.low %v6993_v5, %v6997_v16  ;;  %v8213_v59 = vcombine.low %v7016_v10, %v7020_v48  ;;  %v8215_v3 = vcombine.low %v7017_v30, %v7021_v38  ;;  %v6970_v16 = vld [vmem:[#allocation5 + $0x50] sm:$0xff] }
 0x4e8   :  { %v8216_v19 = vcombine.high %v7017_v30, %v7021_v38  ;;  %7418 = vmatprep.mubr.bf16.mxu0 %v9200_v26  ;;  %v8161_v24 = vcombine.low %v6962_v61, %v6966_v56  ;;  %v8162_v7 = vcombine.high %v6962_v61, %v6966_v56  ;;  %7461 = vmatprep.mubr.bf16.mxu1 %v9200_v26  ;;  %v6990_v20 = vld [vmem:[#allocation5 + $0xf0] sm:$0xff]  ;;  %v6999_v38 = vld [vmem:[#allocation5 + $0x138] sm:$0xff] }
 0x4e9   :  { %7389 = vmatpush1.bf16.msra.mxu0 %v8165_v63  ;;  %v8163_v33 = vcombine.low %v6963_v41, %v6967_v54  ;;  %v8164_v37 = vcombine.high %v6963_v41, %v6967_v54  ;;  %v6994_v48 = vld [vmem:[#allocation5 + $0x110] sm:$0xff] }
 0x4ea   :  { %7432 = vmatpush1.bf16.msra.mxu1 %v8167_v42  ;;  %7390 = vmatprep.subr.bf16.mxu0 %v8174_v9  ;;  %v8124_v42 = vld [vmem:[%s13580_s10] ss:$0 sm:$0xff] }
 0x4eb   :  { %7433 = vmatprep.subr.bf16.mxu1 %v8176_v45  ;;  %v6998_v30 = vld [vmem:[#allocation5 + $0x130] sm:$0xff] }
 0x4ec   :  { %v7002_v56 = vld [vmem:[#allocation5 + $0x150] sm:$0xff] }
 0x4ed   :  { %7391 = vmatpush1.bf16.msra.mxu0 %v8173_v17  ;;  %v7006_v41 = vld [vmem:[#allocation5 + $0x170] sm:$0xff] }
 0x4ee   :  { %7434 = vmatpush1.bf16.msra.mxu1 %v8175_v6  ;;  %7392 = vmatprep.subr.bf16.mxu0 %v8182_v14 }
 0x4ef   :  { %7435 = vmatprep.subr.bf16.mxu1 %v8184_v32 }
 0x4f1   :  { %7393 = vmatpush1.bf16.msra.mxu0 %v8181_v46  ;;  %v6974_v46 = vld [vmem:[#allocation5 + $0x70] sm:$0xff] }
 0x4f2   :  { %7436 = vmatpush1.bf16.msra.mxu1 %v8183_v58  ;;  %7394 = vmatprep.subr.bf16.mxu0 %v8190_v8  ;;  %v6971_v58 = vld [vmem:[#allocation5 + $0x58] sm:$0xff]  ;;  %v8170_v28 = vcombine.high %v6970_v16, %v6974_v46 }
 0x4f3   :  { %7437 = vmatprep.subr.bf16.mxu1 %v8192_v44  ;;  %v6975_v8 = vld [vmem:[#allocation5 + $0x78] sm:$0xff] }
 0x4f4   :  { %v8172_v53 = vcombine.high %v6971_v58, %v6975_v8 }
 0x4f5   :  { %7395 = vmatpush1.bf16.msra.mxu0 %v8189_v25  ;;  %v6982_v25 = vld [vmem:[#allocation5 + $0xb0] sm:$0xff] }
 0x4f6   :  { %7438 = vmatpush1.bf16.msra.mxu1 %v8191_v47  ;;  %7396 = vmatprep.subr.bf16.mxu0 %v8198_v39  ;;  %v6979_v47 = vld [vmem:[#allocation5 + $0x98] sm:$0xff] }
 0x4f7   :  { %7439 = vmatprep.subr.bf16.mxu1 %v8200_v51  ;;  %v6983_v39 = vld [vmem:[#allocation5 + $0xb8] sm:$0xff]  ;;  %v8169_v51 = vcombine.low %v6970_v16, %v6974_v46 }
 0x4f8   :  { %v8180_v62 = vcombine.high %v6979_v47, %v6983_v39 }
 0x4f9   :  { %7397 = vmatpush1.bf16.msra.mxu0 %v8197_v60  ;;  %v8171_v60 = vcombine.low %v6971_v58, %v6975_v8  ;;  %v7024_v58 = vld [vmem:[%s13582_s12] sm:$0xff] }
 0x4fa   :  { %7440 = vmatpush1.bf16.msra.mxu1 %v8199_v52  ;;  %7398 = vmatprep.subr.bf16.mxu0 %v8206_v27  ;;  %v8178_v52 = vcombine.high %v6978_v21, %v6982_v25  ;;  %v6987_v27 = vld [vmem:[#allocation5 + $0xd8] sm:$0xff]  ;;  %v7029_v8 = vrot.slane %v7024_v58, %v11920_v0 }
 0x4fb   :  { %7441 = vmatprep.subr.bf16.mxu1 %v8208_v43  ;;  %v8186_v43 = vcombine.high %v6986_v13, %v6990_v20  ;;  %v8188_v10 = vcombine.high %v6987_v27, %v6991_v15 }
 0x4fd   :  { %7399 = vmatpush1.bf16.msra.mxu0 %v8205_v1  ;;  %v8177_v1 = vcombine.low %v6978_v21, %v6982_v25 }
 0x4fe   :  { %7442 = vmatpush1.bf16.msra.mxu1 %v8207_v34  ;;  %7400 = vmatprep.subr.bf16.mxu0 %v8214_v2  ;;  %v8179_v34 = vcombine.low %v6979_v47, %v6983_v39  ;;  %v6995_v2 = vld [vmem:[#allocation5 + $0x118] sm:$0xff] }
 0x4ff   :  { %7443 = vmatprep.subr.bf16.mxu1 %v8216_v19  ;;  %v8194_v19 = vcombine.high %v6994_v48, %v6998_v30  ;;  %v8196_v61 = vcombine.high %v6995_v2, %v6999_v38  ;;  %v8195_v54 = vcombine.low %v6995_v2, %v6999_v38 }
 0x501   :  { %7401 = vmatpush1.bf16.msra.mxu0 %v8213_v59  ;;  %v8185_v59 = vcombine.low %v6986_v13, %v6990_v20 }
 0x502   :  { %7444 = vmatpush1.bf16.msra.mxu1 %v8215_v3  ;;  %7472 = vmatprep.subr.bf16.mxu0 %v8162_v7  ;;  %v8187_v3 = vcombine.low %v6987_v27, %v6991_v15  ;;  %v8193_v7 = vcombine.low %v6994_v48, %v6998_v30  ;;  %v7045_v15 = vrot.slane %v7024_v58, %v11955_v18 }
 0x503   :  { %7515 = vmatprep.subr.bf16.mxu1 %v8164_v37 }
 0x5b7   :  { %v8237_v40 = vpop.f32.mrb[20].mxu0 }
 0x5b8   :  { %v8259_v63 = vpop.f32.mrb[20].mxu1  ;;  %v8238_v9 = vpop.f32.mrb[21].mxu0 }
 0x5b9   :  { %v8239_v45 = vadd.f32 %v8238_v9, %v8237_v40  ;;  %v8260_v55 = vpop.f32.mrb[21].mxu1  ;;  %v8240_v22 = vpop.f32.mrb[22].mxu0  ;;  %v7010_v40 = vld [vmem:[#allocation5 + $0x190] sm:$0xff]  ;;  %v7015_v9 = vld [vmem:[#allocation5 + $0x1b8] sm:$0xff] }
 0x5ba   :  { %v8261_v50 = vadd.f32 %v8260_v55, %v8259_v63  ;;  %v8262_v57 = vpop.f32.mrb[22].mxu1  ;;  %v8241_v17 = vpop.f32.mrb[23].mxu0  ;;  %v7014_v63 = vld [vmem:[#allocation5 + $0x1b0] sm:$0xff] }
 0x5bb   :  { %v6912_v6 = vadd.f32 %v8239_v45, %v8124_v42  ;;  %v8242_v14 = vadd.f32 %v8241_v17, %v8240_v22  ;;  %v8263_v32 = vpop.f32.mrb[23].mxu1  ;;  %v8201_v45 = vcombine.low %v7002_v56, %v7006_v41  ;;  %v8210_v22 = vcombine.high %v7010_v40, %v7014_v63  ;;  %v7022_v17 = vld [vmem:[#allocation5 + $0x1f0] sm:$0xff] }
 0x5bc   :  { %v8264_v23 = vadd.f32 %v8263_v32, %v8262_v57  ;;  %v7018_v57 = vld [vmem:[#allocation5 + $0x1d0] sm:$0xff]  ;;  %v8209_v32 = vcombine.low %v7010_v40, %v7014_v63 }
 0x5bd   :  { %v6953_v31 = vadd.f32 %v8261_v50, %v6912_v6  ;;  %v6915_v5 = vadd.f32 %v8242_v14, %v8124_v42  ;;  %v7011_v42 = vld [vmem:[#allocation5 + $0x198] sm:$0xff]  ;;  %v8217_v16 = vcombine.low %v7018_v57, %v7022_v17 }
 0x5be   :  { %v8212_v50 = vcombine.high %v7011_v42, %v7015_v9  ;;  %v7019_v6 = vld [vmem:[#allocation5 + $0x1d8] sm:$0xff] }
 0x5bf   :  { %v6956_v44 = vadd.f32 %v8264_v23, %v6915_v5  ;;  %v7023_v14 = vld [vmem:[#allocation5 + $0x1f8] sm:$0xff]  ;;  %v8211_v23 = vcombine.low %v7011_v42, %v7015_v9 }
 0x5c0   :  { %v8220_v5 = vcombine.high %v7019_v6, %v7023_v14  ;;  %v8219_v46 = vcombine.low %v7019_v6, %v7023_v14 }
 0x5c1   :  { %v13505_v4 = vpack.c.bf16 %v6956_v44, %v6953_v31  ;;  %v8218_v31 = vcombine.high %v7018_v57, %v7022_v17  ;;  %v7037_v44 = vrot.slane %v7024_v58, %v11914_v35 }
 0x5c3   :  { %7419 = vmatmul.mubr.bf16.vlgmr.msra.gmra.mrb[24].mxu0 %v13505_v4  ;;  %7462 = vmatmul.mubr.bf16.vlgmr.msra.gmra.mrb[24].mxu1 %v13505_v4 }
 0x5c4   :  { %7473 = vmatpush1.bf16.msra.mxu0 %v8161_v24  ;;  %7516 = vmatpush1.bf16.msra.mxu1 %v8163_v33  ;;  %v7007_v24 = vld [vmem:[#allocation5 + $0x178] sm:$0xff]  ;;  %v8202_v33 = vcombine.high %v7002_v56, %v7006_v41 }
 0x5c5   :  { %7474 = vmatprep.subr.bf16.mxu0 %v8170_v28  ;;  %7517 = vmatprep.subr.bf16.mxu1 %v8172_v53  ;;  %v7033_v28 = vrot.slane %v7024_v58, %v11928_v11  ;;  %v7041_v53 = vrot.slane %v7024_v58, %v11917_v29 }
 0x5c6   :  { %7504 = vmatprep.mubr.bf16.mxu0 %v9200_v26  ;;  %7547 = vmatprep.mubr.bf16.mxu1 %v9200_v26  ;;  %v7003_v26 = vld [vmem:[#allocation5 + $0x158] sm:$0xff] }
 0x5c7   :  { %v8204_v37 = vcombine.high %v7003_v26, %v7007_v24  ;;  %v8203_v55 = vcombine.low %v7003_v26, %v7007_v24 }
 0x5c8   :  { %7475 = vmatpush1.bf16.msra.mxu0 %v8169_v51  ;;  %7518 = vmatpush1.bf16.msra.mxu1 %v8171_v60 }
 0x5c9   :  { %7476 = vmatprep.subr.bf16.mxu0 %v8178_v52  ;;  %7519 = vmatprep.subr.bf16.mxu1 %v8180_v62 }
 0x5cc   :  { %7477 = vmatpush1.bf16.msra.mxu0 %v8177_v1  ;;  %7520 = vmatpush1.bf16.msra.mxu1 %v8179_v34  ;;  %v7053_v1 = vrot.slane %v7024_v58, %v12003_v12  ;;  %v7049_v34 = vrot.slane %v7024_v58, %v11960_v36 }
 0x5cd   :  { %7478 = vmatprep.subr.bf16.mxu0 %v8186_v43  ;;  %7521 = vmatprep.subr.bf16.mxu1 %v8188_v10  ;;  %v7057_v43 = vrot.slane %v7024_v58, %v12006_v49 }
 0x5d0   :  { %7479 = vmatpush1.bf16.msra.mxu0 %v8185_v59  ;;  %7522 = vmatpush1.bf16.msra.mxu1 %v8187_v3 }
 0x5d1   :  { %7480 = vmatprep.subr.bf16.mxu0 %v8194_v19  ;;  %7523 = vmatprep.subr.bf16.mxu1 %v8196_v61 }
 0x5d4   :  { %7481 = vmatpush1.bf16.msra.mxu0 %v8193_v7  ;;  %7524 = vmatpush1.bf16.msra.mxu1 %v8195_v54 }
 0x5d5   :  { %7482 = vmatprep.subr.bf16.mxu0 %v8202_v33  ;;  %7525 = vmatprep.subr.bf16.mxu1 %v8204_v37 }
 0x5d8   :  { %7483 = vmatpush1.bf16.msra.mxu0 %v8201_v45  ;;  %7526 = vmatpush1.bf16.msra.mxu1 %v8203_v55 }
 0x5d9   :  { %7484 = vmatprep.subr.bf16.mxu0 %v8210_v22  ;;  %7527 = vmatprep.subr.bf16.mxu1 %v8212_v50 }
 0x5dc   :  { %7485 = vmatpush1.bf16.msra.mxu0 %v8209_v32  ;;  %7528 = vmatpush1.bf16.msra.mxu1 %v8211_v23 }
 0x5dd   :  { %7486 = vmatprep.subr.bf16.mxu0 %v8218_v31  ;;  %7529 = vmatprep.subr.bf16.mxu1 %v8220_v5 }
 0x5e0   :  { %7487 = vmatpush1.bf16.msra.mxu0 %v8217_v16  ;;  %7530 = vmatpush1.bf16.msra.mxu1 %v8219_v46 }
 0x5e3   :  { %7505 = vmatmul.mubr.bf16.vlgmr.msra.gmra.mrb[28].mxu0 %v13505_v4  ;;  %7548 = vmatmul.mubr.bf16.vlgmr.msra.gmra.mrb[28].mxu1 %v13505_v4 }
 0x696   :  { %v7420_v21 = vpop.f32.mrb[24].mxu0  ;;  %v7463_v25 = vpop.f32.mrb[24].mxu1 }
 0x697   :  { %v7421_v47 = vadd.f32 %v7420_v21, %v7029_v8  ;;  %v7464_v39 = vadd.f32 %v7463_v25, %v7037_v44  ;;  %v7422_v51 = vpop.f32.mrb[25].mxu0  ;;  %v7465_v60 = vpop.f32.mrb[25].mxu1 }
 0x698   :  { %v7423_v52 = vadd.f32 %v7422_v51, %v7033_v28  ;;  %v7466_v4 = vadd.f32 %v7465_v60, %v7041_v53  ;;  %v7424_v62 = vpop.f32.mrb[26].mxu0  ;;  %v7467_v13 = vpop.f32.mrb[26].mxu1 }
 0x699   :  { %7558 = vst [vmem:[%s13583_s13] sm:$0xff] %v7421_v47  ;;  %7560 = vst [vmem:[%s13583_s13 + $0x10] sm:$0xff] %v7464_v39  ;;  %v7425_v35 = vadd.f32 %v7424_v62, %v7029_v8  ;;  %v7468_v29 = vadd.f32 %v7467_v13, %v7037_v44  ;;  %v7426_v0 = vpop.f32.mrb[27].mxu0  ;;  %v7469_v11 = vpop.f32.mrb[27].mxu1 }
 0x69a   :  { %7559 = vst [vmem:[%s13583_s13 + $0x8] sm:$0xff] %v7423_v52  ;;  %7561 = vst [vmem:[%s13583_s13 + $0x18] sm:$0xff] %v7466_v4  ;;  %v7427_v20 = vadd.f32 %v7426_v0, %v7033_v28  ;;  %v7470_v27 = vadd.f32 %v7469_v11, %v7041_v53 }
 0x69b   :  { %7566 = vst [vmem:[%s13583_s13 + $0x40] sm:$0xff] %v7425_v35  ;;  %7568 = vst [vmem:[%s13583_s13 + $0x50] sm:$0xff] %v7468_v29 }
 0x69c   :  { %7567 = vst [vmem:[%s13583_s13 + $0x48] sm:$0xff] %v7427_v20  ;;  %7569 = vst [vmem:[%s13583_s13 + $0x58] sm:$0xff] %v7470_v27 }
 0x6b6   :  { %v7506_v10 = vpop.f32.mrb[28].mxu0  ;;  %v7549_v48 = vpop.f32.mrb[28].mxu1 }
 0x6b7   :  { %v7507_v30 = vadd.f32 %v7506_v10, %v7045_v15  ;;  %v7550_v2 = vadd.f32 %v7549_v48, %v7053_v1  ;;  %v7508_v38 = vpop.f32.mrb[29].mxu0  ;;  %v7551_v59 = vpop.f32.mrb[29].mxu1 }
 0x6b8   :  { %v7509_v3 = vadd.f32 %v7508_v38, %v7049_v34  ;;  %v7552_v19 = vadd.f32 %v7551_v59, %v7057_v43  ;;  %v7510_v61 = vpop.f32.mrb[30].mxu0  ;;  %v7553_v56 = vpop.f32.mrb[30].mxu1 }
 0x6b9   :  { %7562 = vst [vmem:[%s13583_s13 + $0x20] sm:$0xff] %v7507_v30  ;;  %7564 = vst [vmem:[%s13583_s13 + $0x30] sm:$0xff] %v7550_v2  ;;  %v7511_v18 = vadd.f32 %v7510_v61, %v7045_v15  ;;  %v7554_v36 = vadd.f32 %v7553_v56, %v7053_v1  ;;  %v7512_v12 = vpop.f32.mrb[31].mxu0  ;;  %v7555_v49 = vpop.f32.mrb[31].mxu1 }
 0x6ba   :  { %7563 = vst [vmem:[%s13583_s13 + $0x28] sm:$0xff] %v7509_v3  ;;  %7565 = vst [vmem:[%s13583_s13 + $0x38] sm:$0xff] %v7552_v19  ;;  %v7513_v41 = vadd.f32 %v7512_v12, %v7049_v34  ;;  %v7556_v26 = vadd.f32 %v7555_v49, %v7057_v43 }
 0x6bb   :  { %7570 = vst [vmem:[%s13583_s13 + $0x60] sm:$0xff] %v7511_v18  ;;  %7572 = vst [vmem:[%s13583_s13 + $0x70] sm:$0xff] %v7554_v36 }
 0x6bc   :  { %7571 = vst [vmem:[%s13583_s13 + $0x68] sm:$0xff] %v7513_v41  ;;  %7573 = vst [vmem:[%s13583_s13 + $0x78] sm:$0xff] %v7556_v26 }
 0x6bd   :  { %7578 = vsyncpa [#allocation4], 1 }
 0x6be   :  { %7579 = vsyncpa [#allocation6], 1 }

</bundles_post_ra>
